<compile_context>
chip_gen: v7x
topology: tpu7x:2x2x1
jax: 0.10.0
libtpu: 0.0.40
codegen_flags: <defaults>
</compile_context>

<pallas_src>
import functools

import jax
import jax.numpy as jnp
from jax.experimental import pallas as pl
from jax.experimental.pallas import tpu as pltpu


# ----------------------------------------------------------------------------
# helpers
# ----------------------------------------------------------------------------
def _round_up(x, m):
    return ((x + m - 1) // m) * m


# ----------------------------------------------------------------------------
# Pallas kernel 1: tiled matmul + bias (+ fused residual) + optional ReLU
# bf16 operands on the MXU, f32 accumulation / epilogue.
# ----------------------------------------------------------------------------
def _gemm_kernel(*refs, relu, has_residual):
    if has_residual:
        a_ref, b_ref, bias_ref, res_ref, o_ref, acc_ref = refs
    else:
        a_ref, b_ref, bias_ref, o_ref, acc_ref = refs
        res_ref = None

    k = pl.program_id(2)

    @pl.when(k == 0)
    def _():
        acc_ref[...] = jnp.zeros_like(acc_ref)

    acc_ref[...] += jnp.dot(a_ref[...], b_ref[...],
                            preferred_element_type=jnp.float32)

    @pl.when(k == pl.num_programs(2) - 1)
    def _():
        out = acc_ref[...] + bias_ref[...]          # (tm,tn) + (1,tn)
        if has_residual:
            out = out + res_ref[...]
        if relu:
            out = jnp.maximum(out, 0.0)
        o_ref[...] = out.astype(o_ref.dtype)


def _pick_tiles(M, K, N):
    # tm: shrink to the real M (16-aligned, works for bf16/f32 sublane tiling)
    if M <= 128:
        tm = _round_up(M, 16)
        Mp = tm
    else:
        tm = 128
        Mp = _round_up(M, 128)
    # tn: 256 fills the 256x256 MXUs (v6e/v7x); harmless on v5e
    Np = _round_up(N, 128)
    tn = 256 if Np % 256 == 0 else 128
    # tk: largest of {512,384,256,128} that divides padded K
    Kp = _round_up(K, 128)
    tk = 128
    for cand in (512, 384, 256, 128):
        if Kp % cand == 0:
            tk = cand
            break
    return tm, Mp, tn, Np, tk, Kp


def matmul_bias(a, b, bias, *, relu=False, residual=None):
    """a:[M,K] @ b:[K,N] + bias[N] (+ residual[M,N]), optional ReLU."""
    M, K = a.shape
    K2, N = b.shape
    assert K == K2
    tm, Mp, tn, Np, tk, Kp = _pick_tiles(M, K, N)

    a_p = jnp.pad(a, ((0, Mp - M), (0, Kp - K))).astype(jnp.bfloat16)
    b_p = jnp.pad(b, ((0, Kp - K), (0, Np - N))).astype(jnp.bfloat16)
    bias_p = jnp.pad(bias, (0, Np - N)).reshape(1, Np).astype(jnp.float32)

    in_specs = [
        pl.BlockSpec((tm, tk), lambda i, j, k: (i, k)),
        pl.BlockSpec((tk, tn), lambda i, j, k: (k, j)),
        pl.BlockSpec((1, tn), lambda i, j, k: (0, j)),
    ]
    inputs = [a_p, b_p, bias_p]
    has_residual = residual is not None
    if has_residual:
        res_p = jnp.pad(residual.astype(jnp.float32),
                        ((0, Mp - M), (0, Np - N)))
        in_specs.append(pl.BlockSpec((tm, tn), lambda i, j, k: (i, j)))
        inputs.append(res_p)

    out = pl.pallas_call(
        functools.partial(_gemm_kernel, relu=relu, has_residual=has_residual),
        out_shape=jax.ShapeDtypeStruct((Mp, Np), jnp.float32),
        grid_spec=pltpu.PrefetchScalarGridSpec(
            num_scalar_prefetch=0,
            grid=(Mp // tm, Np // tn, Kp // tk),
            in_specs=in_specs,
            out_specs=pl.BlockSpec((tm, tn), lambda i, j, k: (i, j)),
            scratch_shapes=[pltpu.VMEM((tm, tn), jnp.float32)],
        ),
        compiler_params=pltpu.CompilerParams(
            dimension_semantics=("parallel", "parallel", "arbitrary")),
    )(*inputs)

    if Mp == M and Np == N:
        return out
    return out[:M, :N]


# ----------------------------------------------------------------------------
# Pallas kernel 2: 3x3 max-pool as a gridded elementwise max over 9 shifted
# lane-dense views (no [9, rows, 128] HBM stack).
# ----------------------------------------------------------------------------
def _max9_kernel(*refs):
    o_ref = refs[-1]
    m = refs[0][...]
    for r in refs[1:-1]:
        m = jnp.maximum(m, r[...])
    o_ref[...] = m


def maxpool2d_nhwc(x, k=3, stride=2, pad=1):
    B, H, W, C = x.shape
    xp = jnp.pad(x, ((0, 0), (pad, pad), (pad, pad), (0, 0)),
                 constant_values=-jnp.inf)
    Hp, Wp = H + 2 * pad, W + 2 * pad
    oh = (Hp - k) // stride + 1
    ow = (Wp - k) // stride + 1

    slices = [xp[:, i:i + stride * oh:stride, j:j + stride * ow:stride, :]
              for i in range(k) for j in range(k)]

    total = B * oh * ow * C
    rows = _round_up(pl.cdiv(total, 128), 8)
    if rows <= 512:
        tr = rows
    else:
        rows = _round_up(rows, 512)
        tr = 512
    padn = rows * 128 - total
    flats = [jnp.pad(s.reshape(-1), (0, padn)).reshape(rows, 128)
             for s in slices]

    spec = pl.BlockSpec((tr, 128), lambda i: (i, 0))
    out = pl.pallas_call(
        _max9_kernel,
        out_shape=jax.ShapeDtypeStruct((rows, 128), jnp.float32),
        grid_spec=pltpu.PrefetchScalarGridSpec(
            num_scalar_prefetch=0,
            grid=(rows // tr,),
            in_specs=[spec] * (k * k),
            out_specs=spec,
        ),
        compiler_params=pltpu.CompilerParams(
            dimension_semantics=("parallel",)),
    )(*flats)
    return out.reshape(-1)[:total].reshape(B, oh, ow, C)


# ----------------------------------------------------------------------------
# conv = NHWC im2col (cheap strided slices + lane concat) + Pallas GEMM,
# with BatchNorm folded and optional fused residual + ReLU epilogue.
# ----------------------------------------------------------------------------
# TODO(synk): replace the im2col concat with a windowed BlockSpec K-grid over
# (kh, kw, cin-chunk) for a zero-materialization conv at large resolutions.
def _im2col_nhwc(x, kh, kw, stride, pad):
    B, H, W, C = x.shape
    if pad:
        x = jnp.pad(x, ((0, 0), (pad, pad), (pad, pad), (0, 0)))
    Hp, Wp = H + 2 * pad, W + 2 * pad
    oh = (Hp - kh) // stride + 1
    ow = (Wp - kw) // stride + 1
    if kh == 1 and kw == 1:
        cols = x[:, ::stride, ::stride, :]
    else:
        cols = jnp.concatenate(
            [x[:, i:i + stride * oh:stride, j:j + stride * ow:stride, :]
             for i in range(kh) for j in range(kw)], axis=-1)
    return cols.reshape(B * oh * ow, kh * kw * C), oh, ow


def conv_bn(x, w, bn, *, stride, pad, relu, residual=None):
    """x: NHWC. Returns NHWC. BN folded; optional fused residual add + ReLU."""
    eps = 1e-5
    scale = bn["gamma"] / jnp.sqrt(bn["var"] + eps)
    bias = bn["beta"] - bn["mean"] * scale
    w_eff = w * scale[:, None, None, None]            # (cout, cin, kh, kw)
    cout, cin, kh, kw = w.shape

    cols, oh, ow = _im2col_nhwc(x, kh, kw, stride, pad)
    # column ordering of cols is (kh, kw, cin) -> match with weight transpose
    wm = w_eff.transpose(2, 3, 1, 0).reshape(kh * kw * cin, cout)

    B = x.shape[0]
    res2d = None
    if residual is not None:
        res2d = residual.reshape(B * oh * ow, cout)

    out = matmul_bias(cols, wm, bias, relu=relu, residual=res2d)
    return out.reshape(B, oh, ow, cout)


def basic_block(x, p, stride):
    if "down_conv" in p:
        identity = conv_bn(x, p["down_conv"], p["down_bn"],
                           stride=stride, pad=0, relu=False)
    else:
        identity = x
    out = conv_bn(x, p["conv1"], p["bn1"], stride=stride, pad=1, relu=True)
    # conv2 + BN + residual add + ReLU fused in one GEMM epilogue
    out = conv_bn(out, p["conv2"], p["bn2"], stride=1, pad=1, relu=True,
                  residual=identity)
    return out


def my_network_forward(params, x):
    # one-time layout change: NCHW (PyTorch boundary) -> NHWC (internal)
    x = jnp.transpose(x, (0, 2, 3, 1))
    # conv stem
    x = conv_bn(x, params["conv1"], params["bn1"], stride=2, pad=3, relu=True)
    x = maxpool2d_nhwc(x, k=3, stride=2, pad=1)
    # 4 stages of 2 BasicBlocks (resnet18)
    strides = {"layer1": 1, "layer2": 2, "layer3": 2, "layer4": 2}
    for name in ("layer1", "layer2", "layer3", "layer4"):
        blocks = params[name]
        x = basic_block(x, blocks[0], strides[name])
        x = basic_block(x, blocks[1], 1)
    # adaptive avg-pool to 1x1 + flatten (tiny [B,512] reduction, JAX glue)
    x = jnp.mean(x, axis=(1, 2))                      # [B, 512]
    # fc: Linear(512, 6) — adaptive-tile Pallas GEMM (single tiny block)
    return matmul_bias(x, params["fc_w"].T, params["fc_b"], relu=False)


# ----------------------------------------------------------------------------
# deterministic parameter initialization (synthetic, no checkpoint load)
# ----------------------------------------------------------------------------
class _KeyGen:
    def __init__(self, key):
        self.key = key

    def __call__(self):
        self.key, sub = jax.random.split(self.key)
        return sub


def _init_conv(kg, cout, cin, kh, kw):
    std = (2.0 / (cin * kh * kw)) ** 0.5
    return std * jax.random.normal(kg(), (cout, cin, kh, kw), jnp.float32)


def _init_bn(kg, c):
    return dict(
        gamma=1.0 + 0.1 * jax.random.normal(kg(), (c,), jnp.float32),
        beta=0.1 * jax.random.normal(kg(), (c,), jnp.float32),
        mean=0.1 * jax.random.normal(kg(), (c,), jnp.float32),
        var=jnp.ones((c,), jnp.float32),
    )


def _init_block(kg, cin, cout, stride):
    p = dict(
        conv1=_init_conv(kg, cout, cin, 3, 3), bn1=_init_bn(kg, cout),
        conv2=_init_conv(kg, cout, cout, 3, 3), bn2=_init_bn(kg, cout),
    )
    if stride != 1 or cin != cout:
        p["down_conv"] = _init_conv(kg, cout, cin, 1, 1)
        p["down_bn"] = _init_bn(kg, cout)
    return p


def init_params(seed=42):
    kg = _KeyGen(jax.random.PRNGKey(seed))
    params = dict(
        conv1=_init_conv(kg, 64, 3, 7, 7),
        bn1=_init_bn(kg, 64),
        layer1=[_init_block(kg, 64, 64, 1), _init_block(kg, 64, 64, 1)],
        layer2=[_init_block(kg, 64, 128, 2), _init_block(kg, 128, 128, 1)],
        layer3=[_init_block(kg, 128, 256, 2), _init_block(kg, 256, 256, 1)],
        layer4=[_init_block(kg, 256, 512, 2), _init_block(kg, 512, 512, 1)],
        fc_w=(1.0 / 512.0 ** 0.5) * jax.random.normal(kg(), (6, 512),
                                                      jnp.float32),
        fc_b=0.01 * jax.random.normal(kg(), (6,), jnp.float32),
    )
    return params


# ----------------------------------------------------------------------------
if __name__ == "__main__":
    params = init_params(seed=42)
    x = jax.random.normal(jax.random.PRNGKey(0), (2, 3, 32, 32), jnp.float32)

    fwd = jax.jit(lambda inp: my_network_forward(params, inp))
    out = fwd(x)
    jax.block_until_ready(out)

    assert out.shape == (2, 6), out.shape
    assert out.dtype == jnp.float32
    assert bool(jnp.all(jnp.isfinite(out)))
    print("KERNEL_OK")
</pallas_src>

<mosaic_0001>
module attributes {stable_mosaic.version = 11 : i64} {
  func.func @_gemm_kernel(%arg0: i32, %arg1: i32, %arg2: i32, %arg3: memref<128x256xbf16, #tpu.memory_space<vmem>>, %arg4: memref<256x128xbf16, #tpu.memory_space<vmem>>, %arg5: memref<1x128xf32, #tpu.memory_space<vmem>>, %arg6: memref<128x128xf32, #tpu.memory_space<vmem>>, %arg7: memref<128x128xf32, #tpu.memory_space<vmem>>) attributes {dimension_semantics = [#tpu.dimension_semantics<parallel>, #tpu.dimension_semantics<parallel>, #tpu.dimension_semantics<arbitrary>], iteration_bounds = array<i64: 4, 1, 1>, scalar_prefetch = 0 : i64, scratch_operands = 1 : i64, tpu.core_type = #tpu.core_type<tc>, window_params = [{transform_indices = @transform_0, window_bounds = array<i64: 128, 256>}, {transform_indices = @transform_1, window_bounds = array<i64: 256, 128>}, {transform_indices = @transform_2, window_bounds = array<i64: 1, 128>}, {transform_indices = @transform_3, window_bounds = array<i64: 128, 128>}]} {
    %c0_i32 = arith.constant 0 : i32
    %0 = arith.cmpi eq, %arg2, %c0_i32 : i32
    %1 = arith.extui %0 : i1 to i32
    %c0_i32_0 = arith.constant 0 : i32
    %2 = arith.cmpi ne, %1, %c0_i32_0 : i32
    scf.if %2 {
      %cst_10 = arith.constant 0.000000e+00 : f32
      %12 = vector.broadcast %cst_10 : f32 to vector<128x128xf32>
      %c0_11 = arith.constant 0 : index
      %c0_12 = arith.constant 0 : index
      %13 = vector.load %arg7[%c0_11, %c0_12] : memref<128x128xf32, #tpu.memory_space<vmem>>, vector<128x128xf32>
      tpu.vector_store %arg7[%c0_11, %c0_12], %12 {strides = array<i32>} : memref<128x128xf32, #tpu.memory_space<vmem>>, vector<128x128xf32>,
    } else {
    }
    %c0 = arith.constant 0 : index
    %c0_1 = arith.constant 0 : index
    %3 = vector.load %arg7[%c0, %c0_1] : memref<128x128xf32, #tpu.memory_space<vmem>>, vector<128x128xf32>
    %c0_2 = arith.constant 0 : index
    %c0_3 = arith.constant 0 : index
    %4 = vector.load %arg3[%c0_2, %c0_3] : memref<128x256xbf16, #tpu.memory_space<vmem>>, vector<128x256xbf16>
    %c0_4 = arith.constant 0 : index
    %c0_5 = arith.constant 0 : index
    %5 = vector.load %arg4[%c0_4, %c0_5] : memref<256x128xbf16, #tpu.memory_space<vmem>>, vector<256x128xbf16>
    %cst = arith.constant dense<0.000000e+00> : vector<128x128xf32>
    %6 = tpu.matmul %4, %5, %cst {dimension_numbers = #tpu.dot_dimension_numbers<[1], [0], [0], [1], [0, 0, 1, 1], [], []>} : vector<128x256xbf16>, vector<256x128xbf16>, vector<128x128xf32> -> vector<128x128xf32>
    %7 = arith.addf %3, %6 : vector<128x128xf32>
    %c0_6 = arith.constant 0 : index
    %c0_7 = arith.constant 0 : index
    %8 = vector.load %arg7[%c0_6, %c0_7] : memref<128x128xf32, #tpu.memory_space<vmem>>, vector<128x128xf32>
    tpu.vector_store %arg7[%c0_6, %c0_7], %7 {strides = array<i32>} : memref<128x128xf32, #tpu.memory_space<vmem>>, vector<128x128xf32>,
    %c0_i32_8 = arith.constant 0 : i32
    %9 = arith.cmpi eq, %arg2, %c0_i32_8 : i32
    %10 = arith.extui %9 : i1 to i32
    %c0_i32_9 = arith.constant 0 : i32
    %11 = arith.cmpi ne, %10, %c0_i32_9 : i32
    scf.if %11 {
      %c0_10 = arith.constant 0 : index
      %c0_11 = arith.constant 0 : index
      %12 = vector.load %arg7[%c0_10, %c0_11] : memref<128x128xf32, #tpu.memory_space<vmem>>, vector<128x128xf32>
      %c0_12 = arith.constant 0 : index
      %c0_13 = arith.constant 0 : index
      %13 = vector.load %arg5[%c0_12, %c0_13] : memref<1x128xf32, #tpu.memory_space<vmem>>, vector<1x128xf32>
      %14 = vector.broadcast %13 : vector<1x128xf32> to vector<128x128xf32>
      %15 = arith.addf %12, %14 : vector<128x128xf32>
      %cst_14 = arith.constant 0.000000e+00 : f32
      %16 = vector.broadcast %cst_14 : f32 to vector<128x128xf32>
      %17 = arith.maximumf %15, %16 : vector<128x128xf32>
      %c0_15 = arith.constant 0 : index
      %c0_16 = arith.constant 0 : index
      %18 = vector.load %arg6[%c0_15, %c0_16] : memref<128x128xf32, #tpu.memory_space<vmem>>, vector<128x128xf32>
      tpu.vector_store %arg6[%c0_15, %c0_16], %17 {strides = array<i32>} : memref<128x128xf32, #tpu.memory_space<vmem>>, vector<128x128xf32>,
    } else {
    }
    return
  }
  func.func @transform_0(%arg0: i32, %arg1: i32, %arg2: i32) -> (i32, i32) {
    %c0_i32 = arith.constant 0 : i32
    return %arg0, %arg2 : i32, i32
  }
  func.func @transform_1(%arg0: i32, %arg1: i32, %arg2: i32) -> (i32, i32) {
    %c0_i32 = arith.constant 0 : i32
    return %arg2, %arg1 : i32, i32
  }
  func.func @transform_2(%arg0: i32, %arg1: i32, %arg2: i32) -> (i32, i32) {
    %c0_i32 = arith.constant 0 : i32
    %c0_i32_0 = arith.constant 0 : i32
    return %c0_i32, %arg1 : i32, i32
  }
  func.func @transform_3(%arg0: i32, %arg1: i32, %arg2: i32) -> (i32, i32) {
    %c0_i32 = arith.constant 0 : i32
    return %arg0, %arg1 : i32, i32
  }
}

module attributes {stable_mosaic.version = 11 : i64} {
  func.func @_max9_kernel(%arg0: i32, %arg1: memref<64x128xf32, #tpu.memory_space<vmem>>, %arg2: memref<64x128xf32, #tpu.memory_space<vmem>>, %arg3: memref<64x128xf32, #tpu.memory_space<vmem>>, %arg4: memref<64x128xf32, #tpu.memory_space<vmem>>, %arg5: memref<64x128xf32, #tpu.memory_space<vmem>>, %arg6: memref<64x128xf32, #tpu.memory_space<vmem>>, %arg7: memref<64x128xf32, #tpu.memory_space<vmem>>, %arg8: memref<64x128xf32, #tpu.memory_space<vmem>>, %arg9: memref<64x128xf32, #tpu.memory_space<vmem>>, %arg10: memref<64x128xf32, #tpu.memory_space<vmem>>) attributes {dimension_semantics = [#tpu.dimension_semantics<parallel>], iteration_bounds = array<i64: 1>, scalar_prefetch = 0 : i64, scratch_operands = 0 : i64, tpu.core_type = #tpu.core_type<tc>, window_params = [{transform_indices = @transform_0, window_bounds = array<i64: 64, 128>}, {transform_indices = @transform_1, window_bounds = array<i64: 64, 128>}, {transform_indices = @transform_2, window_bounds = array<i64: 64, 128>}, {transform_indices = @transform_3, window_bounds = array<i64: 64, 128>}, {transform_indices = @transform_4, window_bounds = array<i64: 64, 128>}, {transform_indices = @transform_5, window_bounds = array<i64: 64, 128>}, {transform_indices = @transform_6, window_bounds = array<i64: 64, 128>}, {transform_indices = @transform_7, window_bounds = array<i64: 64, 128>}, {transform_indices = @transform_8, window_bounds = array<i64: 64, 128>}, {transform_indices = @transform_9, window_bounds = array<i64: 64, 128>}]} {
    %c0 = arith.constant 0 : index
    %c0_0 = arith.constant 0 : index
    %0 = vector.load %arg1[%c0, %c0_0] : memref<64x128xf32, #tpu.memory_space<vmem>>, vector<64x128xf32>
    %c0_1 = arith.constant 0 : index
    %c0_2 = arith.constant 0 : index
    %1 = vector.load %arg2[%c0_1, %c0_2] : memref<64x128xf32, #tpu.memory_space<vmem>>, vector<64x128xf32>
    %2 = arith.maximumf %0, %1 : vector<64x128xf32>
    %c0_3 = arith.constant 0 : index
    %c0_4 = arith.constant 0 : index
    %3 = vector.load %arg3[%c0_3, %c0_4] : memref<64x128xf32, #tpu.memory_space<vmem>>, vector<64x128xf32>
    %4 = arith.maximumf %2, %3 : vector<64x128xf32>
    %c0_5 = arith.constant 0 : index
    %c0_6 = arith.constant 0 : index
    %5 = vector.load %arg4[%c0_5, %c0_6] : memref<64x128xf32, #tpu.memory_space<vmem>>, vector<64x128xf32>
    %6 = arith.maximumf %4, %5 : vector<64x128xf32>
    %c0_7 = arith.constant 0 : index
    %c0_8 = arith.constant 0 : index
    %7 = vector.load %arg5[%c0_7, %c0_8] : memref<64x128xf32, #tpu.memory_space<vmem>>, vector<64x128xf32>
    %8 = arith.maximumf %6, %7 : vector<64x128xf32>
    %c0_9 = arith.constant 0 : index
    %c0_10 = arith.constant 0 : index
    %9 = vector.load %arg6[%c0_9, %c0_10] : memref<64x128xf32, #tpu.memory_space<vmem>>, vector<64x128xf32>
    %10 = arith.maximumf %8, %9 : vector<64x128xf32>
    %c0_11 = arith.constant 0 : index
    %c0_12 = arith.constant 0 : index
    %11 = vector.load %arg7[%c0_11, %c0_12] : memref<64x128xf32, #tpu.memory_space<vmem>>, vector<64x128xf32>
    %12 = arith.maximumf %10, %11 : vector<64x128xf32>
    %c0_13 = arith.constant 0 : index
    %c0_14 = arith.constant 0 : index
    %13 = vector.load %arg8[%c0_13, %c0_14] : memref<64x128xf32, #tpu.memory_space<vmem>>, vector<64x128xf32>
    %14 = arith.maximumf %12, %13 : vector<64x128xf32>
    %c0_15 = arith.constant 0 : index
    %c0_16 = arith.constant 0 : index
    %15 = vector.load %arg9[%c0_15, %c0_16] : memref<64x128xf32, #tpu.memory_space<vmem>>, vector<64x128xf32>
    %16 = arith.maximumf %14, %15 : vector<64x128xf32>
    %c0_17 = arith.constant 0 : index
    %c0_18 = arith.constant 0 : index
    %17 = vector.load %arg10[%c0_17, %c0_18] : memref<64x128xf32, #tpu.memory_space<vmem>>, vector<64x128xf32>
    tpu.vector_store %arg10[%c0_17, %c0_18], %16 {strides = array<i32>} : memref<64x128xf32, #tpu.memory_space<vmem>>, vector<64x128xf32>,
    return
  }
  func.func @transform_0(%arg0: i32) -> (i32, i32) {
    %c0_i32 = arith.constant 0 : i32
    %c0_i32_0 = arith.constant 0 : i32
    return %arg0, %c0_i32 : i32, i32
  }
  func.func @transform_1(%arg0: i32) -> (i32, i32) {
    %c0_i32 = arith.constant 0 : i32
    %c0_i32_0 = arith.constant 0 : i32
    return %arg0, %c0_i32 : i32, i32
  }
  func.func @transform_2(%arg0: i32) -> (i32, i32) {
    %c0_i32 = arith.constant 0 : i32
    %c0_i32_0 = arith.constant 0 : i32
    return %arg0, %c0_i32 : i32, i32
  }
  func.func @transform_3(%arg0: i32) -> (i32, i32) {
    %c0_i32 = arith.constant 0 : i32
    %c0_i32_0 = arith.constant 0 : i32
    return %arg0, %c0_i32 : i32, i32
  }
  func.func @transform_4(%arg0: i32) -> (i32, i32) {
    %c0_i32 = arith.constant 0 : i32
    %c0_i32_0 = arith.constant 0 : i32
    return %arg0, %c0_i32 : i32, i32
  }
  func.func @transform_5(%arg0: i32) -> (i32, i32) {
    %c0_i32 = arith.constant 0 : i32
    %c0_i32_0 = arith.constant 0 : i32
    return %arg0, %c0_i32 : i32, i32
  }
  func.func @transform_6(%arg0: i32) -> (i32, i32) {
    %c0_i32 = arith.constant 0 : i32
    %c0_i32_0 = arith.constant 0 : i32
    return %arg0, %c0_i32 : i32, i32
  }
  func.func @transform_7(%arg0: i32) -> (i32, i32) {
    %c0_i32 = arith.constant 0 : i32
    %c0_i32_0 = arith.constant 0 : i32
    return %arg0, %c0_i32 : i32, i32
  }
  func.func @transform_8(%arg0: i32) -> (i32, i32) {
    %c0_i32 = arith.constant 0 : i32
    %c0_i32_0 = arith.constant 0 : i32
    return %arg0, %c0_i32 : i32, i32
  }
  func.func @transform_9(%arg0: i32) -> (i32, i32) {
    %c0_i32 = arith.constant 0 : i32
    %c0_i32_0 = arith.constant 0 : i32
    return %arg0, %c0_i32 : i32, i32
  }
}

module attributes {stable_mosaic.version = 11 : i64} {
  func.func @_gemm_kernel(%arg0: i32, %arg1: i32, %arg2: i32, %arg3: memref<128x128xbf16, #tpu.memory_space<vmem>>, %arg4: memref<128x128xbf16, #tpu.memory_space<vmem>>, %arg5: memref<1x128xf32, #tpu.memory_space<vmem>>, %arg6: memref<128x128xf32, #tpu.memory_space<vmem>>, %arg7: memref<128x128xf32, #tpu.memory_space<vmem>>) attributes {dimension_semantics = [#tpu.dimension_semantics<parallel>, #tpu.dimension_semantics<parallel>, #tpu.dimension_semantics<arbitrary>], iteration_bounds = array<i64: 1, 1, 5>, scalar_prefetch = 0 : i64, scratch_operands = 1 : i64, tpu.core_type = #tpu.core_type<tc>, window_params = [{transform_indices = @transform_0, window_bounds = array<i64: 128, 128>}, {transform_indices = @transform_1, window_bounds = array<i64: 128, 128>}, {transform_indices = @transform_2, window_bounds = array<i64: 1, 128>}, {transform_indices = @transform_3, window_bounds = array<i64: 128, 128>}]} {
    %c0_i32 = arith.constant 0 : i32
    %0 = arith.cmpi eq, %arg2, %c0_i32 : i32
    %1 = arith.extui %0 : i1 to i32
    %c0_i32_0 = arith.constant 0 : i32
    %2 = arith.cmpi ne, %1, %c0_i32_0 : i32
    scf.if %2 {
      %cst_9 = arith.constant 0.000000e+00 : f32
      %12 = vector.broadcast %cst_9 : f32 to vector<128x128xf32>
      %c0_10 = arith.constant 0 : index
      %c0_11 = arith.constant 0 : index
      %13 = vector.load %arg7[%c0_10, %c0_11] : memref<128x128xf32, #tpu.memory_space<vmem>>, vector<128x128xf32>
      tpu.vector_store %arg7[%c0_10, %c0_11], %12 {strides = array<i32>} : memref<128x128xf32, #tpu.memory_space<vmem>>, vector<128x128xf32>,
    } else {
    }
    %c0 = arith.constant 0 : index
    %c0_1 = arith.constant 0 : index
    %3 = vector.load %arg7[%c0, %c0_1] : memref<128x128xf32, #tpu.memory_space<vmem>>, vector<128x128xf32>
    %c0_2 = arith.constant 0 : index
    %c0_3 = arith.constant 0 : index
    %4 = vector.load %arg3[%c0_2, %c0_3] : memref<128x128xbf16, #tpu.memory_space<vmem>>, vector<128x128xbf16>
    %c0_4 = arith.constant 0 : index
    %c0_5 = arith.constant 0 : index
    %5 = vector.load %arg4[%c0_4, %c0_5] : memref<128x128xbf16, #tpu.memory_space<vmem>>, vector<128x128xbf16>
    %cst = arith.constant dense<0.000000e+00> : vector<128x128xf32>
    %6 = tpu.matmul %4, %5, %cst {dimension_numbers = #tpu.dot_dimension_numbers<[1], [0], [0], [1], [0, 0, 1, 1], [], []>} : vector<128x128xbf16>, vector<128x128xbf16>, vector<128x128xf32> -> vector<128x128xf32>
    %7 = arith.addf %3, %6 : vector<128x128xf32>
    %c0_6 = arith.constant 0 : index
    %c0_7 = arith.constant 0 : index
    %8 = vector.load %arg7[%c0_6, %c0_7] : memref<128x128xf32, #tpu.memory_space<vmem>>, vector<128x128xf32>
    tpu.vector_store %arg7[%c0_6, %c0_7], %7 {strides = array<i32>} : memref<128x128xf32, #tpu.memory_space<vmem>>, vector<128x128xf32>,
    %c4_i32 = arith.constant 4 : i32
    %9 = arith.cmpi eq, %arg2, %c4_i32 : i32
    %10 = arith.extui %9 : i1 to i32
    %c0_i32_8 = arith.constant 0 : i32
    %11 = arith.cmpi ne, %10, %c0_i32_8 : i32
    scf.if %11 {
      %c0_9 = arith.constant 0 : index
      %c0_10 = arith.constant 0 : index
      %12 = vector.load %arg7[%c0_9, %c0_10] : memref<128x128xf32, #tpu.memory_space<vmem>>, vector<128x128xf32>
      %c0_11 = arith.constant 0 : index
      %c0_12 = arith.constant 0 : index
      %13 = vector.load %arg5[%c0_11, %c0_12] : memref<1x128xf32, #tpu.memory_space<vmem>>, vector<1x128xf32>
      %14 = vector.broadcast %13 : vector<1x128xf32> to vector<128x128xf32>
      %15 = arith.addf %12, %14 : vector<128x128xf32>
      %cst_13 = arith.constant 0.000000e+00 : f32
      %16 = vector.broadcast %cst_13 : f32 to vector<128x128xf32>
      %17 = arith.maximumf %15, %16 : vector<128x128xf32>
      %c0_14 = arith.constant 0 : index
      %c0_15 = arith.constant 0 : index
      %18 = vector.load %arg6[%c0_14, %c0_15] : memref<128x128xf32, #tpu.memory_space<vmem>>, vector<128x128xf32>
      tpu.vector_store %arg6[%c0_14, %c0_15], %17 {strides = array<i32>} : memref<128x128xf32, #tpu.memory_space<vmem>>, vector<128x128xf32>,
    } else {
    }
    return
  }
  func.func @transform_0(%arg0: i32, %arg1: i32, %arg2: i32) -> (i32, i32) {
    %c0_i32 = arith.constant 0 : i32
    return %arg0, %arg2 : i32, i32
  }
  func.func @transform_1(%arg0: i32, %arg1: i32, %arg2: i32) -> (i32, i32) {
    %c0_i32 = arith.constant 0 : i32
    return %arg2, %arg1 : i32, i32
  }
  func.func @transform_2(%arg0: i32, %arg1: i32, %arg2: i32) -> (i32, i32) {
    %c0_i32 = arith.constant 0 : i32
    %c0_i32_0 = arith.constant 0 : i32
    return %c0_i32, %arg1 : i32, i32
  }
  func.func @transform_3(%arg0: i32, %arg1: i32, %arg2: i32) -> (i32, i32) {
    %c0_i32 = arith.constant 0 : i32
    return %arg0, %arg1 : i32, i32
  }
}

module attributes {stable_mosaic.version = 11 : i64} {
  func.func @_gemm_kernel(%arg0: i32, %arg1: i32, %arg2: i32, %arg3: memref<128x128xbf16, #tpu.memory_space<vmem>>, %arg4: memref<128x128xbf16, #tpu.memory_space<vmem>>, %arg5: memref<1x128xf32, #tpu.memory_space<vmem>>, %arg6: memref<128x128xf32, #tpu.memory_space<vmem>>, %arg7: memref<128x128xf32, #tpu.memory_space<vmem>>, %arg8: memref<128x128xf32, #tpu.memory_space<vmem>>) attributes {dimension_semantics = [#tpu.dimension_semantics<parallel>, #tpu.dimension_semantics<parallel>, #tpu.dimension_semantics<arbitrary>], iteration_bounds = array<i64: 1, 1, 5>, scalar_prefetch = 0 : i64, scratch_operands = 1 : i64, tpu.core_type = #tpu.core_type<tc>, window_params = [{transform_indices = @transform_0, window_bounds = array<i64: 128, 128>}, {transform_indices = @transform_1, window_bounds = array<i64: 128, 128>}, {transform_indices = @transform_2, window_bounds = array<i64: 1, 128>}, {transform_indices = @transform_3, window_bounds = array<i64: 128, 128>}, {transform_indices = @transform_4, window_bounds = array<i64: 128, 128>}]} {
    %c0_i32 = arith.constant 0 : i32
    %0 = arith.cmpi eq, %arg2, %c0_i32 : i32
    %1 = arith.extui %0 : i1 to i32
    %c0_i32_0 = arith.constant 0 : i32
    %2 = arith.cmpi ne, %1, %c0_i32_0 : i32
    scf.if %2 {
      %cst_9 = arith.constant 0.000000e+00 : f32
      %12 = vector.broadcast %cst_9 : f32 to vector<128x128xf32>
      %c0_10 = arith.constant 0 : index
      %c0_11 = arith.constant 0 : index
      %13 = vector.load %arg8[%c0_10, %c0_11] : memref<128x128xf32, #tpu.memory_space<vmem>>, vector<128x128xf32>
      tpu.vector_store %arg8[%c0_10, %c0_11], %12 {strides = array<i32>} : memref<128x128xf32, #tpu.memory_space<vmem>>, vector<128x128xf32>,
    } else {
    }
    %c0 = arith.constant 0 : index
    %c0_1 = arith.constant 0 : index
    %3 = vector.load %arg8[%c0, %c0_1] : memref<128x128xf32, #tpu.memory_space<vmem>>, vector<128x128xf32>
    %c0_2 = arith.constant 0 : index
    %c0_3 = arith.constant 0 : index
    %4 = vector.load %arg3[%c0_2, %c0_3] : memref<128x128xbf16, #tpu.memory_space<vmem>>, vector<128x128xbf16>
    %c0_4 = arith.constant 0 : index
    %c0_5 = arith.constant 0 : index
    %5 = vector.load %arg4[%c0_4, %c0_5] : memref<128x128xbf16, #tpu.memory_space<vmem>>, vector<128x128xbf16>
    %cst = arith.constant dense<0.000000e+00> : vector<128x128xf32>
    %6 = tpu.matmul %4, %5, %cst {dimension_numbers = #tpu.dot_dimension_numbers<[1], [0], [0], [1], [0, 0, 1, 1], [], []>} : vector<128x128xbf16>, vector<128x128xbf16>, vector<128x128xf32> -> vector<128x128xf32>
    %7 = arith.addf %3, %6 : vector<128x128xf32>
    %c0_6 = arith.constant 0 : index
    %c0_7 = arith.constant 0 : index
    %8 = vector.load %arg8[%c0_6, %c0_7] : memref<128x128xf32, #tpu.memory_space<vmem>>, vector<128x128xf32>
    tpu.vector_store %arg8[%c0_6, %c0_7], %7 {strides = array<i32>} : memref<128x128xf32, #tpu.memory_space<vmem>>, vector<128x128xf32>,
    %c4_i32 = arith.constant 4 : i32
    %9 = arith.cmpi eq, %arg2, %c4_i32 : i32
    %10 = arith.extui %9 : i1 to i32
    %c0_i32_8 = arith.constant 0 : i32
    %11 = arith.cmpi ne, %10, %c0_i32_8 : i32
    scf.if %11 {
      %c0_9 = arith.constant 0 : index
      %c0_10 = arith.constant 0 : index
      %12 = vector.load %arg8[%c0_9, %c0_10] : memref<128x128xf32, #tpu.memory_space<vmem>>, vector<128x128xf32>
      %c0_11 = arith.constant 0 : index
      %c0_12 = arith.constant 0 : index
      %13 = vector.load %arg5[%c0_11, %c0_12] : memref<1x128xf32, #tpu.memory_space<vmem>>, vector<1x128xf32>
      %14 = vector.broadcast %13 : vector<1x128xf32> to vector<128x128xf32>
      %15 = arith.addf %12, %14 : vector<128x128xf32>
      %c0_13 = arith.constant 0 : index
      %c0_14 = arith.constant 0 : index
      %16 = vector.load %arg6[%c0_13, %c0_14] : memref<128x128xf32, #tpu.memory_space<vmem>>, vector<128x128xf32>
      %17 = arith.addf %15, %16 : vector<128x128xf32>
      %cst_15 = arith.constant 0.000000e+00 : f32
      %18 = vector.broadcast %cst_15 : f32 to vector<128x128xf32>
      %19 = arith.maximumf %17, %18 : vector<128x128xf32>
      %c0_16 = arith.constant 0 : index
      %c0_17 = arith.constant 0 : index
      %20 = vector.load %arg7[%c0_16, %c0_17] : memref<128x128xf32, #tpu.memory_space<vmem>>, vector<128x128xf32>
      tpu.vector_store %arg7[%c0_16, %c0_17], %19 {strides = array<i32>} : memref<128x128xf32, #tpu.memory_space<vmem>>, vector<128x128xf32>,
    } else {
    }
    return
  }
  func.func @transform_0(%arg0: i32, %arg1: i32, %arg2: i32) -> (i32, i32) {
    %c0_i32 = arith.constant 0 : i32
    return %arg0, %arg2 : i32, i32
  }
  func.func @transform_1(%arg0: i32, %arg1: i32, %arg2: i32) -> (i32, i32) {
    %c0_i32 = arith.constant 0 : i32
    return %arg2, %arg1 : i32, i32
  }
  func.func @transform_2(%arg0: i32, %arg1: i32, %arg2: i32) -> (i32, i32) {
    %c0_i32 = arith.constant 0 : i32
    %c0_i32_0 = arith.constant 0 : i32
    return %c0_i32, %arg1 : i32, i32
  }
  func.func @transform_3(%arg0: i32, %arg1: i32, %arg2: i32) -> (i32, i32) {
    %c0_i32 = arith.constant 0 : i32
    return %arg0, %arg1 : i32, i32
  }
  func.func @transform_4(%arg0: i32, %arg1: i32, %arg2: i32) -> (i32, i32) {
    %c0_i32 = arith.constant 0 : i32
    return %arg0, %arg1 : i32, i32
  }
}

module attributes {stable_mosaic.version = 11 : i64} {
  func.func @_gemm_kernel(%arg0: i32, %arg1: i32, %arg2: i32, %arg3: memref<32x128xbf16, #tpu.memory_space<vmem>>, %arg4: memref<128x128xbf16, #tpu.memory_space<vmem>>, %arg5: memref<1x128xf32, #tpu.memory_space<vmem>>, %arg6: memref<32x128xf32, #tpu.memory_space<vmem>>, %arg7: memref<32x128xf32, #tpu.memory_space<vmem>>) attributes {dimension_semantics = [#tpu.dimension_semantics<parallel>, #tpu.dimension_semantics<parallel>, #tpu.dimension_semantics<arbitrary>], iteration_bounds = array<i64: 1, 1, 5>, scalar_prefetch = 0 : i64, scratch_operands = 1 : i64, tpu.core_type = #tpu.core_type<tc>, window_params = [{transform_indices = @transform_0, window_bounds = array<i64: 32, 128>}, {transform_indices = @transform_1, window_bounds = array<i64: 128, 128>}, {transform_indices = @transform_2, window_bounds = array<i64: 1, 128>}, {transform_indices = @transform_3, window_bounds = array<i64: 32, 128>}]} {
    %c0_i32 = arith.constant 0 : i32
    %0 = arith.cmpi eq, %arg2, %c0_i32 : i32
    %1 = arith.extui %0 : i1 to i32
    %c0_i32_0 = arith.constant 0 : i32
    %2 = arith.cmpi ne, %1, %c0_i32_0 : i32
    scf.if %2 {
      %cst_9 = arith.constant 0.000000e+00 : f32
      %12 = vector.broadcast %cst_9 : f32 to vector<32x128xf32>
      %c0_10 = arith.constant 0 : index
      %c0_11 = arith.constant 0 : index
      %13 = vector.load %arg7[%c0_10, %c0_11] : memref<32x128xf32, #tpu.memory_space<vmem>>, vector<32x128xf32>
      tpu.vector_store %arg7[%c0_10, %c0_11], %12 {strides = array<i32>} : memref<32x128xf32, #tpu.memory_space<vmem>>, vector<32x128xf32>,
    } else {
    }
    %c0 = arith.constant 0 : index
    %c0_1 = arith.constant 0 : index
    %3 = vector.load %arg7[%c0, %c0_1] : memref<32x128xf32, #tpu.memory_space<vmem>>, vector<32x128xf32>
    %c0_2 = arith.constant 0 : index
    %c0_3 = arith.constant 0 : index
    %4 = vector.load %arg3[%c0_2, %c0_3] : memref<32x128xbf16, #tpu.memory_space<vmem>>, vector<32x128xbf16>
    %c0_4 = arith.constant 0 : index
    %c0_5 = arith.constant 0 : index
    %5 = vector.load %arg4[%c0_4, %c0_5] : memref<128x128xbf16, #tpu.memory_space<vmem>>, vector<128x128xbf16>
    %cst = arith.constant dense<0.000000e+00> : vector<32x128xf32>
    %6 = tpu.matmul %4, %5, %cst {dimension_numbers = #tpu.dot_dimension_numbers<[1], [0], [0], [1], [0, 0, 1, 1], [], []>} : vector<32x128xbf16>, vector<128x128xbf16>, vector<32x128xf32> -> vector<32x128xf32>
    %7 = arith.addf %3, %6 : vector<32x128xf32>
    %c0_6 = arith.constant 0 : index
    %c0_7 = arith.constant 0 : index
    %8 = vector.load %arg7[%c0_6, %c0_7] : memref<32x128xf32, #tpu.memory_space<vmem>>, vector<32x128xf32>
    tpu.vector_store %arg7[%c0_6, %c0_7], %7 {strides = array<i32>} : memref<32x128xf32, #tpu.memory_space<vmem>>, vector<32x128xf32>,
    %c4_i32 = arith.constant 4 : i32
    %9 = arith.cmpi eq, %arg2, %c4_i32 : i32
    %10 = arith.extui %9 : i1 to i32
    %c0_i32_8 = arith.constant 0 : i32
    %11 = arith.cmpi ne, %10, %c0_i32_8 : i32
    scf.if %11 {
      %c0_9 = arith.constant 0 : index
      %c0_10 = arith.constant 0 : index
      %12 = vector.load %arg7[%c0_9, %c0_10] : memref<32x128xf32, #tpu.memory_space<vmem>>, vector<32x128xf32>
      %c0_11 = arith.constant 0 : index
      %c0_12 = arith.constant 0 : index
      %13 = vector.load %arg5[%c0_11, %c0_12] : memref<1x128xf32, #tpu.memory_space<vmem>>, vector<1x128xf32>
      %14 = vector.broadcast %13 : vector<1x128xf32> to vector<32x128xf32>
      %15 = arith.addf %12, %14 : vector<32x128xf32>
      %cst_13 = arith.constant 0.000000e+00 : f32
      %16 = vector.broadcast %cst_13 : f32 to vector<32x128xf32>
      %17 = arith.maximumf %15, %16 : vector<32x128xf32>
      %c0_14 = arith.constant 0 : index
      %c0_15 = arith.constant 0 : index
      %18 = vector.load %arg6[%c0_14, %c0_15] : memref<32x128xf32, #tpu.memory_space<vmem>>, vector<32x128xf32>
      tpu.vector_store %arg6[%c0_14, %c0_15], %17 {strides = array<i32>} : memref<32x128xf32, #tpu.memory_space<vmem>>, vector<32x128xf32>,
    } else {
    }
    return
  }
  func.func @transform_0(%arg0: i32, %arg1: i32, %arg2: i32) -> (i32, i32) {
    %c0_i32 = arith.constant 0 : i32
    return %arg0, %arg2 : i32, i32
  }
  func.func @transform_1(%arg0: i32, %arg1: i32, %arg2: i32) -> (i32, i32) {
    %c0_i32 = arith.constant 0 : i32
    return %arg2, %arg1 : i32, i32
  }
  func.func @transform_2(%arg0: i32, %arg1: i32, %arg2: i32) -> (i32, i32) {
    %c0_i32 = arith.constant 0 : i32
    %c0_i32_0 = arith.constant 0 : i32
    return %c0_i32, %arg1 : i32, i32
  }
  func.func @transform_3(%arg0: i32, %arg1: i32, %arg2: i32) -> (i32, i32) {
    %c0_i32 = arith.constant 0 : i32
    return %arg0, %arg1 : i32, i32
  }
}

module attributes {stable_mosaic.version = 11 : i64} {
  func.func @_gemm_kernel(%arg0: i32, %arg1: i32, %arg2: i32, %arg3: memref<32x384xbf16, #tpu.memory_space<vmem>>, %arg4: memref<384x128xbf16, #tpu.memory_space<vmem>>, %arg5: memref<1x128xf32, #tpu.memory_space<vmem>>, %arg6: memref<32x128xf32, #tpu.memory_space<vmem>>, %arg7: memref<32x128xf32, #tpu.memory_space<vmem>>, %arg8: memref<32x128xf32, #tpu.memory_space<vmem>>) attributes {dimension_semantics = [#tpu.dimension_semantics<parallel>, #tpu.dimension_semantics<parallel>, #tpu.dimension_semantics<arbitrary>], iteration_bounds = array<i64: 1, 1, 3>, scalar_prefetch = 0 : i64, scratch_operands = 1 : i64, tpu.core_type = #tpu.core_type<tc>, window_params = [{transform_indices = @transform_0, window_bounds = array<i64: 32, 384>}, {transform_indices = @transform_1, window_bounds = array<i64: 384, 128>}, {transform_indices = @transform_2, window_bounds = array<i64: 1, 128>}, {transform_indices = @transform_3, window_bounds = array<i64: 32, 128>}, {transform_indices = @transform_4, window_bounds = array<i64: 32, 128>}]} {
    %c0_i32 = arith.constant 0 : i32
    %0 = arith.cmpi eq, %arg2, %c0_i32 : i32
    %1 = arith.extui %0 : i1 to i32
    %c0_i32_0 = arith.constant 0 : i32
    %2 = arith.cmpi ne, %1, %c0_i32_0 : i32
    scf.if %2 {
      %cst_9 = arith.constant 0.000000e+00 : f32
      %12 = vector.broadcast %cst_9 : f32 to vector<32x128xf32>
      %c0_10 = arith.constant 0 : index
      %c0_11 = arith.constant 0 : index
      %13 = vector.load %arg8[%c0_10, %c0_11] : memref<32x128xf32, #tpu.memory_space<vmem>>, vector<32x128xf32>
      tpu.vector_store %arg8[%c0_10, %c0_11], %12 {strides = array<i32>} : memref<32x128xf32, #tpu.memory_space<vmem>>, vector<32x128xf32>,
    } else {
    }
    %c0 = arith.constant 0 : index
    %c0_1 = arith.constant 0 : index
    %3 = vector.load %arg8[%c0, %c0_1] : memref<32x128xf32, #tpu.memory_space<vmem>>, vector<32x128xf32>
    %c0_2 = arith.constant 0 : index
    %c0_3 = arith.constant 0 : index
    %4 = vector.load %arg3[%c0_2, %c0_3] : memref<32x384xbf16, #tpu.memory_space<vmem>>, vector<32x384xbf16>
    %c0_4 = arith.constant 0 : index
    %c0_5 = arith.constant 0 : index
    %5 = vector.load %arg4[%c0_4, %c0_5] : memref<384x128xbf16, #tpu.memory_space<vmem>>, vector<384x128xbf16>
    %cst = arith.constant dense<0.000000e+00> : vector<32x128xf32>
    %6 = tpu.matmul %4, %5, %cst {dimension_numbers = #tpu.dot_dimension_numbers<[1], [0], [0], [1], [0, 0, 1, 1], [], []>} : vector<32x384xbf16>, vector<384x128xbf16>, vector<32x128xf32> -> vector<32x128xf32>
    %7 = arith.addf %3, %6 : vector<32x128xf32>
    %c0_6 = arith.constant 0 : index
    %c0_7 = arith.constant 0 : index
    %8 = vector.load %arg8[%c0_6, %c0_7] : memref<32x128xf32, #tpu.memory_space<vmem>>, vector<32x128xf32>
    tpu.vector_store %arg8[%c0_6, %c0_7], %7 {strides = array<i32>} : memref<32x128xf32, #tpu.memory_space<vmem>>, vector<32x128xf32>,
    %c2_i32 = arith.constant 2 : i32
    %9 = arith.cmpi eq, %arg2, %c2_i32 : i32
    %10 = arith.extui %9 : i1 to i32
    %c0_i32_8 = arith.constant 0 : i32
    %11 = arith.cmpi ne, %10, %c0_i32_8 : i32
    scf.if %11 {
      %c0_9 = arith.constant 0 : index
      %c0_10 = arith.constant 0 : index
      %12 = vector.load %arg8[%c0_9, %c0_10] : memref<32x128xf32, #tpu.memory_space<vmem>>, vector<32x128xf32>
      %c0_11 = arith.constant 0 : index
      %c0_12 = arith.constant 0 : index
      %13 = vector.load %arg5[%c0_11, %c0_12] : memref<1x128xf32, #tpu.memory_space<vmem>>, vector<1x128xf32>
      %14 = vector.broadcast %13 : vector<1x128xf32> to vector<32x128xf32>
      %15 = arith.addf %12, %14 : vector<32x128xf32>
      %c0_13 = arith.constant 0 : index
      %c0_14 = arith.constant 0 : index
      %16 = vector.load %arg6[%c0_13, %c0_14] : memref<32x128xf32, #tpu.memory_space<vmem>>, vector<32x128xf32>
      %17 = arith.addf %15, %16 : vector<32x128xf32>
      %cst_15 = arith.constant 0.000000e+00 : f32
      %18 = vector.broadcast %cst_15 : f32 to vector<32x128xf32>
      %19 = arith.maximumf %17, %18 : vector<32x128xf32>
      %c0_16 = arith.constant 0 : index
      %c0_17 = arith.constant 0 : index
      %20 = vector.load %arg7[%c0_16, %c0_17] : memref<32x128xf32, #tpu.memory_space<vmem>>, vector<32x128xf32>
      tpu.vector_store %arg7[%c0_16, %c0_17], %19 {strides = array<i32>} : memref<32x128xf32, #tpu.memory_space<vmem>>, vector<32x128xf32>,
    } else {
    }
    return
  }
  func.func @transform_0(%arg0: i32, %arg1: i32, %arg2: i32) -> (i32, i32) {
    %c0_i32 = arith.constant 0 : i32
    return %arg0, %arg2 : i32, i32
  }
  func.func @transform_1(%arg0: i32, %arg1: i32, %arg2: i32) -> (i32, i32) {
    %c0_i32 = arith.constant 0 : i32
    return %arg2, %arg1 : i32, i32
  }
  func.func @transform_2(%arg0: i32, %arg1: i32, %arg2: i32) -> (i32, i32) {
    %c0_i32 = arith.constant 0 : i32
    %c0_i32_0 = arith.constant 0 : i32
    return %c0_i32, %arg1 : i32, i32
  }
  func.func @transform_3(%arg0: i32, %arg1: i32, %arg2: i32) -> (i32, i32) {
    %c0_i32 = arith.constant 0 : i32
    return %arg0, %arg1 : i32, i32
  }
  func.func @transform_4(%arg0: i32, %arg1: i32, %arg2: i32) -> (i32, i32) {
    %c0_i32 = arith.constant 0 : i32
    return %arg0, %arg1 : i32, i32
  }
}

module attributes {stable_mosaic.version = 11 : i64} {
  func.func @_gemm_kernel(%arg0: i32, %arg1: i32, %arg2: i32, %arg3: memref<32x384xbf16, #tpu.memory_space<vmem>>, %arg4: memref<384x128xbf16, #tpu.memory_space<vmem>>, %arg5: memref<1x128xf32, #tpu.memory_space<vmem>>, %arg6: memref<32x128xf32, #tpu.memory_space<vmem>>, %arg7: memref<32x128xf32, #tpu.memory_space<vmem>>) attributes {dimension_semantics = [#tpu.dimension_semantics<parallel>, #tpu.dimension_semantics<parallel>, #tpu.dimension_semantics<arbitrary>], iteration_bounds = array<i64: 1, 1, 3>, scalar_prefetch = 0 : i64, scratch_operands = 1 : i64, tpu.core_type = #tpu.core_type<tc>, window_params = [{transform_indices = @transform_0, window_bounds = array<i64: 32, 384>}, {transform_indices = @transform_1, window_bounds = array<i64: 384, 128>}, {transform_indices = @transform_2, window_bounds = array<i64: 1, 128>}, {transform_indices = @transform_3, window_bounds = array<i64: 32, 128>}]} {
    %c0_i32 = arith.constant 0 : i32
    %0 = arith.cmpi eq, %arg2, %c0_i32 : i32
    %1 = arith.extui %0 : i1 to i32
    %c0_i32_0 = arith.constant 0 : i32
    %2 = arith.cmpi ne, %1, %c0_i32_0 : i32
    scf.if %2 {
      %cst_9 = arith.constant 0.000000e+00 : f32
      %12 = vector.broadcast %cst_9 : f32 to vector<32x128xf32>
      %c0_10 = arith.constant 0 : index
      %c0_11 = arith.constant 0 : index
      %13 = vector.load %arg7[%c0_10, %c0_11] : memref<32x128xf32, #tpu.memory_space<vmem>>, vector<32x128xf32>
      tpu.vector_store %arg7[%c0_10, %c0_11], %12 {strides = array<i32>} : memref<32x128xf32, #tpu.memory_space<vmem>>, vector<32x128xf32>,
    } else {
    }
    %c0 = arith.constant 0 : index
    %c0_1 = arith.constant 0 : index
    %3 = vector.load %arg7[%c0, %c0_1] : memref<32x128xf32, #tpu.memory_space<vmem>>, vector<32x128xf32>
    %c0_2 = arith.constant 0 : index
    %c0_3 = arith.constant 0 : index
    %4 = vector.load %arg3[%c0_2, %c0_3] : memref<32x384xbf16, #tpu.memory_space<vmem>>, vector<32x384xbf16>
    %c0_4 = arith.constant 0 : index
    %c0_5 = arith.constant 0 : index
    %5 = vector.load %arg4[%c0_4, %c0_5] : memref<384x128xbf16, #tpu.memory_space<vmem>>, vector<384x128xbf16>
    %cst = arith.constant dense<0.000000e+00> : vector<32x128xf32>
    %6 = tpu.matmul %4, %5, %cst {dimension_numbers = #tpu.dot_dimension_numbers<[1], [0], [0], [1], [0, 0, 1, 1], [], []>} : vector<32x384xbf16>, vector<384x128xbf16>, vector<32x128xf32> -> vector<32x128xf32>
    %7 = arith.addf %3, %6 : vector<32x128xf32>
    %c0_6 = arith.constant 0 : index
    %c0_7 = arith.constant 0 : index
    %8 = vector.load %arg7[%c0_6, %c0_7] : memref<32x128xf32, #tpu.memory_space<vmem>>, vector<32x128xf32>
    tpu.vector_store %arg7[%c0_6, %c0_7], %7 {strides = array<i32>} : memref<32x128xf32, #tpu.memory_space<vmem>>, vector<32x128xf32>,
    %c2_i32 = arith.constant 2 : i32
    %9 = arith.cmpi eq, %arg2, %c2_i32 : i32
    %10 = arith.extui %9 : i1 to i32
    %c0_i32_8 = arith.constant 0 : i32
    %11 = arith.cmpi ne, %10, %c0_i32_8 : i32
    scf.if %11 {
      %c0_9 = arith.constant 0 : index
      %c0_10 = arith.constant 0 : index
      %12 = vector.load %arg7[%c0_9, %c0_10] : memref<32x128xf32, #tpu.memory_space<vmem>>, vector<32x128xf32>
      %c0_11 = arith.constant 0 : index
      %c0_12 = arith.constant 0 : index
      %13 = vector.load %arg5[%c0_11, %c0_12] : memref<1x128xf32, #tpu.memory_space<vmem>>, vector<1x128xf32>
      %14 = vector.broadcast %13 : vector<1x128xf32> to vector<32x128xf32>
      %15 = arith.addf %12, %14 : vector<32x128xf32>
      %cst_13 = arith.constant 0.000000e+00 : f32
      %16 = vector.broadcast %cst_13 : f32 to vector<32x128xf32>
      %17 = arith.maximumf %15, %16 : vector<32x128xf32>
      %c0_14 = arith.constant 0 : index
      %c0_15 = arith.constant 0 : index
      %18 = vector.load %arg6[%c0_14, %c0_15] : memref<32x128xf32, #tpu.memory_space<vmem>>, vector<32x128xf32>
      tpu.vector_store %arg6[%c0_14, %c0_15], %17 {strides = array<i32>} : memref<32x128xf32, #tpu.memory_space<vmem>>, vector<32x128xf32>,
    } else {
    }
    return
  }
  func.func @transform_0(%arg0: i32, %arg1: i32, %arg2: i32) -> (i32, i32) {
    %c0_i32 = arith.constant 0 : i32
    return %arg0, %arg2 : i32, i32
  }
  func.func @transform_1(%arg0: i32, %arg1: i32, %arg2: i32) -> (i32, i32) {
    %c0_i32 = arith.constant 0 : i32
    return %arg2, %arg1 : i32, i32
  }
  func.func @transform_2(%arg0: i32, %arg1: i32, %arg2: i32) -> (i32, i32) {
    %c0_i32 = arith.constant 0 : i32
    %c0_i32_0 = arith.constant 0 : i32
    return %c0_i32, %arg1 : i32, i32
  }
  func.func @transform_3(%arg0: i32, %arg1: i32, %arg2: i32) -> (i32, i32) {
    %c0_i32 = arith.constant 0 : i32
    return %arg0, %arg1 : i32, i32
  }
}

module attributes {stable_mosaic.version = 11 : i64} {
  func.func @_gemm_kernel(%arg0: i32, %arg1: i32, %arg2: i32, %arg3: memref<32x128xbf16, #tpu.memory_space<vmem>>, %arg4: memref<128x128xbf16, #tpu.memory_space<vmem>>, %arg5: memref<1x128xf32, #tpu.memory_space<vmem>>, %arg6: memref<32x128xf32, #tpu.memory_space<vmem>>, %arg7: memref<32x128xf32, #tpu.memory_space<vmem>>) attributes {dimension_semantics = [#tpu.dimension_semantics<parallel>, #tpu.dimension_semantics<parallel>, #tpu.dimension_semantics<arbitrary>], iteration_bounds = array<i64: 1, 1, 1>, scalar_prefetch = 0 : i64, scratch_operands = 1 : i64, tpu.core_type = #tpu.core_type<tc>, window_params = [{transform_indices = @transform_0, window_bounds = array<i64: 32, 128>}, {transform_indices = @transform_1, window_bounds = array<i64: 128, 128>}, {transform_indices = @transform_2, window_bounds = array<i64: 1, 128>}, {transform_indices = @transform_3, window_bounds = array<i64: 32, 128>}]} {
    %c0_i32 = arith.constant 0 : i32
    %0 = arith.cmpi eq, %arg2, %c0_i32 : i32
    %1 = arith.extui %0 : i1 to i32
    %c0_i32_0 = arith.constant 0 : i32
    %2 = arith.cmpi ne, %1, %c0_i32_0 : i32
    scf.if %2 {
      %cst_10 = arith.constant 0.000000e+00 : f32
      %12 = vector.broadcast %cst_10 : f32 to vector<32x128xf32>
      %c0_11 = arith.constant 0 : index
      %c0_12 = arith.constant 0 : index
      %13 = vector.load %arg7[%c0_11, %c0_12] : memref<32x128xf32, #tpu.memory_space<vmem>>, vector<32x128xf32>
      tpu.vector_store %arg7[%c0_11, %c0_12], %12 {strides = array<i32>} : memref<32x128xf32, #tpu.memory_space<vmem>>, vector<32x128xf32>,
    } else {
    }
    %c0 = arith.constant 0 : index
    %c0_1 = arith.constant 0 : index
    %3 = vector.load %arg7[%c0, %c0_1] : memref<32x128xf32, #tpu.memory_space<vmem>>, vector<32x128xf32>
    %c0_2 = arith.constant 0 : index
    %c0_3 = arith.constant 0 : index
    %4 = vector.load %arg3[%c0_2, %c0_3] : memref<32x128xbf16, #tpu.memory_space<vmem>>, vector<32x128xbf16>
    %c0_4 = arith.constant 0 : index
    %c0_5 = arith.constant 0 : index
    %5 = vector.load %arg4[%c0_4, %c0_5] : memref<128x128xbf16, #tpu.memory_space<vmem>>, vector<128x128xbf16>
    %cst = arith.constant dense<0.000000e+00> : vector<32x128xf32>
    %6 = tpu.matmul %4, %5, %cst {dimension_numbers = #tpu.dot_dimension_numbers<[1], [0], [0], [1], [0, 0, 1, 1], [], []>} : vector<32x128xbf16>, vector<128x128xbf16>, vector<32x128xf32> -> vector<32x128xf32>
    %7 = arith.addf %3, %6 : vector<32x128xf32>
    %c0_6 = arith.constant 0 : index
    %c0_7 = arith.constant 0 : index
    %8 = vector.load %arg7[%c0_6, %c0_7] : memref<32x128xf32, #tpu.memory_space<vmem>>, vector<32x128xf32>
    tpu.vector_store %arg7[%c0_6, %c0_7], %7 {strides = array<i32>} : memref<32x128xf32, #tpu.memory_space<vmem>>, vector<32x128xf32>,
    %c0_i32_8 = arith.constant 0 : i32
    %9 = arith.cmpi eq, %arg2, %c0_i32_8 : i32
    %10 = arith.extui %9 : i1 to i32
    %c0_i32_9 = arith.constant 0 : i32
    %11 = arith.cmpi ne, %10, %c0_i32_9 : i32
    scf.if %11 {
      %c0_10 = arith.constant 0 : index
      %c0_11 = arith.constant 0 : index
      %12 = vector.load %arg7[%c0_10, %c0_11] : memref<32x128xf32, #tpu.memory_space<vmem>>, vector<32x128xf32>
      %c0_12 = arith.constant 0 : index
      %c0_13 = arith.constant 0 : index
      %13 = vector.load %arg5[%c0_12, %c0_13] : memref<1x128xf32, #tpu.memory_space<vmem>>, vector<1x128xf32>
      %14 = vector.broadcast %13 : vector<1x128xf32> to vector<32x128xf32>
      %15 = arith.addf %12, %14 : vector<32x128xf32>
      %c0_14 = arith.constant 0 : index
      %c0_15 = arith.constant 0 : index
      %16 = vector.load %arg6[%c0_14, %c0_15] : memref<32x128xf32, #tpu.memory_space<vmem>>, vector<32x128xf32>
      tpu.vector_store %arg6[%c0_14, %c0_15], %15 {strides = array<i32>} : memref<32x128xf32, #tpu.memory_space<vmem>>, vector<32x128xf32>,
    } else {
    }
    return
  }
  func.func @transform_0(%arg0: i32, %arg1: i32, %arg2: i32) -> (i32, i32) {
    %c0_i32 = arith.constant 0 : i32
    return %arg0, %arg2 : i32, i32
  }
  func.func @transform_1(%arg0: i32, %arg1: i32, %arg2: i32) -> (i32, i32) {
    %c0_i32 = arith.constant 0 : i32
    return %arg2, %arg1 : i32, i32
  }
  func.func @transform_2(%arg0: i32, %arg1: i32, %arg2: i32) -> (i32, i32) {
    %c0_i32 = arith.constant 0 : i32
    %c0_i32_0 = arith.constant 0 : i32
    return %c0_i32, %arg1 : i32, i32
  }
  func.func @transform_3(%arg0: i32, %arg1: i32, %arg2: i32) -> (i32, i32) {
    %c0_i32 = arith.constant 0 : i32
    return %arg0, %arg1 : i32, i32
  }
}

module attributes {stable_mosaic.version = 11 : i64} {
  func.func @_gemm_kernel(%arg0: i32, %arg1: i32, %arg2: i32, %arg3: memref<16x384xbf16, #tpu.memory_space<vmem>>, %arg4: memref<384x256xbf16, #tpu.memory_space<vmem>>, %arg5: memref<1x256xf32, #tpu.memory_space<vmem>>, %arg6: memref<16x256xf32, #tpu.memory_space<vmem>>, %arg7: memref<16x256xf32, #tpu.memory_space<vmem>>) attributes {dimension_semantics = [#tpu.dimension_semantics<parallel>, #tpu.dimension_semantics<parallel>, #tpu.dimension_semantics<arbitrary>], iteration_bounds = array<i64: 1, 1, 3>, scalar_prefetch = 0 : i64, scratch_operands = 1 : i64, tpu.core_type = #tpu.core_type<tc>, window_params = [{transform_indices = @transform_0, window_bounds = array<i64: 16, 384>}, {transform_indices = @transform_1, window_bounds = array<i64: 384, 256>}, {transform_indices = @transform_2, window_bounds = array<i64: 1, 256>}, {transform_indices = @transform_3, window_bounds = array<i64: 16, 256>}]} {
    %c0_i32 = arith.constant 0 : i32
    %0 = arith.cmpi eq, %arg2, %c0_i32 : i32
    %1 = arith.extui %0 : i1 to i32
    %c0_i32_0 = arith.constant 0 : i32
    %2 = arith.cmpi ne, %1, %c0_i32_0 : i32
    scf.if %2 {
      %cst_9 = arith.constant 0.000000e+00 : f32
      %12 = vector.broadcast %cst_9 : f32 to vector<16x256xf32>
      %c0_10 = arith.constant 0 : index
      %c0_11 = arith.constant 0 : index
      %13 = vector.load %arg7[%c0_10, %c0_11] : memref<16x256xf32, #tpu.memory_space<vmem>>, vector<16x256xf32>
      tpu.vector_store %arg7[%c0_10, %c0_11], %12 {strides = array<i32>} : memref<16x256xf32, #tpu.memory_space<vmem>>, vector<16x256xf32>,
    } else {
    }
    %c0 = arith.constant 0 : index
    %c0_1 = arith.constant 0 : index
    %3 = vector.load %arg7[%c0, %c0_1] : memref<16x256xf32, #tpu.memory_space<vmem>>, vector<16x256xf32>
    %c0_2 = arith.constant 0 : index
    %c0_3 = arith.constant 0 : index
    %4 = vector.load %arg3[%c0_2, %c0_3] : memref<16x384xbf16, #tpu.memory_space<vmem>>, vector<16x384xbf16>
    %c0_4 = arith.constant 0 : index
    %c0_5 = arith.constant 0 : index
    %5 = vector.load %arg4[%c0_4, %c0_5] : memref<384x256xbf16, #tpu.memory_space<vmem>>, vector<384x256xbf16>
    %cst = arith.constant dense<0.000000e+00> : vector<16x256xf32>
    %6 = tpu.matmul %4, %5, %cst {dimension_numbers = #tpu.dot_dimension_numbers<[1], [0], [0], [1], [0, 0, 1, 1], [], []>} : vector<16x384xbf16>, vector<384x256xbf16>, vector<16x256xf32> -> vector<16x256xf32>
    %7 = arith.addf %3, %6 : vector<16x256xf32>
    %c0_6 = arith.constant 0 : index
    %c0_7 = arith.constant 0 : index
    %8 = vector.load %arg7[%c0_6, %c0_7] : memref<16x256xf32, #tpu.memory_space<vmem>>, vector<16x256xf32>
    tpu.vector_store %arg7[%c0_6, %c0_7], %7 {strides = array<i32>} : memref<16x256xf32, #tpu.memory_space<vmem>>, vector<16x256xf32>,
    %c2_i32 = arith.constant 2 : i32
    %9 = arith.cmpi eq, %arg2, %c2_i32 : i32
    %10 = arith.extui %9 : i1 to i32
    %c0_i32_8 = arith.constant 0 : i32
    %11 = arith.cmpi ne, %10, %c0_i32_8 : i32
    scf.if %11 {
      %c0_9 = arith.constant 0 : index
      %c0_10 = arith.constant 0 : index
      %12 = vector.load %arg7[%c0_9, %c0_10] : memref<16x256xf32, #tpu.memory_space<vmem>>, vector<16x256xf32>
      %c0_11 = arith.constant 0 : index
      %c0_12 = arith.constant 0 : index
      %13 = vector.load %arg5[%c0_11, %c0_12] : memref<1x256xf32, #tpu.memory_space<vmem>>, vector<1x256xf32>
      %14 = vector.broadcast %13 : vector<1x256xf32> to vector<16x256xf32>
      %15 = arith.addf %12, %14 : vector<16x256xf32>
      %cst_13 = arith.constant 0.000000e+00 : f32
      %16 = vector.broadcast %cst_13 : f32 to vector<16x256xf32>
      %17 = arith.maximumf %15, %16 : vector<16x256xf32>
      %c0_14 = arith.constant 0 : index
      %c0_15 = arith.constant 0 : index
      %18 = vector.load %arg6[%c0_14, %c0_15] : memref<16x256xf32, #tpu.memory_space<vmem>>, vector<16x256xf32>
      tpu.vector_store %arg6[%c0_14, %c0_15], %17 {strides = array<i32>} : memref<16x256xf32, #tpu.memory_space<vmem>>, vector<16x256xf32>,
    } else {
    }
    return
  }
  func.func @transform_0(%arg0: i32, %arg1: i32, %arg2: i32) -> (i32, i32) {
    %c0_i32 = arith.constant 0 : i32
    return %arg0, %arg2 : i32, i32
  }
  func.func @transform_1(%arg0: i32, %arg1: i32, %arg2: i32) -> (i32, i32) {
    %c0_i32 = arith.constant 0 : i32
    return %arg2, %arg1 : i32, i32
  }
  func.func @transform_2(%arg0: i32, %arg1: i32, %arg2: i32) -> (i32, i32) {
    %c0_i32 = arith.constant 0 : i32
    %c0_i32_0 = arith.constant 0 : i32
    return %c0_i32, %arg1 : i32, i32
  }
  func.func @transform_3(%arg0: i32, %arg1: i32, %arg2: i32) -> (i32, i32) {
    %c0_i32 = arith.constant 0 : i32
    return %arg0, %arg1 : i32, i32
  }
}

module attributes {stable_mosaic.version = 11 : i64} {
  func.func @_gemm_kernel(%arg0: i32, %arg1: i32, %arg2: i32, %arg3: memref<16x128xbf16, #tpu.memory_space<vmem>>, %arg4: memref<128x256xbf16, #tpu.memory_space<vmem>>, %arg5: memref<1x256xf32, #tpu.memory_space<vmem>>, %arg6: memref<16x256xf32, #tpu.memory_space<vmem>>, %arg7: memref<16x256xf32, #tpu.memory_space<vmem>>) attributes {dimension_semantics = [#tpu.dimension_semantics<parallel>, #tpu.dimension_semantics<parallel>, #tpu.dimension_semantics<arbitrary>], iteration_bounds = array<i64: 1, 1, 1>, scalar_prefetch = 0 : i64, scratch_operands = 1 : i64, tpu.core_type = #tpu.core_type<tc>, window_params = [{transform_indices = @transform_0, window_bounds = array<i64: 16, 128>}, {transform_indices = @transform_1, window_bounds = array<i64: 128, 256>}, {transform_indices = @transform_2, window_bounds = array<i64: 1, 256>}, {transform_indices = @transform_3, window_bounds = array<i64: 16, 256>}]} {
    %c0_i32 = arith.constant 0 : i32
    %0 = arith.cmpi eq, %arg2, %c0_i32 : i32
    %1 = arith.extui %0 : i1 to i32
    %c0_i32_0 = arith.constant 0 : i32
    %2 = arith.cmpi ne, %1, %c0_i32_0 : i32
    scf.if %2 {
      %cst_10 = arith.constant 0.000000e+00 : f32
      %12 = vector.broadcast %cst_10 : f32 to vector<16x256xf32>
      %c0_11 = arith.constant 0 : index
      %c0_12 = arith.constant 0 : index
      %13 = vector.load %arg7[%c0_11, %c0_12] : memref<16x256xf32, #tpu.memory_space<vmem>>, vector<16x256xf32>
      tpu.vector_store %arg7[%c0_11, %c0_12], %12 {strides = array<i32>} : memref<16x256xf32, #tpu.memory_space<vmem>>, vector<16x256xf32>,
    } else {
    }
    %c0 = arith.constant 0 : index
    %c0_1 = arith.constant 0 : index
    %3 = vector.load %arg7[%c0, %c0_1] : memref<16x256xf32, #tpu.memory_space<vmem>>, vector<16x256xf32>
    %c0_2 = arith.constant 0 : index
    %c0_3 = arith.constant 0 : index
    %4 = vector.load %arg3[%c0_2, %c0_3] : memref<16x128xbf16, #tpu.memory_space<vmem>>, vector<16x128xbf16>
    %c0_4 = arith.constant 0 : index
    %c0_5 = arith.constant 0 : index
    %5 = vector.load %arg4[%c0_4, %c0_5] : memref<128x256xbf16, #tpu.memory_space<vmem>>, vector<128x256xbf16>
    %cst = arith.constant dense<0.000000e+00> : vector<16x256xf32>
    %6 = tpu.matmul %4, %5, %cst {dimension_numbers = #tpu.dot_dimension_numbers<[1], [0], [0], [1], [0, 0, 1, 1], [], []>} : vector<16x128xbf16>, vector<128x256xbf16>, vector<16x256xf32> -> vector<16x256xf32>
    %7 = arith.addf %3, %6 : vector<16x256xf32>
    %c0_6 = arith.constant 0 : index
    %c0_7 = arith.constant 0 : index
    %8 = vector.load %arg7[%c0_6, %c0_7] : memref<16x256xf32, #tpu.memory_space<vmem>>, vector<16x256xf32>
    tpu.vector_store %arg7[%c0_6, %c0_7], %7 {strides = array<i32>} : memref<16x256xf32, #tpu.memory_space<vmem>>, vector<16x256xf32>,
    %c0_i32_8 = arith.constant 0 : i32
    %9 = arith.cmpi eq, %arg2, %c0_i32_8 : i32
    %10 = arith.extui %9 : i1 to i32
    %c0_i32_9 = arith.constant 0 : i32
    %11 = arith.cmpi ne, %10, %c0_i32_9 : i32
    scf.if %11 {
      %c0_10 = arith.constant 0 : index
      %c0_11 = arith.constant 0 : index
      %12 = vector.load %arg7[%c0_10, %c0_11] : memref<16x256xf32, #tpu.memory_space<vmem>>, vector<16x256xf32>
      %c0_12 = arith.constant 0 : index
      %c0_13 = arith.constant 0 : index
      %13 = vector.load %arg5[%c0_12, %c0_13] : memref<1x256xf32, #tpu.memory_space<vmem>>, vector<1x256xf32>
      %14 = vector.broadcast %13 : vector<1x256xf32> to vector<16x256xf32>
      %15 = arith.addf %12, %14 : vector<16x256xf32>
      %c0_14 = arith.constant 0 : index
      %c0_15 = arith.constant 0 : index
      %16 = vector.load %arg6[%c0_14, %c0_15] : memref<16x256xf32, #tpu.memory_space<vmem>>, vector<16x256xf32>
      tpu.vector_store %arg6[%c0_14, %c0_15], %15 {strides = array<i32>} : memref<16x256xf32, #tpu.memory_space<vmem>>, vector<16x256xf32>,
    } else {
    }
    return
  }
  func.func @transform_0(%arg0: i32, %arg1: i32, %arg2: i32) -> (i32, i32) {
    %c0_i32 = arith.constant 0 : i32
    return %arg0, %arg2 : i32, i32
  }
  func.func @transform_1(%arg0: i32, %arg1: i32, %arg2: i32) -> (i32, i32) {
    %c0_i32 = arith.constant 0 : i32
    return %arg2, %arg1 : i32, i32
  }
  func.func @transform_2(%arg0: i32, %arg1: i32, %arg2: i32) -> (i32, i32) {
    %c0_i32 = arith.constant 0 : i32
    %c0_i32_0 = arith.constant 0 : i32
    return %c0_i32, %arg1 : i32, i32
  }
  func.func @transform_3(%arg0: i32, %arg1: i32, %arg2: i32) -> (i32, i32) {
    %c0_i32 = arith.constant 0 : i32
    return %arg0, %arg1 : i32, i32
  }
}

module attributes {stable_mosaic.version = 11 : i64} {
  func.func @_gemm_kernel(%arg0: i32, %arg1: i32, %arg2: i32, %arg3: memref<16x384xbf16, #tpu.memory_space<vmem>>, %arg4: memref<384x256xbf16, #tpu.memory_space<vmem>>, %arg5: memref<1x256xf32, #tpu.memory_space<vmem>>, %arg6: memref<16x256xf32, #tpu.memory_space<vmem>>, %arg7: memref<16x256xf32, #tpu.memory_space<vmem>>, %arg8: memref<16x256xf32, #tpu.memory_space<vmem>>) attributes {dimension_semantics = [#tpu.dimension_semantics<parallel>, #tpu.dimension_semantics<parallel>, #tpu.dimension_semantics<arbitrary>], iteration_bounds = array<i64: 1, 1, 6>, scalar_prefetch = 0 : i64, scratch_operands = 1 : i64, tpu.core_type = #tpu.core_type<tc>, window_params = [{transform_indices = @transform_0, window_bounds = array<i64: 16, 384>}, {transform_indices = @transform_1, window_bounds = array<i64: 384, 256>}, {transform_indices = @transform_2, window_bounds = array<i64: 1, 256>}, {transform_indices = @transform_3, window_bounds = array<i64: 16, 256>}, {transform_indices = @transform_4, window_bounds = array<i64: 16, 256>}]} {
    %c0_i32 = arith.constant 0 : i32
    %0 = arith.cmpi eq, %arg2, %c0_i32 : i32
    %1 = arith.extui %0 : i1 to i32
    %c0_i32_0 = arith.constant 0 : i32
    %2 = arith.cmpi ne, %1, %c0_i32_0 : i32
    scf.if %2 {
      %cst_9 = arith.constant 0.000000e+00 : f32
      %12 = vector.broadcast %cst_9 : f32 to vector<16x256xf32>
      %c0_10 = arith.constant 0 : index
      %c0_11 = arith.constant 0 : index
      %13 = vector.load %arg8[%c0_10, %c0_11] : memref<16x256xf32, #tpu.memory_space<vmem>>, vector<16x256xf32>
      tpu.vector_store %arg8[%c0_10, %c0_11], %12 {strides = array<i32>} : memref<16x256xf32, #tpu.memory_space<vmem>>, vector<16x256xf32>,
    } else {
    }
    %c0 = arith.constant 0 : index
    %c0_1 = arith.constant 0 : index
    %3 = vector.load %arg8[%c0, %c0_1] : memref<16x256xf32, #tpu.memory_space<vmem>>, vector<16x256xf32>
    %c0_2 = arith.constant 0 : index
    %c0_3 = arith.constant 0 : index
    %4 = vector.load %arg3[%c0_2, %c0_3] : memref<16x384xbf16, #tpu.memory_space<vmem>>, vector<16x384xbf16>
    %c0_4 = arith.constant 0 : index
    %c0_5 = arith.constant 0 : index
    %5 = vector.load %arg4[%c0_4, %c0_5] : memref<384x256xbf16, #tpu.memory_space<vmem>>, vector<384x256xbf16>
    %cst = arith.constant dense<0.000000e+00> : vector<16x256xf32>
    %6 = tpu.matmul %4, %5, %cst {dimension_numbers = #tpu.dot_dimension_numbers<[1], [0], [0], [1], [0, 0, 1, 1], [], []>} : vector<16x384xbf16>, vector<384x256xbf16>, vector<16x256xf32> -> vector<16x256xf32>
    %7 = arith.addf %3, %6 : vector<16x256xf32>
    %c0_6 = arith.constant 0 : index
    %c0_7 = arith.constant 0 : index
    %8 = vector.load %arg8[%c0_6, %c0_7] : memref<16x256xf32, #tpu.memory_space<vmem>>, vector<16x256xf32>
    tpu.vector_store %arg8[%c0_6, %c0_7], %7 {strides = array<i32>} : memref<16x256xf32, #tpu.memory_space<vmem>>, vector<16x256xf32>,
    %c5_i32 = arith.constant 5 : i32
    %9 = arith.cmpi eq, %arg2, %c5_i32 : i32
    %10 = arith.extui %9 : i1 to i32
    %c0_i32_8 = arith.constant 0 : i32
    %11 = arith.cmpi ne, %10, %c0_i32_8 : i32
    scf.if %11 {
      %c0_9 = arith.constant 0 : index
      %c0_10 = arith.constant 0 : index
      %12 = vector.load %arg8[%c0_9, %c0_10] : memref<16x256xf32, #tpu.memory_space<vmem>>, vector<16x256xf32>
      %c0_11 = arith.constant 0 : index
      %c0_12 = arith.constant 0 : index
      %13 = vector.load %arg5[%c0_11, %c0_12] : memref<1x256xf32, #tpu.memory_space<vmem>>, vector<1x256xf32>
      %14 = vector.broadcast %13 : vector<1x256xf32> to vector<16x256xf32>
      %15 = arith.addf %12, %14 : vector<16x256xf32>
      %c0_13 = arith.constant 0 : index
      %c0_14 = arith.constant 0 : index
      %16 = vector.load %arg6[%c0_13, %c0_14] : memref<16x256xf32, #tpu.memory_space<vmem>>, vector<16x256xf32>
      %17 = arith.addf %15, %16 : vector<16x256xf32>
      %cst_15 = arith.constant 0.000000e+00 : f32
      %18 = vector.broadcast %cst_15 : f32 to vector<16x256xf32>
      %19 = arith.maximumf %17, %18 : vector<16x256xf32>
      %c0_16 = arith.constant 0 : index
      %c0_17 = arith.constant 0 : index
      %20 = vector.load %arg7[%c0_16, %c0_17] : memref<16x256xf32, #tpu.memory_space<vmem>>, vector<16x256xf32>
      tpu.vector_store %arg7[%c0_16, %c0_17], %19 {strides = array<i32>} : memref<16x256xf32, #tpu.memory_space<vmem>>, vector<16x256xf32>,
    } else {
    }
    return
  }
  func.func @transform_0(%arg0: i32, %arg1: i32, %arg2: i32) -> (i32, i32) {
    %c0_i32 = arith.constant 0 : i32
    return %arg0, %arg2 : i32, i32
  }
  func.func @transform_1(%arg0: i32, %arg1: i32, %arg2: i32) -> (i32, i32) {
    %c0_i32 = arith.constant 0 : i32
    return %arg2, %arg1 : i32, i32
  }
  func.func @transform_2(%arg0: i32, %arg1: i32, %arg2: i32) -> (i32, i32) {
    %c0_i32 = arith.constant 0 : i32
    %c0_i32_0 = arith.constant 0 : i32
    return %c0_i32, %arg1 : i32, i32
  }
  func.func @transform_3(%arg0: i32, %arg1: i32, %arg2: i32) -> (i32, i32) {
    %c0_i32 = arith.constant 0 : i32
    return %arg0, %arg1 : i32, i32
  }
  func.func @transform_4(%arg0: i32, %arg1: i32, %arg2: i32) -> (i32, i32) {
    %c0_i32 = arith.constant 0 : i32
    return %arg0, %arg1 : i32, i32
  }
}

module attributes {stable_mosaic.version = 11 : i64} {
  func.func @_gemm_kernel(%arg0: i32, %arg1: i32, %arg2: i32, %arg3: memref<16x384xbf16, #tpu.memory_space<vmem>>, %arg4: memref<384x256xbf16, #tpu.memory_space<vmem>>, %arg5: memref<1x256xf32, #tpu.memory_space<vmem>>, %arg6: memref<16x256xf32, #tpu.memory_space<vmem>>, %arg7: memref<16x256xf32, #tpu.memory_space<vmem>>) attributes {dimension_semantics = [#tpu.dimension_semantics<parallel>, #tpu.dimension_semantics<parallel>, #tpu.dimension_semantics<arbitrary>], iteration_bounds = array<i64: 1, 1, 6>, scalar_prefetch = 0 : i64, scratch_operands = 1 : i64, tpu.core_type = #tpu.core_type<tc>, window_params = [{transform_indices = @transform_0, window_bounds = array<i64: 16, 384>}, {transform_indices = @transform_1, window_bounds = array<i64: 384, 256>}, {transform_indices = @transform_2, window_bounds = array<i64: 1, 256>}, {transform_indices = @transform_3, window_bounds = array<i64: 16, 256>}]} {
    %c0_i32 = arith.constant 0 : i32
    %0 = arith.cmpi eq, %arg2, %c0_i32 : i32
    %1 = arith.extui %0 : i1 to i32
    %c0_i32_0 = arith.constant 0 : i32
    %2 = arith.cmpi ne, %1, %c0_i32_0 : i32
    scf.if %2 {
      %cst_9 = arith.constant 0.000000e+00 : f32
      %12 = vector.broadcast %cst_9 : f32 to vector<16x256xf32>
      %c0_10 = arith.constant 0 : index
      %c0_11 = arith.constant 0 : index
      %13 = vector.load %arg7[%c0_10, %c0_11] : memref<16x256xf32, #tpu.memory_space<vmem>>, vector<16x256xf32>
      tpu.vector_store %arg7[%c0_10, %c0_11], %12 {strides = array<i32>} : memref<16x256xf32, #tpu.memory_space<vmem>>, vector<16x256xf32>,
    } else {
    }
    %c0 = arith.constant 0 : index
    %c0_1 = arith.constant 0 : index
    %3 = vector.load %arg7[%c0, %c0_1] : memref<16x256xf32, #tpu.memory_space<vmem>>, vector<16x256xf32>
    %c0_2 = arith.constant 0 : index
    %c0_3 = arith.constant 0 : index
    %4 = vector.load %arg3[%c0_2, %c0_3] : memref<16x384xbf16, #tpu.memory_space<vmem>>, vector<16x384xbf16>
    %c0_4 = arith.constant 0 : index
    %c0_5 = arith.constant 0 : index
    %5 = vector.load %arg4[%c0_4, %c0_5] : memref<384x256xbf16, #tpu.memory_space<vmem>>, vector<384x256xbf16>
    %cst = arith.constant dense<0.000000e+00> : vector<16x256xf32>
    %6 = tpu.matmul %4, %5, %cst {dimension_numbers = #tpu.dot_dimension_numbers<[1], [0], [0], [1], [0, 0, 1, 1], [], []>} : vector<16x384xbf16>, vector<384x256xbf16>, vector<16x256xf32> -> vector<16x256xf32>
    %7 = arith.addf %3, %6 : vector<16x256xf32>
    %c0_6 = arith.constant 0 : index
    %c0_7 = arith.constant 0 : index
    %8 = vector.load %arg7[%c0_6, %c0_7] : memref<16x256xf32, #tpu.memory_space<vmem>>, vector<16x256xf32>
    tpu.vector_store %arg7[%c0_6, %c0_7], %7 {strides = array<i32>} : memref<16x256xf32, #tpu.memory_space<vmem>>, vector<16x256xf32>,
    %c5_i32 = arith.constant 5 : i32
    %9 = arith.cmpi eq, %arg2, %c5_i32 : i32
    %10 = arith.extui %9 : i1 to i32
    %c0_i32_8 = arith.constant 0 : i32
    %11 = arith.cmpi ne, %10, %c0_i32_8 : i32
    scf.if %11 {
      %c0_9 = arith.constant 0 : index
      %c0_10 = arith.constant 0 : index
      %12 = vector.load %arg7[%c0_9, %c0_10] : memref<16x256xf32, #tpu.memory_space<vmem>>, vector<16x256xf32>
      %c0_11 = arith.constant 0 : index
      %c0_12 = arith.constant 0 : index
      %13 = vector.load %arg5[%c0_11, %c0_12] : memref<1x256xf32, #tpu.memory_space<vmem>>, vector<1x256xf32>
      %14 = vector.broadcast %13 : vector<1x256xf32> to vector<16x256xf32>
      %15 = arith.addf %12, %14 : vector<16x256xf32>
      %cst_13 = arith.constant 0.000000e+00 : f32
      %16 = vector.broadcast %cst_13 : f32 to vector<16x256xf32>
      %17 = arith.maximumf %15, %16 : vector<16x256xf32>
      %c0_14 = arith.constant 0 : index
      %c0_15 = arith.constant 0 : index
      %18 = vector.load %arg6[%c0_14, %c0_15] : memref<16x256xf32, #tpu.memory_space<vmem>>, vector<16x256xf32>
      tpu.vector_store %arg6[%c0_14, %c0_15], %17 {strides = array<i32>} : memref<16x256xf32, #tpu.memory_space<vmem>>, vector<16x256xf32>,
    } else {
    }
    return
  }
  func.func @transform_0(%arg0: i32, %arg1: i32, %arg2: i32) -> (i32, i32) {
    %c0_i32 = arith.constant 0 : i32
    return %arg0, %arg2 : i32, i32
  }
  func.func @transform_1(%arg0: i32, %arg1: i32, %arg2: i32) -> (i32, i32) {
    %c0_i32 = arith.constant 0 : i32
    return %arg2, %arg1 : i32, i32
  }
  func.func @transform_2(%arg0: i32, %arg1: i32, %arg2: i32) -> (i32, i32) {
    %c0_i32 = arith.constant 0 : i32
    %c0_i32_0 = arith.constant 0 : i32
    return %c0_i32, %arg1 : i32, i32
  }
  func.func @transform_3(%arg0: i32, %arg1: i32, %arg2: i32) -> (i32, i32) {
    %c0_i32 = arith.constant 0 : i32
    return %arg0, %arg1 : i32, i32
  }
}

module attributes {stable_mosaic.version = 11 : i64} {
  func.func @_gemm_kernel(%arg0: i32, %arg1: i32, %arg2: i32, %arg3: memref<16x384xbf16, #tpu.memory_space<vmem>>, %arg4: memref<384x256xbf16, #tpu.memory_space<vmem>>, %arg5: memref<1x256xf32, #tpu.memory_space<vmem>>, %arg6: memref<16x256xf32, #tpu.memory_space<vmem>>, %arg7: memref<16x256xf32, #tpu.memory_space<vmem>>) attributes {dimension_semantics = [#tpu.dimension_semantics<parallel>, #tpu.dimension_semantics<parallel>, #tpu.dimension_semantics<arbitrary>], iteration_bounds = array<i64: 1, 2, 6>, scalar_prefetch = 0 : i64, scratch_operands = 1 : i64, tpu.core_type = #tpu.core_type<tc>, window_params = [{transform_indices = @transform_0, window_bounds = array<i64: 16, 384>}, {transform_indices = @transform_1, window_bounds = array<i64: 384, 256>}, {transform_indices = @transform_2, window_bounds = array<i64: 1, 256>}, {transform_indices = @transform_3, window_bounds = array<i64: 16, 256>}]} {
    %c0_i32 = arith.constant 0 : i32
    %0 = arith.cmpi eq, %arg2, %c0_i32 : i32
    %1 = arith.extui %0 : i1 to i32
    %c0_i32_0 = arith.constant 0 : i32
    %2 = arith.cmpi ne, %1, %c0_i32_0 : i32
    scf.if %2 {
      %cst_9 = arith.constant 0.000000e+00 : f32
      %12 = vector.broadcast %cst_9 : f32 to vector<16x256xf32>
      %c0_10 = arith.constant 0 : index
      %c0_11 = arith.constant 0 : index
      %13 = vector.load %arg7[%c0_10, %c0_11] : memref<16x256xf32, #tpu.memory_space<vmem>>, vector<16x256xf32>
      tpu.vector_store %arg7[%c0_10, %c0_11], %12 {strides = array<i32>} : memref<16x256xf32, #tpu.memory_space<vmem>>, vector<16x256xf32>,
    } else {
    }
    %c0 = arith.constant 0 : index
    %c0_1 = arith.constant 0 : index
    %3 = vector.load %arg7[%c0, %c0_1] : memref<16x256xf32, #tpu.memory_space<vmem>>, vector<16x256xf32>
    %c0_2 = arith.constant 0 : index
    %c0_3 = arith.constant 0 : index
    %4 = vector.load %arg3[%c0_2, %c0_3] : memref<16x384xbf16, #tpu.memory_space<vmem>>, vector<16x384xbf16>
    %c0_4 = arith.constant 0 : index
    %c0_5 = arith.constant 0 : index
    %5 = vector.load %arg4[%c0_4, %c0_5] : memref<384x256xbf16, #tpu.memory_space<vmem>>, vector<384x256xbf16>
    %cst = arith.constant dense<0.000000e+00> : vector<16x256xf32>
    %6 = tpu.matmul %4, %5, %cst {dimension_numbers = #tpu.dot_dimension_numbers<[1], [0], [0], [1], [0, 0, 1, 1], [], []>} : vector<16x384xbf16>, vector<384x256xbf16>, vector<16x256xf32> -> vector<16x256xf32>
    %7 = arith.addf %3, %6 : vector<16x256xf32>
    %c0_6 = arith.constant 0 : index
    %c0_7 = arith.constant 0 : index
    %8 = vector.load %arg7[%c0_6, %c0_7] : memref<16x256xf32, #tpu.memory_space<vmem>>, vector<16x256xf32>
    tpu.vector_store %arg7[%c0_6, %c0_7], %7 {strides = array<i32>} : memref<16x256xf32, #tpu.memory_space<vmem>>, vector<16x256xf32>,
    %c5_i32 = arith.constant 5 : i32
    %9 = arith.cmpi eq, %arg2, %c5_i32 : i32
    %10 = arith.extui %9 : i1 to i32
    %c0_i32_8 = arith.constant 0 : i32
    %11 = arith.cmpi ne, %10, %c0_i32_8 : i32
    scf.if %11 {
      %c0_9 = arith.constant 0 : index
      %c0_10 = arith.constant 0 : index
      %12 = vector.load %arg7[%c0_9, %c0_10] : memref<16x256xf32, #tpu.memory_space<vmem>>, vector<16x256xf32>
      %c0_11 = arith.constant 0 : index
      %c0_12 = arith.constant 0 : index
      %13 = vector.load %arg5[%c0_11, %c0_12] : memref<1x256xf32, #tpu.memory_space<vmem>>, vector<1x256xf32>
      %14 = vector.broadcast %13 : vector<1x256xf32> to vector<16x256xf32>
      %15 = arith.addf %12, %14 : vector<16x256xf32>
      %cst_13 = arith.constant 0.000000e+00 : f32
      %16 = vector.broadcast %cst_13 : f32 to vector<16x256xf32>
      %17 = arith.maximumf %15, %16 : vector<16x256xf32>
      %c0_14 = arith.constant 0 : index
      %c0_15 = arith.constant 0 : index
      %18 = vector.load %arg6[%c0_14, %c0_15] : memref<16x256xf32, #tpu.memory_space<vmem>>, vector<16x256xf32>
      tpu.vector_store %arg6[%c0_14, %c0_15], %17 {strides = array<i32>} : memref<16x256xf32, #tpu.memory_space<vmem>>, vector<16x256xf32>,
    } else {
    }
    return
  }
  func.func @transform_0(%arg0: i32, %arg1: i32, %arg2: i32) -> (i32, i32) {
    %c0_i32 = arith.constant 0 : i32
    return %arg0, %arg2 : i32, i32
  }
  func.func @transform_1(%arg0: i32, %arg1: i32, %arg2: i32) -> (i32, i32) {
    %c0_i32 = arith.constant 0 : i32
    return %arg2, %arg1 : i32, i32
  }
  func.func @transform_2(%arg0: i32, %arg1: i32, %arg2: i32) -> (i32, i32) {
    %c0_i32 = arith.constant 0 : i32
    %c0_i32_0 = arith.constant 0 : i32
    return %c0_i32, %arg1 : i32, i32
  }
  func.func @transform_3(%arg0: i32, %arg1: i32, %arg2: i32) -> (i32, i32) {
    %c0_i32 = arith.constant 0 : i32
    return %arg0, %arg1 : i32, i32
  }
}

module attributes {stable_mosaic.version = 11 : i64} {
  func.func @_gemm_kernel(%arg0: i32, %arg1: i32, %arg2: i32, %arg3: memref<16x256xbf16, #tpu.memory_space<vmem>>, %arg4: memref<256x256xbf16, #tpu.memory_space<vmem>>, %arg5: memref<1x256xf32, #tpu.memory_space<vmem>>, %arg6: memref<16x256xf32, #tpu.memory_space<vmem>>, %arg7: memref<16x256xf32, #tpu.memory_space<vmem>>) attributes {dimension_semantics = [#tpu.dimension_semantics<parallel>, #tpu.dimension_semantics<parallel>, #tpu.dimension_semantics<arbitrary>], iteration_bounds = array<i64: 1, 2, 1>, scalar_prefetch = 0 : i64, scratch_operands = 1 : i64, tpu.core_type = #tpu.core_type<tc>, window_params = [{transform_indices = @transform_0, window_bounds = array<i64: 16, 256>}, {transform_indices = @transform_1, window_bounds = array<i64: 256, 256>}, {transform_indices = @transform_2, window_bounds = array<i64: 1, 256>}, {transform_indices = @transform_3, window_bounds = array<i64: 16, 256>}]} {
    %c0_i32 = arith.constant 0 : i32
    %0 = arith.cmpi eq, %arg2, %c0_i32 : i32
    %1 = arith.extui %0 : i1 to i32
    %c0_i32_0 = arith.constant 0 : i32
    %2 = arith.cmpi ne, %1, %c0_i32_0 : i32
    scf.if %2 {
      %cst_10 = arith.constant 0.000000e+00 : f32
      %12 = vector.broadcast %cst_10 : f32 to vector<16x256xf32>
      %c0_11 = arith.constant 0 : index
      %c0_12 = arith.constant 0 : index
      %13 = vector.load %arg7[%c0_11, %c0_12] : memref<16x256xf32, #tpu.memory_space<vmem>>, vector<16x256xf32>
      tpu.vector_store %arg7[%c0_11, %c0_12], %12 {strides = array<i32>} : memref<16x256xf32, #tpu.memory_space<vmem>>, vector<16x256xf32>,
    } else {
    }
    %c0 = arith.constant 0 : index
    %c0_1 = arith.constant 0 : index
    %3 = vector.load %arg7[%c0, %c0_1] : memref<16x256xf32, #tpu.memory_space<vmem>>, vector<16x256xf32>
    %c0_2 = arith.constant 0 : index
    %c0_3 = arith.constant 0 : index
    %4 = vector.load %arg3[%c0_2, %c0_3] : memref<16x256xbf16, #tpu.memory_space<vmem>>, vector<16x256xbf16>
    %c0_4 = arith.constant 0 : index
    %c0_5 = arith.constant 0 : index
    %5 = vector.load %arg4[%c0_4, %c0_5] : memref<256x256xbf16, #tpu.memory_space<vmem>>, vector<256x256xbf16>
    %cst = arith.constant dense<0.000000e+00> : vector<16x256xf32>
    %6 = tpu.matmul %4, %5, %cst {dimension_numbers = #tpu.dot_dimension_numbers<[1], [0], [0], [1], [0, 0, 1, 1], [], []>} : vector<16x256xbf16>, vector<256x256xbf16>, vector<16x256xf32> -> vector<16x256xf32>
    %7 = arith.addf %3, %6 : vector<16x256xf32>
    %c0_6 = arith.constant 0 : index
    %c0_7 = arith.constant 0 : index
    %8 = vector.load %arg7[%c0_6, %c0_7] : memref<16x256xf32, #tpu.memory_space<vmem>>, vector<16x256xf32>
    tpu.vector_store %arg7[%c0_6, %c0_7], %7 {strides = array<i32>} : memref<16x256xf32, #tpu.memory_space<vmem>>, vector<16x256xf32>,
    %c0_i32_8 = arith.constant 0 : i32
    %9 = arith.cmpi eq, %arg2, %c0_i32_8 : i32
    %10 = arith.extui %9 : i1 to i32
    %c0_i32_9 = arith.constant 0 : i32
    %11 = arith.cmpi ne, %10, %c0_i32_9 : i32
    scf.if %11 {
      %c0_10 = arith.constant 0 : index
      %c0_11 = arith.constant 0 : index
      %12 = vector.load %arg7[%c0_10, %c0_11] : memref<16x256xf32, #tpu.memory_space<vmem>>, vector<16x256xf32>
      %c0_12 = arith.constant 0 : index
      %c0_13 = arith.constant 0 : index
      %13 = vector.load %arg5[%c0_12, %c0_13] : memref<1x256xf32, #tpu.memory_space<vmem>>, vector<1x256xf32>
      %14 = vector.broadcast %13 : vector<1x256xf32> to vector<16x256xf32>
      %15 = arith.addf %12, %14 : vector<16x256xf32>
      %c0_14 = arith.constant 0 : index
      %c0_15 = arith.constant 0 : index
      %16 = vector.load %arg6[%c0_14, %c0_15] : memref<16x256xf32, #tpu.memory_space<vmem>>, vector<16x256xf32>
      tpu.vector_store %arg6[%c0_14, %c0_15], %15 {strides = array<i32>} : memref<16x256xf32, #tpu.memory_space<vmem>>, vector<16x256xf32>,
    } else {
    }
    return
  }
  func.func @transform_0(%arg0: i32, %arg1: i32, %arg2: i32) -> (i32, i32) {
    %c0_i32 = arith.constant 0 : i32
    return %arg0, %arg2 : i32, i32
  }
  func.func @transform_1(%arg0: i32, %arg1: i32, %arg2: i32) -> (i32, i32) {
    %c0_i32 = arith.constant 0 : i32
    return %arg2, %arg1 : i32, i32
  }
  func.func @transform_2(%arg0: i32, %arg1: i32, %arg2: i32) -> (i32, i32) {
    %c0_i32 = arith.constant 0 : i32
    %c0_i32_0 = arith.constant 0 : i32
    return %c0_i32, %arg1 : i32, i32
  }
  func.func @transform_3(%arg0: i32, %arg1: i32, %arg2: i32) -> (i32, i32) {
    %c0_i32 = arith.constant 0 : i32
    return %arg0, %arg1 : i32, i32
  }
}

module attributes {stable_mosaic.version = 11 : i64} {
  func.func @_gemm_kernel(%arg0: i32, %arg1: i32, %arg2: i32, %arg3: memref<16x512xbf16, #tpu.memory_space<vmem>>, %arg4: memref<512x256xbf16, #tpu.memory_space<vmem>>, %arg5: memref<1x256xf32, #tpu.memory_space<vmem>>, %arg6: memref<16x256xf32, #tpu.memory_space<vmem>>, %arg7: memref<16x256xf32, #tpu.memory_space<vmem>>, %arg8: memref<16x256xf32, #tpu.memory_space<vmem>>) attributes {dimension_semantics = [#tpu.dimension_semantics<parallel>, #tpu.dimension_semantics<parallel>, #tpu.dimension_semantics<arbitrary>], iteration_bounds = array<i64: 1, 2, 9>, scalar_prefetch = 0 : i64, scratch_operands = 1 : i64, tpu.core_type = #tpu.core_type<tc>, window_params = [{transform_indices = @transform_0, window_bounds = array<i64: 16, 512>}, {transform_indices = @transform_1, window_bounds = array<i64: 512, 256>}, {transform_indices = @transform_2, window_bounds = array<i64: 1, 256>}, {transform_indices = @transform_3, window_bounds = array<i64: 16, 256>}, {transform_indices = @transform_4, window_bounds = array<i64: 16, 256>}]} {
    %c0_i32 = arith.constant 0 : i32
    %0 = arith.cmpi eq, %arg2, %c0_i32 : i32
    %1 = arith.extui %0 : i1 to i32
    %c0_i32_0 = arith.constant 0 : i32
    %2 = arith.cmpi ne, %1, %c0_i32_0 : i32
    scf.if %2 {
      %cst_9 = arith.constant 0.000000e+00 : f32
      %12 = vector.broadcast %cst_9 : f32 to vector<16x256xf32>
      %c0_10 = arith.constant 0 : index
      %c0_11 = arith.constant 0 : index
      %13 = vector.load %arg8[%c0_10, %c0_11] : memref<16x256xf32, #tpu.memory_space<vmem>>, vector<16x256xf32>
      tpu.vector_store %arg8[%c0_10, %c0_11], %12 {strides = array<i32>} : memref<16x256xf32, #tpu.memory_space<vmem>>, vector<16x256xf32>,
    } else {
    }
    %c0 = arith.constant 0 : index
    %c0_1 = arith.constant 0 : index
    %3 = vector.load %arg8[%c0, %c0_1] : memref<16x256xf32, #tpu.memory_space<vmem>>, vector<16x256xf32>
    %c0_2 = arith.constant 0 : index
    %c0_3 = arith.constant 0 : index
    %4 = vector.load %arg3[%c0_2, %c0_3] : memref<16x512xbf16, #tpu.memory_space<vmem>>, vector<16x512xbf16>
    %c0_4 = arith.constant 0 : index
    %c0_5 = arith.constant 0 : index
    %5 = vector.load %arg4[%c0_4, %c0_5] : memref<512x256xbf16, #tpu.memory_space<vmem>>, vector<512x256xbf16>
    %cst = arith.constant dense<0.000000e+00> : vector<16x256xf32>
    %6 = tpu.matmul %4, %5, %cst {dimension_numbers = #tpu.dot_dimension_numbers<[1], [0], [0], [1], [0, 0, 1, 1], [], []>} : vector<16x512xbf16>, vector<512x256xbf16>, vector<16x256xf32> -> vector<16x256xf32>
    %7 = arith.addf %3, %6 : vector<16x256xf32>
    %c0_6 = arith.constant 0 : index
    %c0_7 = arith.constant 0 : index
    %8 = vector.load %arg8[%c0_6, %c0_7] : memref<16x256xf32, #tpu.memory_space<vmem>>, vector<16x256xf32>
    tpu.vector_store %arg8[%c0_6, %c0_7], %7 {strides = array<i32>} : memref<16x256xf32, #tpu.memory_space<vmem>>, vector<16x256xf32>,
    %c8_i32 = arith.constant 8 : i32
    %9 = arith.cmpi eq, %arg2, %c8_i32 : i32
    %10 = arith.extui %9 : i1 to i32
    %c0_i32_8 = arith.constant 0 : i32
    %11 = arith.cmpi ne, %10, %c0_i32_8 : i32
    scf.if %11 {
      %c0_9 = arith.constant 0 : index
      %c0_10 = arith.constant 0 : index
      %12 = vector.load %arg8[%c0_9, %c0_10] : memref<16x256xf32, #tpu.memory_space<vmem>>, vector<16x256xf32>
      %c0_11 = arith.constant 0 : index
      %c0_12 = arith.constant 0 : index
      %13 = vector.load %arg5[%c0_11, %c0_12] : memref<1x256xf32, #tpu.memory_space<vmem>>, vector<1x256xf32>
      %14 = vector.broadcast %13 : vector<1x256xf32> to vector<16x256xf32>
      %15 = arith.addf %12, %14 : vector<16x256xf32>
      %c0_13 = arith.constant 0 : index
      %c0_14 = arith.constant 0 : index
      %16 = vector.load %arg6[%c0_13, %c0_14] : memref<16x256xf32, #tpu.memory_space<vmem>>, vector<16x256xf32>
      %17 = arith.addf %15, %16 : vector<16x256xf32>
      %cst_15 = arith.constant 0.000000e+00 : f32
      %18 = vector.broadcast %cst_15 : f32 to vector<16x256xf32>
      %19 = arith.maximumf %17, %18 : vector<16x256xf32>
      %c0_16 = arith.constant 0 : index
      %c0_17 = arith.constant 0 : index
      %20 = vector.load %arg7[%c0_16, %c0_17] : memref<16x256xf32, #tpu.memory_space<vmem>>, vector<16x256xf32>
      tpu.vector_store %arg7[%c0_16, %c0_17], %19 {strides = array<i32>} : memref<16x256xf32, #tpu.memory_space<vmem>>, vector<16x256xf32>,
    } else {
    }
    return
  }
  func.func @transform_0(%arg0: i32, %arg1: i32, %arg2: i32) -> (i32, i32) {
    %c0_i32 = arith.constant 0 : i32
    return %arg0, %arg2 : i32, i32
  }
  func.func @transform_1(%arg0: i32, %arg1: i32, %arg2: i32) -> (i32, i32) {
    %c0_i32 = arith.constant 0 : i32
    return %arg2, %arg1 : i32, i32
  }
  func.func @transform_2(%arg0: i32, %arg1: i32, %arg2: i32) -> (i32, i32) {
    %c0_i32 = arith.constant 0 : i32
    %c0_i32_0 = arith.constant 0 : i32
    return %c0_i32, %arg1 : i32, i32
  }
  func.func @transform_3(%arg0: i32, %arg1: i32, %arg2: i32) -> (i32, i32) {
    %c0_i32 = arith.constant 0 : i32
    return %arg0, %arg1 : i32, i32
  }
  func.func @transform_4(%arg0: i32, %arg1: i32, %arg2: i32) -> (i32, i32) {
    %c0_i32 = arith.constant 0 : i32
    return %arg0, %arg1 : i32, i32
  }
}

module attributes {stable_mosaic.version = 11 : i64} {
  func.func @_gemm_kernel(%arg0: i32, %arg1: i32, %arg2: i32, %arg3: memref<16x512xbf16, #tpu.memory_space<vmem>>, %arg4: memref<512x256xbf16, #tpu.memory_space<vmem>>, %arg5: memref<1x256xf32, #tpu.memory_space<vmem>>, %arg6: memref<16x256xf32, #tpu.memory_space<vmem>>, %arg7: memref<16x256xf32, #tpu.memory_space<vmem>>) attributes {dimension_semantics = [#tpu.dimension_semantics<parallel>, #tpu.dimension_semantics<parallel>, #tpu.dimension_semantics<arbitrary>], iteration_bounds = array<i64: 1, 2, 9>, scalar_prefetch = 0 : i64, scratch_operands = 1 : i64, tpu.core_type = #tpu.core_type<tc>, window_params = [{transform_indices = @transform_0, window_bounds = array<i64: 16, 512>}, {transform_indices = @transform_1, window_bounds = array<i64: 512, 256>}, {transform_indices = @transform_2, window_bounds = array<i64: 1, 256>}, {transform_indices = @transform_3, window_bounds = array<i64: 16, 256>}]} {
    %c0_i32 = arith.constant 0 : i32
    %0 = arith.cmpi eq, %arg2, %c0_i32 : i32
    %1 = arith.extui %0 : i1 to i32
    %c0_i32_0 = arith.constant 0 : i32
    %2 = arith.cmpi ne, %1, %c0_i32_0 : i32
    scf.if %2 {
      %cst_9 = arith.constant 0.000000e+00 : f32
      %12 = vector.broadcast %cst_9 : f32 to vector<16x256xf32>
      %c0_10 = arith.constant 0 : index
      %c0_11 = arith.constant 0 : index
      %13 = vector.load %arg7[%c0_10, %c0_11] : memref<16x256xf32, #tpu.memory_space<vmem>>, vector<16x256xf32>
      tpu.vector_store %arg7[%c0_10, %c0_11], %12 {strides = array<i32>} : memref<16x256xf32, #tpu.memory_space<vmem>>, vector<16x256xf32>,
    } else {
    }
    %c0 = arith.constant 0 : index
    %c0_1 = arith.constant 0 : index
    %3 = vector.load %arg7[%c0, %c0_1] : memref<16x256xf32, #tpu.memory_space<vmem>>, vector<16x256xf32>
    %c0_2 = arith.constant 0 : index
    %c0_3 = arith.constant 0 : index
    %4 = vector.load %arg3[%c0_2, %c0_3] : memref<16x512xbf16, #tpu.memory_space<vmem>>, vector<16x512xbf16>
    %c0_4 = arith.constant 0 : index
    %c0_5 = arith.constant 0 : index
    %5 = vector.load %arg4[%c0_4, %c0_5] : memref<512x256xbf16, #tpu.memory_space<vmem>>, vector<512x256xbf16>
    %cst = arith.constant dense<0.000000e+00> : vector<16x256xf32>
    %6 = tpu.matmul %4, %5, %cst {dimension_numbers = #tpu.dot_dimension_numbers<[1], [0], [0], [1], [0, 0, 1, 1], [], []>} : vector<16x512xbf16>, vector<512x256xbf16>, vector<16x256xf32> -> vector<16x256xf32>
    %7 = arith.addf %3, %6 : vector<16x256xf32>
    %c0_6 = arith.constant 0 : index
    %c0_7 = arith.constant 0 : index
    %8 = vector.load %arg7[%c0_6, %c0_7] : memref<16x256xf32, #tpu.memory_space<vmem>>, vector<16x256xf32>
    tpu.vector_store %arg7[%c0_6, %c0_7], %7 {strides = array<i32>} : memref<16x256xf32, #tpu.memory_space<vmem>>, vector<16x256xf32>,
    %c8_i32 = arith.constant 8 : i32
    %9 = arith.cmpi eq, %arg2, %c8_i32 : i32
    %10 = arith.extui %9 : i1 to i32
    %c0_i32_8 = arith.constant 0 : i32
    %11 = arith.cmpi ne, %10, %c0_i32_8 : i32
    scf.if %11 {
      %c0_9 = arith.constant 0 : index
      %c0_10 = arith.constant 0 : index
      %12 = vector.load %arg7[%c0_9, %c0_10] : memref<16x256xf32, #tpu.memory_space<vmem>>, vector<16x256xf32>
      %c0_11 = arith.constant 0 : index
      %c0_12 = arith.constant 0 : index
      %13 = vector.load %arg5[%c0_11, %c0_12] : memref<1x256xf32, #tpu.memory_space<vmem>>, vector<1x256xf32>
      %14 = vector.broadcast %13 : vector<1x256xf32> to vector<16x256xf32>
      %15 = arith.addf %12, %14 : vector<16x256xf32>
      %cst_13 = arith.constant 0.000000e+00 : f32
      %16 = vector.broadcast %cst_13 : f32 to vector<16x256xf32>
      %17 = arith.maximumf %15, %16 : vector<16x256xf32>
      %c0_14 = arith.constant 0 : index
      %c0_15 = arith.constant 0 : index
      %18 = vector.load %arg6[%c0_14, %c0_15] : memref<16x256xf32, #tpu.memory_space<vmem>>, vector<16x256xf32>
      tpu.vector_store %arg6[%c0_14, %c0_15], %17 {strides = array<i32>} : memref<16x256xf32, #tpu.memory_space<vmem>>, vector<16x256xf32>,
    } else {
    }
    return
  }
  func.func @transform_0(%arg0: i32, %arg1: i32, %arg2: i32) -> (i32, i32) {
    %c0_i32 = arith.constant 0 : i32
    return %arg0, %arg2 : i32, i32
  }
  func.func @transform_1(%arg0: i32, %arg1: i32, %arg2: i32) -> (i32, i32) {
    %c0_i32 = arith.constant 0 : i32
    return %arg2, %arg1 : i32, i32
  }
  func.func @transform_2(%arg0: i32, %arg1: i32, %arg2: i32) -> (i32, i32) {
    %c0_i32 = arith.constant 0 : i32
    %c0_i32_0 = arith.constant 0 : i32
    return %c0_i32, %arg1 : i32, i32
  }
  func.func @transform_3(%arg0: i32, %arg1: i32, %arg2: i32) -> (i32, i32) {
    %c0_i32 = arith.constant 0 : i32
    return %arg0, %arg1 : i32, i32
  }
}

module attributes {stable_mosaic.version = 11 : i64} {
  func.func @_gemm_kernel(%arg0: i32, %arg1: i32, %arg2: i32, %arg3: memref<16x512xbf16, #tpu.memory_space<vmem>>, %arg4: memref<512x128xbf16, #tpu.memory_space<vmem>>, %arg5: memref<1x128xf32, #tpu.memory_space<vmem>>, %arg6: memref<16x128xf32, #tpu.memory_space<vmem>>, %arg7: memref<16x128xf32, #tpu.memory_space<vmem>>) attributes {dimension_semantics = [#tpu.dimension_semantics<parallel>, #tpu.dimension_semantics<parallel>, #tpu.dimension_semantics<arbitrary>], iteration_bounds = array<i64: 1, 1, 1>, scalar_prefetch = 0 : i64, scratch_operands = 1 : i64, tpu.core_type = #tpu.core_type<tc>, window_params = [{transform_indices = @transform_0, window_bounds = array<i64: 16, 512>}, {transform_indices = @transform_1, window_bounds = array<i64: 512, 128>}, {transform_indices = @transform_2, window_bounds = array<i64: 1, 128>}, {transform_indices = @transform_3, window_bounds = array<i64: 16, 128>}]} {
    %c0_i32 = arith.constant 0 : i32
    %0 = arith.cmpi eq, %arg2, %c0_i32 : i32
    %1 = arith.extui %0 : i1 to i32
    %c0_i32_0 = arith.constant 0 : i32
    %2 = arith.cmpi ne, %1, %c0_i32_0 : i32
    scf.if %2 {
      %cst_10 = arith.constant 0.000000e+00 : f32
      %12 = vector.broadcast %cst_10 : f32 to vector<16x128xf32>
      %c0_11 = arith.constant 0 : index
      %c0_12 = arith.constant 0 : index
      %13 = vector.load %arg7[%c0_11, %c0_12] : memref<16x128xf32, #tpu.memory_space<vmem>>, vector<16x128xf32>
      tpu.vector_store %arg7[%c0_11, %c0_12], %12 {strides = array<i32>} : memref<16x128xf32, #tpu.memory_space<vmem>>, vector<16x128xf32>,
    } else {
    }
    %c0 = arith.constant 0 : index
    %c0_1 = arith.constant 0 : index
    %3 = vector.load %arg7[%c0, %c0_1] : memref<16x128xf32, #tpu.memory_space<vmem>>, vector<16x128xf32>
    %c0_2 = arith.constant 0 : index
    %c0_3 = arith.constant 0 : index
    %4 = vector.load %arg3[%c0_2, %c0_3] : memref<16x512xbf16, #tpu.memory_space<vmem>>, vector<16x512xbf16>
    %c0_4 = arith.constant 0 : index
    %c0_5 = arith.constant 0 : index
    %5 = vector.load %arg4[%c0_4, %c0_5] : memref<512x128xbf16, #tpu.memory_space<vmem>>, vector<512x128xbf16>
    %cst = arith.constant dense<0.000000e+00> : vector<16x128xf32>
    %6 = tpu.matmul %4, %5, %cst {dimension_numbers = #tpu.dot_dimension_numbers<[1], [0], [0], [1], [0, 0, 1, 1], [], []>} : vector<16x512xbf16>, vector<512x128xbf16>, vector<16x128xf32> -> vector<16x128xf32>
    %7 = arith.addf %3, %6 : vector<16x128xf32>
    %c0_6 = arith.constant 0 : index
    %c0_7 = arith.constant 0 : index
    %8 = vector.load %arg7[%c0_6, %c0_7] : memref<16x128xf32, #tpu.memory_space<vmem>>, vector<16x128xf32>
    tpu.vector_store %arg7[%c0_6, %c0_7], %7 {strides = array<i32>} : memref<16x128xf32, #tpu.memory_space<vmem>>, vector<16x128xf32>,
    %c0_i32_8 = arith.constant 0 : i32
    %9 = arith.cmpi eq, %arg2, %c0_i32_8 : i32
    %10 = arith.extui %9 : i1 to i32
    %c0_i32_9 = arith.constant 0 : i32
    %11 = arith.cmpi ne, %10, %c0_i32_9 : i32
    scf.if %11 {
      %c0_10 = arith.constant 0 : index
      %c0_11 = arith.constant 0 : index
      %12 = vector.load %arg7[%c0_10, %c0_11] : memref<16x128xf32, #tpu.memory_space<vmem>>, vector<16x128xf32>
      %c0_12 = arith.constant 0 : index
      %c0_13 = arith.constant 0 : index
      %13 = vector.load %arg5[%c0_12, %c0_13] : memref<1x128xf32, #tpu.memory_space<vmem>>, vector<1x128xf32>
      %14 = vector.broadcast %13 : vector<1x128xf32> to vector<16x128xf32>
      %15 = arith.addf %12, %14 : vector<16x128xf32>
      %c0_14 = arith.constant 0 : index
      %c0_15 = arith.constant 0 : index
      %16 = vector.load %arg6[%c0_14, %c0_15] : memref<16x128xf32, #tpu.memory_space<vmem>>, vector<16x128xf32>
      tpu.vector_store %arg6[%c0_14, %c0_15], %15 {strides = array<i32>} : memref<16x128xf32, #tpu.memory_space<vmem>>, vector<16x128xf32>,
    } else {
    }
    return
  }
  func.func @transform_0(%arg0: i32, %arg1: i32, %arg2: i32) -> (i32, i32) {
    %c0_i32 = arith.constant 0 : i32
    return %arg0, %arg2 : i32, i32
  }
  func.func @transform_1(%arg0: i32, %arg1: i32, %arg2: i32) -> (i32, i32) {
    %c0_i32 = arith.constant 0 : i32
    return %arg2, %arg1 : i32, i32
  }
  func.func @transform_2(%arg0: i32, %arg1: i32, %arg2: i32) -> (i32, i32) {
    %c0_i32 = arith.constant 0 : i32
    %c0_i32_0 = arith.constant 0 : i32
    return %c0_i32, %arg1 : i32, i32
  }
  func.func @transform_3(%arg0: i32, %arg1: i32, %arg2: i32) -> (i32, i32) {
    %c0_i32 = arith.constant 0 : i32
    return %arg0, %arg1 : i32, i32
  }
}

</mosaic_0001>

<bundles_post_ra>
// kernel: _lambda_.22
= control target key start
LH: loop header
LB: loop body
LE: loop exit
PB: predicated region body
PF: predicated region fallthrough
CT: control target
= control target key end

     0   :  { %s1081_s12 = smov 0   ;;  %s1083_s13 = smov 0   ;;  %s1226_s0 = inlined_call_operand.vmem [shape: bf16[512,256], index: 0, kind: input, shape index: {}]   ;;  %s1227_s1 = inlined_call_operand.vmem [shape: bf16[256,128], index: 1, kind: input, shape index: {}]   ;;  %s1228_s2 = inlined_call_operand.vmem [shape: f32[1,128], index: 2, kind: input, shape index: {}]   ;;  %s1229_s3 = inlined_call_operand.vmem [shape: f32[512,128], index: 3, kind: output, shape index: {}]  }
   0x1   :  { %s1085_s14 = smov 0  }
   0x2 LB: > { %s32_s15 = sadd.s32 1, %s1055_s13  ;;  %p851_p0 = scmp.ge.s32.totalorder %s1059_s14, 1  ;;  %s1059_s14 = sphi %s1085_s14, %s13_s14   ;;  %s1055_s13 = sphi %s1083_s13, %s1231_s13   ;;  %s1051_s12 = sphi %s1081_s12, %s1230_s12  }
   0x3   : > { %p34_p1 = scmp.ge.s32.totalorder %s32_s15, 4  ;;  %p191_p2 = scmp.lt.s32.totalorder %s1059_s14, 5 }
   0x5   : > { %s1233_s15 = smov (%p34_p1, %s32_s15), 0  ;;  %p192_p3 = pnand %p851_p0, %p191_p2 }
   0x6   : > { %v997_v0 = vld [vmem:[%s1227_s1 + $0x40] sm:$0xff] (!%p192_p3)   ;;  %s852_s18 = sshll.u32 (!%p192_p3), %s1051_s12, 4  ;;  %v999_v2 = vld [vmem:[%s1227_s1 + $0x48] sm:$0xff] (!%p192_p3)   ;;  %v1001_v4 = vld [vmem:[%s1227_s1 + $0x50] sm:$0xff] (!%p192_p3)  }
   0x7   : > { %195 = sbr.rel (%p192_p3) target bundleno = 285 (0x11d), region = 32  ;;  %v998_v1 = vld [vmem:[%s1227_s1] sm:$0xff] (!%p192_p3)   ;;  %893 = vmatprep.subr.bf16.mxu0 (!%p192_p3), %v997_v0  ;;  %957 = vmatprep.subr.bf16.mxu1 (!%p192_p3), %v997_v0  ;;  %v1000_v3 = vld [vmem:[%s1227_s1 + $0x8] sm:$0xff] (!%p192_p3)   ;;  %p236_p4 = scmp.lt.s32.totalorder (!%p192_p3), %s852_s18, 63  ;;  %v1002_v5 = vld [vmem:[%s1227_s1 + $0x10] sm:$0xff] (!%p192_p3)  }
   0x8   : > { %894 = vmatpush3.bf16.msra.mxu0 (!%p192_p3), %v998_v1  ;;  %965 = vmatpush3.bf16.msra.mxu1 (!%p192_p3), %v998_v1  ;;  %v1003_v6 = vld [vmem:[%s1227_s1 + $0x58] sm:$0xff] (!%p192_p3)   ;;  %v1005_v8 = vld [vmem:[%s1227_s1 + $0x60] sm:$0xff] (!%p192_p3)   ;;  %v1007_v10 = vld [vmem:[%s1227_s1 + $0x68] sm:$0xff] (!%p192_p3)  }
   0x9   : > { %895 = vmatprep.subr.bf16.mxu0 (!%p192_p3), %v999_v2  ;;  %958 = vmatprep.subr.bf16.mxu1 (!%p192_p3), %v999_v2  ;;  %v1004_v7 = vld [vmem:[%s1227_s1 + $0x18] sm:$0xff] (!%p192_p3)   ;;  %v1006_v9 = vld [vmem:[%s1227_s1 + $0x20] sm:$0xff] (!%p192_p3)   ;;  %v1008_v13 = vld [vmem:[%s1227_s1 + $0x28] sm:$0xff] (!%p192_p3)  }
   0xa   : > { %v1009_v14 = vld [vmem:[%s1227_s1 + $0x70] sm:$0xff] (!%p192_p3)   ;;  %v1011_v16 = vld [vmem:[%s1227_s1 + $0x78] sm:$0xff] (!%p192_p3)   ;;  %v1176_v35 = vld [vmem:[%s1228_s2] ss:$0 sm:$0xff] (!%p192_p3) }
   0xb   : > { %v1010_v15 = vld [vmem:[%s1227_s1 + $0x30] sm:$0xff] (!%p192_p3)   ;;  %v1012_v17 = vld [vmem:[%s1227_s1 + $0x38] sm:$0xff] (!%p192_p3)  }
   0xc   : > { %896 = vmatpush3.bf16.msra.mxu0 (!%p192_p3), %v1000_v3  ;;  %966 = vmatpush3.bf16.msra.mxu1 (!%p192_p3), %v1000_v3 }
   0xd   : > { %897 = vmatprep.subr.bf16.mxu0 (!%p192_p3), %v1001_v4  ;;  %959 = vmatprep.subr.bf16.mxu1 (!%p192_p3), %v1001_v4 }
   0xe   : > { %s1235_s18 = smov (!%p236_p4, %s852_s18), 63 }
   0xf   : > { %s892_s6 = sshll.u32 %s1235_s18, 3 }
  0x10   : > { %898 = vmatpush3.bf16.msra.mxu0 %v1002_v5  ;;  %967 = vmatpush3.bf16.msra.mxu1 %v1002_v5  ;;  %s1134_s11 = scalar_lea.vmem %s1226_s0, %s892_s6  ;;  %s1185_s8 = scalar_lea.vmem %s1229_s3, %s892_s6 }
  0x11   : > { %899 = vmatprep.subr.bf16.mxu0 %v1003_v6  ;;  %960 = vmatprep.subr.bf16.mxu1 %v1003_v6  ;;  %v1015_v11 = vld [vmem:[%s1134_s11 + $0x4] ss:$8 sps:$4 sm:$0xff]   ;;  %v1013_v18 = vld [vmem:[%s1134_s11] ss:$8 sps:$4 sm:$0xff]   ;;  %v1019_v20 = vld [vmem:[%s1134_s11 + $0x14] ss:$8 sps:$4 sm:$0xff]  }
  0x12   : > { %v1018_v12 = vld [vmem:[%s1134_s11 + $0x44] ss:$8 sps:$4 sm:$0xff]   ;;  %560 = vmatprep.mubr.bf16.mxu0 %v1015_v11  ;;  %v1016_v19 = vld [vmem:[%s1134_s11 + $0x40] ss:$8 sps:$4 sm:$0xff]   ;;  %v1021_v21 = vld [vmem:[%s1134_s11 + $0x54] ss:$8 sps:$4 sm:$0xff]  }
  0x13   : > { %592 = vmatprep.mubr.bf16.mxu1 %v1018_v12  ;;  %v1023_v22 = vld [vmem:[%s1134_s11 + $0x10] ss:$8 sps:$4 sm:$0xff]   ;;  %v1025_v24 = vld [vmem:[%s1134_s11 + $0x24] ss:$8 sps:$4 sm:$0xff]   ;;  %v1029_v26 = vld [vmem:[%s1134_s11 + $0x20] ss:$8 sps:$4 sm:$0xff]  }
  0x14   : > { %900 = vmatpush3.bf16.msra.mxu0 %v1004_v7  ;;  %968 = vmatpush3.bf16.msra.mxu1 %v1004_v7  ;;  %v1024_v23 = vld [vmem:[%s1134_s11 + $0x50] ss:$8 sps:$4 sm:$0xff]   ;;  %v1027_v25 = vld [vmem:[%s1134_s11 + $0x64] ss:$8 sps:$4 sm:$0xff]   ;;  %v1030_v27 = vld [vmem:[%s1134_s11 + $0x60] ss:$8 sps:$4 sm:$0xff]  }
  0x15   : > { %901 = vmatprep.subr.bf16.mxu0 %v1005_v8  ;;  %961 = vmatprep.subr.bf16.mxu1 %v1005_v8  ;;  %v1031_v28 = vld [vmem:[%s1134_s11 + $0x34] ss:$8 sps:$4 sm:$0xff]   ;;  %v1035_v30 = vld [vmem:[%s1134_s11 + $0x30] ss:$8 sps:$4 sm:$0xff]  }
  0x16   : > { %v1033_v29 = vld [vmem:[%s1134_s11 + $0x74] ss:$8 sps:$4 sm:$0xff]   ;;  %v1036_v31 = vld [vmem:[%s1134_s11 + $0x70] ss:$8 sps:$4 sm:$0xff]  }
  0x18   : > { %902 = vmatpush3.bf16.msra.mxu0 %v1006_v9  ;;  %969 = vmatpush3.bf16.msra.mxu1 %v1006_v9 }
  0x19   : > { %903 = vmatprep.subr.bf16.mxu0 %v1007_v10  ;;  %962 = vmatprep.subr.bf16.mxu1 %v1007_v10 }
  0x1c   : > { %904 = vmatpush3.bf16.msra.mxu0 %v1008_v13  ;;  %970 = vmatpush3.bf16.msra.mxu1 %v1008_v13 }
  0x1d   : > { %905 = vmatprep.subr.bf16.mxu0 %v1009_v14  ;;  %963 = vmatprep.subr.bf16.mxu1 %v1009_v14 }
  0x20   : > { %906 = vmatpush3.bf16.msra.mxu0 %v1010_v15  ;;  %971 = vmatpush3.bf16.msra.mxu1 %v1010_v15 }
  0x21   : > { %907 = vmatprep.subr.bf16.mxu0 %v1011_v16  ;;  %964 = vmatprep.subr.bf16.mxu1 %v1011_v16 }
  0x24   : > { %908 = vmatpush3.bf16.msra.mxu0 %v1012_v17  ;;  %972 = vmatpush3.bf16.msra.mxu1 %v1012_v17 }
  0x27   : > { %561 = vmatmul.mubr.bf16.vlgmr.msra.gmra.mrb[0].mxu0 %v1013_v18  ;;  %593 = vmatmul.mubr.bf16.vlgmr.msra.gmra.mrb[0].mxu1 %v1016_v19 }
  0x28   : > { %568 = vmatprep.mubr.bf16.mxu0 %v1019_v20  ;;  %600 = vmatprep.mubr.bf16.mxu1 %v1021_v21 }
  0x2f   : > { %569 = vmatmul.mubr.bf16.gmra.mrb[4].mxu0 %v1023_v22  ;;  %601 = vmatmul.mubr.bf16.gmra.mrb[4].mxu1 %v1024_v23 }
  0x30   : > { %576 = vmatprep.mubr.bf16.mxu0 %v1025_v24  ;;  %608 = vmatprep.mubr.bf16.mxu1 %v1027_v25 }
  0x37   : > { %577 = vmatmul.mubr.bf16.gmra.mrb[8].mxu0 %v1029_v26  ;;  %609 = vmatmul.mubr.bf16.gmra.mrb[8].mxu1 %v1030_v27 }
  0x38   : > { %584 = vmatprep.mubr.bf16.mxu0 %v1031_v28  ;;  %616 = vmatprep.mubr.bf16.mxu1 %v1033_v29 }
  0x3f   : > { %585 = vmatmul.mubr.bf16.gmra.mrb[12].mxu0 %v1035_v30  ;;  %617 = vmatmul.mubr.bf16.gmra.mrb[12].mxu1 %v1036_v31 }
  0xfa   : > { %v909_v32 = vpop.f32.mrb[0].mxu0  ;;  %v933_v33 = vpop.f32.mrb[0].mxu1 }
  0xfb   : > { %v910_v34 = vpop.f32.mrb[1].mxu0  ;;  %v934_v36 = vpop.f32.mrb[1].mxu1 }
  0xfc   : > { %v911_v37 = vadd.f32 %v910_v34, %v909_v32  ;;  %v935_v38 = vadd.f32 %v934_v36, %v933_v33  ;;  %v912_v39 = vpop.f32.mrb[2].mxu0  ;;  %v936_v40 = vpop.f32.mrb[2].mxu1 }
  0xfd   : > { %v913_v41 = vpop.f32.mrb[3].mxu0  ;;  %v937_v42 = vpop.f32.mrb[3].mxu1 }
  0xfe   : > { %v683_v43 = vadd.f32 %v911_v37, %v1176_v35  ;;  %v691_v44 = vadd.f32 %v935_v38, %v1176_v35  ;;  %v914_v45 = vadd.f32 %v913_v41, %v912_v39  ;;  %v938_v46 = vadd.f32 %v937_v42, %v936_v40 }
 0x100   : > { %v699_v47 = vmax.f32 %v683_v43, 0.0  ;;  %v707_v48 = vmax.f32 %v691_v44, 0.0  ;;  %v684_v49 = vadd.f32 %v914_v45, %v1176_v35  ;;  %v692_v50 = vadd.f32 %v938_v46, %v1176_v35 }
 0x102   : > { %715 = vst [vmem:[%s1185_s8] sm:$0xff] %v699_v47  ;;  %723 = vst [vmem:[%s1185_s8 + $0x40] sm:$0xff] %v707_v48  ;;  %v700_v51 = vmax.f32 %v684_v49, 0.0  ;;  %v708_v52 = vmax.f32 %v692_v50, 0.0  ;;  %v915_v53 = vpop.f32.mrb[4].mxu0  ;;  %v939_v54 = vpop.f32.mrb[4].mxu1 }
 0x103   : > { %v916_v55 = vpop.f32.mrb[5].mxu0  ;;  %v940_v56 = vpop.f32.mrb[5].mxu1 }
 0x104   : > { %716 = vst [vmem:[%s1185_s8 + $0x8] sm:$0xff] %v700_v51  ;;  %724 = vst [vmem:[%s1185_s8 + $0x48] sm:$0xff] %v708_v52  ;;  %v917_v57 = vadd.f32 %v916_v55, %v915_v53  ;;  %v941_v58 = vadd.f32 %v940_v56, %v939_v54  ;;  %v918_v59 = vpop.f32.mrb[6].mxu0  ;;  %v942_v60 = vpop.f32.mrb[6].mxu1 }
 0x105   : > { %v919_v61 = vpop.f32.mrb[7].mxu0  ;;  %v943_v62 = vpop.f32.mrb[7].mxu1 }
 0x106   : > { %v685_v63 = vadd.f32 %v917_v57, %v1176_v35  ;;  %v693_v0 = vadd.f32 %v941_v58, %v1176_v35  ;;  %v920_v1 = vadd.f32 %v919_v61, %v918_v59  ;;  %v944_v2 = vadd.f32 %v943_v62, %v942_v60 }
 0x108   : > { %v701_v3 = vmax.f32 %v685_v63, 0.0  ;;  %v709_v4 = vmax.f32 %v693_v0, 0.0  ;;  %v686_v5 = vadd.f32 %v920_v1, %v1176_v35  ;;  %v694_v6 = vadd.f32 %v944_v2, %v1176_v35 }
 0x10a   : > { %717 = vst [vmem:[%s1185_s8 + $0x10] sm:$0xff] %v701_v3  ;;  %725 = vst [vmem:[%s1185_s8 + $0x50] sm:$0xff] %v709_v4  ;;  %v702_v7 = vmax.f32 %v686_v5, 0.0  ;;  %v710_v8 = vmax.f32 %v694_v6, 0.0  ;;  %v921_v9 = vpop.f32.mrb[8].mxu0  ;;  %v945_v10 = vpop.f32.mrb[8].mxu1 }
 0x10b   : > { %v922_v11 = vpop.f32.mrb[9].mxu0  ;;  %v946_v12 = vpop.f32.mrb[9].mxu1 }
 0x10c   : > { %718 = vst [vmem:[%s1185_s8 + $0x18] sm:$0xff] %v702_v7  ;;  %726 = vst [vmem:[%s1185_s8 + $0x58] sm:$0xff] %v710_v8  ;;  %v923_v13 = vadd.f32 %v922_v11, %v921_v9  ;;  %v947_v14 = vadd.f32 %v946_v12, %v945_v10  ;;  %v924_v15 = vpop.f32.mrb[10].mxu0  ;;  %v948_v16 = vpop.f32.mrb[10].mxu1 }
 0x10d   : > { %v925_v17 = vpop.f32.mrb[11].mxu0  ;;  %v949_v18 = vpop.f32.mrb[11].mxu1 }
 0x10e   : > { %v687_v19 = vadd.f32 %v923_v13, %v1176_v35  ;;  %v695_v20 = vadd.f32 %v947_v14, %v1176_v35  ;;  %v926_v21 = vadd.f32 %v925_v17, %v924_v15  ;;  %v950_v22 = vadd.f32 %v949_v18, %v948_v16 }
 0x110   : > { %v703_v23 = vmax.f32 %v687_v19, 0.0  ;;  %v711_v24 = vmax.f32 %v695_v20, 0.0  ;;  %v688_v25 = vadd.f32 %v926_v21, %v1176_v35  ;;  %v696_v26 = vadd.f32 %v950_v22, %v1176_v35 }
 0x112   : > { %719 = vst [vmem:[%s1185_s8 + $0x20] sm:$0xff] %v703_v23  ;;  %727 = vst [vmem:[%s1185_s8 + $0x60] sm:$0xff] %v711_v24  ;;  %v704_v27 = vmax.f32 %v688_v25, 0.0  ;;  %v712_v28 = vmax.f32 %v696_v26, 0.0  ;;  %v927_v29 = vpop.f32.mrb[12].mxu0  ;;  %v951_v30 = vpop.f32.mrb[12].mxu1 }
 0x113   : > { %v928_v31 = vpop.f32.mrb[13].mxu0  ;;  %v952_v32 = vpop.f32.mrb[13].mxu1 }
 0x114   : > { %720 = vst [vmem:[%s1185_s8 + $0x28] sm:$0xff] %v704_v27  ;;  %728 = vst [vmem:[%s1185_s8 + $0x68] sm:$0xff] %v712_v28  ;;  %v929_v33 = vadd.f32 %v928_v31, %v927_v29  ;;  %v953_v34 = vadd.f32 %v952_v32, %v951_v30  ;;  %v930_v36 = vpop.f32.mrb[14].mxu0  ;;  %v954_v37 = vpop.f32.mrb[14].mxu1 }
 0x115   : > { %v931_v38 = vpop.f32.mrb[15].mxu0  ;;  %v955_v39 = vpop.f32.mrb[15].mxu1 }
 0x116   : > { %v689_v40 = vadd.f32 %v929_v33, %v1176_v35  ;;  %v697_v41 = vadd.f32 %v953_v34, %v1176_v35  ;;  %v932_v42 = vadd.f32 %v931_v38, %v930_v36  ;;  %v956_v43 = vadd.f32 %v955_v39, %v954_v37 }
 0x118   : > { %v705_v44 = vmax.f32 %v689_v40, 0.0  ;;  %v713_v45 = vmax.f32 %v697_v41, 0.0  ;;  %v690_v46 = vadd.f32 %v932_v42, %v1176_v35  ;;  %v698_v47 = vadd.f32 %v956_v43, %v1176_v35 }
 0x11a   : > { %721 = vst [vmem:[%s1185_s8 + $0x30] sm:$0xff] %v705_v44  ;;  %729 = vst [vmem:[%s1185_s8 + $0x70] sm:$0xff] %v713_v45  ;;  %v706_v48 = vmax.f32 %v690_v46, 0.0  ;;  %v714_v49 = vmax.f32 %v698_v47, 0.0 }
 0x11c   : > { %722 = vst [vmem:[%s1185_s8 + $0x38] sm:$0xff] %v706_v48  ;;  %730 = vst [vmem:[%s1185_s8 + $0x78] sm:$0xff] %v714_v49 }
 0x11d PF: > { %s13_s14 = sadd.s32 1, %s1059_s14   ;;  %s1230_s12 = smov %s1055_s13 }
 0x11e   : > { %p10_p5 = scmp.ge.s32.totalorder %s13_s14, 6   ;;  %s1231_s13 = smov %s1233_s15 }
 0x120   :  { %12 = sbr.rel (!%p10_p5) target bundleno = 2 (0x2), region = 76 }

// kernel: _lambda_.23
= control target key start
LH: loop header
LB: loop body
LE: loop exit
PB: predicated region body
PF: predicated region fallthrough
CT: control target
= control target key end

     0   :  { %s470_s0 = inlined_call_operand.vmem [shape: f32[64,128], index: 0, kind: input, shape index: {}]   ;;  %s471_s1 = inlined_call_operand.vmem [shape: f32[64,128], index: 1, kind: input, shape index: {}]   ;;  %s472_s2 = inlined_call_operand.vmem [shape: f32[64,128], index: 2, kind: input, shape index: {}]   ;;  %s473_s3 = inlined_call_operand.vmem [shape: f32[64,128], index: 3, kind: input, shape index: {}]   ;;  %s474_s4 = inlined_call_operand.vmem [shape: f32[64,128], index: 4, kind: input, shape index: {}]   ;;  %s475_s5 = inlined_call_operand.vmem [shape: f32[64,128], index: 5, kind: input, shape index: {}]   ;;  %s476_s6 = inlined_call_operand.vmem [shape: f32[64,128], index: 6, kind: input, shape index: {}]   ;;  %s477_s7 = inlined_call_operand.vmem [shape: f32[64,128], index: 7, kind: input, shape index: {}]   ;;  %s478_s8 = inlined_call_operand.vmem [shape: f32[64,128], index: 8, kind: input, shape index: {}]   ;;  %s479_s9 = inlined_call_operand.vmem [shape: f32[64,128], index: 9, kind: output, shape index: {}]  }
   0x1   :  { %v32_v0 = vld [vmem:[%s470_s0] sm:$0xff]  ;;  %v33_v6 = vld [vmem:[%s470_s0 + $0x8] sm:$0xff]  ;;  %v34_v15 = vld [vmem:[%s470_s0 + $0x10] sm:$0xff] }
   0x2   :  { %v40_v1 = vld [vmem:[%s471_s1] sm:$0xff]  ;;  %v41_v7 = vld [vmem:[%s471_s1 + $0x8] sm:$0xff]  ;;  %v42_v16 = vld [vmem:[%s471_s1 + $0x10] sm:$0xff] }
   0x3   :  { %v56_v2 = vld [vmem:[%s472_s2] sm:$0xff]  ;;  %v48_v3 = vmax.f32 %v32_v0, %v40_v1  ;;  %v57_v8 = vld [vmem:[%s472_s2 + $0x8] sm:$0xff]  ;;  %v49_v10 = vmax.f32 %v33_v6, %v41_v7  ;;  %v58_v17 = vld [vmem:[%s472_s2 + $0x10] sm:$0xff]  ;;  %v50_v20 = vmax.f32 %v34_v15, %v42_v16 }
   0x4   :  { %v72_v4 = vld [vmem:[%s473_s3] sm:$0xff]  ;;  %v73_v13 = vld [vmem:[%s473_s3 + $0x8] sm:$0xff]  ;;  %v74_v24 = vld [vmem:[%s473_s3 + $0x10] sm:$0xff] }
   0x5   :  { %v64_v5 = vmax.f32 %v48_v3, %v56_v2  ;;  %v88_v9 = vld [vmem:[%s474_s4] sm:$0xff]  ;;  %v65_v14 = vmax.f32 %v49_v10, %v57_v8  ;;  %v89_v19 = vld [vmem:[%s474_s4 + $0x8] sm:$0xff]  ;;  %v66_v26 = vmax.f32 %v50_v20, %v58_v17  ;;  %v35_v27 = vld [vmem:[%s470_s0 + $0x18] sm:$0xff] }
   0x6   :  { %v104_v12 = vld [vmem:[%s475_s5] sm:$0xff]  ;;  %v105_v23 = vld [vmem:[%s475_s5 + $0x8] sm:$0xff]  ;;  %v43_v28 = vld [vmem:[%s471_s1 + $0x18] sm:$0xff] }
   0x7   :  { %v80_v11 = vmax.f32 %v64_v5, %v72_v4  ;;  %v120_v21 = vld [vmem:[%s476_s6] sm:$0xff]  ;;  %v81_v22 = vmax.f32 %v65_v14, %v73_v13  ;;  %v59_v29 = vld [vmem:[%s472_s2 + $0x18] sm:$0xff]  ;;  %v90_v33 = vld [vmem:[%s474_s4 + $0x10] sm:$0xff]  ;;  %v51_v34 = vmax.f32 %v35_v27, %v43_v28  ;;  %v82_v37 = vmax.f32 %v66_v26, %v74_v24 }
   0x8   :  { %v136_v30 = vld [vmem:[%s477_s7] sm:$0xff]  ;;  %v121_v36 = vld [vmem:[%s476_s6 + $0x8] sm:$0xff]  ;;  %v106_v38 = vld [vmem:[%s475_s5 + $0x10] sm:$0xff] }
   0x9   :  { %v96_v18 = vmax.f32 %v80_v11, %v88_v9  ;;  %v152_v31 = vld [vmem:[%s478_s8] sm:$0xff]  ;;  %v97_v32 = vmax.f32 %v81_v22, %v89_v19  ;;  %v75_v39 = vld [vmem:[%s473_s3 + $0x18] sm:$0xff]  ;;  %v67_v41 = vmax.f32 %v51_v34, %v59_v29  ;;  %v137_v46 = vld [vmem:[%s477_s7 + $0x8] sm:$0xff]  ;;  %v98_v48 = vmax.f32 %v82_v37, %v90_v33 }
   0xa   :  { %v36_v42 = vld [vmem:[%s470_s0 + $0x20] sm:$0xff]  ;;  %v153_v47 = vld [vmem:[%s478_s8 + $0x8] sm:$0xff]  ;;  %v91_v49 = vld [vmem:[%s474_s4 + $0x18] sm:$0xff] }
   0xb   :  { %v112_v25 = vmax.f32 %v96_v18, %v104_v12  ;;  %v113_v40 = vmax.f32 %v97_v32, %v105_v23  ;;  %v44_v43 = vld [vmem:[%s471_s1 + $0x20] sm:$0xff]  ;;  %v122_v52 = vld [vmem:[%s476_s6 + $0x10] sm:$0xff]  ;;  %v83_v53 = vmax.f32 %v67_v41, %v75_v39  ;;  %v107_v54 = vld [vmem:[%s475_s5 + $0x18] sm:$0xff]  ;;  %v114_v57 = vmax.f32 %v98_v48, %v106_v38 }
   0xc   :  { %v60_v44 = vld [vmem:[%s472_s2 + $0x20] sm:$0xff]  ;;  %v52_v50 = vmax.f32 %v36_v42, %v44_v43  ;;  %v37_v59 = vld [vmem:[%s470_s0 + $0x28] sm:$0xff]  ;;  %v138_v63 = vld [vmem:[%s477_s7 + $0x10] sm:$0xff] }
   0xd   :  { %v128_v35 = vmax.f32 %v112_v25, %v120_v21  ;;  %v129_v51 = vmax.f32 %v113_v40, %v121_v36  ;;  %v76_v55 = vld [vmem:[%s473_s3 + $0x20] sm:$0xff]  ;;  %v45_v60 = vld [vmem:[%s471_s1 + $0x28] sm:$0xff]  ;;  %v154_v0 = vld [vmem:[%s478_s8 + $0x10] sm:$0xff]  ;;  %v99_v1 = vmax.f32 %v83_v53, %v91_v49  ;;  %v130_v4 = vmax.f32 %v114_v57, %v122_v52 }
   0xe   :  { %v68_v58 = vmax.f32 %v52_v50, %v60_v44  ;;  %v61_v61 = vld [vmem:[%s472_s2 + $0x28] sm:$0xff]  ;;  %v92_v2 = vld [vmem:[%s474_s4 + $0x20] sm:$0xff]  ;;  %v53_v3 = vmax.f32 %v37_v59, %v45_v60  ;;  %v123_v5 = vld [vmem:[%s476_s6 + $0x18] sm:$0xff] }
   0xf   :  { %v144_v45 = vmax.f32 %v128_v35, %v136_v30  ;;  %v145_v62 = vmax.f32 %v129_v51, %v137_v46  ;;  %v108_v7 = vld [vmem:[%s475_s5 + $0x20] sm:$0xff]  ;;  %v77_v8 = vld [vmem:[%s473_s3 + $0x28] sm:$0xff]  ;;  %v115_v10 = vmax.f32 %v99_v1, %v107_v54  ;;  %v38_v12 = vld [vmem:[%s470_s0 + $0x30] sm:$0xff]  ;;  %v146_v15 = vmax.f32 %v130_v4, %v138_v63 }
  0x10   :  { %v84_v6 = vmax.f32 %v68_v58, %v76_v55  ;;  %v69_v11 = vmax.f32 %v53_v3, %v61_v61  ;;  %v46_v13 = vld [vmem:[%s471_s1 + $0x30] sm:$0xff]  ;;  %v139_v16 = vld [vmem:[%s477_s7 + $0x18] sm:$0xff]  ;;  %v93_v19 = vld [vmem:[%s474_s4 + $0x28] sm:$0xff] }
  0x11   :  { %v160_v56 = vmax.f32 %v144_v45, %v152_v31  ;;  %v161_v9 = vmax.f32 %v145_v62, %v153_v47  ;;  %v62_v14 = vld [vmem:[%s472_s2 + $0x30] sm:$0xff]  ;;  %v155_v17 = vld [vmem:[%s478_s8 + $0x18] sm:$0xff]  ;;  %v54_v20 = vmax.f32 %v38_v12, %v46_v13  ;;  %v131_v21 = vmax.f32 %v115_v10, %v123_v5  ;;  %v124_v22 = vld [vmem:[%s476_s6 + $0x20] sm:$0xff] }
  0x12   :  { %v100_v18 = vmax.f32 %v84_v6, %v92_v2  ;;  %v85_v23 = vmax.f32 %v69_v11, %v77_v8  ;;  %v109_v24 = vld [vmem:[%s475_s5 + $0x28] sm:$0xff]  ;;  %v78_v25 = vld [vmem:[%s473_s3 + $0x30] sm:$0xff]  ;;  %v162_v26 = vmax.f32 %v146_v15, %v154_v0  ;;  %v39_v29 = vld [vmem:[%s470_s0 + $0x38] sm:$0xff] }
  0x13   :  { %168 = vst [vmem:[%s479_s9] sm:$0xff] %v160_v56  ;;  %169 = vst [vmem:[%s479_s9 + $0x8] sm:$0xff] %v161_v9  ;;  %v70_v28 = vmax.f32 %v54_v20, %v62_v14  ;;  %v47_v30 = vld [vmem:[%s471_s1 + $0x38] sm:$0xff]  ;;  %v147_v32 = vmax.f32 %v131_v21, %v139_v16  ;;  %v140_v33 = vld [vmem:[%s477_s7 + $0x20] sm:$0xff] }
  0x14   :  { %v116_v27 = vmax.f32 %v100_v18, %v108_v7  ;;  %v63_v31 = vld [vmem:[%s472_s2 + $0x38] sm:$0xff]  ;;  %v101_v34 = vmax.f32 %v85_v23, %v93_v19  ;;  %v94_v35 = vld [vmem:[%s474_s4 + $0x30] sm:$0xff]  ;;  %v55_v36 = vmax.f32 %v39_v29, %v47_v30  ;;  %170 = vst [vmem:[%s479_s9 + $0x10] sm:$0xff] %v162_v26  ;;  %v125_v38 = vld [vmem:[%s476_s6 + $0x28] sm:$0xff] }
  0x15   :  { %v86_v39 = vmax.f32 %v70_v28, %v78_v25  ;;  %v79_v40 = vld [vmem:[%s473_s3 + $0x38] sm:$0xff]  ;;  %v163_v41 = vmax.f32 %v147_v32, %v155_v17  ;;  %v156_v42 = vld [vmem:[%s478_s8 + $0x20] sm:$0xff]  ;;  %v110_v44 = vld [vmem:[%s475_s5 + $0x30] sm:$0xff] }
  0x16   :  { %v132_v37 = vmax.f32 %v116_v27, %v124_v22  ;;  %v117_v43 = vmax.f32 %v101_v34, %v109_v24  ;;  %v71_v45 = vmax.f32 %v55_v36, %v63_v31  ;;  %v141_v47 = vld [vmem:[%s477_s7 + $0x28] sm:$0xff]  ;;  %v95_v49 = vld [vmem:[%s474_s4 + $0x38] sm:$0xff]  ;;  %v126_v51 = vld [vmem:[%s476_s6 + $0x30] sm:$0xff] }
  0x17   :  { %v102_v48 = vmax.f32 %v86_v39, %v94_v35  ;;  %171 = vst [vmem:[%s479_s9 + $0x18] sm:$0xff] %v163_v41  ;;  %v157_v54 = vld [vmem:[%s478_s8 + $0x28] sm:$0xff]  ;;  %v111_v56 = vld [vmem:[%s475_s5 + $0x38] sm:$0xff]  ;;  %v142_v58 = vld [vmem:[%s477_s7 + $0x30] sm:$0xff] }
  0x18   :  { %v148_v46 = vmax.f32 %v132_v37, %v140_v33  ;;  %v133_v50 = vmax.f32 %v117_v43, %v125_v38  ;;  %v87_v52 = vmax.f32 %v71_v45, %v79_v40  ;;  %v127_v61 = vld [vmem:[%s476_s6 + $0x38] sm:$0xff]  ;;  %v158_v63 = vld [vmem:[%s478_s8 + $0x30] sm:$0xff] }
  0x19   :  { %v118_v55 = vmax.f32 %v102_v48, %v110_v44  ;;  %v143_v2 = vld [vmem:[%s477_s7 + $0x38] sm:$0xff] }
  0x1a   :  { %v164_v53 = vmax.f32 %v148_v46, %v156_v42  ;;  %v149_v57 = vmax.f32 %v133_v50, %v141_v47  ;;  %v103_v59 = vmax.f32 %v87_v52, %v95_v49  ;;  %v159_v5 = vld [vmem:[%s478_s8 + $0x38] sm:$0xff] }
  0x1b   :  { %v134_v60 = vmax.f32 %v118_v55, %v126_v51 }
  0x1c   :  { %172 = vst [vmem:[%s479_s9 + $0x20] sm:$0xff] %v164_v53  ;;  %v165_v62 = vmax.f32 %v149_v57, %v157_v54  ;;  %v119_v0 = vmax.f32 %v103_v59, %v111_v56 }
  0x1d   :  { %v150_v1 = vmax.f32 %v134_v60, %v142_v58 }
  0x1e   :  { %173 = vst [vmem:[%s479_s9 + $0x28] sm:$0xff] %v165_v62  ;;  %v135_v3 = vmax.f32 %v119_v0, %v127_v61 }
  0x1f   :  { %v166_v4 = vmax.f32 %v150_v1, %v158_v63 }
  0x20   :  { %v151_v6 = vmax.f32 %v135_v3, %v143_v2 }
  0x21   :  { %174 = vst [vmem:[%s479_s9 + $0x30] sm:$0xff] %v166_v4 }
  0x22   :  { %v167_v7 = vmax.f32 %v151_v6, %v159_v5 }
  0x24   :  { %175 = vst [vmem:[%s479_s9 + $0x38] sm:$0xff] %v167_v7 }

// kernel: _lambda_.24
= control target key start
LH: loop header
LB: loop body
LE: loop exit
PB: predicated region body
PF: predicated region fallthrough
CT: control target
= control target key end

     0   :  { %s1047_s12 = smov 0   ;;  %s1049_s13 = smov 0   ;;  %s1203_s0 = inlined_call_operand.vmem [shape: bf16[128,640], index: 0, kind: input, shape index: {}]   ;;  %s1204_s1 = inlined_call_operand.vmem [shape: bf16[640,128], index: 1, kind: input, shape index: {}]   ;;  %s1205_s2 = inlined_call_operand.vmem [shape: f32[1,128], index: 2, kind: input, shape index: {}]   ;;  %s1206_s3 = inlined_call_operand.vmem [shape: f32[128,128], index: 3, kind: output, shape index: {}]  }
   0x1   :  { %s1051_s14 = smov 0   ;;  %s1053_s15 = smov 0  }
   0x2   :  { %s1055_s16 = smov 0  }
   0x3 LB: > { %s25_s17 = sadd.s32 1, %s1020_s15  ;;  %p48_p1 = scmp.ne.s32.totalorder %s1012_s13, %s1008_s12  ;;  %s1024_s16 = sphi %s1055_s16, %s13_s16   ;;  %s1020_s15 = sphi %s1053_s15, %s1210_s15   ;;  %s1016_s14 = sphi %s1051_s14, %s1209_s14   ;;  %s1012_s13 = sphi %s1049_s13, %s1208_s13   ;;  %s1008_s12 = sphi %s1047_s12, %s1207_s12  }
   0x4   : > { %p26_p0 = scmp.ge.s32.totalorder %s25_s17, 5  ;;  %p49_p2 = scmp.eq.s32.totalorder %s1024_s16, 0 }
   0x5   : > { %s41_s19 = sadd.s32 1, %s1012_s13  ;;  %p835_p5 = scmp.ge.s32.totalorder %s1024_s16, 5 }
   0x6   : > { %s1212_s17 = smov (%p26_p0, %s25_s17), 0  ;;  %p50_p3 = por %p49_p2, %p48_p1 }
   0x7   : > { %s37_s18 = ssub.s32 %s1020_s15, %s1212_s17  ;;  %162 = sbr.rel (%p835_p5) target bundleno = 28 (0x1c), region = 20 }
   0x8   : > { %p39_p4 = scmp.eq.s32.totalorder %s37_s18, 0 }
   0xa   : > { %s1082_s20 = scalar_select %p39_p4, %s1012_s13, %s41_s19  }
   0xe   : > { %165 = sbr.rel (!%p50_p3) target bundleno = 28 (0x1c), region = 24  ;;  %s167_s21 = sand.u32 (%p50_p3), 1, %s1012_s13  }
   0xf   : > { %s837_s22 = sshll.u32 (%p50_p3), %s1020_s15, 2  ;;  %s836_s23 = sshll.u32 (%p50_p3), %s167_s21, 6 }
  0x10   : > { %s1090_s26 = scalar_lea.vmem (%p50_p3), %s1203_s0, %s837_s22  ;;  %s169_s27 = scalar_lea.vmem (%p50_p3), [#allocation3], %s836_s23 }
  0x11   : > { %v190_v0 = vld [vmem:[%s1090_s26] sm:$0xf] (%p50_p3)  ;;  %v192_v1 = vld [vmem:[%s1090_s26 + $0x14] sm:$0xf] (%p50_p3)  ;;  %v194_v2 = vld [vmem:[%s1090_s26 + $0x28] sm:$0xf] (%p50_p3) }
  0x12   : > { %191 = vst [vmem:[%s169_s27] sm:$0xf] (%p50_p3), %v190_v0  ;;  %193 = vst [vmem:[%s169_s27 + $0x4] sm:$0xf] (%p50_p3), %v192_v1  ;;  %v196_v3 = vld [vmem:[%s1090_s26 + $0x3c] sm:$0xf] (%p50_p3) }
  0x13   : > { %v198_v4 = vld [vmem:[%s1090_s26 + $0x50] sm:$0xf] (%p50_p3)  ;;  %195 = vst [vmem:[%s169_s27 + $0x8] sm:$0xf] (%p50_p3), %v194_v2  ;;  %197 = vst [vmem:[%s169_s27 + $0xc] sm:$0xf] (%p50_p3), %v196_v3 }
  0x14   : > { %199 = vst [vmem:[%s169_s27 + $0x10] sm:$0xf] (%p50_p3), %v198_v4  ;;  %v200_v5 = vld [vmem:[%s1090_s26 + $0x64] sm:$0xf] (%p50_p3)  ;;  %v202_v6 = vld [vmem:[%s1090_s26 + $0x78] sm:$0xf] (%p50_p3) }
  0x15   : > { %v204_v7 = vld [vmem:[%s1090_s26 + $0x8c] sm:$0xf]  ;;  %201 = vst [vmem:[%s169_s27 + $0x14] sm:$0xf] %v200_v5  ;;  %203 = vst [vmem:[%s169_s27 + $0x18] sm:$0xf] %v202_v6 }
  0x16   : > { %205 = vst [vmem:[%s169_s27 + $0x1c] sm:$0xf] %v204_v7  ;;  %v206_v8 = vld [vmem:[%s1090_s26 + $0xa0] sm:$0xf]  ;;  %v208_v9 = vld [vmem:[%s1090_s26 + $0xb4] sm:$0xf] }
  0x17   : > { %v210_v10 = vld [vmem:[%s1090_s26 + $0xc8] sm:$0xf]  ;;  %207 = vst [vmem:[%s169_s27 + $0x20] sm:$0xf] %v206_v8  ;;  %209 = vst [vmem:[%s169_s27 + $0x24] sm:$0xf] %v208_v9 }
  0x18   : > { %211 = vst [vmem:[%s169_s27 + $0x28] sm:$0xf] %v210_v10  ;;  %v212_v11 = vld [vmem:[%s1090_s26 + $0xdc] sm:$0xf]  ;;  %v214_v12 = vld [vmem:[%s1090_s26 + $0xf0] sm:$0xf] }
  0x19   : > { %v216_v13 = vld [vmem:[%s1090_s26 + $0x104] sm:$0xf]  ;;  %213 = vst [vmem:[%s169_s27 + $0x2c] sm:$0xf] %v212_v11  ;;  %215 = vst [vmem:[%s169_s27 + $0x30] sm:$0xf] %v214_v12 }
  0x1a   : > { %217 = vst [vmem:[%s169_s27 + $0x34] sm:$0xf] %v216_v13  ;;  %v218_v14 = vld [vmem:[%s1090_s26 + $0x118] sm:$0xf]  ;;  %v220_v15 = vld [vmem:[%s1090_s26 + $0x12c] sm:$0xf] }
  0x1b   : > { %219 = vst [vmem:[%s169_s27 + $0x38] sm:$0xf] %v218_v14  ;;  %221 = vst [vmem:[%s169_s27 + $0x3c] sm:$0xf] %v220_v15 }
  0x1c PF: > { %p838_p6 = scmp.ge.s32.totalorder %s1024_s16, 1  ;;  %p287_p7 = scmp.lt.s32.totalorder %s1024_s16, 6 }
  0x1e   : > { %p288_p8 = pnand %p838_p6, %p287_p7 }
  0x1f   : > { %s294_s28 = sand.u32 (!%p288_p8), 1, %s1008_s12   ;;  %s840_s29 = sshll.u32 (!%p288_p8), %s1016_s14, 4 }
  0x20   : > { %291 = sbr.rel (%p288_p8) target bundleno = 321 (0x141), region = 69  ;;  %s839_s30 = sshll.u32 (!%p288_p8), %s294_s28, 6 }
  0x21   : > { %p333_p9 = scmp.lt.s32.totalorder (!%p288_p8), %s840_s29, 79  ;;  %s1117_s8 = scalar_lea.vmem (!%p288_p8), [#allocation3], %s839_s30 }
  0x22   : > { %p842_p10 = scmp.ne.s32.totalorder (!%p288_p8), %s1016_s14, 0 }
  0x27   : > { %s1214_s29 = smov (!%p333_p9, %s840_s29), 79  ;;  %357 = sbr.rel (%p842_p10) target bundleno = 49 (0x31), region = 77 }
  0x28   : > { %s841_s4 = sshll.u32 %s1214_s29, 2  ;;  %v1026_v16 = vmov (!%p842_p10), 0.0  }
  0x29   : > { %s1115_s7 = scalar_lea.vmem %s1204_s1, %s841_s4  ;;  %358 = vst [vmem:[#allocation2] sm:$0xff] (!%p842_p10), %v1026_v16  ;;  %359 = vst [vmem:[#allocation2 + $0x8] sm:$0xff] (!%p842_p10), %v1026_v16 }
  0x2a   : > { %360 = vst [vmem:[#allocation2 + $0x10] sm:$0xff] (!%p842_p10), %v1026_v16  ;;  %361 = vst [vmem:[#allocation2 + $0x18] sm:$0xff] (!%p842_p10), %v1026_v16 }
  0x2b   : > { %362 = vst [vmem:[#allocation2 + $0x20] sm:$0xff] (!%p842_p10), %v1026_v16  ;;  %363 = vst [vmem:[#allocation2 + $0x28] sm:$0xff] (!%p842_p10), %v1026_v16 }
  0x2c   : > { %364 = vst [vmem:[#allocation2 + $0x30] sm:$0xff] (!%p842_p10), %v1026_v16  ;;  %365 = vst [vmem:[#allocation2 + $0x38] sm:$0xff] (!%p842_p10), %v1026_v16 }
  0x2d   : > { %366 = vst [vmem:[#allocation2 + $0x40] sm:$0xff] (!%p842_p10), %v1026_v16  ;;  %367 = vst [vmem:[#allocation2 + $0x48] sm:$0xff] (!%p842_p10), %v1026_v16 }
  0x2e   : > { %368 = vst [vmem:[#allocation2 + $0x50] sm:$0xff] %v1026_v16  ;;  %369 = vst [vmem:[#allocation2 + $0x58] sm:$0xff] %v1026_v16 }
  0x2f   : > { %370 = vst [vmem:[#allocation2 + $0x60] sm:$0xff] %v1026_v16  ;;  %371 = vst [vmem:[#allocation2 + $0x68] sm:$0xff] %v1026_v16 }
  0x30   : > { %372 = vst [vmem:[#allocation2 + $0x70] sm:$0xff] %v1026_v16  ;;  %373 = vst [vmem:[#allocation2 + $0x78] sm:$0xff] %v1026_v16 }
  0x31 PF: > { %v970_v17 = vld [vmem:[%s1115_s7] sm:$0xff]   ;;  %v971_v18 = vld [vmem:[%s1115_s7 + $0x8] sm:$0xff]   ;;  %v972_v19 = vld [vmem:[%s1115_s7 + $0x10] sm:$0xff]   ;;  %p859_p11 = scmp.ne.s32.totalorder %s1016_s14, 4 }
  0x32   : > { %881 = vmatprep.subr.bf16.mxu0 %v970_v17  ;;  %913 = vmatprep.subr.bf16.mxu1 %v970_v17  ;;  %v973_v20 = vld [vmem:[%s1115_s7 + $0x18] sm:$0xff]   ;;  %v978_v21 = vld [vmem:[%s1117_s8] sm:$0xff]   ;;  %v975_v24 = vld [vmem:[%s1115_s7 + $0x28] sm:$0xff]  }
  0x33   : > { %882 = vmatpush3.bf16.msra.mxu0 %v970_v17  ;;  %921 = vmatpush3.bf16.msra.mxu1 %v970_v17  ;;  %v979_v22 = vld [vmem:[%s1117_s8 + $0x20] sm:$0xff]   ;;  %v976_v25 = vld [vmem:[%s1115_s7 + $0x30] sm:$0xff]   ;;  %v977_v26 = vld [vmem:[%s1115_s7 + $0x38] sm:$0xff]  }
  0x34   : > { %883 = vmatprep.subr.bf16.mxu0 %v971_v18  ;;  %914 = vmatprep.subr.bf16.mxu1 %v971_v18  ;;  %v974_v23 = vld [vmem:[%s1115_s7 + $0x20] sm:$0xff]   ;;  %v980_v27 = vld [vmem:[%s1117_s8 + $0x8] sm:$0xff]   ;;  %v982_v29 = vld [vmem:[%s1117_s8 + $0x10] sm:$0xff]  }
  0x35   : > { %897 = vmatprep.mubr.bf16.mxu0 %v978_v21  ;;  %905 = vmatprep.mubr.bf16.mxu1 %v979_v22  ;;  %v981_v28 = vld [vmem:[%s1117_s8 + $0x28] sm:$0xff]   ;;  %v983_v30 = vld [vmem:[%s1117_s8 + $0x30] sm:$0xff]   ;;  %v984_v31 = vld [vmem:[%s1117_s8 + $0x18] sm:$0xff]  }
  0x36   : > { %v985_v32 = vld [vmem:[%s1117_s8 + $0x38] sm:$0xff]   ;;  %v376_v33 = vld [vmem:[#allocation2 + $0x10] sm:$0xff]  ;;  %v374_v35 = vld [vmem:[#allocation2] sm:$0xff] }
  0x37   : > { %884 = vmatpush3.bf16.msra.mxu0 %v971_v18  ;;  %922 = vmatpush3.bf16.msra.mxu1 %v971_v18  ;;  %v384_v34 = vld [vmem:[#allocation2 + $0x50] sm:$0xff]  ;;  %v382_v36 = vld [vmem:[#allocation2 + $0x40] sm:$0xff]  ;;  %v377_v39 = vld [vmem:[#allocation2 + $0x18] sm:$0xff] }
  0x38   : > { %885 = vmatprep.subr.bf16.mxu0 %v972_v19  ;;  %915 = vmatprep.subr.bf16.mxu1 %v972_v19  ;;  %v385_v40 = vld [vmem:[#allocation2 + $0x58] sm:$0xff]  ;;  %v375_v45 = vld [vmem:[#allocation2 + $0x8] sm:$0xff]  ;;  %v380_v57 = vld [vmem:[#allocation2 + $0x30] sm:$0xff] }
  0x39   : > { %v383_v46 = vld [vmem:[#allocation2 + $0x48] sm:$0xff]  ;;  %v388_v58 = vld [vmem:[#allocation2 + $0x70] sm:$0xff]  ;;  %v378_v59 = vld [vmem:[#allocation2 + $0x20] sm:$0xff] }
  0x3a   : > { %v386_v60 = vld [vmem:[#allocation2 + $0x60] sm:$0xff]  ;;  %v381_v63 = vld [vmem:[#allocation2 + $0x38] sm:$0xff]  ;;  %v379_v5 = vld [vmem:[#allocation2 + $0x28] sm:$0xff] }
  0x3b   : > { %886 = vmatpush3.bf16.msra.mxu0 %v972_v19  ;;  %923 = vmatpush3.bf16.msra.mxu1 %v972_v19  ;;  %v389_v0 = vld [vmem:[#allocation2 + $0x78] sm:$0xff]  ;;  %v387_v6 = vld [vmem:[#allocation2 + $0x68] sm:$0xff]  ;;  %v860_v18 = vld [vmem:[%s1205_s2] ss:$0 sm:$0xff] (!%p859_p11) }
  0x3c   : > { %887 = vmatprep.subr.bf16.mxu0 %v973_v20  ;;  %916 = vmatprep.subr.bf16.mxu1 %v973_v20 }
  0x3f   : > { %888 = vmatpush3.bf16.msra.mxu0 %v973_v20  ;;  %924 = vmatpush3.bf16.msra.mxu1 %v973_v20 }
  0x40   : > { %889 = vmatprep.subr.bf16.mxu0 %v974_v23  ;;  %917 = vmatprep.subr.bf16.mxu1 %v974_v23 }
  0x43   : > { %890 = vmatpush3.bf16.msra.mxu0 %v974_v23  ;;  %925 = vmatpush3.bf16.msra.mxu1 %v974_v23 }
  0x44   : > { %891 = vmatprep.subr.bf16.mxu0 %v975_v24  ;;  %918 = vmatprep.subr.bf16.mxu1 %v975_v24 }
  0x47   : > { %892 = vmatpush3.bf16.msra.mxu0 %v975_v24  ;;  %926 = vmatpush3.bf16.msra.mxu1 %v975_v24 }
  0x48   : > { %893 = vmatprep.subr.bf16.mxu0 %v976_v25  ;;  %919 = vmatprep.subr.bf16.mxu1 %v976_v25 }
  0x4b   : > { %894 = vmatpush3.bf16.msra.mxu0 %v976_v25  ;;  %927 = vmatpush3.bf16.msra.mxu1 %v976_v25 }
  0x4c   : > { %895 = vmatprep.subr.bf16.mxu0 %v977_v26  ;;  %920 = vmatprep.subr.bf16.mxu1 %v977_v26 }
  0x4f   : > { %896 = vmatpush3.bf16.msra.mxu0 %v977_v26  ;;  %928 = vmatpush3.bf16.msra.mxu1 %v977_v26 }
  0x52   : > { %898 = vmatmul.mubr.bf16.vlgmr.msra.gmra.mrb[0].mxu0 %v980_v27  ;;  %906 = vmatmul.mubr.bf16.vlgmr.msra.gmra.mrb[0].mxu1 %v981_v28 }
  0x53   : > { %901 = vmatprep.mubr.bf16.mxu0 %v982_v29  ;;  %909 = vmatprep.mubr.bf16.mxu1 %v983_v30 }
  0x5a   : > { %902 = vmatmul.mubr.bf16.gmra.mrb[4].mxu0 %v984_v31  ;;  %910 = vmatmul.mubr.bf16.gmra.mrb[4].mxu1 %v985_v32 }
 0x125   : > { %v899_v37 = vpop.f32.mrb[0].mxu0  ;;  %v907_v38 = vpop.f32.mrb[0].mxu1 }
 0x126   : > { %v617_v41 = vadd.f32 %v899_v37, %v376_v33  ;;  %v625_v42 = vadd.f32 %v907_v38, %v384_v34  ;;  %v552_v43 = vpop.f32.mrb[1].mxu0  ;;  %v584_v44 = vpop.f32.mrb[1].mxu1 }
 0x127   : > { %v615_v47 = vadd.f32 %v552_v43, %v374_v35  ;;  %v623_v48 = vadd.f32 %v584_v44, %v382_v36  ;;  %v900_v49 = vpop.f32.mrb[2].mxu0  ;;  %v908_v50 = vpop.f32.mrb[2].mxu1 }
 0x128   : > { %633 = vst [vmem:[#allocation2 + $0x10] sm:$0xff] %v617_v41  ;;  %641 = vst [vmem:[#allocation2 + $0x50] sm:$0xff] %v625_v42  ;;  %v618_v51 = vadd.f32 %v900_v49, %v377_v39  ;;  %v626_v52 = vadd.f32 %v908_v50, %v385_v40  ;;  %v555_v53 = vpop.f32.mrb[3].mxu0  ;;  %v587_v54 = vpop.f32.mrb[3].mxu1 }
 0x129   : > { %631 = vst [vmem:[#allocation2] sm:$0xff] %v615_v47  ;;  %639 = vst [vmem:[#allocation2 + $0x40] sm:$0xff] %v623_v48  ;;  %v616_v55 = vadd.f32 %v555_v53, %v375_v45  ;;  %v624_v56 = vadd.f32 %v587_v54, %v383_v46 }
 0x12a   : > { %634 = vst [vmem:[#allocation2 + $0x18] sm:$0xff] %v618_v51  ;;  %642 = vst [vmem:[#allocation2 + $0x58] sm:$0xff] %v626_v52 }
 0x12b   : > { %632 = vst [vmem:[#allocation2 + $0x8] sm:$0xff] %v616_v55  ;;  %640 = vst [vmem:[#allocation2 + $0x48] sm:$0xff] %v624_v56 }
 0x12d   : > { %v903_v61 = vpop.f32.mrb[4].mxu0  ;;  %v911_v62 = vpop.f32.mrb[4].mxu1  ;;  %650 = sbr.rel (%p859_p11) target bundleno = 321 (0x141), region = 81 }
 0x12e   : > { %v621_v1 = vadd.f32 %v903_v61, %v380_v57  ;;  %v629_v2 = vadd.f32 %v911_v62, %v388_v58  ;;  %v568_v3 = vpop.f32.mrb[5].mxu0  ;;  %v600_v4 = vpop.f32.mrb[5].mxu1 }
 0x12f   : > { %v619_v7 = vadd.f32 %v568_v3, %v378_v59  ;;  %v627_v8 = vadd.f32 %v600_v4, %v386_v60  ;;  %v904_v9 = vpop.f32.mrb[6].mxu0  ;;  %v912_v10 = vpop.f32.mrb[6].mxu1  ;;  %v653_v22 = vld [vmem:[#allocation2 + $0x10] sm:$0xff] (!%p859_p11) }
 0x130   : > { %637 = vst [vmem:[#allocation2 + $0x30] sm:$0xff] %v621_v1  ;;  %645 = vst [vmem:[#allocation2 + $0x70] sm:$0xff] %v629_v2  ;;  %v622_v11 = vadd.f32 %v904_v9, %v381_v63  ;;  %v630_v12 = vadd.f32 %v912_v10, %v389_v0  ;;  %v571_v13 = vpop.f32.mrb[7].mxu0  ;;  %v603_v14 = vpop.f32.mrb[7].mxu1  ;;  %v651_v17 = vld [vmem:[#allocation2] sm:$0xff] (!%p859_p11)  ;;  %v676_v25 = vadd.f32 (!%p859_p11), %v860_v18, %v653_v22  ;;  %v661_v37 = vld [vmem:[#allocation2 + $0x50] sm:$0xff] (!%p859_p11) }
 0x131   : > { %635 = vst [vmem:[#allocation2 + $0x20] sm:$0xff] %v619_v7  ;;  %643 = vst [vmem:[#allocation2 + $0x60] sm:$0xff] %v627_v8  ;;  %v620_v15 = vadd.f32 %v571_v13, %v379_v5  ;;  %v628_v16 = vadd.f32 %v603_v14, %v387_v6  ;;  %v674_v20 = vadd.f32 (!%p859_p11), %v860_v18, %v651_v17  ;;  %v654_v23 = vld [vmem:[#allocation2 + $0x18] sm:$0xff] (!%p859_p11)  ;;  %v659_v35 = vld [vmem:[#allocation2 + $0x40] sm:$0xff] (!%p859_p11) }
 0x132   : > { %638 = vst [vmem:[#allocation2 + $0x38] sm:$0xff] %v622_v11  ;;  %646 = vst [vmem:[#allocation2 + $0x78] sm:$0xff] %v630_v12  ;;  %v652_v19 = vld [vmem:[#allocation2 + $0x8] sm:$0xff] (!%p859_p11)  ;;  %v677_v26 = vadd.f32 (!%p859_p11), %v860_v18, %v654_v23  ;;  %v692_v38 = vmax.f32 (!%p859_p11), %v676_v25, 0.0  ;;  %v662_v42 = vld [vmem:[#allocation2 + $0x58] sm:$0xff] (!%p859_p11)  ;;  %v682_v47 = vadd.f32 (!%p859_p11), %v860_v18, %v659_v35  ;;  %v684_v52 = vadd.f32 (!%p859_p11), %v860_v18, %v661_v37 }
 0x133   : > { %636 = vst [vmem:[#allocation2 + $0x28] sm:$0xff] %v620_v15  ;;  %644 = vst [vmem:[#allocation2 + $0x68] sm:$0xff] %v628_v16  ;;  %v675_v21 = vadd.f32 (!%p859_p11), %v860_v18, %v652_v19  ;;  %v690_v31 = vmax.f32 (!%p859_p11), %v674_v20, 0.0  ;;  %v660_v36 = vld [vmem:[#allocation2 + $0x48] sm:$0xff] (!%p859_p11)  ;;  %v685_v53 = vadd.f32 (!%p859_p11), %v860_v18, %v662_v42 }
 0x134   : > { %v693_v39 = vmax.f32 %v677_v26, 0.0  ;;  %v683_v48 = vadd.f32 %v860_v18, %v660_v36  ;;  %708 = vst [vmem:[%s1206_s3 + $0x10] sm:$0xff] %v692_v38  ;;  %v698_v55 = vmax.f32 %v682_v47, 0.0  ;;  %v700_v59 = vmax.f32 %v684_v52, 0.0 }
 0x135   : > { %v691_v32 = vmax.f32 %v675_v21, 0.0  ;;  %706 = vst [vmem:[%s1206_s3] sm:$0xff] %v690_v31  ;;  %v701_v60 = vmax.f32 %v685_v53, 0.0 }
 0x136   : > { %709 = vst [vmem:[%s1206_s3 + $0x18] sm:$0xff] %v693_v39  ;;  %v699_v56 = vmax.f32 %v683_v48, 0.0  ;;  %714 = vst [vmem:[%s1206_s3 + $0x40] sm:$0xff] %v698_v55 }
 0x137   : > { %v657_v29 = vld [vmem:[#allocation2 + $0x30] sm:$0xff]  ;;  %707 = vst [vmem:[%s1206_s3 + $0x8] sm:$0xff] %v691_v32  ;;  %716 = vst [vmem:[%s1206_s3 + $0x50] sm:$0xff] %v700_v59 }
 0x138   : > { %v655_v24 = vld [vmem:[#allocation2 + $0x20] sm:$0xff]  ;;  %v680_v34 = vadd.f32 %v860_v18, %v657_v29  ;;  %v665_v49 = vld [vmem:[#allocation2 + $0x70] sm:$0xff]  ;;  %715 = vst [vmem:[%s1206_s3 + $0x48] sm:$0xff] %v699_v56  ;;  %717 = vst [vmem:[%s1206_s3 + $0x58] sm:$0xff] %v701_v60 }
 0x139   : > { %v678_v27 = vadd.f32 %v860_v18, %v655_v24  ;;  %v658_v30 = vld [vmem:[#allocation2 + $0x38] sm:$0xff]  ;;  %v663_v43 = vld [vmem:[#allocation2 + $0x60] sm:$0xff]  ;;  %v688_v58 = vadd.f32 %v860_v18, %v665_v49 }
 0x13a   : > { %v656_v28 = vld [vmem:[#allocation2 + $0x28] sm:$0xff]  ;;  %v681_v41 = vadd.f32 %v860_v18, %v658_v30  ;;  %v696_v46 = vmax.f32 %v680_v34, 0.0  ;;  %v666_v50 = vld [vmem:[#allocation2 + $0x78] sm:$0xff]  ;;  %v686_v54 = vadd.f32 %v860_v18, %v663_v43 }
 0x13b   : > { %v679_v33 = vadd.f32 %v860_v18, %v656_v28  ;;  %v694_v40 = vmax.f32 %v678_v27, 0.0  ;;  %v664_v44 = vld [vmem:[#allocation2 + $0x68] sm:$0xff]  ;;  %v689_v62 = vadd.f32 %v860_v18, %v666_v50  ;;  %v704_v0 = vmax.f32 %v688_v58, 0.0 }
 0x13c   : > { %v697_v51 = vmax.f32 %v681_v41, 0.0  ;;  %712 = vst [vmem:[%s1206_s3 + $0x30] sm:$0xff] %v696_v46  ;;  %v687_v57 = vadd.f32 %v860_v18, %v664_v44  ;;  %v702_v61 = vmax.f32 %v686_v54, 0.0 }
 0x13d   : > { %v695_v45 = vmax.f32 %v679_v33, 0.0  ;;  %710 = vst [vmem:[%s1206_s3 + $0x20] sm:$0xff] %v694_v40  ;;  %v705_v1 = vmax.f32 %v689_v62, 0.0  ;;  %720 = vst [vmem:[%s1206_s3 + $0x70] sm:$0xff] %v704_v0 }
 0x13e   : > { %713 = vst [vmem:[%s1206_s3 + $0x38] sm:$0xff] %v697_v51  ;;  %v703_v63 = vmax.f32 %v687_v57, 0.0  ;;  %718 = vst [vmem:[%s1206_s3 + $0x60] sm:$0xff] %v702_v61 }
 0x13f   : > { %711 = vst [vmem:[%s1206_s3 + $0x28] sm:$0xff] %v695_v45  ;;  %721 = vst [vmem:[%s1206_s3 + $0x78] sm:$0xff] %v705_v1 }
 0x140   : > { %719 = vst [vmem:[%s1206_s3 + $0x68] sm:$0xff] %v703_v63 }
 0x141 PF: > { %s13_s16 = sadd.s32 1, %s1024_s16   ;;  %s1207_s12 = smov %s1012_s13 }
 0x142   : > { %p10_p12 = scmp.ge.s32.totalorder %s13_s16, 7   ;;  %s1208_s13 = smov %s1082_s20 }
 0x143   : > { %s1209_s14 = smov %s1020_s15  ;;  %s1210_s15 = smov %s1212_s17 }
 0x144   :  { %12 = sbr.rel (!%p10_p12) target bundleno = 3 (0x3), region = 122 }

// kernel: _lambda_.25
= control target key start
LH: loop header
LB: loop body
LE: loop exit
PB: predicated region body
PF: predicated region fallthrough
CT: control target
= control target key end

     0   :  { %s1163_s15 = smov 0   ;;  %s1165_s16 = smov 0   ;;  %s1385_s0 = inlined_call_operand.vmem [shape: bf16[128,640], index: 0, kind: input, shape index: {}]   ;;  %s1386_s1 = inlined_call_operand.vmem [shape: bf16[640,128], index: 1, kind: input, shape index: {}]   ;;  %s1387_s2 = inlined_call_operand.vmem [shape: f32[1,128], index: 2, kind: input, shape index: {}]   ;;  %s1388_s3 = inlined_call_operand.vmem [shape: f32[128,128], index: 3, kind: input, shape index: {}]   ;;  %s1389_s4 = inlined_call_operand.vmem [shape: f32[128,128], index: 4, kind: output, shape index: {}]  }
   0x1   :  { %s1167_s17 = smov 0   ;;  %s1169_s18 = smov 0  }
   0x2   :  { %s1171_s19 = smov 0  }
   0x3 LB: > { %s26_s20 = sadd.s32 1, %s1131_s18  ;;  %p49_p1 = scmp.ne.s32.totalorder %s1123_s16, %s1119_s15  ;;  %s1135_s19 = sphi %s1171_s19, %s14_s19   ;;  %s1131_s18 = sphi %s1169_s18, %s1393_s18   ;;  %s1127_s17 = sphi %s1167_s17, %s1392_s17   ;;  %s1123_s16 = sphi %s1165_s16, %s1391_s16   ;;  %s1119_s15 = sphi %s1163_s15, %s1390_s15  }
   0x4   : > { %p27_p0 = scmp.ge.s32.totalorder %s26_s20, 5  ;;  %p50_p2 = scmp.eq.s32.totalorder %s1135_s19, 0 }
   0x5   : > { %s42_s22 = sadd.s32 1, %s1123_s16  ;;  %p946_p5 = scmp.ge.s32.totalorder %s1135_s19, 5 }
   0x6   : > { %s1395_s20 = smov (%p27_p0, %s26_s20), 0  ;;  %p51_p3 = por %p50_p2, %p49_p1 }
   0x7   : > { %s38_s21 = ssub.s32 %s1131_s18, %s1395_s20  ;;  %203 = sbr.rel (%p946_p5) target bundleno = 28 (0x1c), region = 24 }
   0x8   : > { %p40_p4 = scmp.eq.s32.totalorder %s38_s21, 0 }
   0xa   : > { %s1198_s23 = scalar_select %p40_p4, %s1123_s16, %s42_s22  }
   0xe   : > { %206 = sbr.rel (!%p51_p3) target bundleno = 28 (0x1c), region = 28  ;;  %s208_s24 = sand.u32 (%p51_p3), 1, %s1123_s16  }
   0xf   : > { %s948_s25 = sshll.u32 (%p51_p3), %s1131_s18, 2  ;;  %s947_s26 = sshll.u32 (%p51_p3), %s208_s24, 6 }
  0x10   : > { %s1206_s29 = scalar_lea.vmem (%p51_p3), %s1385_s0, %s948_s25  ;;  %s210_s30 = scalar_lea.vmem (%p51_p3), [#allocation3], %s947_s26 }
  0x11   : > { %v231_v0 = vld [vmem:[%s1206_s29] sm:$0xf] (%p51_p3)  ;;  %v233_v1 = vld [vmem:[%s1206_s29 + $0x14] sm:$0xf] (%p51_p3)  ;;  %v235_v2 = vld [vmem:[%s1206_s29 + $0x28] sm:$0xf] (%p51_p3) }
  0x12   : > { %232 = vst [vmem:[%s210_s30] sm:$0xf] (%p51_p3), %v231_v0  ;;  %234 = vst [vmem:[%s210_s30 + $0x4] sm:$0xf] (%p51_p3), %v233_v1  ;;  %v237_v3 = vld [vmem:[%s1206_s29 + $0x3c] sm:$0xf] (%p51_p3) }
  0x13   : > { %v239_v4 = vld [vmem:[%s1206_s29 + $0x50] sm:$0xf] (%p51_p3)  ;;  %236 = vst [vmem:[%s210_s30 + $0x8] sm:$0xf] (%p51_p3), %v235_v2  ;;  %238 = vst [vmem:[%s210_s30 + $0xc] sm:$0xf] (%p51_p3), %v237_v3 }
  0x14   : > { %240 = vst [vmem:[%s210_s30 + $0x10] sm:$0xf] (%p51_p3), %v239_v4  ;;  %v241_v5 = vld [vmem:[%s1206_s29 + $0x64] sm:$0xf] (%p51_p3)  ;;  %v243_v6 = vld [vmem:[%s1206_s29 + $0x78] sm:$0xf] (%p51_p3) }
  0x15   : > { %v245_v7 = vld [vmem:[%s1206_s29 + $0x8c] sm:$0xf]  ;;  %242 = vst [vmem:[%s210_s30 + $0x14] sm:$0xf] %v241_v5  ;;  %244 = vst [vmem:[%s210_s30 + $0x18] sm:$0xf] %v243_v6 }
  0x16   : > { %246 = vst [vmem:[%s210_s30 + $0x1c] sm:$0xf] %v245_v7  ;;  %v247_v8 = vld [vmem:[%s1206_s29 + $0xa0] sm:$0xf]  ;;  %v249_v9 = vld [vmem:[%s1206_s29 + $0xb4] sm:$0xf] }
  0x17   : > { %v251_v10 = vld [vmem:[%s1206_s29 + $0xc8] sm:$0xf]  ;;  %248 = vst [vmem:[%s210_s30 + $0x20] sm:$0xf] %v247_v8  ;;  %250 = vst [vmem:[%s210_s30 + $0x24] sm:$0xf] %v249_v9 }
  0x18   : > { %252 = vst [vmem:[%s210_s30 + $0x28] sm:$0xf] %v251_v10  ;;  %v253_v11 = vld [vmem:[%s1206_s29 + $0xdc] sm:$0xf]  ;;  %v255_v12 = vld [vmem:[%s1206_s29 + $0xf0] sm:$0xf] }
  0x19   : > { %v257_v13 = vld [vmem:[%s1206_s29 + $0x104] sm:$0xf]  ;;  %254 = vst [vmem:[%s210_s30 + $0x2c] sm:$0xf] %v253_v11  ;;  %256 = vst [vmem:[%s210_s30 + $0x30] sm:$0xf] %v255_v12 }
  0x1a   : > { %258 = vst [vmem:[%s210_s30 + $0x34] sm:$0xf] %v257_v13  ;;  %v259_v14 = vld [vmem:[%s1206_s29 + $0x118] sm:$0xf]  ;;  %v261_v15 = vld [vmem:[%s1206_s29 + $0x12c] sm:$0xf] }
  0x1b   : > { %260 = vst [vmem:[%s210_s30 + $0x38] sm:$0xf] %v259_v14  ;;  %262 = vst [vmem:[%s210_s30 + $0x3c] sm:$0xf] %v261_v15 }
  0x1c PF: > { %p949_p6 = scmp.ge.s32.totalorder %s1135_s19, 1  ;;  %p328_p7 = scmp.lt.s32.totalorder %s1135_s19, 6 }
  0x1e   : > { %p329_p8 = pnand %p949_p6, %p328_p7 }
  0x1f   : > { %s335_s5 = sand.u32 (!%p329_p8), 1, %s1119_s15   ;;  %s951_s6 = sshll.u32 (!%p329_p8), %s1127_s17, 4 }
  0x20   : > { %332 = sbr.rel (%p329_p8) target bundleno = 323 (0x143), region = 73  ;;  %s950_s7 = sshll.u32 (!%p329_p8), %s335_s5, 6 }
  0x21   : > { %p384_p9 = scmp.lt.s32.totalorder (!%p329_p8), %s951_s6, 79  ;;  %s1233_s12 = scalar_lea.vmem (!%p329_p8), [#allocation3], %s950_s7 }
  0x22   : > { %p953_p10 = scmp.ne.s32.totalorder (!%p329_p8), %s1127_s17, 0 }
  0x27   : > { %s1397_s6 = smov (!%p384_p9, %s951_s6), 79  ;;  %417 = sbr.rel (%p953_p10) target bundleno = 49 (0x31), region = 81 }
  0x28   : > { %s952_s8 = sshll.u32 %s1397_s6, 2  ;;  %v1137_v16 = vmov (!%p953_p10), 0.0  }
  0x29   : > { %s1231_s11 = scalar_lea.vmem %s1386_s1, %s952_s8  ;;  %418 = vst [vmem:[#allocation2] sm:$0xff] (!%p953_p10), %v1137_v16  ;;  %419 = vst [vmem:[#allocation2 + $0x8] sm:$0xff] (!%p953_p10), %v1137_v16 }
  0x2a   : > { %420 = vst [vmem:[#allocation2 + $0x10] sm:$0xff] (!%p953_p10), %v1137_v16  ;;  %421 = vst [vmem:[#allocation2 + $0x18] sm:$0xff] (!%p953_p10), %v1137_v16 }
  0x2b   : > { %422 = vst [vmem:[#allocation2 + $0x20] sm:$0xff] (!%p953_p10), %v1137_v16  ;;  %423 = vst [vmem:[#allocation2 + $0x28] sm:$0xff] (!%p953_p10), %v1137_v16 }
  0x2c   : > { %424 = vst [vmem:[#allocation2 + $0x30] sm:$0xff] (!%p953_p10), %v1137_v16  ;;  %425 = vst [vmem:[#allocation2 + $0x38] sm:$0xff] (!%p953_p10), %v1137_v16 }
  0x2d   : > { %426 = vst [vmem:[#allocation2 + $0x40] sm:$0xff] (!%p953_p10), %v1137_v16  ;;  %427 = vst [vmem:[#allocation2 + $0x48] sm:$0xff] (!%p953_p10), %v1137_v16 }
  0x2e   : > { %428 = vst [vmem:[#allocation2 + $0x50] sm:$0xff] %v1137_v16  ;;  %429 = vst [vmem:[#allocation2 + $0x58] sm:$0xff] %v1137_v16 }
  0x2f   : > { %430 = vst [vmem:[#allocation2 + $0x60] sm:$0xff] %v1137_v16  ;;  %431 = vst [vmem:[#allocation2 + $0x68] sm:$0xff] %v1137_v16 }
  0x30   : > { %432 = vst [vmem:[#allocation2 + $0x70] sm:$0xff] %v1137_v16  ;;  %433 = vst [vmem:[#allocation2 + $0x78] sm:$0xff] %v1137_v16 }
  0x31 PF: > { %v1081_v17 = vld [vmem:[%s1231_s11] sm:$0xff]   ;;  %v1082_v18 = vld [vmem:[%s1231_s11 + $0x8] sm:$0xff]   ;;  %v1083_v19 = vld [vmem:[%s1231_s11 + $0x10] sm:$0xff]   ;;  %p970_p11 = scmp.ne.s32.totalorder %s1127_s17, 4 }
  0x32   : > { %992 = vmatprep.subr.bf16.mxu0 %v1081_v17  ;;  %1024 = vmatprep.subr.bf16.mxu1 %v1081_v17  ;;  %v1084_v20 = vld [vmem:[%s1231_s11 + $0x18] sm:$0xff]   ;;  %v1089_v21 = vld [vmem:[%s1233_s12] sm:$0xff]   ;;  %v1086_v24 = vld [vmem:[%s1231_s11 + $0x28] sm:$0xff]  }
  0x33   : > { %993 = vmatpush3.bf16.msra.mxu0 %v1081_v17  ;;  %1032 = vmatpush3.bf16.msra.mxu1 %v1081_v17  ;;  %v1090_v22 = vld [vmem:[%s1233_s12 + $0x20] sm:$0xff]   ;;  %v1087_v25 = vld [vmem:[%s1231_s11 + $0x30] sm:$0xff]   ;;  %v1088_v26 = vld [vmem:[%s1231_s11 + $0x38] sm:$0xff]  }
  0x34   : > { %994 = vmatprep.subr.bf16.mxu0 %v1082_v18  ;;  %1025 = vmatprep.subr.bf16.mxu1 %v1082_v18  ;;  %v1085_v23 = vld [vmem:[%s1231_s11 + $0x20] sm:$0xff]   ;;  %v1091_v27 = vld [vmem:[%s1233_s12 + $0x8] sm:$0xff]   ;;  %v1093_v29 = vld [vmem:[%s1233_s12 + $0x10] sm:$0xff]  }
  0x35   : > { %1008 = vmatprep.mubr.bf16.mxu0 %v1089_v21  ;;  %1016 = vmatprep.mubr.bf16.mxu1 %v1090_v22  ;;  %v1092_v28 = vld [vmem:[%s1233_s12 + $0x28] sm:$0xff]   ;;  %v1094_v30 = vld [vmem:[%s1233_s12 + $0x30] sm:$0xff]   ;;  %v1095_v31 = vld [vmem:[%s1233_s12 + $0x18] sm:$0xff]  }
  0x36   : > { %v1096_v32 = vld [vmem:[%s1233_s12 + $0x38] sm:$0xff]   ;;  %v436_v33 = vld [vmem:[#allocation2 + $0x10] sm:$0xff]  ;;  %v434_v35 = vld [vmem:[#allocation2] sm:$0xff] }
  0x37   : > { %995 = vmatpush3.bf16.msra.mxu0 %v1082_v18  ;;  %1033 = vmatpush3.bf16.msra.mxu1 %v1082_v18  ;;  %v444_v34 = vld [vmem:[#allocation2 + $0x50] sm:$0xff]  ;;  %v442_v36 = vld [vmem:[#allocation2 + $0x40] sm:$0xff]  ;;  %v437_v39 = vld [vmem:[#allocation2 + $0x18] sm:$0xff] }
  0x38   : > { %996 = vmatprep.subr.bf16.mxu0 %v1083_v19  ;;  %1026 = vmatprep.subr.bf16.mxu1 %v1083_v19  ;;  %v445_v40 = vld [vmem:[#allocation2 + $0x58] sm:$0xff]  ;;  %v435_v45 = vld [vmem:[#allocation2 + $0x8] sm:$0xff]  ;;  %v440_v57 = vld [vmem:[#allocation2 + $0x30] sm:$0xff] }
  0x39   : > { %v443_v46 = vld [vmem:[#allocation2 + $0x48] sm:$0xff]  ;;  %v448_v58 = vld [vmem:[#allocation2 + $0x70] sm:$0xff]  ;;  %v438_v59 = vld [vmem:[#allocation2 + $0x20] sm:$0xff] }
  0x3a   : > { %v446_v60 = vld [vmem:[#allocation2 + $0x60] sm:$0xff]  ;;  %v441_v63 = vld [vmem:[#allocation2 + $0x38] sm:$0xff]  ;;  %v439_v5 = vld [vmem:[#allocation2 + $0x28] sm:$0xff] }
  0x3b   : > { %997 = vmatpush3.bf16.msra.mxu0 %v1083_v19  ;;  %1034 = vmatpush3.bf16.msra.mxu1 %v1083_v19  ;;  %v449_v0 = vld [vmem:[#allocation2 + $0x78] sm:$0xff]  ;;  %v447_v6 = vld [vmem:[#allocation2 + $0x68] sm:$0xff]  ;;  %v1256_v18 = vld [vmem:[%s1387_s2] ss:$0 sm:$0xff] (!%p970_p11) }
  0x3c   : > { %998 = vmatprep.subr.bf16.mxu0 %v1084_v20  ;;  %1027 = vmatprep.subr.bf16.mxu1 %v1084_v20  ;;  %v750_v19 = vld [vmem:[%s1388_s3] sm:$0xff] (!%p970_p11)  ;;  %v751_v22 = vld [vmem:[%s1388_s3 + $0x8] sm:$0xff] (!%p970_p11) }
  0x3f   : > { %999 = vmatpush3.bf16.msra.mxu0 %v1084_v20  ;;  %1035 = vmatpush3.bf16.msra.mxu1 %v1084_v20 }
  0x40   : > { %1000 = vmatprep.subr.bf16.mxu0 %v1085_v23  ;;  %1028 = vmatprep.subr.bf16.mxu1 %v1085_v23 }
  0x43   : > { %1001 = vmatpush3.bf16.msra.mxu0 %v1085_v23  ;;  %1036 = vmatpush3.bf16.msra.mxu1 %v1085_v23 }
  0x44   : > { %1002 = vmatprep.subr.bf16.mxu0 %v1086_v24  ;;  %1029 = vmatprep.subr.bf16.mxu1 %v1086_v24 }
  0x47   : > { %1003 = vmatpush3.bf16.msra.mxu0 %v1086_v24  ;;  %1037 = vmatpush3.bf16.msra.mxu1 %v1086_v24 }
  0x48   : > { %1004 = vmatprep.subr.bf16.mxu0 %v1087_v25  ;;  %1030 = vmatprep.subr.bf16.mxu1 %v1087_v25 }
  0x4b   : > { %1005 = vmatpush3.bf16.msra.mxu0 %v1087_v25  ;;  %1038 = vmatpush3.bf16.msra.mxu1 %v1087_v25 }
  0x4c   : > { %1006 = vmatprep.subr.bf16.mxu0 %v1088_v26  ;;  %1031 = vmatprep.subr.bf16.mxu1 %v1088_v26 }
  0x4f   : > { %1007 = vmatpush3.bf16.msra.mxu0 %v1088_v26  ;;  %1039 = vmatpush3.bf16.msra.mxu1 %v1088_v26  ;;  %v752_v26 = vld [vmem:[%s1388_s3 + $0x10] sm:$0xff] (!%p970_p11) }
  0x52   : > { %1009 = vmatmul.mubr.bf16.vlgmr.msra.gmra.mrb[0].mxu0 %v1091_v27  ;;  %1017 = vmatmul.mubr.bf16.vlgmr.msra.gmra.mrb[0].mxu1 %v1092_v28  ;;  %v753_v28 = vld [vmem:[%s1388_s3 + $0x18] sm:$0xff] (!%p970_p11) }
  0x53   : > { %1012 = vmatprep.mubr.bf16.mxu0 %v1093_v29  ;;  %1020 = vmatprep.mubr.bf16.mxu1 %v1094_v30 }
  0x5a   : > { %1013 = vmatmul.mubr.bf16.gmra.mrb[4].mxu0 %v1095_v31  ;;  %1021 = vmatmul.mubr.bf16.gmra.mrb[4].mxu1 %v1096_v32  ;;  %v754_v32 = vld [vmem:[%s1388_s3 + $0x20] sm:$0xff] (!%p970_p11) }
 0x125   : > { %v1010_v37 = vpop.f32.mrb[0].mxu0  ;;  %v1018_v38 = vpop.f32.mrb[0].mxu1 }
 0x126   : > { %v677_v41 = vadd.f32 %v1010_v37, %v436_v33  ;;  %v685_v42 = vadd.f32 %v1018_v38, %v444_v34  ;;  %v612_v43 = vpop.f32.mrb[1].mxu0  ;;  %v644_v44 = vpop.f32.mrb[1].mxu1  ;;  %v755_v38 = vld [vmem:[%s1388_s3 + $0x28] sm:$0xff] (!%p970_p11) }
 0x127   : > { %v675_v47 = vadd.f32 %v612_v43, %v434_v35  ;;  %v683_v48 = vadd.f32 %v644_v44, %v442_v36  ;;  %v1011_v49 = vpop.f32.mrb[2].mxu0  ;;  %v1019_v50 = vpop.f32.mrb[2].mxu1 }
 0x128   : > { %693 = vst [vmem:[#allocation2 + $0x10] sm:$0xff] %v677_v41  ;;  %701 = vst [vmem:[#allocation2 + $0x50] sm:$0xff] %v685_v42  ;;  %v678_v51 = vadd.f32 %v1011_v49, %v437_v39  ;;  %v686_v52 = vadd.f32 %v1019_v50, %v445_v40  ;;  %v615_v53 = vpop.f32.mrb[3].mxu0  ;;  %v647_v54 = vpop.f32.mrb[3].mxu1  ;;  %v756_v40 = vld [vmem:[%s1388_s3 + $0x30] sm:$0xff] (!%p970_p11) }
 0x129   : > { %691 = vst [vmem:[#allocation2] sm:$0xff] %v675_v47  ;;  %699 = vst [vmem:[#allocation2 + $0x40] sm:$0xff] %v683_v48  ;;  %v676_v55 = vadd.f32 %v615_v53, %v435_v45  ;;  %v684_v56 = vadd.f32 %v647_v54, %v443_v46  ;;  %v757_v45 = vld [vmem:[%s1388_s3 + $0x38] sm:$0xff] (!%p970_p11)  ;;  %v759_v53 = vld [vmem:[%s1388_s3 + $0x48] sm:$0xff] (!%p970_p11) }
 0x12a   : > { %694 = vst [vmem:[#allocation2 + $0x18] sm:$0xff] %v678_v51  ;;  %702 = vst [vmem:[#allocation2 + $0x58] sm:$0xff] %v686_v52  ;;  %v758_v51 = vld [vmem:[%s1388_s3 + $0x40] sm:$0xff] (!%p970_p11) }
 0x12b   : > { %692 = vst [vmem:[#allocation2 + $0x8] sm:$0xff] %v676_v55  ;;  %700 = vst [vmem:[#allocation2 + $0x48] sm:$0xff] %v684_v56 }
 0x12d   : > { %v1014_v61 = vpop.f32.mrb[4].mxu0  ;;  %v1022_v62 = vpop.f32.mrb[4].mxu1  ;;  %710 = sbr.rel (%p970_p11) target bundleno = 323 (0x143), region = 85 }
 0x12e   : > { %v681_v1 = vadd.f32 %v1014_v61, %v440_v57  ;;  %v689_v2 = vadd.f32 %v1022_v62, %v448_v58  ;;  %v628_v3 = vpop.f32.mrb[5].mxu0  ;;  %v660_v4 = vpop.f32.mrb[5].mxu1 }
 0x12f   : > { %v679_v7 = vadd.f32 %v628_v3, %v438_v59  ;;  %v687_v8 = vadd.f32 %v660_v4, %v446_v60  ;;  %v1015_v9 = vpop.f32.mrb[6].mxu0  ;;  %v1023_v10 = vpop.f32.mrb[6].mxu1  ;;  %v713_v23 = vld [vmem:[#allocation2 + $0x10] sm:$0xff] (!%p970_p11)  ;;  %v762_v3 = vld [vmem:[%s1388_s3 + $0x60] sm:$0xff] (!%p970_p11) }
 0x130   : > { %697 = vst [vmem:[#allocation2 + $0x30] sm:$0xff] %v681_v1  ;;  %705 = vst [vmem:[#allocation2 + $0x70] sm:$0xff] %v689_v2  ;;  %v682_v11 = vadd.f32 %v1015_v9, %v441_v63  ;;  %v690_v12 = vadd.f32 %v1023_v10, %v449_v0  ;;  %v631_v13 = vpop.f32.mrb[7].mxu0  ;;  %v663_v14 = vpop.f32.mrb[7].mxu1  ;;  %v711_v17 = vld [vmem:[#allocation2] sm:$0xff] (!%p970_p11)  ;;  %v736_v25 = vadd.f32 (!%p970_p11), %v1256_v18, %v713_v23  ;;  %v721_v58 = vld [vmem:[#allocation2 + $0x50] sm:$0xff] (!%p970_p11) }
 0x131   : > { %695 = vst [vmem:[#allocation2 + $0x20] sm:$0xff] %v679_v7  ;;  %703 = vst [vmem:[#allocation2 + $0x60] sm:$0xff] %v687_v8  ;;  %v680_v15 = vadd.f32 %v631_v13, %v439_v5  ;;  %v688_v16 = vadd.f32 %v663_v14, %v447_v6  ;;  %v734_v20 = vadd.f32 (!%p970_p11), %v1256_v18, %v711_v17  ;;  %v714_v27 = vld [vmem:[#allocation2 + $0x18] sm:$0xff] (!%p970_p11)  ;;  %v719_v46 = vld [vmem:[#allocation2 + $0x40] sm:$0xff] (!%p970_p11) }
 0x132   : > { %698 = vst [vmem:[#allocation2 + $0x38] sm:$0xff] %v682_v11  ;;  %706 = vst [vmem:[#allocation2 + $0x78] sm:$0xff] %v690_v12  ;;  %v712_v21 = vld [vmem:[#allocation2 + $0x8] sm:$0xff] (!%p970_p11)  ;;  %v737_v30 = vadd.f32 (!%p970_p11), %v1256_v18, %v714_v27  ;;  %v768_v35 = vadd.f32 (!%p970_p11), %v752_v26, %v736_v25  ;;  %v742_v57 = vadd.f32 (!%p970_p11), %v1256_v18, %v719_v46  ;;  %v760_v59 = vld [vmem:[%s1388_s3 + $0x50] sm:$0xff] (!%p970_p11) }
 0x133   : > { %696 = vst [vmem:[#allocation2 + $0x28] sm:$0xff] %v680_v15  ;;  %704 = vst [vmem:[#allocation2 + $0x68] sm:$0xff] %v688_v16  ;;  %v735_v24 = vadd.f32 (!%p970_p11), %v1256_v18, %v712_v21  ;;  %v766_v29 = vadd.f32 (!%p970_p11), %v750_v19, %v734_v20  ;;  %v720_v52 = vld [vmem:[#allocation2 + $0x48] sm:$0xff] (!%p970_p11)  ;;  %v722_v60 = vld [vmem:[#allocation2 + $0x58] sm:$0xff] (!%p970_p11)  ;;  %v744_v0 = vadd.f32 (!%p970_p11), %v1256_v18, %v721_v58 }
 0x134   : > { %v769_v42 = vadd.f32 %v753_v28, %v737_v30  ;;  %v784_v48 = vmax.f32 %v768_v35, 0.0  ;;  %v743_v63 = vadd.f32 %v1256_v18, %v720_v52  ;;  %v761_v1 = vld [vmem:[%s1388_s3 + $0x58] sm:$0xff]  ;;  %v774_v6 = vadd.f32 %v758_v51, %v742_v57  ;;  %v763_v9 = vld [vmem:[%s1388_s3 + $0x68] sm:$0xff]  ;;  %v764_v15 = vld [vmem:[%s1388_s3 + $0x70] sm:$0xff] }
 0x135   : > { %v767_v34 = vadd.f32 %v751_v22, %v735_v24  ;;  %v782_v41 = vmax.f32 %v766_v29, 0.0  ;;  %v745_v7 = vadd.f32 %v1256_v18, %v722_v60  ;;  %v776_v12 = vadd.f32 %v760_v59, %v744_v0  ;;  %v765_v26 = vld [vmem:[%s1388_s3 + $0x78] sm:$0xff] }
 0x136   : > { %v785_v54 = vmax.f32 %v769_v42, 0.0  ;;  %800 = vst [vmem:[%s1389_s4 + $0x10] sm:$0xff] %v784_v48  ;;  %v775_v11 = vadd.f32 %v759_v53, %v743_v63  ;;  %v790_v19 = vmax.f32 %v774_v6, 0.0 }
 0x137   : > { %v717_v39 = vld [vmem:[#allocation2 + $0x30] sm:$0xff]  ;;  %v783_v47 = vmax.f32 %v767_v34, 0.0  ;;  %798 = vst [vmem:[%s1389_s4] sm:$0xff] %v782_v41  ;;  %v777_v20 = vadd.f32 %v761_v1, %v745_v7  ;;  %v792_v23 = vmax.f32 %v776_v12, 0.0 }
 0x138   : > { %v715_v31 = vld [vmem:[#allocation2 + $0x20] sm:$0xff]  ;;  %v740_v43 = vadd.f32 %v1256_v18, %v717_v39  ;;  %801 = vst [vmem:[%s1389_s4 + $0x18] sm:$0xff] %v785_v54  ;;  %v725_v10 = vld [vmem:[#allocation2 + $0x70] sm:$0xff]  ;;  %v791_v22 = vmax.f32 %v775_v11, 0.0  ;;  %806 = vst [vmem:[%s1389_s4 + $0x40] sm:$0xff] %v790_v19 }
 0x139   : > { %v738_v36 = vadd.f32 %v1256_v18, %v715_v31  ;;  %v718_v44 = vld [vmem:[#allocation2 + $0x38] sm:$0xff]  ;;  %799 = vst [vmem:[%s1389_s4 + $0x8] sm:$0xff] %v783_v47  ;;  %v723_v2 = vld [vmem:[#allocation2 + $0x60] sm:$0xff]  ;;  %v748_v21 = vadd.f32 %v1256_v18, %v725_v10  ;;  %v793_v27 = vmax.f32 %v777_v20, 0.0  ;;  %808 = vst [vmem:[%s1389_s4 + $0x50] sm:$0xff] %v792_v23 }
 0x13a   : > { %v716_v33 = vld [vmem:[#allocation2 + $0x28] sm:$0xff]  ;;  %v772_v55 = vadd.f32 %v756_v40, %v740_v43  ;;  %v741_v56 = vadd.f32 %v1256_v18, %v718_v44  ;;  %v746_v13 = vadd.f32 %v1256_v18, %v723_v2  ;;  %v726_v16 = vld [vmem:[#allocation2 + $0x78] sm:$0xff]  ;;  %807 = vst [vmem:[%s1389_s4 + $0x48] sm:$0xff] %v791_v22 }
 0x13b   : > { %v739_v37 = vadd.f32 %v1256_v18, %v716_v33  ;;  %v770_v49 = vadd.f32 %v754_v32, %v738_v36  ;;  %v724_v8 = vld [vmem:[#allocation2 + $0x68] sm:$0xff]  ;;  %v780_v28 = vadd.f32 %v764_v15, %v748_v21  ;;  %v749_v29 = vadd.f32 %v1256_v18, %v726_v16  ;;  %809 = vst [vmem:[%s1389_s4 + $0x58] sm:$0xff] %v793_v27 }
 0x13c   : > { %v788_v4 = vmax.f32 %v772_v55, 0.0  ;;  %v773_v5 = vadd.f32 %v757_v45, %v741_v56  ;;  %v747_v14 = vadd.f32 %v1256_v18, %v724_v8  ;;  %v778_v24 = vadd.f32 %v762_v3, %v746_v13 }
 0x13d   : > { %v771_v50 = vadd.f32 %v755_v38, %v739_v37  ;;  %v786_v61 = vmax.f32 %v770_v49, 0.0  ;;  %v796_v32 = vmax.f32 %v780_v28, 0.0  ;;  %v781_v33 = vadd.f32 %v765_v26, %v749_v29 }
 0x13e   : > { %804 = vst [vmem:[%s1389_s4 + $0x30] sm:$0xff] %v788_v4  ;;  %v789_v17 = vmax.f32 %v773_v5, 0.0  ;;  %v779_v25 = vadd.f32 %v763_v9, %v747_v14  ;;  %v794_v30 = vmax.f32 %v778_v24, 0.0 }
 0x13f   : > { %v787_v62 = vmax.f32 %v771_v50, 0.0  ;;  %802 = vst [vmem:[%s1389_s4 + $0x20] sm:$0xff] %v786_v61  ;;  %812 = vst [vmem:[%s1389_s4 + $0x70] sm:$0xff] %v796_v32  ;;  %v797_v18 = vmax.f32 %v781_v33, 0.0 }
 0x140   : > { %805 = vst [vmem:[%s1389_s4 + $0x38] sm:$0xff] %v789_v17  ;;  %v795_v31 = vmax.f32 %v779_v25, 0.0  ;;  %810 = vst [vmem:[%s1389_s4 + $0x60] sm:$0xff] %v794_v30 }
 0x141   : > { %803 = vst [vmem:[%s1389_s4 + $0x28] sm:$0xff] %v787_v62  ;;  %813 = vst [vmem:[%s1389_s4 + $0x78] sm:$0xff] %v797_v18 }
 0x142   : > { %811 = vst [vmem:[%s1389_s4 + $0x68] sm:$0xff] %v795_v31 }
 0x143 PF: > { %s14_s19 = sadd.s32 1, %s1135_s19   ;;  %s1390_s15 = smov %s1123_s16 }
 0x144   : > { %p11_p12 = scmp.ge.s32.totalorder %s14_s19, 7   ;;  %s1391_s16 = smov %s1198_s23 }
 0x145   : > { %s1392_s17 = smov %s1131_s18  ;;  %s1393_s18 = smov %s1395_s20 }
 0x146   :  { %13 = sbr.rel (!%p11_p12) target bundleno = 3 (0x3), region = 129 }

// kernel: _lambda_.29
= control target key start
LH: loop header
LB: loop body
LE: loop exit
PB: predicated region body
PF: predicated region fallthrough
CT: control target
= control target key end

     0   :  { %s761_s12 = smov 0   ;;  %s763_s13 = smov 0   ;;  %s860_s0 = inlined_call_operand.vmem [shape: bf16[32,640], index: 0, kind: input, shape index: {}]   ;;  %s861_s1 = inlined_call_operand.vmem [shape: bf16[640,128], index: 1, kind: input, shape index: {}]   ;;  %s862_s2 = inlined_call_operand.vmem [shape: f32[1,128], index: 2, kind: input, shape index: {}]   ;;  %s863_s3 = inlined_call_operand.vmem [shape: f32[32,128], index: 3, kind: output, shape index: {}]  }
   0x1   :  { %s765_s14 = smov 0   ;;  %s767_s15 = smov 0  }
   0x2   :  { %s769_s16 = smov 0  }
   0x3 LB: > { %s25_s17 = sadd.s32 1, %s734_s15  ;;  %p48_p1 = scmp.ne.s32.totalorder %s726_s13, %s722_s12  ;;  %s738_s16 = sphi %s769_s16, %s13_s16   ;;  %s734_s15 = sphi %s767_s15, %s867_s15   ;;  %s730_s14 = sphi %s765_s14, %s866_s14   ;;  %s726_s13 = sphi %s763_s13, %s865_s13   ;;  %s722_s12 = sphi %s761_s12, %s864_s12  }
   0x4   : > { %p26_p0 = scmp.ge.s32.totalorder %s25_s17, 5  ;;  %p49_p2 = scmp.eq.s32.totalorder %s738_s16, 0 }
   0x5   : > { %s41_s19 = sadd.s32 1, %s726_s13  ;;  %p595_p5 = scmp.ge.s32.totalorder %s738_s16, 5 }
   0x6   : > { %s869_s17 = smov (%p26_p0, %s25_s17), 0  ;;  %p50_p3 = por %p49_p2, %p48_p1 }
   0x7   : > { %s37_s18 = ssub.s32 %s734_s15, %s869_s17  ;;  %162 = sbr.rel (%p595_p5) target bundleno = 21 (0x15), region = 20 }
   0x8   : > { %p39_p4 = scmp.eq.s32.totalorder %s37_s18, 0 }
   0xa   : > { %s796_s20 = scalar_select %p39_p4, %s726_s13, %s41_s19  }
   0xe   : > { %165 = sbr.rel (!%p50_p3) target bundleno = 21 (0x15), region = 24  ;;  %s167_s21 = sand.u32 (%p50_p3), 1, %s726_s13  }
   0xf   : > { %s597_s22 = sshll.u32 (%p50_p3), %s734_s15, 2  ;;  %s596_s23 = sshll.u32 (%p50_p3), %s167_s21, 4 }
  0x10   : > { %s174_s26 = scalar_lea.vmem (%p50_p3), %s860_s0, %s597_s22  ;;  %s169_s27 = scalar_lea.vmem (%p50_p3), [#allocation3], %s596_s23 }
  0x11   : > { %v190_v0 = vld [vmem:[%s174_s26] sm:$0xf] (%p50_p3)  ;;  %v192_v1 = vld [vmem:[%s174_s26 + $0x14] sm:$0xf] (%p50_p3)  ;;  %v194_v2 = vld [vmem:[%s174_s26 + $0x28] sm:$0xf] (%p50_p3) }
  0x12   : > { %191 = vst [vmem:[%s169_s27] sm:$0xf] (%p50_p3), %v190_v0  ;;  %193 = vst [vmem:[%s169_s27 + $0x4] sm:$0xf] (%p50_p3), %v192_v1  ;;  %v196_v3 = vld [vmem:[%s174_s26 + $0x3c] sm:$0xf] (%p50_p3) }
  0x13   : > { %195 = vst [vmem:[%s169_s27 + $0x8] sm:$0xf] (%p50_p3), %v194_v2  ;;  %197 = vst [vmem:[%s169_s27 + $0xc] sm:$0xf] (%p50_p3), %v196_v3 }
  0x15 PF: > { %p598_p6 = scmp.ge.s32.totalorder %s738_s16, 1  ;;  %p239_p7 = scmp.lt.s32.totalorder %s738_s16, 6 }
  0x17   : > { %p240_p8 = pnand %p598_p6, %p239_p7 }
  0x18   : > { %s246_s28 = sand.u32 (!%p240_p8), 1, %s722_s12   ;;  %s600_s29 = sshll.u32 (!%p240_p8), %s730_s14, 4 }
  0x19   : > { %243 = sbr.rel (%p240_p8) target bundleno = 302 (0x12e), region = 69  ;;  %s808_s30 = sshll.u32 (!%p240_p8), %s246_s28, 4 }
  0x1a   : > { %p285_p9 = scmp.lt.s32.totalorder (!%p240_p8), %s600_s29, 79  ;;  %s248_s8 = scalar_lea.vmem (!%p240_p8), [#allocation3], %s808_s30 }
  0x1b   : > { %p602_p10 = scmp.ne.s32.totalorder (!%p240_p8), %s730_s14, 0 }
  0x20   : > { %s871_s29 = smov (!%p285_p9, %s600_s29), 79  ;;  %309 = sbr.rel (%p602_p10) target bundleno = 39 (0x27), region = 77 }
  0x21   : > { %s601_s4 = sshll.u32 %s871_s29, 2  ;;  %v740_v4 = vmov (!%p602_p10), 0.0  }
  0x22   : > { %s813_s7 = scalar_lea.vmem %s861_s1, %s601_s4  ;;  %310 = vst [vmem:[#allocation2] sm:$0xff] (!%p602_p10), %v740_v4  ;;  %311 = vst [vmem:[#allocation2 + $0x8] sm:$0xff] (!%p602_p10), %v740_v4 }
  0x23   : > { %312 = vst [vmem:[#allocation2 + $0x10] sm:$0xff] (!%p602_p10), %v740_v4  ;;  %313 = vst [vmem:[#allocation2 + $0x18] sm:$0xff] (!%p602_p10), %v740_v4 }
  0x27 PF: > { %v690_v5 = vld [vmem:[%s813_s7] sm:$0xff]   ;;  %v691_v6 = vld [vmem:[%s813_s7 + $0x8] sm:$0xff]   ;;  %v692_v7 = vld [vmem:[%s813_s7 + $0x10] sm:$0xff]   ;;  %p613_p11 = scmp.ne.s32.totalorder %s730_s14, 4 }
  0x28   : > { %629 = vmatprep.subr.bf16.mxu0 %v690_v5  ;;  %v693_v8 = vld [vmem:[%s813_s7 + $0x18] sm:$0xff]   ;;  %v698_v9 = vld [vmem:[%s248_s8] sm:$0xff]   ;;  %v695_v11 = vld [vmem:[%s813_s7 + $0x28] sm:$0xff]  }
  0x29   : > { %630 = vmatpush3.bf16.msra.mxu0 %v690_v5  ;;  %645 = vmatprep.mubr.bf16.mxu0 %v698_v9  ;;  %v694_v10 = vld [vmem:[%s813_s7 + $0x20] sm:$0xff]   ;;  %v696_v12 = vld [vmem:[%s813_s7 + $0x30] sm:$0xff]   ;;  %v697_v13 = vld [vmem:[%s813_s7 + $0x38] sm:$0xff]  }
  0x2a   : > { %631 = vmatprep.subr.bf16.mxu0 %v691_v6  ;;  %v699_v14 = vld [vmem:[%s248_s8 + $0x8] sm:$0xff]   ;;  %v316_v15 = vld [vmem:[#allocation2 + $0x10] sm:$0xff]  ;;  %v314_v16 = vld [vmem:[#allocation2] sm:$0xff] }
  0x2b   : > { %v317_v18 = vld [vmem:[#allocation2 + $0x18] sm:$0xff]  ;;  %v315_v21 = vld [vmem:[#allocation2 + $0x8] sm:$0xff]  ;;  %v614_v28 = vld [vmem:[%s862_s2] ss:$0 sm:$0xff] (!%p613_p11) }
  0x2d   : > { %632 = vmatpush3.bf16.msra.mxu0 %v691_v6 }
  0x2e   : > { %633 = vmatprep.subr.bf16.mxu0 %v692_v7 }
  0x31   : > { %634 = vmatpush3.bf16.msra.mxu0 %v692_v7 }
  0x32   : > { %635 = vmatprep.subr.bf16.mxu0 %v693_v8 }
  0x35   : > { %636 = vmatpush3.bf16.msra.mxu0 %v693_v8 }
  0x36   : > { %637 = vmatprep.subr.bf16.mxu0 %v694_v10 }
  0x39   : > { %638 = vmatpush3.bf16.msra.mxu0 %v694_v10 }
  0x3a   : > { %639 = vmatprep.subr.bf16.mxu0 %v695_v11 }
  0x3d   : > { %640 = vmatpush3.bf16.msra.mxu0 %v695_v11 }
  0x3e   : > { %641 = vmatprep.subr.bf16.mxu0 %v696_v12 }
  0x41   : > { %642 = vmatpush3.bf16.msra.mxu0 %v696_v12 }
  0x42   : > { %643 = vmatprep.subr.bf16.mxu0 %v697_v13 }
  0x45   : > { %644 = vmatpush3.bf16.msra.mxu0 %v697_v13 }
  0x48   : > { %646 = vmatmul.mubr.bf16.vlgmr.msra.gmra.mrb[0].mxu0 %v699_v14 }
 0x11b   : > { %v647_v17 = vpop.f32.mrb[0].mxu0  ;;  %458 = sbr.rel (%p613_p11) target bundleno = 302 (0x12e), region = 81 }
 0x11c   : > { %v449_v19 = vadd.f32 %v647_v17, %v316_v15  ;;  %v432_v20 = vpop.f32.mrb[1].mxu0 }
 0x11d   : > { %v447_v22 = vadd.f32 %v432_v20, %v314_v16  ;;  %v648_v23 = vpop.f32.mrb[2].mxu0 }
 0x11e   : > { %453 = vst [vmem:[#allocation2 + $0x10] sm:$0xff] %v449_v19  ;;  %v450_v24 = vadd.f32 %v648_v23, %v317_v18  ;;  %v435_v25 = vpop.f32.mrb[3].mxu0 }
 0x11f   : > { %451 = vst [vmem:[#allocation2] sm:$0xff] %v447_v22  ;;  %v448_v26 = vadd.f32 %v435_v25, %v315_v21 }
 0x120   : > { %454 = vst [vmem:[#allocation2 + $0x18] sm:$0xff] %v450_v24 }
 0x121   : > { %452 = vst [vmem:[#allocation2 + $0x8] sm:$0xff] %v448_v26 }
 0x125   : > { %v461_v32 = vld [vmem:[#allocation2 + $0x10] sm:$0xff] }
 0x126   : > { %v459_v27 = vld [vmem:[#allocation2] sm:$0xff]  ;;  %v472_v34 = vadd.f32 %v614_v28, %v461_v32 }
 0x127   : > { %v470_v30 = vadd.f32 %v614_v28, %v459_v27  ;;  %v462_v33 = vld [vmem:[#allocation2 + $0x18] sm:$0xff] }
 0x128   : > { %v460_v29 = vld [vmem:[#allocation2 + $0x8] sm:$0xff]  ;;  %v473_v35 = vadd.f32 %v614_v28, %v462_v33  ;;  %v476_v38 = vmax.f32 %v472_v34, 0.0 }
 0x129   : > { %v471_v31 = vadd.f32 %v614_v28, %v460_v29  ;;  %v474_v36 = vmax.f32 %v470_v30, 0.0 }
 0x12a   : > { %v477_v39 = vmax.f32 %v473_v35, 0.0  ;;  %480 = vst [vmem:[%s863_s3 + $0x10] sm:$0xff] %v476_v38 }
 0x12b   : > { %v475_v37 = vmax.f32 %v471_v31, 0.0  ;;  %478 = vst [vmem:[%s863_s3] sm:$0xff] %v474_v36 }
 0x12c   : > { %481 = vst [vmem:[%s863_s3 + $0x18] sm:$0xff] %v477_v39 }
 0x12d   : > { %479 = vst [vmem:[%s863_s3 + $0x8] sm:$0xff] %v475_v37 }
 0x12e PF: > { %s13_s16 = sadd.s32 1, %s738_s16   ;;  %s864_s12 = smov %s726_s13 }
 0x12f   : > { %p10_p12 = scmp.ge.s32.totalorder %s13_s16, 7   ;;  %s865_s13 = smov %s796_s20 }
 0x130   : > { %s866_s14 = smov %s734_s15  ;;  %s867_s15 = smov %s869_s17 }
 0x131   :  { %12 = sbr.rel (!%p10_p12) target bundleno = 3 (0x3), region = 122 }

// kernel: _lambda_.31
= control target key start
LH: loop header
LB: loop body
LE: loop exit
PB: predicated region body
PF: predicated region fallthrough
CT: control target
= control target key end

     0   :  { %s1036_s12 = smov 0   ;;  %s1038_s13 = smov 0   ;;  %s1152_s0 = inlined_call_operand.vmem [shape: bf16[32,1152], index: 0, kind: input, shape index: {}]   ;;  %s1153_s1 = inlined_call_operand.vmem [shape: bf16[1152,128], index: 1, kind: input, shape index: {}]   ;;  %s1154_s2 = inlined_call_operand.vmem [shape: f32[1,128], index: 2, kind: input, shape index: {}]   ;;  %s1155_s3 = inlined_call_operand.vmem [shape: f32[32,128], index: 3, kind: output, shape index: {}]  }
   0x1   :  { %s1040_s14 = smov 0   ;;  %s1042_s15 = smov 0  }
   0x2   :  { %s1044_s16 = smov 0  }
   0x3 LB: > { %s25_s17 = sadd.s32 1, %s1009_s15  ;;  %p48_p1 = scmp.ne.s32.totalorder %s1001_s13, %s997_s12  ;;  %s1013_s16 = sphi %s1044_s16, %s13_s16   ;;  %s1009_s15 = sphi %s1042_s15, %s1159_s15   ;;  %s1005_s14 = sphi %s1040_s14, %s1158_s14   ;;  %s1001_s13 = sphi %s1038_s13, %s1157_s13   ;;  %s997_s12 = sphi %s1036_s12, %s1156_s12  }
   0x4   : > { %p26_p0 = scmp.ge.s32.totalorder %s25_s17, 3  ;;  %p49_p2 = scmp.eq.s32.totalorder %s1013_s16, 0 }
   0x5   : > { %s41_s19 = sadd.s32 1, %s1001_s13  ;;  %p792_p5 = scmp.ge.s32.totalorder %s1013_s16, 3 }
   0x6   : > { %s1161_s17 = smov (%p26_p0, %s25_s17), 0  ;;  %p50_p3 = por %p49_p2, %p48_p1 }
   0x7   : > { %s37_s18 = ssub.s32 %s1009_s15, %s1161_s17  ;;  %162 = sbr.rel (%p792_p5) target bundleno = 23 (0x17), region = 20 }
   0x8   : > { %p39_p4 = scmp.eq.s32.totalorder %s37_s18, 0 }
   0xa   : > { %s1071_s20 = scalar_select %p39_p4, %s1001_s13, %s41_s19  }
   0xe   : > { %165 = sbr.rel (!%p50_p3) target bundleno = 23 (0x17), region = 24  ;;  %s167_s21 = sand.u32 (%p50_p3), 1, %s1001_s13  }
   0xf   : > { %s841_s22 = smul.u32 (%p50_p3), 12, %s1009_s15 }
  0x10   : > { %s900_s23 = smul.u32 (%p50_p3), 48, %s167_s21 }
  0x11   : > { %s175_s26 = scalar_lea.vmem (%p50_p3), %s1152_s0, %s841_s22 }
  0x12   : > { %v190_v0 = vld [vmem:[%s175_s26] sm:$0xff] (%p50_p3)  ;;  %v194_v2 = vld [vmem:[%s175_s26 + $0x48] sm:$0xff] (%p50_p3)  ;;  %s169_s27 = scalar_lea.vmem (%p50_p3), [#allocation3], %s900_s23  ;;  %v798_v6 = vld [vmem:[%s175_s26 + $0x50] sm:$0xf] (%p50_p3) }
  0x13   : > { %v192_v1 = vld [vmem:[%s175_s26 + $0x24] sm:$0xff] (%p50_p3)  ;;  %191 = vst [vmem:[%s169_s27] sm:$0xff] (%p50_p3), %v190_v0  ;;  %195 = vst [vmem:[%s169_s27 + $0x18] sm:$0xff] (%p50_p3), %v194_v2  ;;  %v196_v3 = vld [vmem:[%s175_s26 + $0x6c] sm:$0xff] (%p50_p3) }
  0x14   : > { %193 = vst [vmem:[%s169_s27 + $0xc] sm:$0xff] (%p50_p3), %v192_v1  ;;  %v794_v4 = vld [vmem:[%s175_s26 + $0x8] sm:$0xf] (%p50_p3)  ;;  %v796_v5 = vld [vmem:[%s175_s26 + $0x2c] sm:$0xf] (%p50_p3)  ;;  %197 = vst [vmem:[%s169_s27 + $0x24] sm:$0xff] (%p50_p3), %v196_v3 }
  0x15   : > { %795 = vst [vmem:[%s169_s27 + $0x8] sm:$0xf] %v794_v4  ;;  %797 = vst [vmem:[%s169_s27 + $0x14] sm:$0xf] %v796_v5  ;;  %v800_v7 = vld [vmem:[%s175_s26 + $0x74] sm:$0xf] }
  0x16   : > { %799 = vst [vmem:[%s169_s27 + $0x20] sm:$0xf] %v798_v6  ;;  %801 = vst [vmem:[%s169_s27 + $0x2c] sm:$0xf] %v800_v7 }
  0x17 PF: > { %p802_p6 = scmp.ge.s32.totalorder %s1013_s16, 1  ;;  %p229_p7 = scmp.lt.s32.totalorder %s1013_s16, 4 }
  0x19   : > { %p230_p8 = pnand %p802_p6, %p229_p7 }
  0x1a   : > { %s236_s28 = sand.u32 (!%p230_p8), 1, %s997_s12   ;;  %s275_s29 = smul.u32 (!%p230_p8), 48, %s1005_s14 }
  0x1b   : > { %233 = sbr.rel (%p230_p8) target bundleno = 316 (0x13c), region = 54  ;;  %p804_p10 = scmp.ne.s32.totalorder (!%p230_p8), %s1005_s14, 0 }
  0x1c   : > { %s901_s30 = smul.u32 (!%p230_p8), 48, %s236_s28  ;;  %p276_p9 = scmp.lt.s32.totalorder (!%p230_p8), %s275_s29, 143 }
  0x1e   : > { %s1088_s8 = scalar_lea.vmem (!%p230_p8), [#allocation3], %s901_s30 }
  0x22   : > { %s1163_s29 = smov (!%p276_p9, %s275_s29), 143  ;;  %300 = sbr.rel (%p804_p10) target bundleno = 41 (0x29), region = 62 }
  0x23   : > { %s803_s4 = sshll.u32 %s1163_s29, 2  ;;  %v1015_v8 = vmov (!%p804_p10), 0.0  }
  0x24   : > { %s1086_s7 = scalar_lea.vmem %s1153_s1, %s803_s4  ;;  %301 = vst [vmem:[#allocation2] sm:$0xff] (!%p804_p10), %v1015_v8  ;;  %302 = vst [vmem:[#allocation2 + $0x8] sm:$0xff] (!%p804_p10), %v1015_v8 }
  0x25   : > { %303 = vst [vmem:[#allocation2 + $0x10] sm:$0xff] (!%p804_p10), %v1015_v8  ;;  %304 = vst [vmem:[#allocation2 + $0x18] sm:$0xff] (!%p804_p10), %v1015_v8 }
  0x29 PF: > { %v943_v9 = vld [vmem:[%s1086_s7 + $0x40] sm:$0xff]   ;;  %v946_v12 = vld [vmem:[%s1086_s7 + $0x48] sm:$0xff]   ;;  %v949_v15 = vld [vmem:[%s1086_s7 + $0x50] sm:$0xff]   ;;  %p835_p11 = scmp.ne.s32.totalorder %s1005_s14, 2 }
  0x2a   : > { %v944_v10 = vld [vmem:[%s1086_s7] sm:$0xff]   ;;  %842 = vmatprep.subr.bf16.mxu0 %v943_v9  ;;  %v947_v13 = vld [vmem:[%s1086_s7 + $0x8] sm:$0xff]   ;;  %v950_v16 = vld [vmem:[%s1086_s7 + $0x10] sm:$0xff]  }
  0x2b   : > { %v945_v11 = vld [vmem:[%s1086_s7 + $0x80] sm:$0xff]   ;;  %843 = vmatpush3.bf16.msra.mxu0 %v944_v10  ;;  %v948_v14 = vld [vmem:[%s1086_s7 + $0x88] sm:$0xff]   ;;  %v951_v17 = vld [vmem:[%s1086_s7 + $0x90] sm:$0xff]  }
  0x2c   : > { %880 = vmatprep.subr.bf16.mxu1 %v945_v11  ;;  %844 = vmatprep.subr.bf16.mxu0 %v946_v12  ;;  %v952_v18 = vld [vmem:[%s1086_s7 + $0x58] sm:$0xff]   ;;  %v955_v21 = vld [vmem:[%s1086_s7 + $0x60] sm:$0xff]   ;;  %v958_v24 = vld [vmem:[%s1086_s7 + $0x68] sm:$0xff]  }
  0x2d   : > { %881 = vmatpush3.bf16.msra.mxu1 %v945_v11  ;;  %v953_v19 = vld [vmem:[%s1086_s7 + $0x18] sm:$0xff]   ;;  %v957_v22 = vld [vmem:[%s1086_s7 + $0xa0] sm:$0xff]   ;;  %v960_v25 = vld [vmem:[%s1086_s7 + $0xa8] sm:$0xff]  }
  0x2e   : > { %882 = vmatprep.subr.bf16.mxu1 %v948_v14  ;;  %v954_v20 = vld [vmem:[%s1086_s7 + $0x98] sm:$0xff]   ;;  %v956_v23 = vld [vmem:[%s1086_s7 + $0x20] sm:$0xff]   ;;  %v959_v26 = vld [vmem:[%s1086_s7 + $0x28] sm:$0xff]  }
  0x2f   : > { %845 = vmatpush3.bf16.msra.mxu0 %v947_v13  ;;  %v961_v27 = vld [vmem:[%s1086_s7 + $0x70] sm:$0xff]   ;;  %v964_v30 = vld [vmem:[%s1086_s7 + $0x78] sm:$0xff]   ;;  %v305_v45 = vld [vmem:[#allocation2] sm:$0xff] }
  0x30   : > { %846 = vmatprep.subr.bf16.mxu0 %v949_v15  ;;  %v962_v28 = vld [vmem:[%s1086_s7 + $0x30] sm:$0xff]   ;;  %v966_v31 = vld [vmem:[%s1086_s7 + $0xb8] sm:$0xff]   ;;  %v306_v50 = vld [vmem:[#allocation2 + $0x8] sm:$0xff] }
  0x31   : > { %883 = vmatpush3.bf16.msra.mxu1 %v948_v14  ;;  %v963_v29 = vld [vmem:[%s1086_s7 + $0xb0] sm:$0xff]   ;;  %v965_v34 = vld [vmem:[%s1086_s7 + $0x38] sm:$0xff]   ;;  %v836_v4 = vld [vmem:[%s1154_s2] ss:$0 sm:$0xff] (!%p835_p11) }
  0x32   : > { %884 = vmatprep.subr.bf16.mxu1 %v951_v17  ;;  %v969_v32 = vld [vmem:[%s1088_s8 + $0x4] ss:$12 sps:$4 sm:$0xff]   ;;  %v970_v33 = vld [vmem:[%s1088_s8 + $0x8] ss:$12 sps:$4 sm:$0xff]   ;;  %v967_v35 = vld [vmem:[%s1088_s8] ss:$12 sps:$4 sm:$0xff]  }
  0x33   : > { %847 = vmatpush3.bf16.msra.mxu0 %v950_v16  ;;  %573 = vmatprep.mubr.bf16.mxu0 %v969_v32  ;;  %v972_v36 = vld [vmem:[%s1088_s8 + $0x1c] ss:$12 sps:$4 sm:$0xff]   ;;  %v971_v37 = vld [vmem:[%s1088_s8 + $0x20] ss:$12 sps:$4 sm:$0xff]   ;;  %v974_v38 = vld [vmem:[%s1088_s8 + $0x18] ss:$12 sps:$4 sm:$0xff]  }
  0x34   : > { %848 = vmatprep.subr.bf16.mxu0 %v952_v18  ;;  %896 = vmatprep.mubr.bf16.mxu1 %v970_v33  ;;  %v307_v59 = vld [vmem:[#allocation2 + $0x10] sm:$0xff]  ;;  %v308_v63 = vld [vmem:[#allocation2 + $0x18] sm:$0xff] }
  0x35   : > { %885 = vmatpush3.bf16.msra.mxu1 %v951_v17 }
  0x36   : > { %886 = vmatprep.subr.bf16.mxu1 %v954_v20 }
  0x37   : > { %849 = vmatpush3.bf16.msra.mxu0 %v953_v19 }
  0x38   : > { %850 = vmatprep.subr.bf16.mxu0 %v955_v21 }
  0x39   : > { %887 = vmatpush3.bf16.msra.mxu1 %v954_v20 }
  0x3a   : > { %888 = vmatprep.subr.bf16.mxu1 %v957_v22 }
  0x3b   : > { %851 = vmatpush3.bf16.msra.mxu0 %v956_v23 }
  0x3c   : > { %852 = vmatprep.subr.bf16.mxu0 %v958_v24 }
  0x3d   : > { %889 = vmatpush3.bf16.msra.mxu1 %v957_v22 }
  0x3e   : > { %890 = vmatprep.subr.bf16.mxu1 %v960_v25 }
  0x3f   : > { %853 = vmatpush3.bf16.msra.mxu0 %v959_v26 }
  0x40   : > { %854 = vmatprep.subr.bf16.mxu0 %v961_v27 }
  0x41   : > { %891 = vmatpush3.bf16.msra.mxu1 %v960_v25 }
  0x42   : > { %892 = vmatprep.subr.bf16.mxu1 %v963_v29 }
  0x43   : > { %855 = vmatpush3.bf16.msra.mxu0 %v962_v28 }
  0x44   : > { %856 = vmatprep.subr.bf16.mxu0 %v964_v30 }
  0x45   : > { %893 = vmatpush3.bf16.msra.mxu1 %v963_v29 }
  0x46   : > { %894 = vmatprep.subr.bf16.mxu1 %v966_v31 }
  0x47   : > { %857 = vmatpush3.bf16.msra.mxu0 %v965_v34 }
  0x49   : > { %895 = vmatpush3.bf16.msra.mxu1 %v966_v31 }
  0x4a   : > { %574 = vmatmul.mubr.bf16.vlgmr.msra.gmra.mrb[0].mxu0 %v967_v35 }
  0x4b   : > { %581 = vmatprep.mubr.bf16.mxu0 %v972_v36 }
  0x4c   : > { %897 = vmatmul.mubr.bf16.vlgmr.msra.gmra.mrb[0].mxu1 %v971_v37 }
  0x52   : > { %582 = vmatmul.mubr.bf16.gmra.mrb[4].mxu0 %v974_v38 }
 0x11d   : > { %v858_v39 = vpop.f32.mrb[0].mxu0 }
 0x11e   : > { %v859_v40 = vpop.f32.mrb[1].mxu0 }
 0x11f   : > { %v860_v41 = vadd.f32 %v859_v40, %v858_v39  ;;  %v861_v42 = vpop.f32.mrb[2].mxu0  ;;  %v898_v43 = vpop.f32.mrb[0].mxu1 }
 0x120   : > { %v862_v44 = vpop.f32.mrb[3].mxu0  ;;  %v624_v46 = vpop.f32.mrb[1].mxu1 }
 0x121   : > { %v863_v47 = vadd.f32 %v862_v44, %v861_v42  ;;  %v625_v48 = vadd.f32 %v860_v41, %v624_v46  ;;  %v899_v49 = vpop.f32.mrb[2].mxu1 }
 0x122   : > { %v627_v51 = vpop.f32.mrb[3].mxu1 }
 0x123   : > { %v639_v52 = vadd.f32 %v625_v48, %v305_v45  ;;  %v628_v53 = vadd.f32 %v863_v47, %v627_v51 }
 0x125   : > { %643 = vst [vmem:[#allocation2] sm:$0xff] %v639_v52  ;;  %v640_v54 = vadd.f32 %v628_v53, %v306_v50  ;;  %v864_v55 = vpop.f32.mrb[4].mxu0 }
 0x126   : > { %v865_v56 = vpop.f32.mrb[5].mxu0 }
 0x127   : > { %644 = vst [vmem:[#allocation2 + $0x8] sm:$0xff] %v640_v54  ;;  %v866_v57 = vadd.f32 %v865_v56, %v864_v55  ;;  %v867_v58 = vpop.f32.mrb[6].mxu0 }
 0x128   : > { %v868_v60 = vpop.f32.mrb[7].mxu0 }
 0x129   : > { %v633_v61 = vadd.f32 %v898_v43, %v866_v57  ;;  %v869_v62 = vadd.f32 %v868_v60, %v867_v58  ;;  %650 = sbr.rel (%p835_p11) target bundleno = 316 (0x13c), region = 66 }
 0x12b   : > { %v641_v0 = vadd.f32 %v633_v61, %v307_v59  ;;  %v636_v1 = vadd.f32 %v899_v49, %v869_v62 }
 0x12c   : > { %v651_v3 = vld [vmem:[#allocation2] sm:$0xff] (!%p835_p11) }
 0x12d   : > { %645 = vst [vmem:[#allocation2 + $0x10] sm:$0xff] %v641_v0  ;;  %v642_v2 = vadd.f32 %v636_v1, %v308_v63  ;;  %v662_v6 = vadd.f32 (!%p835_p11), %v836_v4, %v651_v3 }
 0x12e   : > { %v652_v5 = vld [vmem:[#allocation2 + $0x8] sm:$0xff] (!%p835_p11) }
 0x12f   : > { %646 = vst [vmem:[#allocation2 + $0x18] sm:$0xff] %v642_v2  ;;  %v663_v7 = vadd.f32 (!%p835_p11), %v836_v4, %v652_v5  ;;  %v666_v12 = vmax.f32 (!%p835_p11), %v662_v6, 0.0 }
 0x131   : > { %v667_v13 = vmax.f32 %v663_v7, 0.0  ;;  %670 = vst [vmem:[%s1155_s3] sm:$0xff] %v666_v12 }
 0x133   : > { %671 = vst [vmem:[%s1155_s3 + $0x8] sm:$0xff] %v667_v13 }
 0x134   : > { %v653_v8 = vld [vmem:[#allocation2 + $0x10] sm:$0xff] }
 0x135   : > { %v664_v10 = vadd.f32 %v836_v4, %v653_v8 }
 0x136   : > { %v654_v9 = vld [vmem:[#allocation2 + $0x18] sm:$0xff] }
 0x137   : > { %v665_v11 = vadd.f32 %v836_v4, %v654_v9  ;;  %v668_v14 = vmax.f32 %v664_v10, 0.0 }
 0x139   : > { %v669_v15 = vmax.f32 %v665_v11, 0.0  ;;  %672 = vst [vmem:[%s1155_s3 + $0x10] sm:$0xff] %v668_v14 }
 0x13b   : > { %673 = vst [vmem:[%s1155_s3 + $0x18] sm:$0xff] %v669_v15 }
 0x13c PF: > { %s13_s16 = sadd.s32 1, %s1013_s16   ;;  %s1156_s12 = smov %s1001_s13 }
 0x13d   : > { %p10_p12 = scmp.ge.s32.totalorder %s13_s16, 5   ;;  %s1157_s13 = smov %s1071_s20 }
 0x13e   : > { %s1158_s14 = smov %s1009_s15  ;;  %s1159_s15 = smov %s1161_s17 }
 0x13f   :  { %12 = sbr.rel (!%p10_p12) target bundleno = 3 (0x3), region = 113 }

// kernel: _lambda_.30
= control target key start
LH: loop header
LB: loop body
LE: loop exit
PB: predicated region body
PF: predicated region fallthrough
CT: control target
= control target key end

     0   :  { %s1128_s15 = smov 0   ;;  %s1130_s16 = smov 0   ;;  %s1256_s0 = inlined_call_operand.vmem [shape: bf16[32,1152], index: 0, kind: input, shape index: {}]   ;;  %s1257_s1 = inlined_call_operand.vmem [shape: bf16[1152,128], index: 1, kind: input, shape index: {}]   ;;  %s1258_s2 = inlined_call_operand.vmem [shape: f32[1,128], index: 2, kind: input, shape index: {}]   ;;  %s1259_s3 = inlined_call_operand.vmem [shape: f32[32,128], index: 3, kind: input, shape index: {}]   ;;  %s1260_s4 = inlined_call_operand.vmem [shape: f32[32,128], index: 4, kind: output, shape index: {}]  }
   0x1   :  { %s1132_s17 = smov 0   ;;  %s1134_s18 = smov 0  }
   0x2   :  { %s1136_s19 = smov 0  }
   0x3 LB: > { %s26_s20 = sadd.s32 1, %s1096_s18  ;;  %p49_p1 = scmp.ne.s32.totalorder %s1088_s16, %s1084_s15  ;;  %s1100_s19 = sphi %s1136_s19, %s14_s19   ;;  %s1096_s18 = sphi %s1134_s18, %s1264_s18   ;;  %s1092_s17 = sphi %s1132_s17, %s1263_s17   ;;  %s1088_s16 = sphi %s1130_s16, %s1262_s16   ;;  %s1084_s15 = sphi %s1128_s15, %s1261_s15  }
   0x4   : > { %p27_p0 = scmp.ge.s32.totalorder %s26_s20, 3  ;;  %p50_p2 = scmp.eq.s32.totalorder %s1100_s19, 0 }
   0x5   : > { %s42_s22 = sadd.s32 1, %s1088_s16  ;;  %p879_p5 = scmp.ge.s32.totalorder %s1100_s19, 3 }
   0x6   : > { %s1266_s20 = smov (%p27_p0, %s26_s20), 0  ;;  %p51_p3 = por %p50_p2, %p49_p1 }
   0x7   : > { %s38_s21 = ssub.s32 %s1096_s18, %s1266_s20  ;;  %203 = sbr.rel (%p879_p5) target bundleno = 23 (0x17), region = 24 }
   0x8   : > { %p40_p4 = scmp.eq.s32.totalorder %s38_s21, 0 }
   0xa   : > { %s1163_s23 = scalar_select %p40_p4, %s1088_s16, %s42_s22  }
   0xe   : > { %206 = sbr.rel (!%p51_p3) target bundleno = 23 (0x17), region = 28  ;;  %s208_s24 = sand.u32 (%p51_p3), 1, %s1088_s16  }
   0xf   : > { %s928_s25 = smul.u32 (%p51_p3), 12, %s1096_s18 }
  0x10   : > { %s987_s26 = smul.u32 (%p51_p3), 48, %s208_s24 }
  0x11   : > { %s216_s29 = scalar_lea.vmem (%p51_p3), %s1256_s0, %s928_s25 }
  0x12   : > { %v231_v0 = vld [vmem:[%s216_s29] sm:$0xff] (%p51_p3)  ;;  %v235_v2 = vld [vmem:[%s216_s29 + $0x48] sm:$0xff] (%p51_p3)  ;;  %s210_s30 = scalar_lea.vmem (%p51_p3), [#allocation3], %s987_s26  ;;  %v885_v6 = vld [vmem:[%s216_s29 + $0x50] sm:$0xf] (%p51_p3) }
  0x13   : > { %v233_v1 = vld [vmem:[%s216_s29 + $0x24] sm:$0xff] (%p51_p3)  ;;  %232 = vst [vmem:[%s210_s30] sm:$0xff] (%p51_p3), %v231_v0  ;;  %236 = vst [vmem:[%s210_s30 + $0x18] sm:$0xff] (%p51_p3), %v235_v2  ;;  %v237_v3 = vld [vmem:[%s216_s29 + $0x6c] sm:$0xff] (%p51_p3) }
  0x14   : > { %234 = vst [vmem:[%s210_s30 + $0xc] sm:$0xff] (%p51_p3), %v233_v1  ;;  %v881_v4 = vld [vmem:[%s216_s29 + $0x8] sm:$0xf] (%p51_p3)  ;;  %v883_v5 = vld [vmem:[%s216_s29 + $0x2c] sm:$0xf] (%p51_p3)  ;;  %238 = vst [vmem:[%s210_s30 + $0x24] sm:$0xff] (%p51_p3), %v237_v3 }
  0x15   : > { %882 = vst [vmem:[%s210_s30 + $0x8] sm:$0xf] %v881_v4  ;;  %884 = vst [vmem:[%s210_s30 + $0x14] sm:$0xf] %v883_v5  ;;  %v887_v7 = vld [vmem:[%s216_s29 + $0x74] sm:$0xf] }
  0x16   : > { %886 = vst [vmem:[%s210_s30 + $0x20] sm:$0xf] %v885_v6  ;;  %888 = vst [vmem:[%s210_s30 + $0x2c] sm:$0xf] %v887_v7 }
  0x17 PF: > { %p889_p6 = scmp.ge.s32.totalorder %s1100_s19, 1  ;;  %p270_p7 = scmp.lt.s32.totalorder %s1100_s19, 4 }
  0x19   : > { %p271_p8 = pnand %p889_p6, %p270_p7 }
  0x1a   : > { %s277_s5 = sand.u32 (!%p271_p8), 1, %s1084_s15   ;;  %s326_s6 = smul.u32 (!%p271_p8), 48, %s1092_s17 }
  0x1b   : > { %274 = sbr.rel (%p271_p8) target bundleno = 318 (0x13e), region = 58  ;;  %p891_p10 = scmp.ne.s32.totalorder (!%p271_p8), %s1092_s17, 0 }
  0x1c   : > { %s988_s7 = smul.u32 (!%p271_p8), 48, %s277_s5  ;;  %p327_p9 = scmp.lt.s32.totalorder (!%p271_p8), %s326_s6, 143 }
  0x1e   : > { %s1180_s12 = scalar_lea.vmem (!%p271_p8), [#allocation3], %s988_s7 }
  0x22   : > { %s1268_s6 = smov (!%p327_p9, %s326_s6), 143  ;;  %360 = sbr.rel (%p891_p10) target bundleno = 41 (0x29), region = 66 }
  0x23   : > { %s890_s8 = sshll.u32 %s1268_s6, 2  ;;  %v1102_v8 = vmov (!%p891_p10), 0.0  }
  0x24   : > { %s1178_s11 = scalar_lea.vmem %s1257_s1, %s890_s8  ;;  %361 = vst [vmem:[#allocation2] sm:$0xff] (!%p891_p10), %v1102_v8  ;;  %362 = vst [vmem:[#allocation2 + $0x8] sm:$0xff] (!%p891_p10), %v1102_v8 }
  0x25   : > { %363 = vst [vmem:[#allocation2 + $0x10] sm:$0xff] (!%p891_p10), %v1102_v8  ;;  %364 = vst [vmem:[#allocation2 + $0x18] sm:$0xff] (!%p891_p10), %v1102_v8 }
  0x29 PF: > { %v1030_v9 = vld [vmem:[%s1178_s11 + $0x40] sm:$0xff]   ;;  %v1033_v12 = vld [vmem:[%s1178_s11 + $0x48] sm:$0xff]   ;;  %v1036_v15 = vld [vmem:[%s1178_s11 + $0x50] sm:$0xff]   ;;  %p922_p11 = scmp.ne.s32.totalorder %s1092_s17, 2 }
  0x2a   : > { %v1031_v10 = vld [vmem:[%s1178_s11] sm:$0xff]   ;;  %929 = vmatprep.subr.bf16.mxu0 %v1030_v9  ;;  %v1034_v13 = vld [vmem:[%s1178_s11 + $0x8] sm:$0xff]   ;;  %v1037_v16 = vld [vmem:[%s1178_s11 + $0x10] sm:$0xff]  }
  0x2b   : > { %v1032_v11 = vld [vmem:[%s1178_s11 + $0x80] sm:$0xff]   ;;  %930 = vmatpush3.bf16.msra.mxu0 %v1031_v10  ;;  %v1035_v14 = vld [vmem:[%s1178_s11 + $0x88] sm:$0xff]   ;;  %v1038_v17 = vld [vmem:[%s1178_s11 + $0x90] sm:$0xff]  }
  0x2c   : > { %967 = vmatprep.subr.bf16.mxu1 %v1032_v11  ;;  %931 = vmatprep.subr.bf16.mxu0 %v1033_v12  ;;  %v1039_v18 = vld [vmem:[%s1178_s11 + $0x58] sm:$0xff]   ;;  %v1042_v21 = vld [vmem:[%s1178_s11 + $0x60] sm:$0xff]   ;;  %v1045_v24 = vld [vmem:[%s1178_s11 + $0x68] sm:$0xff]  }
  0x2d   : > { %968 = vmatpush3.bf16.msra.mxu1 %v1032_v11  ;;  %v1040_v19 = vld [vmem:[%s1178_s11 + $0x18] sm:$0xff]   ;;  %v1044_v22 = vld [vmem:[%s1178_s11 + $0xa0] sm:$0xff]   ;;  %v1047_v25 = vld [vmem:[%s1178_s11 + $0xa8] sm:$0xff]  }
  0x2e   : > { %969 = vmatprep.subr.bf16.mxu1 %v1035_v14  ;;  %v1041_v20 = vld [vmem:[%s1178_s11 + $0x98] sm:$0xff]   ;;  %v1043_v23 = vld [vmem:[%s1178_s11 + $0x20] sm:$0xff]   ;;  %v1046_v26 = vld [vmem:[%s1178_s11 + $0x28] sm:$0xff]  }
  0x2f   : > { %932 = vmatpush3.bf16.msra.mxu0 %v1034_v13  ;;  %v1048_v27 = vld [vmem:[%s1178_s11 + $0x70] sm:$0xff]   ;;  %v1051_v30 = vld [vmem:[%s1178_s11 + $0x78] sm:$0xff]   ;;  %v365_v45 = vld [vmem:[#allocation2] sm:$0xff] }
  0x30   : > { %933 = vmatprep.subr.bf16.mxu0 %v1036_v15  ;;  %v1049_v28 = vld [vmem:[%s1178_s11 + $0x30] sm:$0xff]   ;;  %v1053_v31 = vld [vmem:[%s1178_s11 + $0xb8] sm:$0xff]   ;;  %v366_v50 = vld [vmem:[#allocation2 + $0x8] sm:$0xff] }
  0x31   : > { %970 = vmatpush3.bf16.msra.mxu1 %v1035_v14  ;;  %v1050_v29 = vld [vmem:[%s1178_s11 + $0xb0] sm:$0xff]   ;;  %v1052_v34 = vld [vmem:[%s1178_s11 + $0x38] sm:$0xff]   ;;  %v923_v4 = vld [vmem:[%s1258_s2] ss:$0 sm:$0xff] (!%p922_p11) }
  0x32   : > { %971 = vmatprep.subr.bf16.mxu1 %v1038_v17  ;;  %v1056_v32 = vld [vmem:[%s1180_s12 + $0x4] ss:$12 sps:$4 sm:$0xff]   ;;  %v1057_v33 = vld [vmem:[%s1180_s12 + $0x8] ss:$12 sps:$4 sm:$0xff]   ;;  %v1054_v35 = vld [vmem:[%s1180_s12] ss:$12 sps:$4 sm:$0xff]  }
  0x33   : > { %934 = vmatpush3.bf16.msra.mxu0 %v1037_v16  ;;  %633 = vmatprep.mubr.bf16.mxu0 %v1056_v32  ;;  %v1059_v36 = vld [vmem:[%s1180_s12 + $0x1c] ss:$12 sps:$4 sm:$0xff]   ;;  %v1058_v37 = vld [vmem:[%s1180_s12 + $0x20] ss:$12 sps:$4 sm:$0xff]   ;;  %v1061_v38 = vld [vmem:[%s1180_s12 + $0x18] ss:$12 sps:$4 sm:$0xff]  }
  0x34   : > { %935 = vmatprep.subr.bf16.mxu0 %v1039_v18  ;;  %983 = vmatprep.mubr.bf16.mxu1 %v1057_v33  ;;  %v367_v59 = vld [vmem:[#allocation2 + $0x10] sm:$0xff]  ;;  %v368_v63 = vld [vmem:[#allocation2 + $0x18] sm:$0xff]  ;;  %v726_v5 = vld [vmem:[%s1259_s3] sm:$0xff] (!%p922_p11) }
  0x35   : > { %972 = vmatpush3.bf16.msra.mxu1 %v1038_v17  ;;  %v727_v8 = vld [vmem:[%s1259_s3 + $0x8] sm:$0xff] (!%p922_p11)  ;;  %v728_v12 = vld [vmem:[%s1259_s3 + $0x10] sm:$0xff] (!%p922_p11)  ;;  %v729_v14 = vld [vmem:[%s1259_s3 + $0x18] sm:$0xff] (!%p922_p11) }
  0x36   : > { %973 = vmatprep.subr.bf16.mxu1 %v1041_v20 }
  0x37   : > { %936 = vmatpush3.bf16.msra.mxu0 %v1040_v19 }
  0x38   : > { %937 = vmatprep.subr.bf16.mxu0 %v1042_v21 }
  0x39   : > { %974 = vmatpush3.bf16.msra.mxu1 %v1041_v20 }
  0x3a   : > { %975 = vmatprep.subr.bf16.mxu1 %v1044_v22 }
  0x3b   : > { %938 = vmatpush3.bf16.msra.mxu0 %v1043_v23 }
  0x3c   : > { %939 = vmatprep.subr.bf16.mxu0 %v1045_v24 }
  0x3d   : > { %976 = vmatpush3.bf16.msra.mxu1 %v1044_v22 }
  0x3e   : > { %977 = vmatprep.subr.bf16.mxu1 %v1047_v25 }
  0x3f   : > { %940 = vmatpush3.bf16.msra.mxu0 %v1046_v26 }
  0x40   : > { %941 = vmatprep.subr.bf16.mxu0 %v1048_v27 }
  0x41   : > { %978 = vmatpush3.bf16.msra.mxu1 %v1047_v25 }
  0x42   : > { %979 = vmatprep.subr.bf16.mxu1 %v1050_v29 }
  0x43   : > { %942 = vmatpush3.bf16.msra.mxu0 %v1049_v28 }
  0x44   : > { %943 = vmatprep.subr.bf16.mxu0 %v1051_v30 }
  0x45   : > { %980 = vmatpush3.bf16.msra.mxu1 %v1050_v29 }
  0x46   : > { %981 = vmatprep.subr.bf16.mxu1 %v1053_v31 }
  0x47   : > { %944 = vmatpush3.bf16.msra.mxu0 %v1052_v34 }
  0x49   : > { %982 = vmatpush3.bf16.msra.mxu1 %v1053_v31 }
  0x4a   : > { %634 = vmatmul.mubr.bf16.vlgmr.msra.gmra.mrb[0].mxu0 %v1054_v35 }
  0x4b   : > { %641 = vmatprep.mubr.bf16.mxu0 %v1059_v36 }
  0x4c   : > { %984 = vmatmul.mubr.bf16.vlgmr.msra.gmra.mrb[0].mxu1 %v1058_v37 }
  0x52   : > { %642 = vmatmul.mubr.bf16.gmra.mrb[4].mxu0 %v1061_v38 }
 0x11d   : > { %v945_v39 = vpop.f32.mrb[0].mxu0 }
 0x11e   : > { %v946_v40 = vpop.f32.mrb[1].mxu0 }
 0x11f   : > { %v947_v41 = vadd.f32 %v946_v40, %v945_v39  ;;  %v948_v42 = vpop.f32.mrb[2].mxu0  ;;  %v985_v43 = vpop.f32.mrb[0].mxu1 }
 0x120   : > { %v949_v44 = vpop.f32.mrb[3].mxu0  ;;  %v684_v46 = vpop.f32.mrb[1].mxu1 }
 0x121   : > { %v950_v47 = vadd.f32 %v949_v44, %v948_v42  ;;  %v685_v48 = vadd.f32 %v947_v41, %v684_v46  ;;  %v986_v49 = vpop.f32.mrb[2].mxu1 }
 0x122   : > { %v687_v51 = vpop.f32.mrb[3].mxu1 }
 0x123   : > { %v699_v52 = vadd.f32 %v685_v48, %v365_v45  ;;  %v688_v53 = vadd.f32 %v950_v47, %v687_v51 }
 0x125   : > { %703 = vst [vmem:[#allocation2] sm:$0xff] %v699_v52  ;;  %v700_v54 = vadd.f32 %v688_v53, %v366_v50  ;;  %v951_v55 = vpop.f32.mrb[4].mxu0 }
 0x126   : > { %v952_v56 = vpop.f32.mrb[5].mxu0 }
 0x127   : > { %704 = vst [vmem:[#allocation2 + $0x8] sm:$0xff] %v700_v54  ;;  %v953_v57 = vadd.f32 %v952_v56, %v951_v55  ;;  %v954_v58 = vpop.f32.mrb[6].mxu0 }
 0x128   : > { %v955_v60 = vpop.f32.mrb[7].mxu0 }
 0x129   : > { %v693_v61 = vadd.f32 %v985_v43, %v953_v57  ;;  %v956_v62 = vadd.f32 %v955_v60, %v954_v58  ;;  %710 = sbr.rel (%p922_p11) target bundleno = 318 (0x13e), region = 70 }
 0x12b   : > { %v701_v0 = vadd.f32 %v693_v61, %v367_v59  ;;  %v696_v1 = vadd.f32 %v986_v49, %v956_v62 }
 0x12c   : > { %v711_v3 = vld [vmem:[#allocation2] sm:$0xff] (!%p922_p11) }
 0x12d   : > { %705 = vst [vmem:[#allocation2 + $0x10] sm:$0xff] %v701_v0  ;;  %v702_v2 = vadd.f32 %v696_v1, %v368_v63  ;;  %v722_v6 = vadd.f32 (!%p922_p11), %v923_v4, %v711_v3 }
 0x12e   : > { %v712_v7 = vld [vmem:[#allocation2 + $0x8] sm:$0xff] (!%p922_p11) }
 0x12f   : > { %706 = vst [vmem:[#allocation2 + $0x18] sm:$0xff] %v702_v2  ;;  %v723_v10 = vadd.f32 (!%p922_p11), %v923_v4, %v712_v7  ;;  %v730_v15 = vadd.f32 (!%p922_p11), %v726_v5, %v722_v6 }
 0x131   : > { %v731_v17 = vadd.f32 %v727_v8, %v723_v10  ;;  %v734_v19 = vmax.f32 %v730_v15, 0.0 }
 0x133   : > { %v735_v21 = vmax.f32 %v731_v17, 0.0  ;;  %738 = vst [vmem:[%s1260_s4] sm:$0xff] %v734_v19 }
 0x134   : > { %v713_v9 = vld [vmem:[#allocation2 + $0x10] sm:$0xff] }
 0x135   : > { %v724_v11 = vadd.f32 %v923_v4, %v713_v9  ;;  %739 = vst [vmem:[%s1260_s4 + $0x8] sm:$0xff] %v735_v21 }
 0x136   : > { %v714_v13 = vld [vmem:[#allocation2 + $0x18] sm:$0xff] }
 0x137   : > { %v725_v16 = vadd.f32 %v923_v4, %v714_v13  ;;  %v732_v18 = vadd.f32 %v728_v12, %v724_v11 }
 0x139   : > { %v733_v20 = vadd.f32 %v729_v14, %v725_v16  ;;  %v736_v22 = vmax.f32 %v732_v18, 0.0 }
 0x13b   : > { %v737_v23 = vmax.f32 %v733_v20, 0.0  ;;  %740 = vst [vmem:[%s1260_s4 + $0x10] sm:$0xff] %v736_v22 }
 0x13d   : > { %741 = vst [vmem:[%s1260_s4 + $0x18] sm:$0xff] %v737_v23 }
 0x13e PF: > { %s14_s19 = sadd.s32 1, %s1100_s19   ;;  %s1261_s15 = smov %s1088_s16 }
 0x13f   : > { %p11_p12 = scmp.ge.s32.totalorder %s14_s19, 5   ;;  %s1262_s16 = smov %s1163_s23 }
 0x140   : > { %s1263_s17 = smov %s1096_s18  ;;  %s1264_s18 = smov %s1266_s20 }
 0x141   :  { %13 = sbr.rel (!%p11_p12) target bundleno = 3 (0x3), region = 120 }

// kernel: _lambda_.28
= control target key start
LH: loop header
LB: loop body
LE: loop exit
PB: predicated region body
PF: predicated region fallthrough
CT: control target
= control target key end

     0   :  { %s306_s1 = inlined_call_operand.vmem [shape: bf16[128,128], index: 1, kind: input, shape index: {}]   ;;  %s307_s0 = inlined_call_operand.vmem [shape: bf16[32,128], index: 0, kind: input, shape index: {}]   ;;  %s308_s2 = inlined_call_operand.vmem [shape: f32[1,128], index: 2, kind: input, shape index: {}]   ;;  %s309_s3 = inlined_call_operand.vmem [shape: f32[32,128], index: 3, kind: output, shape index: {}]  }
   0x1   :  { %v231_v0 = vld [vmem:[%s306_s1] sm:$0xff]   ;;  %v232_v1 = vld [vmem:[%s306_s1 + $0x8] sm:$0xff]   ;;  %v233_v2 = vld [vmem:[%s306_s1 + $0x10] sm:$0xff]  }
   0x2   :  { %211 = vmatprep.subr.bf16.mxu0 %v231_v0  ;;  %v234_v3 = vld [vmem:[%s306_s1 + $0x18] sm:$0xff]   ;;  %v239_v4 = vld [vmem:[%s307_s0] sm:$0xff]   ;;  %v236_v6 = vld [vmem:[%s306_s1 + $0x28] sm:$0xff]  }
   0x3   :  { %212 = vmatpush3.bf16.msra.mxu0 %v231_v0  ;;  %227 = vmatprep.mubr.bf16.mxu0 %v239_v4  ;;  %v235_v5 = vld [vmem:[%s306_s1 + $0x20] sm:$0xff]   ;;  %v237_v7 = vld [vmem:[%s306_s1 + $0x30] sm:$0xff]   ;;  %v238_v8 = vld [vmem:[%s306_s1 + $0x38] sm:$0xff]  }
   0x4   :  { %213 = vmatprep.subr.bf16.mxu0 %v232_v1  ;;  %v240_v9 = vld [vmem:[%s307_s0 + $0x8] sm:$0xff]   ;;  %v200_v10 = vld [vmem:[%s308_s2] ss:$0 sm:$0xff] }
   0x7   :  { %214 = vmatpush3.bf16.msra.mxu0 %v232_v1 }
   0x8   :  { %215 = vmatprep.subr.bf16.mxu0 %v233_v2 }
   0xb   :  { %216 = vmatpush3.bf16.msra.mxu0 %v233_v2 }
   0xc   :  { %217 = vmatprep.subr.bf16.mxu0 %v234_v3 }
   0xf   :  { %218 = vmatpush3.bf16.msra.mxu0 %v234_v3 }
  0x10   :  { %219 = vmatprep.subr.bf16.mxu0 %v235_v5 }
  0x13   :  { %220 = vmatpush3.bf16.msra.mxu0 %v235_v5 }
  0x14   :  { %221 = vmatprep.subr.bf16.mxu0 %v236_v6 }
  0x17   :  { %222 = vmatpush3.bf16.msra.mxu0 %v236_v6 }
  0x18   :  { %223 = vmatprep.subr.bf16.mxu0 %v237_v7 }
  0x1b   :  { %224 = vmatpush3.bf16.msra.mxu0 %v237_v7 }
  0x1c   :  { %225 = vmatprep.subr.bf16.mxu0 %v238_v8 }
  0x1f   :  { %226 = vmatpush3.bf16.msra.mxu0 %v238_v8 }
  0x22   :  { %228 = vmatmul.mubr.bf16.vlgmr.msra.gmra.mrb[0].mxu0 %v240_v9 }
  0xf5   :  { %v229_v11 = vpop.f32.mrb[0].mxu0 }
  0xf6   :  { %v180_v12 = vadd.f32 %v229_v11, %v200_v10  ;;  %v141_v13 = vpop.f32.mrb[1].mxu0 }
  0xf7   :  { %v178_v14 = vadd.f32 %v200_v10, %v141_v13  ;;  %v230_v15 = vpop.f32.mrb[2].mxu0 }
  0xf8   :  { %184 = vst [vmem:[%s309_s3 + $0x10] sm:$0xff] %v180_v12  ;;  %v181_v16 = vadd.f32 %v230_v15, %v200_v10  ;;  %v144_v17 = vpop.f32.mrb[3].mxu0 }
  0xf9   :  { %182 = vst [vmem:[%s309_s3] sm:$0xff] %v178_v14  ;;  %v179_v18 = vadd.f32 %v200_v10, %v144_v17 }
  0xfa   :  { %185 = vst [vmem:[%s309_s3 + $0x18] sm:$0xff] %v181_v16 }
  0xfb   :  { %183 = vst [vmem:[%s309_s3 + $0x8] sm:$0xff] %v179_v18 }

// kernel: _lambda_.34
= control target key start
LH: loop header
LB: loop body
LE: loop exit
PB: predicated region body
PF: predicated region fallthrough
CT: control target
= control target key end

     0   :  { %s1137_s12 = smov 0   ;;  %s1139_s13 = smov 0   ;;  %s1274_s0 = inlined_call_operand.vmem [shape: bf16[16,1152], index: 0, kind: input, shape index: {}]   ;;  %s1275_s1 = inlined_call_operand.vmem [shape: bf16[1152,256], index: 1, kind: input, shape index: {}]   ;;  %s1276_s2 = inlined_call_operand.vmem [shape: f32[1,256], index: 2, kind: input, shape index: {}]   ;;  %s1277_s3 = inlined_call_operand.vmem [shape: f32[16,256], index: 3, kind: output, shape index: {}]  }
   0x1   :  { %s1141_s14 = smov 0   ;;  %s1143_s15 = smov 0  }
   0x2   :  { %s1145_s16 = smov 0  }
   0x3 LB: > { %s25_s17 = sadd.s32 1, %s1109_s15  ;;  %p48_p1 = scmp.ne.s32.totalorder %s1101_s13, %s1097_s12  ;;  %s1113_s16 = sphi %s1145_s16, %s13_s16   ;;  %s1109_s15 = sphi %s1143_s15, %s1281_s15   ;;  %s1105_s14 = sphi %s1141_s14, %s1280_s14   ;;  %s1101_s13 = sphi %s1139_s13, %s1279_s13   ;;  %s1097_s12 = sphi %s1137_s12, %s1278_s12  }
   0x4   : > { %p26_p0 = scmp.ge.s32.totalorder %s25_s17, 3  ;;  %p49_p2 = scmp.eq.s32.totalorder %s1113_s16, 0 }
   0x5   : > { %s41_s19 = sadd.s32 1, %s1101_s13  ;;  %p883_p5 = scmp.ge.s32.totalorder %s1113_s16, 3 }
   0x6   : > { %s1283_s17 = smov (%p26_p0, %s25_s17), 0  ;;  %p50_p3 = por %p49_p2, %p48_p1 }
   0x7   : > { %s37_s18 = ssub.s32 %s1109_s15, %s1283_s17  ;;  %164 = sbr.rel (%p883_p5) target bundleno = 21 (0x15), region = 20 }
   0x8   : > { %p39_p4 = scmp.eq.s32.totalorder %s37_s18, 0 }
   0xa   : > { %s1172_s20 = scalar_select %p39_p4, %s1101_s13, %s41_s19  }
   0xe   : > { %167 = sbr.rel (!%p50_p3) target bundleno = 21 (0x15), region = 24  ;;  %s169_s21 = sand.u32 (%p50_p3), 1, %s1101_s13  }
   0xf   : > { %s949_s22 = smul.u32 (%p50_p3), 12, %s1109_s15 }
  0x10   : > { %s955_s23 = smul.u32 (%p50_p3), 24, %s169_s21 }
  0x11   : > { %s177_s26 = scalar_lea.vmem (%p50_p3), %s1274_s0, %s949_s22 }
  0x12   : > { %v192_v0 = vld [vmem:[%s177_s26] sm:$0xff] (%p50_p3)  ;;  %v885_v2 = vld [vmem:[%s177_s26 + $0x8] sm:$0xf] (%p50_p3)  ;;  %s171_s27 = scalar_lea.vmem (%p50_p3), [#allocation3], %s955_s23  ;;  %v887_v3 = vld [vmem:[%s177_s26 + $0x2c] sm:$0xf] (%p50_p3) }
  0x13   : > { %v194_v1 = vld [vmem:[%s177_s26 + $0x24] sm:$0xff] (%p50_p3)  ;;  %193 = vst [vmem:[%s171_s27] sm:$0xff] (%p50_p3), %v192_v0  ;;  %886 = vst [vmem:[%s171_s27 + $0x8] sm:$0xf] (%p50_p3), %v885_v2 }
  0x14   : > { %195 = vst [vmem:[%s171_s27 + $0xc] sm:$0xff] (%p50_p3), %v194_v1  ;;  %888 = vst [vmem:[%s171_s27 + $0x14] sm:$0xf] (%p50_p3), %v887_v3 }
  0x15 PF: > { %p889_p6 = scmp.ge.s32.totalorder %s1113_s16, 1  ;;  %p226_p7 = scmp.lt.s32.totalorder %s1113_s16, 4 }
  0x17   : > { %p227_p8 = pnand %p889_p6, %p226_p7 }
  0x18   : > { %s233_s28 = sand.u32 (!%p227_p8), 1, %s1097_s12   ;;  %s277_s29 = smul.u32 (!%p227_p8), 48, %s1105_s14 }
  0x19   : > { %230 = sbr.rel (%p227_p8) target bundleno = 336 (0x150), region = 54  ;;  %p892_p10 = scmp.ne.s32.totalorder (!%p227_p8), %s1105_s14, 0 }
  0x1a   : > { %s956_s30 = smul.u32 (!%p227_p8), 24, %s233_s28  ;;  %p279_p9 = scmp.lt.s32.totalorder (!%p227_p8), %s277_s29, 143 }
  0x1c   : > { %s1189_s8 = scalar_lea.vmem (!%p227_p8), [#allocation3], %s956_s30 }
  0x20   : > { %s1285_s29 = smov (!%p279_p9, %s277_s29), 143  ;;  %310 = sbr.rel (%p892_p10) target bundleno = 39 (0x27), region = 62 }
  0x21   : > { %s950_s4 = sshll.u32 %s1285_s29, 3  ;;  %v1115_v4 = vmov (!%p892_p10), 0.0  }
  0x22   : > { %s1187_s7 = scalar_lea.vmem %s1275_s1, %s950_s4  ;;  %311 = vst [vmem:[#allocation2] sm:$0xff] (!%p892_p10), %v1115_v4  ;;  %312 = vst [vmem:[#allocation2 + $0x8] sm:$0xff] (!%p892_p10), %v1115_v4 }
  0x23   : > { %313 = vst [vmem:[#allocation2 + $0x10] sm:$0xff] (!%p892_p10), %v1115_v4  ;;  %314 = vst [vmem:[#allocation2 + $0x18] sm:$0xff] (!%p892_p10), %v1115_v4 }
  0x27 PF: > { %v999_v5 = vld [vmem:[%s1187_s7 + $0x4] ss:$8 sps:$4 sm:$0xff]   ;;  %v1001_v6 = vld [vmem:[%s1187_s7] ss:$8 sps:$4 sm:$0xff]   ;;  %v1116_v7 = vmov 0   ;;  %p944_p11 = scmp.ne.s32.totalorder %s1105_s14, 2 }
  0x28   : > { %702 = vmatprep.mubr.bf16.mxu0 %v1116_v7  ;;  %627 = vmatprep.subr.bf16.mxu1 %v999_v5  ;;  %v1002_v8 = vld [vmem:[%s1187_s7 + $0x14] ss:$8 sps:$4 sm:$0xff]   ;;  %v1004_v9 = vld [vmem:[%s1187_s7 + $0x10] ss:$8 sps:$4 sm:$0xff]   ;;  %v1005_v10 = vld [vmem:[%s1187_s7 + $0x24] ss:$8 sps:$4 sm:$0xff]  }
  0x29   : > { %628 = vmatpush1.bf16.msra.mxu1 %v1001_v6  ;;  %v1007_v11 = vld [vmem:[%s1187_s7 + $0x20] ss:$8 sps:$4 sm:$0xff]   ;;  %v1008_v12 = vld [vmem:[%s1187_s7 + $0x34] ss:$8 sps:$4 sm:$0xff]   ;;  %v1010_v13 = vld [vmem:[%s1187_s7 + $0x30] ss:$8 sps:$4 sm:$0xff]  }
  0x2a   : > { %629 = vmatprep.subr.bf16.mxu1 %v1002_v8  ;;  %v1023_v14 = vld [vmem:[%s1187_s7 + $0x104] ss:$8 sps:$4 sm:$0xff]   ;;  %v1025_v15 = vld [vmem:[%s1187_s7 + $0x100] ss:$8 sps:$4 sm:$0xff]   ;;  %v1029_v17 = vld [vmem:[%s1187_s7 + $0x114] ss:$8 sps:$4 sm:$0xff]  }
  0x2b   : > { %v1011_v16 = vld [vmem:[%s1187_s7 + $0x44] ss:$8 sps:$4 sm:$0xff]   ;;  %670 = vmatprep.subr.bf16.mxu0 %v1023_v14  ;;  %v1031_v18 = vld [vmem:[%s1187_s7 + $0x110] ss:$8 sps:$4 sm:$0xff]   ;;  %v1013_v19 = vld [vmem:[%s1187_s7 + $0x40] ss:$8 sps:$4 sm:$0xff]  }
  0x2c   : > { %671 = vmatpush1.bf16.msra.mxu0 %v1025_v15  ;;  %v1014_v20 = vld [vmem:[%s1187_s7 + $0x54] ss:$8 sps:$4 sm:$0xff]   ;;  %v1035_v21 = vld [vmem:[%s1187_s7 + $0x124] ss:$8 sps:$4 sm:$0xff]   ;;  %v1037_v22 = vld [vmem:[%s1187_s7 + $0x120] ss:$8 sps:$4 sm:$0xff]  }
  0x2d   : > { %630 = vmatpush1.bf16.msra.mxu1 %v1004_v9  ;;  %672 = vmatprep.subr.bf16.mxu0 %v1029_v17  ;;  %v1016_v23 = vld [vmem:[%s1187_s7 + $0x50] ss:$8 sps:$4 sm:$0xff]   ;;  %v1041_v24 = vld [vmem:[%s1187_s7 + $0x134] ss:$8 sps:$4 sm:$0xff]   ;;  %v1017_v25 = vld [vmem:[%s1187_s7 + $0x64] ss:$8 sps:$4 sm:$0xff]  }
  0x2e   : > { %631 = vmatprep.subr.bf16.mxu1 %v1005_v10  ;;  %v1043_v26 = vld [vmem:[%s1187_s7 + $0x130] ss:$8 sps:$4 sm:$0xff]   ;;  %v1019_v27 = vld [vmem:[%s1187_s7 + $0x60] ss:$8 sps:$4 sm:$0xff]   ;;  %v1047_v28 = vld [vmem:[%s1187_s7 + $0x144] ss:$8 sps:$4 sm:$0xff]  }
  0x2f   : > { %v1020_v29 = vld [vmem:[%s1187_s7 + $0x74] ss:$8 sps:$4 sm:$0xff]   ;;  %v1049_v30 = vld [vmem:[%s1187_s7 + $0x140] ss:$8 sps:$4 sm:$0xff]   ;;  %v1022_v31 = vld [vmem:[%s1187_s7 + $0x70] ss:$8 sps:$4 sm:$0xff]  }
  0x30   : > { %673 = vmatpush1.bf16.msra.mxu0 %v1031_v18  ;;  %v1053_v32 = vld [vmem:[%s1187_s7 + $0x154] ss:$8 sps:$4 sm:$0xff]   ;;  %v1026_v33 = vld [vmem:[%s1187_s7 + $0x84] ss:$8 sps:$4 sm:$0xff]   ;;  %v1055_v34 = vld [vmem:[%s1187_s7 + $0x150] ss:$8 sps:$4 sm:$0xff]  }
  0x31   : > { %632 = vmatpush1.bf16.msra.mxu1 %v1007_v11  ;;  %674 = vmatprep.subr.bf16.mxu0 %v1035_v21  ;;  %v1028_v35 = vld [vmem:[%s1187_s7 + $0x80] ss:$8 sps:$4 sm:$0xff]   ;;  %v1059_v36 = vld [vmem:[%s1187_s7 + $0x164] ss:$8 sps:$4 sm:$0xff]   ;;  %v1032_v37 = vld [vmem:[%s1187_s7 + $0x94] ss:$8 sps:$4 sm:$0xff]  }
  0x32   : > { %633 = vmatprep.subr.bf16.mxu1 %v1008_v12  ;;  %v1061_v38 = vld [vmem:[%s1187_s7 + $0x160] ss:$8 sps:$4 sm:$0xff]   ;;  %v1034_v40 = vld [vmem:[%s1187_s7 + $0x90] ss:$8 sps:$4 sm:$0xff]   ;;  %v1065_v41 = vld [vmem:[%s1187_s7 + $0x174] ss:$8 sps:$4 sm:$0xff]  }
  0x33   : > { %v1074_v39 = vld [vmem:[%s1189_s8 + $0x4] ss:$12 sps:$4 sm:$0xff]   ;;  %v1071_v46 = vld [vmem:[%s1189_s8 + $0x8] ss:$12 sps:$4 sm:$0xff]   ;;  %v1072_v56 = vld [vmem:[%s1189_s8] ss:$12 sps:$4 sm:$0xff]  }
  0x34   : > { %675 = vmatpush1.bf16.msra.mxu0 %v1037_v22  ;;  %v1038_v42 = vld [vmem:[%s1187_s7 + $0xa4] ss:$8 sps:$4 sm:$0xff]   ;;  %659 = vmatprep.mubr.bf16.mxu1 %v1074_v39  ;;  %v1067_v43 = vld [vmem:[%s1187_s7 + $0x170] ss:$8 sps:$4 sm:$0xff]   ;;  %v1040_v44 = vld [vmem:[%s1187_s7 + $0xa0] ss:$8 sps:$4 sm:$0xff]  }
  0x35   : > { %634 = vmatpush1.bf16.msra.mxu1 %v1010_v13  ;;  %676 = vmatprep.subr.bf16.mxu0 %v1041_v24  ;;  %v1044_v45 = vld [vmem:[%s1187_s7 + $0xb4] ss:$8 sps:$4 sm:$0xff]   ;;  %v1046_v47 = vld [vmem:[%s1187_s7 + $0xb0] ss:$8 sps:$4 sm:$0xff]   ;;  %v1050_v48 = vld [vmem:[%s1187_s7 + $0xc4] ss:$8 sps:$4 sm:$0xff]   ;;  %v731_v13 = vlaneseq (!%p944_p11) }
  0x36   : > { %635 = vmatprep.subr.bf16.mxu1 %v1011_v16  ;;  %v1052_v49 = vld [vmem:[%s1187_s7 + $0xc0] ss:$8 sps:$4 sm:$0xff]   ;;  %v1056_v50 = vld [vmem:[%s1187_s7 + $0xd4] ss:$8 sps:$4 sm:$0xff]   ;;  %v1058_v51 = vld [vmem:[%s1187_s7 + $0xd0] ss:$8 sps:$4 sm:$0xff]  }
  0x37   : > { %v1062_v52 = vld [vmem:[%s1187_s7 + $0xe4] ss:$8 sps:$4 sm:$0xff]   ;;  %v1064_v53 = vld [vmem:[%s1187_s7 + $0xe0] ss:$8 sps:$4 sm:$0xff]   ;;  %v1068_v54 = vld [vmem:[%s1187_s7 + $0xf4] ss:$8 sps:$4 sm:$0xff]  }
  0x38   : > { %677 = vmatpush1.bf16.msra.mxu0 %v1043_v26  ;;  %v1070_v55 = vld [vmem:[%s1187_s7 + $0xf0] ss:$8 sps:$4 sm:$0xff]   ;;  %v315_v61 = vld [vmem:[#allocation2] sm:$0xff]  ;;  %v316_v0 = vld [vmem:[#allocation2 + $0x8] sm:$0xff]  ;;  %v732_v14 = vshrl.u32 (!%p944_p11), %v731_v13, 7 }
  0x39   : > { %636 = vmatpush1.bf16.msra.mxu1 %v1013_v19  ;;  %678 = vmatprep.subr.bf16.mxu0 %v1047_v28  ;;  %v317_v3 = vld [vmem:[#allocation2 + $0x10] sm:$0xff]  ;;  %v318_v7 = vld [vmem:[#allocation2 + $0x18] sm:$0xff]  ;;  %v729_v15 = vld [vmem:[%s1276_s2] sm:$0x3] (!%p944_p11) }
  0x3a   : > { %637 = vmatprep.subr.bf16.mxu1 %v1014_v20  ;;  %v733_v17 = vsub.s32 (!%p944_p11), 0, %v732_v14  ;;  %v737_v18 = vsub.s32 (!%p944_p11), 1, %v732_v14 }
  0x3c   : > { %679 = vmatpush1.bf16.msra.mxu0 %v1049_v30  ;;  %v734_v22 = vrot.slane (!%p944_p11), %v729_v15, %v733_v17 }
  0x3d   : > { %638 = vmatpush1.bf16.msra.mxu1 %v1016_v23  ;;  %680 = vmatprep.subr.bf16.mxu0 %v1053_v32  ;;  %v738_v23 = vrot.slane (!%p944_p11), %v729_v15, %v737_v18 }
  0x3e   : > { %639 = vmatprep.subr.bf16.mxu1 %v1017_v25 }
  0x40   : > { %681 = vmatpush1.bf16.msra.mxu0 %v1055_v34 }
  0x41   : > { %640 = vmatpush1.bf16.msra.mxu1 %v1019_v27  ;;  %682 = vmatprep.subr.bf16.mxu0 %v1059_v36 }
  0x42   : > { %641 = vmatprep.subr.bf16.mxu1 %v1020_v29 }
  0x44   : > { %683 = vmatpush1.bf16.msra.mxu0 %v1061_v38 }
  0x45   : > { %642 = vmatpush1.bf16.msra.mxu1 %v1022_v31  ;;  %684 = vmatprep.subr.bf16.mxu0 %v1065_v41 }
  0x46   : > { %643 = vmatprep.subr.bf16.mxu1 %v1026_v33 }
  0x48   : > { %685 = vmatpush1.bf16.msra.mxu0 %v1067_v43 }
  0x49   : > { %644 = vmatpush1.bf16.msra.mxu1 %v1028_v35 }
  0x4a   : > { %645 = vmatprep.subr.bf16.mxu1 %v1032_v37 }
  0x4b   : > { %703 = vmatmul.mubr.bf16.vlgmr.msra.gmra.mrb[0].mxu0 %v1071_v46 }
  0x4d   : > { %646 = vmatpush1.bf16.msra.mxu1 %v1034_v40 }
  0x4e   : > { %647 = vmatprep.subr.bf16.mxu1 %v1038_v42 }
  0x51   : > { %648 = vmatpush1.bf16.msra.mxu1 %v1040_v44 }
  0x52   : > { %649 = vmatprep.subr.bf16.mxu1 %v1044_v45 }
  0x55   : > { %650 = vmatpush1.bf16.msra.mxu1 %v1046_v47 }
  0x56   : > { %651 = vmatprep.subr.bf16.mxu1 %v1050_v48 }
  0x59   : > { %652 = vmatpush1.bf16.msra.mxu1 %v1052_v49 }
  0x5a   : > { %653 = vmatprep.subr.bf16.mxu1 %v1056_v50 }
  0x5d   : > { %654 = vmatpush1.bf16.msra.mxu1 %v1058_v51 }
  0x5e   : > { %655 = vmatprep.subr.bf16.mxu1 %v1062_v52 }
  0x61   : > { %656 = vmatpush1.bf16.msra.mxu1 %v1064_v53 }
  0x62   : > { %657 = vmatprep.subr.bf16.mxu1 %v1068_v54 }
  0x65   : > { %658 = vmatpush1.bf16.msra.mxu1 %v1070_v55 }
  0x68   : > { %660 = vmatmul.mubr.bf16.vlgmr.msra.gmra.mrb[0].mxu1 %v1072_v56 }
 0x11e   : > { %v704_v57 = vpop.f32.mrb[0].mxu0 }
 0x11f   : > { %v706_v58 = vpop.f32.mrb[1].mxu0 }
 0x120   : > { %v708_v59 = vpop.f32.mrb[2].mxu0 }
 0x121   : > { %v710_v60 = vpop.f32.mrb[3].mxu0 }
 0x13b   : > { %v661_v62 = vpop.f32.mrb[0].mxu1 }
 0x13c   : > { %v705_v63 = vadd.f32 %v704_v57, %v661_v62  ;;  %v663_v1 = vpop.f32.mrb[1].mxu1 }
 0x13d   : > { %v707_v2 = vadd.f32 %v706_v58, %v663_v1  ;;  %v665_v4 = vpop.f32.mrb[2].mxu1  ;;  %724 = sbr.rel (%p944_p11) target bundleno = 336 (0x150), region = 66 }
 0x13e   : > { %v713_v5 = vadd.f32 %v705_v63, %v315_v61  ;;  %v709_v6 = vadd.f32 %v708_v59, %v665_v4  ;;  %v667_v8 = vpop.f32.mrb[3].mxu1 }
 0x13f   : > { %v714_v9 = vadd.f32 %v707_v2, %v316_v0  ;;  %v711_v10 = vadd.f32 %v710_v60, %v667_v8 }
 0x140   : > { %717 = vst [vmem:[#allocation2] sm:$0xff] %v713_v5  ;;  %v715_v11 = vadd.f32 %v709_v6, %v317_v3 }
 0x141   : > { %718 = vst [vmem:[#allocation2 + $0x8] sm:$0xff] %v714_v9  ;;  %v716_v12 = vadd.f32 %v711_v10, %v318_v7 }
 0x142   : > { %719 = vst [vmem:[#allocation2 + $0x10] sm:$0xff] %v715_v11 }
 0x143   : > { %720 = vst [vmem:[#allocation2 + $0x18] sm:$0xff] %v716_v12 }
 0x147   : > { %v725_v16 = vld [vmem:[#allocation2] sm:$0xff] }
 0x148   : > { %v726_v19 = vld [vmem:[#allocation2 + $0x8] sm:$0xff]  ;;  %v741_v24 = vadd.f32 %v734_v22, %v725_v16 }
 0x149   : > { %v727_v20 = vld [vmem:[#allocation2 + $0x10] sm:$0xff]  ;;  %v742_v25 = vadd.f32 %v738_v23, %v726_v19 }
 0x14a   : > { %v728_v21 = vld [vmem:[#allocation2 + $0x18] sm:$0xff]  ;;  %v743_v26 = vadd.f32 %v734_v22, %v727_v20  ;;  %v745_v28 = vmax.f32 %v741_v24, 0.0 }
 0x14b   : > { %v744_v27 = vadd.f32 %v738_v23, %v728_v21  ;;  %v746_v29 = vmax.f32 %v742_v25, 0.0 }
 0x14c   : > { %v747_v30 = vmax.f32 %v743_v26, 0.0  ;;  %749 = vst [vmem:[%s1277_s3] sm:$0xff] %v745_v28 }
 0x14d   : > { %v748_v31 = vmax.f32 %v744_v27, 0.0  ;;  %750 = vst [vmem:[%s1277_s3 + $0x8] sm:$0xff] %v746_v29 }
 0x14e   : > { %751 = vst [vmem:[%s1277_s3 + $0x10] sm:$0xff] %v747_v30 }
 0x14f   : > { %752 = vst [vmem:[%s1277_s3 + $0x18] sm:$0xff] %v748_v31 }
 0x150 PF: > { %s13_s16 = sadd.s32 1, %s1113_s16   ;;  %s1278_s12 = smov %s1101_s13 }
 0x151   : > { %p10_p12 = scmp.ge.s32.totalorder %s13_s16, 5   ;;  %s1279_s13 = smov %s1172_s20 }
 0x152   : > { %s1280_s14 = smov %s1109_s15  ;;  %s1281_s15 = smov %s1283_s17 }
 0x153   :  { %12 = sbr.rel (!%p10_p12) target bundleno = 3 (0x3), region = 113 }

// kernel: _lambda_.33
= control target key start
LH: loop header
LB: loop body
LE: loop exit
PB: predicated region body
PF: predicated region fallthrough
CT: control target
= control target key end

     0   :  { %v256_v1 = vmov 0   ;;  %v191_v18 = vlaneseq  ;;  %s343_s1 = inlined_call_operand.vmem [shape: bf16[128,256], index: 1, kind: input, shape index: {}]   ;;  %s344_s0 = inlined_call_operand.vmem [shape: bf16[16,128], index: 0, kind: input, shape index: {}]   ;;  %s345_s2 = inlined_call_operand.vmem [shape: f32[1,256], index: 2, kind: input, shape index: {}]   ;;  %s346_s3 = inlined_call_operand.vmem [shape: f32[16,256], index: 3, kind: output, shape index: {}]  }
   0x1   :  { %v231_v0 = vld [vmem:[%s343_s1 + $0x4] ss:$8 sps:$4 sm:$0xff]   ;;  %163 = vmatprep.mubr.bf16.mxu0 %v256_v1  ;;  %v233_v2 = vld [vmem:[%s343_s1] ss:$8 sps:$4 sm:$0xff]   ;;  %v234_v3 = vld [vmem:[%s343_s1 + $0x14] ss:$8 sps:$4 sm:$0xff]  }
   0x2   :  { %131 = vmatprep.subr.bf16.mxu0 %v231_v0  ;;  %v236_v4 = vld [vmem:[%s343_s1 + $0x10] ss:$8 sps:$4 sm:$0xff]   ;;  %v237_v5 = vld [vmem:[%s343_s1 + $0x24] ss:$8 sps:$4 sm:$0xff]   ;;  %v239_v6 = vld [vmem:[%s343_s1 + $0x20] ss:$8 sps:$4 sm:$0xff]  }
   0x3   :  { %132 = vmatpush1.bf16.msra.mxu0 %v233_v2  ;;  %v240_v7 = vld [vmem:[%s343_s1 + $0x34] ss:$8 sps:$4 sm:$0xff]   ;;  %v242_v8 = vld [vmem:[%s343_s1 + $0x30] ss:$8 sps:$4 sm:$0xff]   ;;  %v243_v9 = vld [vmem:[%s343_s1 + $0x44] ss:$8 sps:$4 sm:$0xff]  }
   0x4   :  { %133 = vmatprep.subr.bf16.mxu0 %v234_v3  ;;  %v245_v10 = vld [vmem:[%s343_s1 + $0x40] ss:$8 sps:$4 sm:$0xff]   ;;  %v246_v11 = vld [vmem:[%s343_s1 + $0x54] ss:$8 sps:$4 sm:$0xff]   ;;  %v248_v12 = vld [vmem:[%s343_s1 + $0x50] ss:$8 sps:$4 sm:$0xff]  }
   0x5   :  { %v249_v13 = vld [vmem:[%s343_s1 + $0x64] ss:$8 sps:$4 sm:$0xff]   ;;  %v251_v14 = vld [vmem:[%s343_s1 + $0x60] ss:$8 sps:$4 sm:$0xff]   ;;  %v252_v15 = vld [vmem:[%s343_s1 + $0x74] ss:$8 sps:$4 sm:$0xff]  }
   0x6   :  { %v254_v16 = vld [vmem:[%s343_s1 + $0x70] ss:$8 sps:$4 sm:$0xff]   ;;  %v255_v17 = vld [vmem:[%s344_s0] sm:$0xff]   ;;  %v192_v19 = vshrl.u32 %v191_v18, 7 }
   0x7   :  { %134 = vmatpush1.bf16.msra.mxu0 %v236_v4  ;;  %v189_v21 = vld [vmem:[%s345_s2] sm:$0x3] }
   0x8   :  { %135 = vmatprep.subr.bf16.mxu0 %v237_v5  ;;  %v193_v20 = vsub.s32 0, %v192_v19  ;;  %v197_v22 = vsub.s32 1, %v192_v19 }
   0xa   :  { %v194_v23 = vrot.slane %v189_v21, %v193_v20  ;;  %v198_v24 = vrot.slane %v189_v21, %v197_v22 }
   0xb   :  { %136 = vmatpush1.bf16.msra.mxu0 %v239_v6 }
   0xc   :  { %137 = vmatprep.subr.bf16.mxu0 %v240_v7 }
   0xf   :  { %138 = vmatpush1.bf16.msra.mxu0 %v242_v8 }
  0x10   :  { %139 = vmatprep.subr.bf16.mxu0 %v243_v9 }
  0x13   :  { %140 = vmatpush1.bf16.msra.mxu0 %v245_v10 }
  0x14   :  { %141 = vmatprep.subr.bf16.mxu0 %v246_v11 }
  0x17   :  { %142 = vmatpush1.bf16.msra.mxu0 %v248_v12 }
  0x18   :  { %143 = vmatprep.subr.bf16.mxu0 %v249_v13 }
  0x1b   :  { %144 = vmatpush1.bf16.msra.mxu0 %v251_v14 }
  0x1c   :  { %145 = vmatprep.subr.bf16.mxu0 %v252_v15 }
  0x1f   :  { %146 = vmatpush1.bf16.msra.mxu0 %v254_v16 }
  0x22   :  { %164 = vmatmul.mubr.bf16.vlgmr.msra.gmra.mrb[0].mxu0 %v255_v17 }
  0xf5   :  { %v165_v25 = vpop.f32.mrb[0].mxu0 }
  0xf6   :  { %v201_v26 = vadd.f32 %v194_v23, %v165_v25  ;;  %v167_v27 = vpop.f32.mrb[1].mxu0 }
  0xf7   :  { %v202_v28 = vadd.f32 %v198_v24, %v167_v27  ;;  %v169_v29 = vpop.f32.mrb[2].mxu0 }
  0xf8   :  { %205 = vst [vmem:[%s346_s3] sm:$0xff] %v201_v26  ;;  %v203_v30 = vadd.f32 %v194_v23, %v169_v29  ;;  %v171_v31 = vpop.f32.mrb[3].mxu0 }
  0xf9   :  { %206 = vst [vmem:[%s346_s3 + $0x8] sm:$0xff] %v202_v28  ;;  %v204_v32 = vadd.f32 %v198_v24, %v171_v31 }
  0xfa   :  { %207 = vst [vmem:[%s346_s3 + $0x10] sm:$0xff] %v203_v30 }
  0xfb   :  { %208 = vst [vmem:[%s346_s3 + $0x18] sm:$0xff] %v204_v32 }

// kernel: _lambda_.35
= control target key start
LH: loop header
LB: loop body
LE: loop exit
PB: predicated region body
PF: predicated region fallthrough
CT: control target
= control target key end

     0   :  { %s1240_s15 = smov 0   ;;  %s1242_s16 = smov 0   ;;  %s1389_s0 = inlined_call_operand.vmem [shape: bf16[16,2304], index: 0, kind: input, shape index: {}]   ;;  %s1390_s1 = inlined_call_operand.vmem [shape: bf16[2304,256], index: 1, kind: input, shape index: {}]   ;;  %s1391_s2 = inlined_call_operand.vmem [shape: f32[1,256], index: 2, kind: input, shape index: {}]   ;;  %s1392_s3 = inlined_call_operand.vmem [shape: f32[16,256], index: 3, kind: input, shape index: {}]   ;;  %s1393_s4 = inlined_call_operand.vmem [shape: f32[16,256], index: 4, kind: output, shape index: {}]  }
   0x1   :  { %s1244_s17 = smov 0   ;;  %s1246_s18 = smov 0  }
   0x2   :  { %s1248_s19 = smov 0  }
   0x3 LB: > { %s26_s20 = sadd.s32 1, %s1207_s18  ;;  %p49_p1 = scmp.ne.s32.totalorder %s1199_s16, %s1195_s15  ;;  %s1211_s19 = sphi %s1248_s19, %s14_s19   ;;  %s1207_s18 = sphi %s1246_s18, %s1397_s18   ;;  %s1203_s17 = sphi %s1244_s17, %s1396_s17   ;;  %s1199_s16 = sphi %s1242_s16, %s1395_s16   ;;  %s1195_s15 = sphi %s1240_s15, %s1394_s15  }
   0x4   : > { %p27_p0 = scmp.ge.s32.totalorder %s26_s20, 6  ;;  %p50_p2 = scmp.eq.s32.totalorder %s1211_s19, 0 }
   0x5   : > { %s42_s22 = sadd.s32 1, %s1199_s16  ;;  %p981_p5 = scmp.ge.s32.totalorder %s1211_s19, 6 }
   0x6   : > { %s1399_s20 = smov (%p27_p0, %s26_s20), 0  ;;  %p51_p3 = por %p50_p2, %p49_p1 }
   0x7   : > { %s38_s21 = ssub.s32 %s1207_s18, %s1399_s20  ;;  %208 = sbr.rel (%p981_p5) target bundleno = 21 (0x15), region = 24 }
   0x8   : > { %p40_p4 = scmp.eq.s32.totalorder %s38_s21, 0 }
   0xa   : > { %s1275_s23 = scalar_select %p40_p4, %s1199_s16, %s42_s22  }
   0xe   : > { %211 = sbr.rel (!%p51_p3) target bundleno = 21 (0x15), region = 28  ;;  %s213_s24 = sand.u32 (%p51_p3), 1, %s1199_s16  }
   0xf   : > { %s1047_s25 = smul.u32 (%p51_p3), 12, %s1207_s18 }
  0x10   : > { %s1053_s26 = smul.u32 (%p51_p3), 24, %s213_s24 }
  0x11   : > { %s221_s29 = scalar_lea.vmem (%p51_p3), %s1389_s0, %s1047_s25 }
  0x12   : > { %v236_v0 = vld [vmem:[%s221_s29] sm:$0xff] (%p51_p3)  ;;  %v238_v1 = vld [vmem:[%s221_s29 + $0x48] sm:$0xff] (%p51_p3)  ;;  %s215_s30 = scalar_lea.vmem (%p51_p3), [#allocation3], %s1053_s26  ;;  %v985_v3 = vld [vmem:[%s221_s29 + $0x50] sm:$0xf] (%p51_p3) }
  0x13   : > { %v983_v2 = vld [vmem:[%s221_s29 + $0x8] sm:$0xf] (%p51_p3)  ;;  %237 = vst [vmem:[%s215_s30] sm:$0xff] (%p51_p3), %v236_v0  ;;  %239 = vst [vmem:[%s215_s30 + $0xc] sm:$0xff] (%p51_p3), %v238_v1 }
  0x14   : > { %984 = vst [vmem:[%s215_s30 + $0x8] sm:$0xf] (%p51_p3), %v983_v2  ;;  %986 = vst [vmem:[%s215_s30 + $0x14] sm:$0xf] (%p51_p3), %v985_v3 }
  0x15 PF: > { %p987_p6 = scmp.ge.s32.totalorder %s1211_s19, 1  ;;  %p270_p7 = scmp.lt.s32.totalorder %s1211_s19, 7 }
  0x17   : > { %p271_p8 = pnand %p987_p6, %p270_p7 }
  0x18   : > { %s277_s5 = sand.u32 (!%p271_p8), 1, %s1195_s15   ;;  %s333_s6 = smul.u32 (!%p271_p8), 48, %s1203_s17 }
  0x19   : > { %274 = sbr.rel (%p271_p8) target bundleno = 338 (0x152), region = 58  ;;  %p990_p10 = scmp.ne.s32.totalorder (!%p271_p8), %s1203_s17, 0 }
  0x1a   : > { %s1054_s7 = smul.u32 (!%p271_p8), 24, %s277_s5  ;;  %p335_p9 = scmp.lt.s32.totalorder (!%p271_p8), %s333_s6, 287 }
  0x1c   : > { %s1292_s12 = scalar_lea.vmem (!%p271_p8), [#allocation3], %s1054_s7 }
  0x20   : > { %s1401_s6 = smov (!%p335_p9, %s333_s6), 287  ;;  %378 = sbr.rel (%p990_p10) target bundleno = 39 (0x27), region = 66 }
  0x21   : > { %s1048_s8 = sshll.u32 %s1401_s6, 3  ;;  %v1213_v4 = vmov (!%p990_p10), 0.0  }
  0x22   : > { %s1290_s11 = scalar_lea.vmem %s1390_s1, %s1048_s8  ;;  %379 = vst [vmem:[#allocation2] sm:$0xff] (!%p990_p10), %v1213_v4  ;;  %380 = vst [vmem:[#allocation2 + $0x8] sm:$0xff] (!%p990_p10), %v1213_v4 }
  0x23   : > { %381 = vst [vmem:[#allocation2 + $0x10] sm:$0xff] (!%p990_p10), %v1213_v4  ;;  %382 = vst [vmem:[#allocation2 + $0x18] sm:$0xff] (!%p990_p10), %v1213_v4 }
  0x27 PF: > { %v1097_v5 = vld [vmem:[%s1290_s11 + $0x4] ss:$8 sps:$4 sm:$0xff]   ;;  %v1099_v6 = vld [vmem:[%s1290_s11] ss:$8 sps:$4 sm:$0xff]   ;;  %v1214_v7 = vmov 0   ;;  %p1042_p11 = scmp.ne.s32.totalorder %s1203_s17, 5 }
  0x28   : > { %770 = vmatprep.mubr.bf16.mxu0 %v1214_v7  ;;  %695 = vmatprep.subr.bf16.mxu1 %v1097_v5  ;;  %v1100_v8 = vld [vmem:[%s1290_s11 + $0x14] ss:$8 sps:$4 sm:$0xff]   ;;  %v1102_v9 = vld [vmem:[%s1290_s11 + $0x10] ss:$8 sps:$4 sm:$0xff]   ;;  %v1103_v10 = vld [vmem:[%s1290_s11 + $0x24] ss:$8 sps:$4 sm:$0xff]  }
  0x29   : > { %696 = vmatpush1.bf16.msra.mxu1 %v1099_v6  ;;  %v1105_v11 = vld [vmem:[%s1290_s11 + $0x20] ss:$8 sps:$4 sm:$0xff]   ;;  %v1106_v12 = vld [vmem:[%s1290_s11 + $0x34] ss:$8 sps:$4 sm:$0xff]   ;;  %v1108_v13 = vld [vmem:[%s1290_s11 + $0x30] ss:$8 sps:$4 sm:$0xff]  }
  0x2a   : > { %697 = vmatprep.subr.bf16.mxu1 %v1100_v8  ;;  %v1121_v14 = vld [vmem:[%s1290_s11 + $0x104] ss:$8 sps:$4 sm:$0xff]   ;;  %v1123_v15 = vld [vmem:[%s1290_s11 + $0x100] ss:$8 sps:$4 sm:$0xff]   ;;  %v1127_v17 = vld [vmem:[%s1290_s11 + $0x114] ss:$8 sps:$4 sm:$0xff]  }
  0x2b   : > { %v1109_v16 = vld [vmem:[%s1290_s11 + $0x44] ss:$8 sps:$4 sm:$0xff]   ;;  %738 = vmatprep.subr.bf16.mxu0 %v1121_v14  ;;  %v1129_v18 = vld [vmem:[%s1290_s11 + $0x110] ss:$8 sps:$4 sm:$0xff]   ;;  %v1111_v19 = vld [vmem:[%s1290_s11 + $0x40] ss:$8 sps:$4 sm:$0xff]  }
  0x2c   : > { %739 = vmatpush1.bf16.msra.mxu0 %v1123_v15  ;;  %v1112_v20 = vld [vmem:[%s1290_s11 + $0x54] ss:$8 sps:$4 sm:$0xff]   ;;  %v1133_v21 = vld [vmem:[%s1290_s11 + $0x124] ss:$8 sps:$4 sm:$0xff]   ;;  %v1135_v22 = vld [vmem:[%s1290_s11 + $0x120] ss:$8 sps:$4 sm:$0xff]  }
  0x2d   : > { %698 = vmatpush1.bf16.msra.mxu1 %v1102_v9  ;;  %740 = vmatprep.subr.bf16.mxu0 %v1127_v17  ;;  %v1114_v23 = vld [vmem:[%s1290_s11 + $0x50] ss:$8 sps:$4 sm:$0xff]   ;;  %v1139_v24 = vld [vmem:[%s1290_s11 + $0x134] ss:$8 sps:$4 sm:$0xff]   ;;  %v1115_v25 = vld [vmem:[%s1290_s11 + $0x64] ss:$8 sps:$4 sm:$0xff]  }
  0x2e   : > { %699 = vmatprep.subr.bf16.mxu1 %v1103_v10  ;;  %v1141_v26 = vld [vmem:[%s1290_s11 + $0x130] ss:$8 sps:$4 sm:$0xff]   ;;  %v1117_v27 = vld [vmem:[%s1290_s11 + $0x60] ss:$8 sps:$4 sm:$0xff]   ;;  %v1145_v28 = vld [vmem:[%s1290_s11 + $0x144] ss:$8 sps:$4 sm:$0xff]  }
  0x2f   : > { %v1118_v29 = vld [vmem:[%s1290_s11 + $0x74] ss:$8 sps:$4 sm:$0xff]   ;;  %v1147_v30 = vld [vmem:[%s1290_s11 + $0x140] ss:$8 sps:$4 sm:$0xff]   ;;  %v1120_v31 = vld [vmem:[%s1290_s11 + $0x70] ss:$8 sps:$4 sm:$0xff]  }
  0x30   : > { %741 = vmatpush1.bf16.msra.mxu0 %v1129_v18  ;;  %v1151_v32 = vld [vmem:[%s1290_s11 + $0x154] ss:$8 sps:$4 sm:$0xff]   ;;  %v1124_v33 = vld [vmem:[%s1290_s11 + $0x84] ss:$8 sps:$4 sm:$0xff]   ;;  %v1153_v34 = vld [vmem:[%s1290_s11 + $0x150] ss:$8 sps:$4 sm:$0xff]  }
  0x31   : > { %700 = vmatpush1.bf16.msra.mxu1 %v1105_v11  ;;  %742 = vmatprep.subr.bf16.mxu0 %v1133_v21  ;;  %v1126_v35 = vld [vmem:[%s1290_s11 + $0x80] ss:$8 sps:$4 sm:$0xff]   ;;  %v1157_v36 = vld [vmem:[%s1290_s11 + $0x164] ss:$8 sps:$4 sm:$0xff]   ;;  %v1130_v37 = vld [vmem:[%s1290_s11 + $0x94] ss:$8 sps:$4 sm:$0xff]  }
  0x32   : > { %701 = vmatprep.subr.bf16.mxu1 %v1106_v12  ;;  %v1159_v38 = vld [vmem:[%s1290_s11 + $0x160] ss:$8 sps:$4 sm:$0xff]   ;;  %v1132_v40 = vld [vmem:[%s1290_s11 + $0x90] ss:$8 sps:$4 sm:$0xff]   ;;  %v1163_v41 = vld [vmem:[%s1290_s11 + $0x174] ss:$8 sps:$4 sm:$0xff]  }
  0x33   : > { %v1172_v39 = vld [vmem:[%s1292_s12 + $0x4] ss:$12 sps:$4 sm:$0xff]   ;;  %v1169_v46 = vld [vmem:[%s1292_s12 + $0x8] ss:$12 sps:$4 sm:$0xff]   ;;  %v1170_v56 = vld [vmem:[%s1292_s12] ss:$12 sps:$4 sm:$0xff]  }
  0x34   : > { %743 = vmatpush1.bf16.msra.mxu0 %v1135_v22  ;;  %v1136_v42 = vld [vmem:[%s1290_s11 + $0xa4] ss:$8 sps:$4 sm:$0xff]   ;;  %727 = vmatprep.mubr.bf16.mxu1 %v1172_v39  ;;  %v1165_v43 = vld [vmem:[%s1290_s11 + $0x170] ss:$8 sps:$4 sm:$0xff]   ;;  %v1138_v44 = vld [vmem:[%s1290_s11 + $0xa0] ss:$8 sps:$4 sm:$0xff]  }
  0x35   : > { %702 = vmatpush1.bf16.msra.mxu1 %v1108_v13  ;;  %744 = vmatprep.subr.bf16.mxu0 %v1139_v24  ;;  %v1142_v45 = vld [vmem:[%s1290_s11 + $0xb4] ss:$8 sps:$4 sm:$0xff]   ;;  %v1144_v47 = vld [vmem:[%s1290_s11 + $0xb0] ss:$8 sps:$4 sm:$0xff]   ;;  %v1148_v48 = vld [vmem:[%s1290_s11 + $0xc4] ss:$8 sps:$4 sm:$0xff]   ;;  %v799_v13 = vlaneseq (!%p1042_p11) }
  0x36   : > { %703 = vmatprep.subr.bf16.mxu1 %v1109_v16  ;;  %v1150_v49 = vld [vmem:[%s1290_s11 + $0xc0] ss:$8 sps:$4 sm:$0xff]   ;;  %v1154_v50 = vld [vmem:[%s1290_s11 + $0xd4] ss:$8 sps:$4 sm:$0xff]   ;;  %v1156_v51 = vld [vmem:[%s1290_s11 + $0xd0] ss:$8 sps:$4 sm:$0xff]  }
  0x37   : > { %v1160_v52 = vld [vmem:[%s1290_s11 + $0xe4] ss:$8 sps:$4 sm:$0xff]   ;;  %v1162_v53 = vld [vmem:[%s1290_s11 + $0xe0] ss:$8 sps:$4 sm:$0xff]   ;;  %v1166_v54 = vld [vmem:[%s1290_s11 + $0xf4] ss:$8 sps:$4 sm:$0xff]  }
  0x38   : > { %745 = vmatpush1.bf16.msra.mxu0 %v1141_v26  ;;  %v1168_v55 = vld [vmem:[%s1290_s11 + $0xf0] ss:$8 sps:$4 sm:$0xff]   ;;  %v383_v61 = vld [vmem:[#allocation2] sm:$0xff]  ;;  %v384_v0 = vld [vmem:[#allocation2 + $0x8] sm:$0xff]  ;;  %v800_v14 = vshrl.u32 (!%p1042_p11), %v799_v13, 7 }
  0x39   : > { %704 = vmatpush1.bf16.msra.mxu1 %v1111_v19  ;;  %746 = vmatprep.subr.bf16.mxu0 %v1145_v28  ;;  %v385_v3 = vld [vmem:[#allocation2 + $0x10] sm:$0xff]  ;;  %v386_v7 = vld [vmem:[#allocation2 + $0x18] sm:$0xff]  ;;  %v797_v15 = vld [vmem:[%s1391_s2] sm:$0x3] (!%p1042_p11) }
  0x3a   : > { %705 = vmatprep.subr.bf16.mxu1 %v1112_v20  ;;  %v801_v17 = vsub.s32 (!%p1042_p11), 0, %v800_v14  ;;  %v805_v18 = vsub.s32 (!%p1042_p11), 1, %v800_v14  ;;  %v815_v26 = vld [vmem:[%s1392_s3 + $0x10] sm:$0xff] (!%p1042_p11) }
  0x3c   : > { %747 = vmatpush1.bf16.msra.mxu0 %v1147_v30  ;;  %v802_v22 = vrot.slane (!%p1042_p11), %v797_v15, %v801_v17  ;;  %v806_v24 = vrot.slane (!%p1042_p11), %v797_v15, %v805_v18 }
  0x3d   : > { %706 = vmatpush1.bf16.msra.mxu1 %v1114_v23  ;;  %748 = vmatprep.subr.bf16.mxu0 %v1151_v32  ;;  %v813_v23 = vld [vmem:[%s1392_s3] sm:$0xff] (!%p1042_p11) }
  0x3e   : > { %707 = vmatprep.subr.bf16.mxu1 %v1115_v25  ;;  %v814_v25 = vld [vmem:[%s1392_s3 + $0x8] sm:$0xff] (!%p1042_p11) }
  0x40   : > { %749 = vmatpush1.bf16.msra.mxu0 %v1153_v34 }
  0x41   : > { %708 = vmatpush1.bf16.msra.mxu1 %v1117_v27  ;;  %750 = vmatprep.subr.bf16.mxu0 %v1157_v36  ;;  %v816_v27 = vld [vmem:[%s1392_s3 + $0x18] sm:$0xff] (!%p1042_p11) }
  0x42   : > { %709 = vmatprep.subr.bf16.mxu1 %v1118_v29 }
  0x44   : > { %751 = vmatpush1.bf16.msra.mxu0 %v1159_v38 }
  0x45   : > { %710 = vmatpush1.bf16.msra.mxu1 %v1120_v31  ;;  %752 = vmatprep.subr.bf16.mxu0 %v1163_v41 }
  0x46   : > { %711 = vmatprep.subr.bf16.mxu1 %v1124_v33 }
  0x48   : > { %753 = vmatpush1.bf16.msra.mxu0 %v1165_v43 }
  0x49   : > { %712 = vmatpush1.bf16.msra.mxu1 %v1126_v35 }
  0x4a   : > { %713 = vmatprep.subr.bf16.mxu1 %v1130_v37 }
  0x4b   : > { %771 = vmatmul.mubr.bf16.vlgmr.msra.gmra.mrb[0].mxu0 %v1169_v46 }
  0x4d   : > { %714 = vmatpush1.bf16.msra.mxu1 %v1132_v40 }
  0x4e   : > { %715 = vmatprep.subr.bf16.mxu1 %v1136_v42 }
  0x51   : > { %716 = vmatpush1.bf16.msra.mxu1 %v1138_v44 }
  0x52   : > { %717 = vmatprep.subr.bf16.mxu1 %v1142_v45 }
  0x55   : > { %718 = vmatpush1.bf16.msra.mxu1 %v1144_v47 }
  0x56   : > { %719 = vmatprep.subr.bf16.mxu1 %v1148_v48 }
  0x59   : > { %720 = vmatpush1.bf16.msra.mxu1 %v1150_v49 }
  0x5a   : > { %721 = vmatprep.subr.bf16.mxu1 %v1154_v50 }
  0x5d   : > { %722 = vmatpush1.bf16.msra.mxu1 %v1156_v51 }
  0x5e   : > { %723 = vmatprep.subr.bf16.mxu1 %v1160_v52 }
  0x61   : > { %724 = vmatpush1.bf16.msra.mxu1 %v1162_v53 }
  0x62   : > { %725 = vmatprep.subr.bf16.mxu1 %v1166_v54 }
  0x65   : > { %726 = vmatpush1.bf16.msra.mxu1 %v1168_v55 }
  0x68   : > { %728 = vmatmul.mubr.bf16.vlgmr.msra.gmra.mrb[0].mxu1 %v1170_v56 }
 0x11e   : > { %v772_v57 = vpop.f32.mrb[0].mxu0 }
 0x11f   : > { %v774_v58 = vpop.f32.mrb[1].mxu0 }
 0x120   : > { %v776_v59 = vpop.f32.mrb[2].mxu0 }
 0x121   : > { %v778_v60 = vpop.f32.mrb[3].mxu0 }
 0x13b   : > { %v729_v62 = vpop.f32.mrb[0].mxu1 }
 0x13c   : > { %v773_v63 = vadd.f32 %v772_v57, %v729_v62  ;;  %v731_v1 = vpop.f32.mrb[1].mxu1 }
 0x13d   : > { %v775_v2 = vadd.f32 %v774_v58, %v731_v1  ;;  %v733_v4 = vpop.f32.mrb[2].mxu1  ;;  %792 = sbr.rel (%p1042_p11) target bundleno = 338 (0x152), region = 70 }
 0x13e   : > { %v781_v5 = vadd.f32 %v773_v63, %v383_v61  ;;  %v777_v6 = vadd.f32 %v776_v59, %v733_v4  ;;  %v735_v8 = vpop.f32.mrb[3].mxu1 }
 0x13f   : > { %v782_v9 = vadd.f32 %v775_v2, %v384_v0  ;;  %v779_v10 = vadd.f32 %v778_v60, %v735_v8 }
 0x140   : > { %785 = vst [vmem:[#allocation2] sm:$0xff] %v781_v5  ;;  %v783_v11 = vadd.f32 %v777_v6, %v385_v3 }
 0x141   : > { %786 = vst [vmem:[#allocation2 + $0x8] sm:$0xff] %v782_v9  ;;  %v784_v12 = vadd.f32 %v779_v10, %v386_v7 }
 0x142   : > { %787 = vst [vmem:[#allocation2 + $0x10] sm:$0xff] %v783_v11 }
 0x143   : > { %788 = vst [vmem:[#allocation2 + $0x18] sm:$0xff] %v784_v12 }
 0x147   : > { %v793_v16 = vld [vmem:[#allocation2] sm:$0xff] }
 0x148   : > { %v794_v19 = vld [vmem:[#allocation2 + $0x8] sm:$0xff]  ;;  %v809_v28 = vadd.f32 %v802_v22, %v793_v16 }
 0x149   : > { %v795_v20 = vld [vmem:[#allocation2 + $0x10] sm:$0xff]  ;;  %v810_v29 = vadd.f32 %v806_v24, %v794_v19 }
 0x14a   : > { %v796_v21 = vld [vmem:[#allocation2 + $0x18] sm:$0xff]  ;;  %v811_v30 = vadd.f32 %v802_v22, %v795_v20  ;;  %v817_v32 = vadd.f32 %v813_v23, %v809_v28 }
 0x14b   : > { %v812_v31 = vadd.f32 %v806_v24, %v796_v21  ;;  %v818_v33 = vadd.f32 %v814_v25, %v810_v29 }
 0x14c   : > { %v819_v34 = vadd.f32 %v815_v26, %v811_v30  ;;  %v821_v36 = vmax.f32 %v817_v32, 0.0 }
 0x14d   : > { %v820_v35 = vadd.f32 %v816_v27, %v812_v31  ;;  %v822_v37 = vmax.f32 %v818_v33, 0.0 }
 0x14e   : > { %v823_v38 = vmax.f32 %v819_v34, 0.0  ;;  %825 = vst [vmem:[%s1393_s4] sm:$0xff] %v821_v36 }
 0x14f   : > { %v824_v39 = vmax.f32 %v820_v35, 0.0  ;;  %826 = vst [vmem:[%s1393_s4 + $0x8] sm:$0xff] %v822_v37 }
 0x150   : > { %827 = vst [vmem:[%s1393_s4 + $0x10] sm:$0xff] %v823_v38 }
 0x151   : > { %828 = vst [vmem:[%s1393_s4 + $0x18] sm:$0xff] %v824_v39 }
 0x152 PF: > { %s14_s19 = sadd.s32 1, %s1211_s19   ;;  %s1394_s15 = smov %s1199_s16 }
 0x153   : > { %p11_p12 = scmp.ge.s32.totalorder %s14_s19, 8   ;;  %s1395_s16 = smov %s1275_s23 }
 0x154   : > { %s1396_s17 = smov %s1207_s18  ;;  %s1397_s18 = smov %s1399_s20 }
 0x155   :  { %13 = sbr.rel (!%p11_p12) target bundleno = 3 (0x3), region = 120 }

// kernel: _lambda_.36
= control target key start
LH: loop header
LB: loop body
LE: loop exit
PB: predicated region body
PF: predicated region fallthrough
CT: control target
= control target key end

     0   :  { %s1137_s12 = smov 0   ;;  %s1139_s13 = smov 0   ;;  %s1274_s0 = inlined_call_operand.vmem [shape: bf16[16,2304], index: 0, kind: input, shape index: {}]   ;;  %s1275_s1 = inlined_call_operand.vmem [shape: bf16[2304,256], index: 1, kind: input, shape index: {}]   ;;  %s1276_s2 = inlined_call_operand.vmem [shape: f32[1,256], index: 2, kind: input, shape index: {}]   ;;  %s1277_s3 = inlined_call_operand.vmem [shape: f32[16,256], index: 3, kind: output, shape index: {}]  }
   0x1   :  { %s1141_s14 = smov 0   ;;  %s1143_s15 = smov 0  }
   0x2   :  { %s1145_s16 = smov 0  }
   0x3 LB: > { %s25_s17 = sadd.s32 1, %s1109_s15  ;;  %p48_p1 = scmp.ne.s32.totalorder %s1101_s13, %s1097_s12  ;;  %s1113_s16 = sphi %s1145_s16, %s13_s16   ;;  %s1109_s15 = sphi %s1143_s15, %s1281_s15   ;;  %s1105_s14 = sphi %s1141_s14, %s1280_s14   ;;  %s1101_s13 = sphi %s1139_s13, %s1279_s13   ;;  %s1097_s12 = sphi %s1137_s12, %s1278_s12  }
   0x4   : > { %p26_p0 = scmp.ge.s32.totalorder %s25_s17, 6  ;;  %p49_p2 = scmp.eq.s32.totalorder %s1113_s16, 0 }
   0x5   : > { %s41_s19 = sadd.s32 1, %s1101_s13  ;;  %p883_p5 = scmp.ge.s32.totalorder %s1113_s16, 6 }
   0x6   : > { %s1283_s17 = smov (%p26_p0, %s25_s17), 0  ;;  %p50_p3 = por %p49_p2, %p48_p1 }
   0x7   : > { %s37_s18 = ssub.s32 %s1109_s15, %s1283_s17  ;;  %164 = sbr.rel (%p883_p5) target bundleno = 21 (0x15), region = 20 }
   0x8   : > { %p39_p4 = scmp.eq.s32.totalorder %s37_s18, 0 }
   0xa   : > { %s1172_s20 = scalar_select %p39_p4, %s1101_s13, %s41_s19  }
   0xe   : > { %167 = sbr.rel (!%p50_p3) target bundleno = 21 (0x15), region = 24  ;;  %s169_s21 = sand.u32 (%p50_p3), 1, %s1101_s13  }
   0xf   : > { %s949_s22 = smul.u32 (%p50_p3), 12, %s1109_s15 }
  0x10   : > { %s955_s23 = smul.u32 (%p50_p3), 24, %s169_s21 }
  0x11   : > { %s177_s26 = scalar_lea.vmem (%p50_p3), %s1274_s0, %s949_s22 }
  0x12   : > { %v192_v0 = vld [vmem:[%s177_s26] sm:$0xff] (%p50_p3)  ;;  %v194_v1 = vld [vmem:[%s177_s26 + $0x48] sm:$0xff] (%p50_p3)  ;;  %s171_s27 = scalar_lea.vmem (%p50_p3), [#allocation3], %s955_s23  ;;  %v887_v3 = vld [vmem:[%s177_s26 + $0x50] sm:$0xf] (%p50_p3) }
  0x13   : > { %v885_v2 = vld [vmem:[%s177_s26 + $0x8] sm:$0xf] (%p50_p3)  ;;  %193 = vst [vmem:[%s171_s27] sm:$0xff] (%p50_p3), %v192_v0  ;;  %195 = vst [vmem:[%s171_s27 + $0xc] sm:$0xff] (%p50_p3), %v194_v1 }
  0x14   : > { %886 = vst [vmem:[%s171_s27 + $0x8] sm:$0xf] (%p50_p3), %v885_v2  ;;  %888 = vst [vmem:[%s171_s27 + $0x14] sm:$0xf] (%p50_p3), %v887_v3 }
  0x15 PF: > { %p889_p6 = scmp.ge.s32.totalorder %s1113_s16, 1  ;;  %p226_p7 = scmp.lt.s32.totalorder %s1113_s16, 7 }
  0x17   : > { %p227_p8 = pnand %p889_p6, %p226_p7 }
  0x18   : > { %s233_s28 = sand.u32 (!%p227_p8), 1, %s1097_s12   ;;  %s277_s29 = smul.u32 (!%p227_p8), 48, %s1105_s14 }
  0x19   : > { %230 = sbr.rel (%p227_p8) target bundleno = 336 (0x150), region = 54  ;;  %p892_p10 = scmp.ne.s32.totalorder (!%p227_p8), %s1105_s14, 0 }
  0x1a   : > { %s956_s30 = smul.u32 (!%p227_p8), 24, %s233_s28  ;;  %p279_p9 = scmp.lt.s32.totalorder (!%p227_p8), %s277_s29, 287 }
  0x1c   : > { %s1189_s8 = scalar_lea.vmem (!%p227_p8), [#allocation3], %s956_s30 }
  0x20   : > { %s1285_s29 = smov (!%p279_p9, %s277_s29), 287  ;;  %310 = sbr.rel (%p892_p10) target bundleno = 39 (0x27), region = 62 }
  0x21   : > { %s950_s4 = sshll.u32 %s1285_s29, 3  ;;  %v1115_v4 = vmov (!%p892_p10), 0.0  }
  0x22   : > { %s1187_s7 = scalar_lea.vmem %s1275_s1, %s950_s4  ;;  %311 = vst [vmem:[#allocation2] sm:$0xff] (!%p892_p10), %v1115_v4  ;;  %312 = vst [vmem:[#allocation2 + $0x8] sm:$0xff] (!%p892_p10), %v1115_v4 }
  0x23   : > { %313 = vst [vmem:[#allocation2 + $0x10] sm:$0xff] (!%p892_p10), %v1115_v4  ;;  %314 = vst [vmem:[#allocation2 + $0x18] sm:$0xff] (!%p892_p10), %v1115_v4 }
  0x27 PF: > { %v999_v5 = vld [vmem:[%s1187_s7 + $0x4] ss:$8 sps:$4 sm:$0xff]   ;;  %v1001_v6 = vld [vmem:[%s1187_s7] ss:$8 sps:$4 sm:$0xff]   ;;  %v1116_v7 = vmov 0   ;;  %p944_p11 = scmp.ne.s32.totalorder %s1105_s14, 5 }
  0x28   : > { %702 = vmatprep.mubr.bf16.mxu0 %v1116_v7  ;;  %627 = vmatprep.subr.bf16.mxu1 %v999_v5  ;;  %v1002_v8 = vld [vmem:[%s1187_s7 + $0x14] ss:$8 sps:$4 sm:$0xff]   ;;  %v1004_v9 = vld [vmem:[%s1187_s7 + $0x10] ss:$8 sps:$4 sm:$0xff]   ;;  %v1005_v10 = vld [vmem:[%s1187_s7 + $0x24] ss:$8 sps:$4 sm:$0xff]  }
  0x29   : > { %628 = vmatpush1.bf16.msra.mxu1 %v1001_v6  ;;  %v1007_v11 = vld [vmem:[%s1187_s7 + $0x20] ss:$8 sps:$4 sm:$0xff]   ;;  %v1008_v12 = vld [vmem:[%s1187_s7 + $0x34] ss:$8 sps:$4 sm:$0xff]   ;;  %v1010_v13 = vld [vmem:[%s1187_s7 + $0x30] ss:$8 sps:$4 sm:$0xff]  }
  0x2a   : > { %629 = vmatprep.subr.bf16.mxu1 %v1002_v8  ;;  %v1023_v14 = vld [vmem:[%s1187_s7 + $0x104] ss:$8 sps:$4 sm:$0xff]   ;;  %v1025_v15 = vld [vmem:[%s1187_s7 + $0x100] ss:$8 sps:$4 sm:$0xff]   ;;  %v1029_v17 = vld [vmem:[%s1187_s7 + $0x114] ss:$8 sps:$4 sm:$0xff]  }
  0x2b   : > { %v1011_v16 = vld [vmem:[%s1187_s7 + $0x44] ss:$8 sps:$4 sm:$0xff]   ;;  %670 = vmatprep.subr.bf16.mxu0 %v1023_v14  ;;  %v1031_v18 = vld [vmem:[%s1187_s7 + $0x110] ss:$8 sps:$4 sm:$0xff]   ;;  %v1013_v19 = vld [vmem:[%s1187_s7 + $0x40] ss:$8 sps:$4 sm:$0xff]  }
  0x2c   : > { %671 = vmatpush1.bf16.msra.mxu0 %v1025_v15  ;;  %v1014_v20 = vld [vmem:[%s1187_s7 + $0x54] ss:$8 sps:$4 sm:$0xff]   ;;  %v1035_v21 = vld [vmem:[%s1187_s7 + $0x124] ss:$8 sps:$4 sm:$0xff]   ;;  %v1037_v22 = vld [vmem:[%s1187_s7 + $0x120] ss:$8 sps:$4 sm:$0xff]  }
  0x2d   : > { %630 = vmatpush1.bf16.msra.mxu1 %v1004_v9  ;;  %672 = vmatprep.subr.bf16.mxu0 %v1029_v17  ;;  %v1016_v23 = vld [vmem:[%s1187_s7 + $0x50] ss:$8 sps:$4 sm:$0xff]   ;;  %v1041_v24 = vld [vmem:[%s1187_s7 + $0x134] ss:$8 sps:$4 sm:$0xff]   ;;  %v1017_v25 = vld [vmem:[%s1187_s7 + $0x64] ss:$8 sps:$4 sm:$0xff]  }
  0x2e   : > { %631 = vmatprep.subr.bf16.mxu1 %v1005_v10  ;;  %v1043_v26 = vld [vmem:[%s1187_s7 + $0x130] ss:$8 sps:$4 sm:$0xff]   ;;  %v1019_v27 = vld [vmem:[%s1187_s7 + $0x60] ss:$8 sps:$4 sm:$0xff]   ;;  %v1047_v28 = vld [vmem:[%s1187_s7 + $0x144] ss:$8 sps:$4 sm:$0xff]  }
  0x2f   : > { %v1020_v29 = vld [vmem:[%s1187_s7 + $0x74] ss:$8 sps:$4 sm:$0xff]   ;;  %v1049_v30 = vld [vmem:[%s1187_s7 + $0x140] ss:$8 sps:$4 sm:$0xff]   ;;  %v1022_v31 = vld [vmem:[%s1187_s7 + $0x70] ss:$8 sps:$4 sm:$0xff]  }
  0x30   : > { %673 = vmatpush1.bf16.msra.mxu0 %v1031_v18  ;;  %v1053_v32 = vld [vmem:[%s1187_s7 + $0x154] ss:$8 sps:$4 sm:$0xff]   ;;  %v1026_v33 = vld [vmem:[%s1187_s7 + $0x84] ss:$8 sps:$4 sm:$0xff]   ;;  %v1055_v34 = vld [vmem:[%s1187_s7 + $0x150] ss:$8 sps:$4 sm:$0xff]  }
  0x31   : > { %632 = vmatpush1.bf16.msra.mxu1 %v1007_v11  ;;  %674 = vmatprep.subr.bf16.mxu0 %v1035_v21  ;;  %v1028_v35 = vld [vmem:[%s1187_s7 + $0x80] ss:$8 sps:$4 sm:$0xff]   ;;  %v1059_v36 = vld [vmem:[%s1187_s7 + $0x164] ss:$8 sps:$4 sm:$0xff]   ;;  %v1032_v37 = vld [vmem:[%s1187_s7 + $0x94] ss:$8 sps:$4 sm:$0xff]  }
  0x32   : > { %633 = vmatprep.subr.bf16.mxu1 %v1008_v12  ;;  %v1061_v38 = vld [vmem:[%s1187_s7 + $0x160] ss:$8 sps:$4 sm:$0xff]   ;;  %v1034_v40 = vld [vmem:[%s1187_s7 + $0x90] ss:$8 sps:$4 sm:$0xff]   ;;  %v1065_v41 = vld [vmem:[%s1187_s7 + $0x174] ss:$8 sps:$4 sm:$0xff]  }
  0x33   : > { %v1074_v39 = vld [vmem:[%s1189_s8 + $0x4] ss:$12 sps:$4 sm:$0xff]   ;;  %v1071_v46 = vld [vmem:[%s1189_s8 + $0x8] ss:$12 sps:$4 sm:$0xff]   ;;  %v1072_v56 = vld [vmem:[%s1189_s8] ss:$12 sps:$4 sm:$0xff]  }
  0x34   : > { %675 = vmatpush1.bf16.msra.mxu0 %v1037_v22  ;;  %v1038_v42 = vld [vmem:[%s1187_s7 + $0xa4] ss:$8 sps:$4 sm:$0xff]   ;;  %659 = vmatprep.mubr.bf16.mxu1 %v1074_v39  ;;  %v1067_v43 = vld [vmem:[%s1187_s7 + $0x170] ss:$8 sps:$4 sm:$0xff]   ;;  %v1040_v44 = vld [vmem:[%s1187_s7 + $0xa0] ss:$8 sps:$4 sm:$0xff]  }
  0x35   : > { %634 = vmatpush1.bf16.msra.mxu1 %v1010_v13  ;;  %676 = vmatprep.subr.bf16.mxu0 %v1041_v24  ;;  %v1044_v45 = vld [vmem:[%s1187_s7 + $0xb4] ss:$8 sps:$4 sm:$0xff]   ;;  %v1046_v47 = vld [vmem:[%s1187_s7 + $0xb0] ss:$8 sps:$4 sm:$0xff]   ;;  %v1050_v48 = vld [vmem:[%s1187_s7 + $0xc4] ss:$8 sps:$4 sm:$0xff]   ;;  %v731_v13 = vlaneseq (!%p944_p11) }
  0x36   : > { %635 = vmatprep.subr.bf16.mxu1 %v1011_v16  ;;  %v1052_v49 = vld [vmem:[%s1187_s7 + $0xc0] ss:$8 sps:$4 sm:$0xff]   ;;  %v1056_v50 = vld [vmem:[%s1187_s7 + $0xd4] ss:$8 sps:$4 sm:$0xff]   ;;  %v1058_v51 = vld [vmem:[%s1187_s7 + $0xd0] ss:$8 sps:$4 sm:$0xff]  }
  0x37   : > { %v1062_v52 = vld [vmem:[%s1187_s7 + $0xe4] ss:$8 sps:$4 sm:$0xff]   ;;  %v1064_v53 = vld [vmem:[%s1187_s7 + $0xe0] ss:$8 sps:$4 sm:$0xff]   ;;  %v1068_v54 = vld [vmem:[%s1187_s7 + $0xf4] ss:$8 sps:$4 sm:$0xff]  }
  0x38   : > { %677 = vmatpush1.bf16.msra.mxu0 %v1043_v26  ;;  %v1070_v55 = vld [vmem:[%s1187_s7 + $0xf0] ss:$8 sps:$4 sm:$0xff]   ;;  %v315_v61 = vld [vmem:[#allocation2] sm:$0xff]  ;;  %v316_v0 = vld [vmem:[#allocation2 + $0x8] sm:$0xff]  ;;  %v732_v14 = vshrl.u32 (!%p944_p11), %v731_v13, 7 }
  0x39   : > { %636 = vmatpush1.bf16.msra.mxu1 %v1013_v19  ;;  %678 = vmatprep.subr.bf16.mxu0 %v1047_v28  ;;  %v317_v3 = vld [vmem:[#allocation2 + $0x10] sm:$0xff]  ;;  %v318_v7 = vld [vmem:[#allocation2 + $0x18] sm:$0xff]  ;;  %v729_v15 = vld [vmem:[%s1276_s2] sm:$0x3] (!%p944_p11) }
  0x3a   : > { %637 = vmatprep.subr.bf16.mxu1 %v1014_v20  ;;  %v733_v17 = vsub.s32 (!%p944_p11), 0, %v732_v14  ;;  %v737_v18 = vsub.s32 (!%p944_p11), 1, %v732_v14 }
  0x3c   : > { %679 = vmatpush1.bf16.msra.mxu0 %v1049_v30  ;;  %v734_v22 = vrot.slane (!%p944_p11), %v729_v15, %v733_v17 }
  0x3d   : > { %638 = vmatpush1.bf16.msra.mxu1 %v1016_v23  ;;  %680 = vmatprep.subr.bf16.mxu0 %v1053_v32  ;;  %v738_v23 = vrot.slane (!%p944_p11), %v729_v15, %v737_v18 }
  0x3e   : > { %639 = vmatprep.subr.bf16.mxu1 %v1017_v25 }
  0x40   : > { %681 = vmatpush1.bf16.msra.mxu0 %v1055_v34 }
  0x41   : > { %640 = vmatpush1.bf16.msra.mxu1 %v1019_v27  ;;  %682 = vmatprep.subr.bf16.mxu0 %v1059_v36 }
  0x42   : > { %641 = vmatprep.subr.bf16.mxu1 %v1020_v29 }
  0x44   : > { %683 = vmatpush1.bf16.msra.mxu0 %v1061_v38 }
  0x45   : > { %642 = vmatpush1.bf16.msra.mxu1 %v1022_v31  ;;  %684 = vmatprep.subr.bf16.mxu0 %v1065_v41 }
  0x46   : > { %643 = vmatprep.subr.bf16.mxu1 %v1026_v33 }
  0x48   : > { %685 = vmatpush1.bf16.msra.mxu0 %v1067_v43 }
  0x49   : > { %644 = vmatpush1.bf16.msra.mxu1 %v1028_v35 }
  0x4a   : > { %645 = vmatprep.subr.bf16.mxu1 %v1032_v37 }
  0x4b   : > { %703 = vmatmul.mubr.bf16.vlgmr.msra.gmra.mrb[0].mxu0 %v1071_v46 }
  0x4d   : > { %646 = vmatpush1.bf16.msra.mxu1 %v1034_v40 }
  0x4e   : > { %647 = vmatprep.subr.bf16.mxu1 %v1038_v42 }
  0x51   : > { %648 = vmatpush1.bf16.msra.mxu1 %v1040_v44 }
  0x52   : > { %649 = vmatprep.subr.bf16.mxu1 %v1044_v45 }
  0x55   : > { %650 = vmatpush1.bf16.msra.mxu1 %v1046_v47 }
  0x56   : > { %651 = vmatprep.subr.bf16.mxu1 %v1050_v48 }
  0x59   : > { %652 = vmatpush1.bf16.msra.mxu1 %v1052_v49 }
  0x5a   : > { %653 = vmatprep.subr.bf16.mxu1 %v1056_v50 }
  0x5d   : > { %654 = vmatpush1.bf16.msra.mxu1 %v1058_v51 }
  0x5e   : > { %655 = vmatprep.subr.bf16.mxu1 %v1062_v52 }
  0x61   : > { %656 = vmatpush1.bf16.msra.mxu1 %v1064_v53 }
  0x62   : > { %657 = vmatprep.subr.bf16.mxu1 %v1068_v54 }
  0x65   : > { %658 = vmatpush1.bf16.msra.mxu1 %v1070_v55 }
  0x68   : > { %660 = vmatmul.mubr.bf16.vlgmr.msra.gmra.mrb[0].mxu1 %v1072_v56 }
 0x11e   : > { %v704_v57 = vpop.f32.mrb[0].mxu0 }
 0x11f   : > { %v706_v58 = vpop.f32.mrb[1].mxu0 }
 0x120   : > { %v708_v59 = vpop.f32.mrb[2].mxu0 }
 0x121   : > { %v710_v60 = vpop.f32.mrb[3].mxu0 }
 0x13b   : > { %v661_v62 = vpop.f32.mrb[0].mxu1 }
 0x13c   : > { %v705_v63 = vadd.f32 %v704_v57, %v661_v62  ;;  %v663_v1 = vpop.f32.mrb[1].mxu1 }
 0x13d   : > { %v707_v2 = vadd.f32 %v706_v58, %v663_v1  ;;  %v665_v4 = vpop.f32.mrb[2].mxu1  ;;  %724 = sbr.rel (%p944_p11) target bundleno = 336 (0x150), region = 66 }
 0x13e   : > { %v713_v5 = vadd.f32 %v705_v63, %v315_v61  ;;  %v709_v6 = vadd.f32 %v708_v59, %v665_v4  ;;  %v667_v8 = vpop.f32.mrb[3].mxu1 }
 0x13f   : > { %v714_v9 = vadd.f32 %v707_v2, %v316_v0  ;;  %v711_v10 = vadd.f32 %v710_v60, %v667_v8 }
 0x140   : > { %717 = vst [vmem:[#allocation2] sm:$0xff] %v713_v5  ;;  %v715_v11 = vadd.f32 %v709_v6, %v317_v3 }
 0x141   : > { %718 = vst [vmem:[#allocation2 + $0x8] sm:$0xff] %v714_v9  ;;  %v716_v12 = vadd.f32 %v711_v10, %v318_v7 }
 0x142   : > { %719 = vst [vmem:[#allocation2 + $0x10] sm:$0xff] %v715_v11 }
 0x143   : > { %720 = vst [vmem:[#allocation2 + $0x18] sm:$0xff] %v716_v12 }
 0x147   : > { %v725_v16 = vld [vmem:[#allocation2] sm:$0xff] }
 0x148   : > { %v726_v19 = vld [vmem:[#allocation2 + $0x8] sm:$0xff]  ;;  %v741_v24 = vadd.f32 %v734_v22, %v725_v16 }
 0x149   : > { %v727_v20 = vld [vmem:[#allocation2 + $0x10] sm:$0xff]  ;;  %v742_v25 = vadd.f32 %v738_v23, %v726_v19 }
 0x14a   : > { %v728_v21 = vld [vmem:[#allocation2 + $0x18] sm:$0xff]  ;;  %v743_v26 = vadd.f32 %v734_v22, %v727_v20  ;;  %v745_v28 = vmax.f32 %v741_v24, 0.0 }
 0x14b   : > { %v744_v27 = vadd.f32 %v738_v23, %v728_v21  ;;  %v746_v29 = vmax.f32 %v742_v25, 0.0 }
 0x14c   : > { %v747_v30 = vmax.f32 %v743_v26, 0.0  ;;  %749 = vst [vmem:[%s1277_s3] sm:$0xff] %v745_v28 }
 0x14d   : > { %v748_v31 = vmax.f32 %v744_v27, 0.0  ;;  %750 = vst [vmem:[%s1277_s3 + $0x8] sm:$0xff] %v746_v29 }
 0x14e   : > { %751 = vst [vmem:[%s1277_s3 + $0x10] sm:$0xff] %v747_v30 }
 0x14f   : > { %752 = vst [vmem:[%s1277_s3 + $0x18] sm:$0xff] %v748_v31 }
 0x150 PF: > { %s13_s16 = sadd.s32 1, %s1113_s16   ;;  %s1278_s12 = smov %s1101_s13 }
 0x151   : > { %p10_p12 = scmp.ge.s32.totalorder %s13_s16, 8   ;;  %s1279_s13 = smov %s1172_s20 }
 0x152   : > { %s1280_s14 = smov %s1109_s15  ;;  %s1281_s15 = smov %s1283_s17 }
 0x153   :  { %12 = sbr.rel (!%p10_p12) target bundleno = 3 (0x3), region = 113 }

// kernel: _lambda_.39
= control target key start
LH: loop header
LB: loop body
LE: loop exit
PB: predicated region body
PF: predicated region fallthrough
CT: control target
= control target key end

     0   :  { %s1790_s0 = inlined_call_operand.vmem [shape: bf16[16,2304], index: 0, kind: input, shape index: {}]   ;;  %s1791_s1 = inlined_call_operand.vmem [shape: bf16[2304,512], index: 1, kind: input, shape index: {}]   ;;  %s1792_s2 = inlined_call_operand.vmem [shape: f32[1,512], index: 2, kind: input, shape index: {}]   ;;  %s1793_s3 = inlined_call_operand.vmem [shape: f32[16,512], index: 3, kind: output, shape index: {}]  }
   0x1   :  { %1795 = sst [smem:[#allocation7_spill]] %s1790_s0 }
   0x2   :  { %1796 = sst [smem:[#allocation8_spill]] %s1791_s1 }
   0x3   :  { %s1453_s12 = smov 0   ;;  %s1455_s13 = smov 0  }
   0x4   :  { %s1457_s14 = smov 0   ;;  %s1459_s15 = smov 0  }
   0x5   :  { %s1461_s16 = smov 0   ;;  %s1463_s17 = smov 0  }
   0x6   :  { %s1465_s18 = smov 0   ;;  %s1467_s19 = smov 0  }
   0x7   :  { %s1469_s20 = smov 0   ;;  %s1471_s21 = smov 0  }
   0x8   :  { %s1473_s22 = smov 0  }
   0x9 LB: > { %s1093_s23 = sadd.s32 4294967295, %s1429_s22   ;;  %s25_s24 = sadd.s32 1, %s1421_s20  ;;  %s1429_s22 = sphi %s1473_s22, %s13_s22   ;;  %s1425_s21 = sphi %s1471_s21, %s1813_s21   ;;  %s1421_s20 = sphi %s1469_s20, %s1812_s20   ;;  %s1417_s19 = sphi %s1467_s19, %s1811_s19   ;;  %s1413_s18 = sphi %s1465_s18, %s1810_s18   ;;  %s1409_s17 = sphi %s1463_s17, %s1809_s17   ;;  %s1405_s16 = sphi %s1461_s16, %s1808_s16   ;;  %s1401_s15 = sphi %s1459_s15, %s1807_s15   ;;  %s1397_s14 = sphi %s1457_s14, %s1806_s14   ;;  %s1393_s13 = sphi %s1455_s13, %s1805_s13   ;;  %s1389_s12 = sphi %s1453_s12, %s1804_s12  }
   0xa   : > { %p26_p0 = scmp.ge.s32.totalorder %s25_s24, 6  ;;  %s28_s25 = sadd.s32 1, %s1425_s21 }
   0xb   : > { %s41_s26 = sadd.s32 1, %s1409_s17  ;;  %p48_p1 = scmp.ne.s32.totalorder %s1409_s17, %s1405_s16 }
   0xc   : > { %s1815_s24 = smov (%p26_p0, %s25_s24), 0  ;;  %s1817_s25 = smov (!%p26_p0, %s28_s25), %s1425_s21 }
   0xd   : > { %s37_s27 = ssub.s32 %s1421_s20, %s1815_s24  ;;  %p49_p2 = scmp.eq.s32.totalorder %s1429_s22, 0 }
   0xe   : > { %p30_p3 = scmp.ge.s32.totalorder %s1817_s25, 2  ;;  %p39_p4 = scmp.eq.s32.totalorder %s37_s27, 0 }
   0xf   : > { %p1520_p5 = por %p49_p2, %p48_p1  ;;  %s69_s29 = sadd.s32 1, %s1401_s15 }
  0x10   : > { %s1819_s25 = smov (%p30_p3, %s1817_s25), 0  ;;  %p76_p6 = scmp.ne.s32.totalorder %s1401_s15, %s1397_s14 }
  0x11   : > { %1798 = sst [smem:[#allocation6_spill]] %s1819_s25  ;;  %s65_s4 = ssub.s32 %s1425_s21, %s1819_s25 }
  0x12   : > { %s1528_s30 = scalar_select %p39_p4, %s1409_s17, %s41_s26  }
  0x13   : > { %s66_s5 = sor.u32 %s65_s4, %s37_s27  ;;  %p121_p7 = scmp.eq.s32.totalorder %s65_s4, 0 }
  0x14   : > { %p67_p8 = scmp.eq.s32.totalorder %s66_s5, 0  ;;  %p1534_p9 = por %p76_p6, %p49_p2 }
  0x15   : > { %s123_s7 = sadd.s32 1, %s1393_s13  ;;  %p133_p10 = scmp.ne.s32.totalorder %s1393_s13, %s1389_s12 }
  0x16   : > { %s1542_s8 = scalar_select %p67_p8, %s1401_s15, %s69_s29  }
  0x17   : > { %s1545_s9 = scalar_select %p121_p7, %s1393_s13, %s123_s7  }
  0x18   : > { %p134_p11 = scmp.eq.s32.totalorder %s1093_s23, 11  ;;  %p1096_p13 = scmp.ge.s32.totalorder %s1429_s22, 12 }
  0x1a   : > { %p1547_p12 = por %p134_p11, %p133_p10  ;;  %156 = sbr.rel (%p1096_p13) target bundleno = 78 (0x4e), region = 16 }
  0x21   : > { %159 = sbr.rel (!%p1520_p5) target bundleno = 44 (0x2c), region = 20  ;;  %s161_s11 = sand.u32 (%p1520_p5), 1, %s1409_s17  }
  0x22   : > { %s1166_s26 = smul.u32 (%p1520_p5), 12, %s1421_s20  ;;  %s1801_s0 = sld [smem:[#allocation7_spill]] (%p1520_p5) }
  0x23   : > { %s1173_s27 = smul.u32 (%p1520_p5), 24, %s161_s11 }
  0x25   : > { %s163_s23 = scalar_lea.vmem (%p1520_p5), [#allocation3], %s1173_s27 }
  0x28   : > { %s169_s5 = scalar_lea.vmem %s1801_s0, %s1166_s26 }
  0x29   : > { %v184_v0 = vld [vmem:[%s169_s5] sm:$0xff]  ;;  %v186_v1 = vld [vmem:[%s169_s5 + $0x48] sm:$0xff]  ;;  %v1100_v3 = vld [vmem:[%s169_s5 + $0x50] sm:$0xf] }
  0x2a   : > { %v1098_v2 = vld [vmem:[%s169_s5 + $0x8] sm:$0xf]  ;;  %185 = vst [vmem:[%s163_s23] sm:$0xff] %v184_v0  ;;  %187 = vst [vmem:[%s163_s23 + $0xc] sm:$0xff] %v186_v1 }
  0x2b   : > { %1099 = vst [vmem:[%s163_s23 + $0x8] sm:$0xf] %v1098_v2  ;;  %1101 = vst [vmem:[%s163_s23 + $0x14] sm:$0xf] %v1100_v3 }
  0x2c PF: > { %204 = sbr.rel (!%p1534_p9) target bundleno = 78 (0x4e), region = 46  ;;  %s206_s28 = sand.u32 (%p1534_p9), 1, %s1401_s15  }
  0x2d   : > { %s1174_s7 = smul.u32 (%p1534_p9), 384, %s206_s28  ;;  %s1102_s11 = sshll.u32 (%p1534_p9), %s1425_s21, 1 }
  0x2e   : > { %s1167_s26 = smul.u32 (%p1534_p9), 192, %s1421_s20  ;;  %s1802_s1 = sld [smem:[#allocation8_spill]] (%p1534_p9) }
  0x2f   : > { %s1572_s6 = scalar_lea.vmem (%p1534_p9), [#allocation4], %s1174_s7 }
  0x30   : > { %s212_s29 = sadd.s32 (%p1534_p9), %s1167_s26, %s1102_s11 }
  0x31   : > { %s1104_s4 = sshll.u32 (%p1534_p9), %s212_s29, 2 }
  0x34   : > { %s1567_s25 = scalar_lea.vmem %s1802_s1, %s1104_s4 }
  0x35   : > { %v336_v4 = vld [vmem:[%s1567_s25] sm:$0xff]  ;;  %v338_v5 = vld [vmem:[%s1567_s25 + $0x10] sm:$0xff] }
  0x36   : > { %v340_v6 = vld [vmem:[%s1567_s25 + $0x20] sm:$0xff]  ;;  %337 = vst [vmem:[%s1572_s6] sm:$0xff] %v336_v4  ;;  %339 = vst [vmem:[%s1572_s6 + $0x8] sm:$0xff] %v338_v5  ;;  %v342_v7 = vld [vmem:[%s1567_s25 + $0x30] sm:$0xff] }
  0x37   : > { %341 = vst [vmem:[%s1572_s6 + $0x10] sm:$0xff] %v340_v6  ;;  %v344_v8 = vld [vmem:[%s1567_s25 + $0x40] sm:$0xff]  ;;  %v346_v9 = vld [vmem:[%s1567_s25 + $0x50] sm:$0xff]  ;;  %343 = vst [vmem:[%s1572_s6 + $0x18] sm:$0xff] %v342_v7 }
  0x38   : > { %345 = vst [vmem:[%s1572_s6 + $0x20] sm:$0xff] %v344_v8  ;;  %347 = vst [vmem:[%s1572_s6 + $0x28] sm:$0xff] %v346_v9  ;;  %v348_v10 = vld [vmem:[%s1567_s25 + $0x60] sm:$0xff]  ;;  %v350_v11 = vld [vmem:[%s1567_s25 + $0x70] sm:$0xff] }
  0x39   : > { %v352_v12 = vld [vmem:[%s1567_s25 + $0x80] sm:$0xff]  ;;  %349 = vst [vmem:[%s1572_s6 + $0x30] sm:$0xff] %v348_v10  ;;  %351 = vst [vmem:[%s1572_s6 + $0x38] sm:$0xff] %v350_v11  ;;  %v354_v13 = vld [vmem:[%s1567_s25 + $0x90] sm:$0xff] }
  0x3a   : > { %353 = vst [vmem:[%s1572_s6 + $0x40] sm:$0xff] %v352_v12  ;;  %v356_v14 = vld [vmem:[%s1567_s25 + $0xa0] sm:$0xff]  ;;  %v358_v15 = vld [vmem:[%s1567_s25 + $0xb0] sm:$0xff]  ;;  %355 = vst [vmem:[%s1572_s6 + $0x48] sm:$0xff] %v354_v13 }
  0x3b   : > { %357 = vst [vmem:[%s1572_s6 + $0x50] sm:$0xff] %v356_v14  ;;  %359 = vst [vmem:[%s1572_s6 + $0x58] sm:$0xff] %v358_v15  ;;  %v360_v16 = vld [vmem:[%s1567_s25 + $0xc0] sm:$0xff]  ;;  %v362_v17 = vld [vmem:[%s1567_s25 + $0xd0] sm:$0xff] }
  0x3c   : > { %v364_v18 = vld [vmem:[%s1567_s25 + $0xe0] sm:$0xff]  ;;  %361 = vst [vmem:[%s1572_s6 + $0x60] sm:$0xff] %v360_v16  ;;  %363 = vst [vmem:[%s1572_s6 + $0x68] sm:$0xff] %v362_v17  ;;  %v366_v19 = vld [vmem:[%s1567_s25 + $0xf0] sm:$0xff] }
  0x3d   : > { %365 = vst [vmem:[%s1572_s6 + $0x70] sm:$0xff] %v364_v18  ;;  %v368_v20 = vld [vmem:[%s1567_s25 + $0x100] sm:$0xff]  ;;  %v370_v21 = vld [vmem:[%s1567_s25 + $0x110] sm:$0xff]  ;;  %367 = vst [vmem:[%s1572_s6 + $0x78] sm:$0xff] %v366_v19 }
  0x3e   : > { %369 = vst [vmem:[%s1572_s6 + $0x80] sm:$0xff] %v368_v20  ;;  %371 = vst [vmem:[%s1572_s6 + $0x88] sm:$0xff] %v370_v21  ;;  %v372_v22 = vld [vmem:[%s1567_s25 + $0x120] sm:$0xff]  ;;  %v374_v23 = vld [vmem:[%s1567_s25 + $0x130] sm:$0xff] }
  0x3f   : > { %v376_v24 = vld [vmem:[%s1567_s25 + $0x140] sm:$0xff]  ;;  %373 = vst [vmem:[%s1572_s6 + $0x90] sm:$0xff] %v372_v22  ;;  %375 = vst [vmem:[%s1572_s6 + $0x98] sm:$0xff] %v374_v23  ;;  %v378_v25 = vld [vmem:[%s1567_s25 + $0x150] sm:$0xff] }
  0x40   : > { %377 = vst [vmem:[%s1572_s6 + $0xa0] sm:$0xff] %v376_v24  ;;  %v380_v26 = vld [vmem:[%s1567_s25 + $0x160] sm:$0xff]  ;;  %v382_v27 = vld [vmem:[%s1567_s25 + $0x170] sm:$0xff]  ;;  %379 = vst [vmem:[%s1572_s6 + $0xa8] sm:$0xff] %v378_v25 }
  0x41   : > { %381 = vst [vmem:[%s1572_s6 + $0xb0] sm:$0xff] %v380_v26  ;;  %383 = vst [vmem:[%s1572_s6 + $0xb8] sm:$0xff] %v382_v27  ;;  %v384_v28 = vld [vmem:[%s1567_s25 + $0x180] sm:$0xff]  ;;  %v386_v29 = vld [vmem:[%s1567_s25 + $0x190] sm:$0xff] }
  0x42   : > { %v388_v30 = vld [vmem:[%s1567_s25 + $0x1a0] sm:$0xff]  ;;  %385 = vst [vmem:[%s1572_s6 + $0xc0] sm:$0xff] %v384_v28  ;;  %387 = vst [vmem:[%s1572_s6 + $0xc8] sm:$0xff] %v386_v29  ;;  %v390_v31 = vld [vmem:[%s1567_s25 + $0x1b0] sm:$0xff] }
  0x43   : > { %389 = vst [vmem:[%s1572_s6 + $0xd0] sm:$0xff] %v388_v30  ;;  %v392_v32 = vld [vmem:[%s1567_s25 + $0x1c0] sm:$0xff]  ;;  %v394_v33 = vld [vmem:[%s1567_s25 + $0x1d0] sm:$0xff]  ;;  %391 = vst [vmem:[%s1572_s6 + $0xd8] sm:$0xff] %v390_v31 }
  0x44   : > { %393 = vst [vmem:[%s1572_s6 + $0xe0] sm:$0xff] %v392_v32  ;;  %395 = vst [vmem:[%s1572_s6 + $0xe8] sm:$0xff] %v394_v33  ;;  %v396_v34 = vld [vmem:[%s1567_s25 + $0x1e0] sm:$0xff]  ;;  %v398_v35 = vld [vmem:[%s1567_s25 + $0x1f0] sm:$0xff] }
  0x45   : > { %v400_v36 = vld [vmem:[%s1567_s25 + $0x200] sm:$0xff]  ;;  %397 = vst [vmem:[%s1572_s6 + $0xf0] sm:$0xff] %v396_v34  ;;  %399 = vst [vmem:[%s1572_s6 + $0xf8] sm:$0xff] %v398_v35  ;;  %v402_v37 = vld [vmem:[%s1567_s25 + $0x210] sm:$0xff] }
  0x46   : > { %401 = vst [vmem:[%s1572_s6 + $0x100] sm:$0xff] %v400_v36  ;;  %v404_v38 = vld [vmem:[%s1567_s25 + $0x220] sm:$0xff]  ;;  %v406_v39 = vld [vmem:[%s1567_s25 + $0x230] sm:$0xff]  ;;  %403 = vst [vmem:[%s1572_s6 + $0x108] sm:$0xff] %v402_v37 }
  0x47   : > { %405 = vst [vmem:[%s1572_s6 + $0x110] sm:$0xff] %v404_v38  ;;  %407 = vst [vmem:[%s1572_s6 + $0x118] sm:$0xff] %v406_v39  ;;  %v408_v40 = vld [vmem:[%s1567_s25 + $0x240] sm:$0xff]  ;;  %v410_v41 = vld [vmem:[%s1567_s25 + $0x250] sm:$0xff] }
  0x48   : > { %v412_v42 = vld [vmem:[%s1567_s25 + $0x260] sm:$0xff]  ;;  %409 = vst [vmem:[%s1572_s6 + $0x120] sm:$0xff] %v408_v40  ;;  %411 = vst [vmem:[%s1572_s6 + $0x128] sm:$0xff] %v410_v41  ;;  %v414_v43 = vld [vmem:[%s1567_s25 + $0x270] sm:$0xff] }
  0x49   : > { %413 = vst [vmem:[%s1572_s6 + $0x130] sm:$0xff] %v412_v42  ;;  %v416_v44 = vld [vmem:[%s1567_s25 + $0x280] sm:$0xff]  ;;  %v418_v45 = vld [vmem:[%s1567_s25 + $0x290] sm:$0xff]  ;;  %415 = vst [vmem:[%s1572_s6 + $0x138] sm:$0xff] %v414_v43 }
  0x4a   : > { %417 = vst [vmem:[%s1572_s6 + $0x140] sm:$0xff] %v416_v44  ;;  %419 = vst [vmem:[%s1572_s6 + $0x148] sm:$0xff] %v418_v45  ;;  %v420_v46 = vld [vmem:[%s1567_s25 + $0x2a0] sm:$0xff]  ;;  %v422_v47 = vld [vmem:[%s1567_s25 + $0x2b0] sm:$0xff] }
  0x4b   : > { %v424_v48 = vld [vmem:[%s1567_s25 + $0x2c0] sm:$0xff]  ;;  %421 = vst [vmem:[%s1572_s6 + $0x150] sm:$0xff] %v420_v46  ;;  %423 = vst [vmem:[%s1572_s6 + $0x158] sm:$0xff] %v422_v47  ;;  %v426_v49 = vld [vmem:[%s1567_s25 + $0x2d0] sm:$0xff] }
  0x4c   : > { %425 = vst [vmem:[%s1572_s6 + $0x160] sm:$0xff] %v424_v48  ;;  %v428_v50 = vld [vmem:[%s1567_s25 + $0x2e0] sm:$0xff]  ;;  %v430_v51 = vld [vmem:[%s1567_s25 + $0x2f0] sm:$0xff]  ;;  %427 = vst [vmem:[%s1572_s6 + $0x168] sm:$0xff] %v426_v49 }
  0x4d   : > { %429 = vst [vmem:[%s1572_s6 + $0x170] sm:$0xff] %v428_v50  ;;  %431 = vst [vmem:[%s1572_s6 + $0x178] sm:$0xff] %v430_v51 }
  0x4e PF: > { %p1105_p0 = scmp.ge.s32.totalorder %s1429_s22, 1  ;;  %p444_p1 = scmp.lt.s32.totalorder %s1429_s22, 13 }
  0x50   : > { %p445_p2 = pnand %p1105_p0, %p444_p1 }
  0x51   : > { %s451_s0 = sand.u32 (!%p445_p2), 1, %s1405_s16   ;;  %s458_s5 = sand.u32 (!%p445_p2), 1, %s1397_s14  }
  0x52   : > { %448 = sbr.rel (%p445_p2) target bundleno = 401 (0x191), region = 88  ;;  %s485_s28 = sand.u32 (!%p445_p2), 1, %s1389_s12  }
  0x53   : > { %s1175_s23 = smul.u32 (!%p445_p2), 24, %s451_s0  ;;  %s1106_s7 = sshll.u32 (!%p445_p2), %s485_s28, 5 }
  0x54   : > { %s1176_s25 = smul.u32 (!%p445_p2), 384, %s458_s5  ;;  %s1107_s11 = sshll.u32 (!%p445_p2), %s1417_s19, 1 }
  0x55   : > { %p493_p3 = scmp.lt.s32.totalorder (!%p445_p2), %s1107_s11, 3  ;;  %s1679_s27 = scalar_lea.vmem (!%p445_p2), [#allocation3], %s1175_s23 }
  0x56   : > { %s1681_s6 = scalar_lea.vmem (!%p445_p2), [#allocation4], %s1176_s25  ;;  %s1683_s1 = scalar_lea.vmem (!%p445_p2), [#allocation5], %s1106_s7 }
  0x57   : > { %p1108_p4 = scmp.ne.s32.totalorder (!%p445_p2), %s1413_s18, 0 }
  0x59   : > { %s1821_s11 = smov (!%p493_p3, %s1107_s11), 3  ;;  %503 = sbr.rel (%p1108_p4) target bundleno = 96 (0x60), region = 100 }
  0x5a   : > { %s495_s4 = scalar_lea.vmem %s1792_s2, %s1821_s11  ;;  %v1431_v52 = vmov (!%p1108_p4), 0.0  }
  0x5b   : > { %504 = vst [vmem:[#allocation2] sm:$0xff] (!%p1108_p4), %v1431_v52  ;;  %505 = vst [vmem:[#allocation2 + $0x8] sm:$0xff] (!%p1108_p4), %v1431_v52 }
  0x5c   : > { %506 = vst [vmem:[#allocation2 + $0x10] sm:$0xff] (!%p1108_p4), %v1431_v52  ;;  %507 = vst [vmem:[#allocation2 + $0x18] sm:$0xff] (!%p1108_p4), %v1431_v52 }
  0x60 PF: > { %v1267_v53 = vld [vmem:[%s1681_s6 + $0x4] ss:$8 sps:$4 sm:$0xff]   ;;  %v1269_v54 = vld [vmem:[%s1681_s6] ss:$8 sps:$4 sm:$0xff]   ;;  %v1432_v55 = vmov 0   ;;  %p1160_p5 = scmp.ne.s32.totalorder %s1413_s18, 5 }
  0x61   : > { %895 = vmatprep.mubr.bf16.mxu0 %v1432_v55  ;;  %820 = vmatprep.subr.bf16.mxu1 %v1267_v53  ;;  %v1270_v56 = vld [vmem:[%s1681_s6 + $0x14] ss:$8 sps:$4 sm:$0xff]   ;;  %v1272_v57 = vld [vmem:[%s1681_s6 + $0x10] ss:$8 sps:$4 sm:$0xff]   ;;  %v1273_v58 = vld [vmem:[%s1681_s6 + $0x24] ss:$8 sps:$4 sm:$0xff]  }
  0x62   : > { %821 = vmatpush1.bf16.msra.mxu1 %v1269_v54  ;;  %v1275_v59 = vld [vmem:[%s1681_s6 + $0x20] ss:$8 sps:$4 sm:$0xff]   ;;  %v1276_v60 = vld [vmem:[%s1681_s6 + $0x34] ss:$8 sps:$4 sm:$0xff]   ;;  %v1278_v61 = vld [vmem:[%s1681_s6 + $0x30] ss:$8 sps:$4 sm:$0xff]  }
  0x63   : > { %822 = vmatprep.subr.bf16.mxu1 %v1270_v56  ;;  %v1291_v62 = vld [vmem:[%s1681_s6 + $0x104] ss:$8 sps:$4 sm:$0xff]   ;;  %v1293_v63 = vld [vmem:[%s1681_s6 + $0x100] ss:$8 sps:$4 sm:$0xff]   ;;  %v1297_v1 = vld [vmem:[%s1681_s6 + $0x114] ss:$8 sps:$4 sm:$0xff]  }
  0x64   : > { %v1279_v0 = vld [vmem:[%s1681_s6 + $0x44] ss:$8 sps:$4 sm:$0xff]   ;;  %863 = vmatprep.subr.bf16.mxu0 %v1291_v62  ;;  %v1299_v2 = vld [vmem:[%s1681_s6 + $0x110] ss:$8 sps:$4 sm:$0xff]   ;;  %v1281_v3 = vld [vmem:[%s1681_s6 + $0x40] ss:$8 sps:$4 sm:$0xff]  }
  0x65   : > { %864 = vmatpush1.bf16.msra.mxu0 %v1293_v63  ;;  %v1282_v4 = vld [vmem:[%s1681_s6 + $0x54] ss:$8 sps:$4 sm:$0xff]   ;;  %v1303_v5 = vld [vmem:[%s1681_s6 + $0x124] ss:$8 sps:$4 sm:$0xff]   ;;  %v1305_v6 = vld [vmem:[%s1681_s6 + $0x120] ss:$8 sps:$4 sm:$0xff]  }
  0x66   : > { %823 = vmatpush1.bf16.msra.mxu1 %v1272_v57  ;;  %865 = vmatprep.subr.bf16.mxu0 %v1297_v1  ;;  %v1284_v7 = vld [vmem:[%s1681_s6 + $0x50] ss:$8 sps:$4 sm:$0xff]   ;;  %v1309_v8 = vld [vmem:[%s1681_s6 + $0x134] ss:$8 sps:$4 sm:$0xff]   ;;  %v1285_v9 = vld [vmem:[%s1681_s6 + $0x64] ss:$8 sps:$4 sm:$0xff]  }
  0x67   : > { %824 = vmatprep.subr.bf16.mxu1 %v1273_v58  ;;  %v1311_v10 = vld [vmem:[%s1681_s6 + $0x130] ss:$8 sps:$4 sm:$0xff]   ;;  %v1287_v11 = vld [vmem:[%s1681_s6 + $0x60] ss:$8 sps:$4 sm:$0xff]   ;;  %v1315_v12 = vld [vmem:[%s1681_s6 + $0x144] ss:$8 sps:$4 sm:$0xff]  }
  0x68   : > { %v1288_v13 = vld [vmem:[%s1681_s6 + $0x74] ss:$8 sps:$4 sm:$0xff]   ;;  %v1317_v14 = vld [vmem:[%s1681_s6 + $0x140] ss:$8 sps:$4 sm:$0xff]   ;;  %v1290_v15 = vld [vmem:[%s1681_s6 + $0x70] ss:$8 sps:$4 sm:$0xff]  }
  0x69   : > { %866 = vmatpush1.bf16.msra.mxu0 %v1299_v2  ;;  %v1321_v16 = vld [vmem:[%s1681_s6 + $0x154] ss:$8 sps:$4 sm:$0xff]   ;;  %v1294_v17 = vld [vmem:[%s1681_s6 + $0x84] ss:$8 sps:$4 sm:$0xff]   ;;  %v1323_v18 = vld [vmem:[%s1681_s6 + $0x150] ss:$8 sps:$4 sm:$0xff]  }
  0x6a   : > { %825 = vmatpush1.bf16.msra.mxu1 %v1275_v59  ;;  %867 = vmatprep.subr.bf16.mxu0 %v1303_v5  ;;  %v1296_v19 = vld [vmem:[%s1681_s6 + $0x80] ss:$8 sps:$4 sm:$0xff]   ;;  %v1327_v20 = vld [vmem:[%s1681_s6 + $0x164] ss:$8 sps:$4 sm:$0xff]   ;;  %v1300_v21 = vld [vmem:[%s1681_s6 + $0x94] ss:$8 sps:$4 sm:$0xff]  }
  0x6b   : > { %826 = vmatprep.subr.bf16.mxu1 %v1276_v60  ;;  %v1329_v22 = vld [vmem:[%s1681_s6 + $0x160] ss:$8 sps:$4 sm:$0xff]   ;;  %v1302_v24 = vld [vmem:[%s1681_s6 + $0x90] ss:$8 sps:$4 sm:$0xff]   ;;  %v1333_v25 = vld [vmem:[%s1681_s6 + $0x174] ss:$8 sps:$4 sm:$0xff]  }
  0x6c   : > { %v1342_v23 = vld [vmem:[%s1679_s27 + $0x4] ss:$12 sps:$4 sm:$0xff]   ;;  %v1339_v30 = vld [vmem:[%s1679_s27 + $0x8] ss:$12 sps:$4 sm:$0xff]   ;;  %v1340_v40 = vld [vmem:[%s1679_s27] ss:$12 sps:$4 sm:$0xff]  }
  0x6d   : > { %868 = vmatpush1.bf16.msra.mxu0 %v1305_v6  ;;  %v1306_v26 = vld [vmem:[%s1681_s6 + $0xa4] ss:$8 sps:$4 sm:$0xff]   ;;  %852 = vmatprep.mubr.bf16.mxu1 %v1342_v23  ;;  %v1335_v27 = vld [vmem:[%s1681_s6 + $0x170] ss:$8 sps:$4 sm:$0xff]   ;;  %v1308_v28 = vld [vmem:[%s1681_s6 + $0xa0] ss:$8 sps:$4 sm:$0xff]  }
  0x6e   : > { %827 = vmatpush1.bf16.msra.mxu1 %v1278_v61  ;;  %869 = vmatprep.subr.bf16.mxu0 %v1309_v8  ;;  %v1312_v29 = vld [vmem:[%s1681_s6 + $0xb4] ss:$8 sps:$4 sm:$0xff]   ;;  %v1314_v31 = vld [vmem:[%s1681_s6 + $0xb0] ss:$8 sps:$4 sm:$0xff]   ;;  %v1318_v32 = vld [vmem:[%s1681_s6 + $0xc4] ss:$8 sps:$4 sm:$0xff]   ;;  %v924_v61 = vlaneseq (!%p1160_p5) }
  0x6f   : > { %828 = vmatprep.subr.bf16.mxu1 %v1279_v0  ;;  %v1320_v33 = vld [vmem:[%s1681_s6 + $0xc0] ss:$8 sps:$4 sm:$0xff]   ;;  %v1324_v34 = vld [vmem:[%s1681_s6 + $0xd4] ss:$8 sps:$4 sm:$0xff]   ;;  %v1326_v35 = vld [vmem:[%s1681_s6 + $0xd0] ss:$8 sps:$4 sm:$0xff]  }
  0x70   : > { %v1330_v36 = vld [vmem:[%s1681_s6 + $0xe4] ss:$8 sps:$4 sm:$0xff]   ;;  %v1332_v37 = vld [vmem:[%s1681_s6 + $0xe0] ss:$8 sps:$4 sm:$0xff]   ;;  %v1336_v38 = vld [vmem:[%s1681_s6 + $0xf4] ss:$8 sps:$4 sm:$0xff]  }
  0x71   : > { %870 = vmatpush1.bf16.msra.mxu0 %v1311_v10  ;;  %v1338_v39 = vld [vmem:[%s1681_s6 + $0xf0] ss:$8 sps:$4 sm:$0xff]   ;;  %v510_v51 = vld [vmem:[#allocation2 + $0x10] sm:$0xff]  ;;  %v511_v55 = vld [vmem:[#allocation2 + $0x18] sm:$0xff]  ;;  %v925_v62 = vshrl.u32 (!%p1160_p5), %v924_v61, 7 }
  0x72   : > { %829 = vmatpush1.bf16.msra.mxu1 %v1281_v3  ;;  %871 = vmatprep.subr.bf16.mxu0 %v1315_v12  ;;  %v508_v45 = vld [vmem:[#allocation2] sm:$0xff]  ;;  %v509_v48 = vld [vmem:[#allocation2 + $0x8] sm:$0xff] }
  0x73   : > { %830 = vmatprep.subr.bf16.mxu1 %v1282_v4  ;;  %v922_v63 = vld [vmem:[%s495_s4] sm:$0x3] (!%p1160_p5)  ;;  %v926_v1 = vsub.s32 (!%p1160_p5), 0, %v925_v62  ;;  %v930_v2 = vsub.s32 (!%p1160_p5), 1, %v925_v62 }
  0x75   : > { %872 = vmatpush1.bf16.msra.mxu0 %v1317_v14  ;;  %v927_v6 = vrot.slane (!%p1160_p5), %v922_v63, %v926_v1 }
  0x76   : > { %831 = vmatpush1.bf16.msra.mxu1 %v1284_v7  ;;  %873 = vmatprep.subr.bf16.mxu0 %v1321_v16  ;;  %v931_v7 = vrot.slane (!%p1160_p5), %v922_v63, %v930_v2 }
  0x77   : > { %832 = vmatprep.subr.bf16.mxu1 %v1285_v9 }
  0x79   : > { %874 = vmatpush1.bf16.msra.mxu0 %v1323_v18 }
  0x7a   : > { %833 = vmatpush1.bf16.msra.mxu1 %v1287_v11  ;;  %875 = vmatprep.subr.bf16.mxu0 %v1327_v20 }
  0x7b   : > { %834 = vmatprep.subr.bf16.mxu1 %v1288_v13 }
  0x7d   : > { %876 = vmatpush1.bf16.msra.mxu0 %v1329_v22 }
  0x7e   : > { %835 = vmatpush1.bf16.msra.mxu1 %v1290_v15  ;;  %877 = vmatprep.subr.bf16.mxu0 %v1333_v25 }
  0x7f   : > { %836 = vmatprep.subr.bf16.mxu1 %v1294_v17 }
  0x81   : > { %878 = vmatpush1.bf16.msra.mxu0 %v1335_v27 }
  0x82   : > { %837 = vmatpush1.bf16.msra.mxu1 %v1296_v19 }
  0x83   : > { %838 = vmatprep.subr.bf16.mxu1 %v1300_v21 }
  0x84   : > { %896 = vmatmul.mubr.bf16.vlgmr.msra.gmra.mrb[0].mxu0 %v1339_v30 }
  0x86   : > { %839 = vmatpush1.bf16.msra.mxu1 %v1302_v24 }
  0x87   : > { %840 = vmatprep.subr.bf16.mxu1 %v1306_v26 }
  0x8a   : > { %841 = vmatpush1.bf16.msra.mxu1 %v1308_v28 }
  0x8b   : > { %842 = vmatprep.subr.bf16.mxu1 %v1312_v29 }
  0x8e   : > { %843 = vmatpush1.bf16.msra.mxu1 %v1314_v31 }
  0x8f   : > { %844 = vmatprep.subr.bf16.mxu1 %v1318_v32 }
  0x92   : > { %845 = vmatpush1.bf16.msra.mxu1 %v1320_v33 }
  0x93   : > { %846 = vmatprep.subr.bf16.mxu1 %v1324_v34 }
  0x96   : > { %847 = vmatpush1.bf16.msra.mxu1 %v1326_v35 }
  0x97   : > { %848 = vmatprep.subr.bf16.mxu1 %v1330_v36 }
  0x9a   : > { %849 = vmatpush1.bf16.msra.mxu1 %v1332_v37 }
  0x9b   : > { %850 = vmatprep.subr.bf16.mxu1 %v1336_v38 }
  0x9e   : > { %851 = vmatpush1.bf16.msra.mxu1 %v1338_v39 }
  0xa1   : > { %853 = vmatmul.mubr.bf16.vlgmr.msra.gmra.mrb[0].mxu1 %v1340_v40 }
 0x157   : > { %v897_v41 = vpop.f32.mrb[0].mxu0 }
 0x158   : > { %v899_v42 = vpop.f32.mrb[1].mxu0 }
 0x159   : > { %v901_v43 = vpop.f32.mrb[2].mxu0 }
 0x15a   : > { %v903_v44 = vpop.f32.mrb[3].mxu0 }
 0x174   : > { %v854_v46 = vpop.f32.mrb[0].mxu1 }
 0x175   : > { %v898_v47 = vadd.f32 %v897_v41, %v854_v46  ;;  %v856_v49 = vpop.f32.mrb[1].mxu1 }
 0x176   : > { %v900_v50 = vadd.f32 %v899_v42, %v856_v49  ;;  %v858_v52 = vpop.f32.mrb[2].mxu1  ;;  %917 = sbr.rel (%p1160_p5) target bundleno = 393 (0x189), region = 104 }
 0x177   : > { %v906_v53 = vadd.f32 %v898_v47, %v508_v45  ;;  %v902_v54 = vadd.f32 %v901_v43, %v858_v52  ;;  %v860_v56 = vpop.f32.mrb[3].mxu1 }
 0x178   : > { %v907_v57 = vadd.f32 %v900_v50, %v509_v48  ;;  %v904_v58 = vadd.f32 %v903_v44, %v860_v56 }
 0x179   : > { %910 = vst [vmem:[#allocation2] sm:$0xff] %v906_v53  ;;  %v908_v59 = vadd.f32 %v902_v54, %v510_v51 }
 0x17a   : > { %911 = vst [vmem:[#allocation2 + $0x8] sm:$0xff] %v907_v57  ;;  %v909_v60 = vadd.f32 %v904_v58, %v511_v55 }
 0x17b   : > { %912 = vst [vmem:[#allocation2 + $0x10] sm:$0xff] %v908_v59 }
 0x17c   : > { %913 = vst [vmem:[#allocation2 + $0x18] sm:$0xff] %v909_v60 }
 0x180   : > { %v918_v0 = vld [vmem:[#allocation2] sm:$0xff] }
 0x181   : > { %v919_v3 = vld [vmem:[#allocation2 + $0x8] sm:$0xff]  ;;  %v934_v8 = vadd.f32 %v927_v6, %v918_v0 }
 0x182   : > { %v920_v4 = vld [vmem:[#allocation2 + $0x10] sm:$0xff]  ;;  %v935_v9 = vadd.f32 %v931_v7, %v919_v3 }
 0x183   : > { %v921_v5 = vld [vmem:[#allocation2 + $0x18] sm:$0xff]  ;;  %v936_v10 = vadd.f32 %v927_v6, %v920_v4  ;;  %v938_v12 = vmax.f32 %v934_v8, 0.0 }
 0x184   : > { %v937_v11 = vadd.f32 %v931_v7, %v921_v5  ;;  %v939_v13 = vmax.f32 %v935_v9, 0.0 }
 0x185   : > { %v940_v14 = vmax.f32 %v936_v10, 0.0  ;;  %942 = vst [vmem:[%s1683_s1] sm:$0xff] %v938_v12 }
 0x186   : > { %v941_v15 = vmax.f32 %v937_v11, 0.0  ;;  %943 = vst [vmem:[%s1683_s1 + $0x8] sm:$0xff] %v939_v13 }
 0x187   : > { %944 = vst [vmem:[%s1683_s1 + $0x10] sm:$0xff] %v940_v14 }
 0x188   : > { %945 = vst [vmem:[%s1683_s1 + $0x18] sm:$0xff] %v941_v15 }
 0x189 PF: > { %952 = sbr.rel (!%p1547_p12) target bundleno = 401 (0x191), region = 108  ;;  %s1168_s16 = sshll.u32 (%p1547_p12), %s1417_s19, 4 }
 0x18a   : > { %s958_s5 = scalar_lea.vmem (%p1547_p12), %s1793_s3, %s1168_s16 }
 0x18c   : > { %v971_v16 = vld [vmem:[%s1683_s1] sm:$0xff] (%p1547_p12) }
 0x18d   : > { %v973_v17 = vld [vmem:[%s1683_s1 + $0x8] sm:$0xff] (%p1547_p12)  ;;  %972 = vst [vmem:[%s958_s5] sm:$0xff] (%p1547_p12), %v971_v16 }
 0x18e   : > { %v975_v18 = vld [vmem:[%s1683_s1 + $0x10] sm:$0xff] (%p1547_p12)  ;;  %974 = vst [vmem:[%s958_s5 + $0x8] sm:$0xff] (%p1547_p12), %v973_v17 }
 0x18f   : > { %v977_v19 = vld [vmem:[%s1683_s1 + $0x18] sm:$0xff] (%p1547_p12)  ;;  %976 = vst [vmem:[%s958_s5 + $0x20] sm:$0xff] (%p1547_p12), %v975_v18 }
 0x190   : > { %978 = vst [vmem:[%s958_s5 + $0x28] sm:$0xff] %v977_v19 }
 0x191 PF: > { %s13_s22 = sadd.s32 1, %s1429_s22   ;;  %s1803_s10 = sld [smem:[#allocation6_spill]] }
 0x192   : > { %p10_p6 = scmp.ge.s32.totalorder %s13_s22, 14   ;;  %s1804_s12 = smov %s1393_s13 }
 0x193   : > { %s1805_s13 = smov %s1545_s9  ;;  %s1806_s14 = smov %s1401_s15 }
 0x194   : > { %s1807_s15 = smov %s1542_s8  ;;  %s1808_s16 = smov %s1409_s17 }
 0x195   : > { %s1809_s17 = smov %s1528_s30  ;;  %s1810_s18 = smov %s1421_s20 }
 0x196   : > { %s1811_s19 = smov %s1425_s21  ;;  %s1812_s20 = smov %s1815_s24 }
 0x197   : > { %s1813_s21 = smov %s1803_s10  ;;  %12 = sbr.rel (!%p10_p6) target bundleno = 9 (0x9), region = 179 }

// kernel: _lambda_.38
= control target key start
LH: loop header
LB: loop body
LE: loop exit
PB: predicated region body
PF: predicated region fallthrough
CT: control target
= control target key end

     0   :  { %s1052_s12 = smov 0   ;;  %s1054_s13 = smov 0   ;;  %s1240_s0 = inlined_call_operand.vmem [shape: bf16[16,256], index: 0, kind: input, shape index: {}]   ;;  %s1241_s1 = inlined_call_operand.vmem [shape: bf16[256,512], index: 1, kind: input, shape index: {}]   ;;  %s1242_s2 = inlined_call_operand.vmem [shape: f32[1,512], index: 2, kind: input, shape index: {}]   ;;  %s1243_s3 = inlined_call_operand.vmem [shape: f32[16,512], index: 3, kind: output, shape index: {}]  }
   0x1   :  { %s1056_s14 = smov 0   ;;  %s1058_s15 = smov 0  }
   0x2   :  { %s1060_s16 = smov 0  }
   0x3 LB: > { %s28_s17 = sadd.s32 1, %s1026_s15  ;;  %s848_s18 = sadd.s32 4294967295, %s1030_s16   ;;  %s1030_s16 = sphi %s1060_s16, %s13_s16   ;;  %s1026_s15 = sphi %s1058_s15, %s1248_s15   ;;  %s1022_s14 = sphi %s1056_s14, %s1247_s14   ;;  %s1018_s13 = sphi %s1054_s13, %s1246_s13   ;;  %s1014_s12 = sphi %s1052_s12, %s1245_s12  }
   0x4   : > { %p30_p0 = scmp.ge.s32.totalorder %s28_s17, 2  ;;  %p76_p1 = scmp.ne.s32.totalorder %s1018_s13, %s1014_s12 }
   0x5   : > { %p77_p2 = scmp.eq.s32.totalorder %s1030_s16, 0  ;;  %p134_p4 = scmp.eq.s32.totalorder %s848_s18, 1 }
   0x6   : > { %s1250_s17 = smov (%p30_p0, %s28_s17), 0  ;;  %s69_s20 = sadd.s32 1, %s1018_s13 }
   0x7   : > { %p78_p3 = por %p77_p2, %p76_p1  ;;  %s65_s19 = ssub.s32 %s1026_s15, %s1250_s17 }
   0x8   : > { %p67_p5 = scmp.eq.s32.totalorder %s65_s19, 0  ;;  %p1087_p6 = por %p134_p4, %p76_p1 }
   0x9   : > { %p852_p7 = scmp.ge.s32.totalorder %s1030_s16, 2 }
   0xa   : > { %s1092_s22 = scalar_select %p67_p5, %s1018_s13, %s69_s20  }
   0xb   : > { %171 = sbr.rel (%p852_p7) target bundleno = 38 (0x26), region = 20 }
  0x12   : > { %174 = sbr.rel (!%p78_p3) target bundleno = 38 (0x26), region = 24  ;;  %s176_s23 = sand.u32 (%p78_p3), 1, %s1018_s13  }
  0x13   : > { %s899_s24 = sshll.u32 (%p78_p3), %s1026_s15, 3  ;;  %s853_s25 = sshll.u32 (%p78_p3), %s176_s23, 8 }
  0x14   : > { %s1100_s28 = scalar_lea.vmem (%p78_p3), %s1241_s1, %s899_s24  ;;  %s1105_s29 = scalar_lea.vmem (%p78_p3), [#allocation3], %s853_s25 }
  0x15   : > { %v274_v0 = vld [vmem:[%s1100_s28] sm:$0xff] (%p78_p3)  ;;  %v276_v1 = vld [vmem:[%s1100_s28 + $0x10] sm:$0xff] (%p78_p3) }
  0x16   : > { %v278_v2 = vld [vmem:[%s1100_s28 + $0x20] sm:$0xff] (%p78_p3)  ;;  %275 = vst [vmem:[%s1105_s29] sm:$0xff] (%p78_p3), %v274_v0  ;;  %277 = vst [vmem:[%s1105_s29 + $0x8] sm:$0xff] (%p78_p3), %v276_v1  ;;  %v280_v3 = vld [vmem:[%s1100_s28 + $0x30] sm:$0xff] (%p78_p3) }
  0x17   : > { %279 = vst [vmem:[%s1105_s29 + $0x10] sm:$0xff] (%p78_p3), %v278_v2  ;;  %v282_v4 = vld [vmem:[%s1100_s28 + $0x40] sm:$0xff] (%p78_p3)  ;;  %v284_v5 = vld [vmem:[%s1100_s28 + $0x50] sm:$0xff] (%p78_p3)  ;;  %281 = vst [vmem:[%s1105_s29 + $0x18] sm:$0xff] (%p78_p3), %v280_v3 }
  0x18   : > { %283 = vst [vmem:[%s1105_s29 + $0x20] sm:$0xff] (%p78_p3), %v282_v4  ;;  %285 = vst [vmem:[%s1105_s29 + $0x28] sm:$0xff] (%p78_p3), %v284_v5  ;;  %v286_v6 = vld [vmem:[%s1100_s28 + $0x60] sm:$0xff] (%p78_p3)  ;;  %v288_v7 = vld [vmem:[%s1100_s28 + $0x70] sm:$0xff] (%p78_p3) }
  0x19   : > { %v290_v8 = vld [vmem:[%s1100_s28 + $0x80] sm:$0xff]  ;;  %287 = vst [vmem:[%s1105_s29 + $0x30] sm:$0xff] %v286_v6  ;;  %289 = vst [vmem:[%s1105_s29 + $0x38] sm:$0xff] %v288_v7  ;;  %v292_v9 = vld [vmem:[%s1100_s28 + $0x90] sm:$0xff] }
  0x1a   : > { %291 = vst [vmem:[%s1105_s29 + $0x40] sm:$0xff] %v290_v8  ;;  %v294_v10 = vld [vmem:[%s1100_s28 + $0xa0] sm:$0xff]  ;;  %v296_v11 = vld [vmem:[%s1100_s28 + $0xb0] sm:$0xff]  ;;  %293 = vst [vmem:[%s1105_s29 + $0x48] sm:$0xff] %v292_v9 }
  0x1b   : > { %295 = vst [vmem:[%s1105_s29 + $0x50] sm:$0xff] %v294_v10  ;;  %297 = vst [vmem:[%s1105_s29 + $0x58] sm:$0xff] %v296_v11  ;;  %v298_v12 = vld [vmem:[%s1100_s28 + $0xc0] sm:$0xff]  ;;  %v300_v13 = vld [vmem:[%s1100_s28 + $0xd0] sm:$0xff] }
  0x1c   : > { %v302_v14 = vld [vmem:[%s1100_s28 + $0xe0] sm:$0xff]  ;;  %299 = vst [vmem:[%s1105_s29 + $0x60] sm:$0xff] %v298_v12  ;;  %301 = vst [vmem:[%s1105_s29 + $0x68] sm:$0xff] %v300_v13  ;;  %v304_v15 = vld [vmem:[%s1100_s28 + $0xf0] sm:$0xff] }
  0x1d   : > { %303 = vst [vmem:[%s1105_s29 + $0x70] sm:$0xff] %v302_v14  ;;  %v306_v16 = vld [vmem:[%s1100_s28 + $0x100] sm:$0xff]  ;;  %v308_v17 = vld [vmem:[%s1100_s28 + $0x110] sm:$0xff]  ;;  %305 = vst [vmem:[%s1105_s29 + $0x78] sm:$0xff] %v304_v15 }
  0x1e   : > { %307 = vst [vmem:[%s1105_s29 + $0x80] sm:$0xff] %v306_v16  ;;  %309 = vst [vmem:[%s1105_s29 + $0x88] sm:$0xff] %v308_v17  ;;  %v310_v18 = vld [vmem:[%s1100_s28 + $0x120] sm:$0xff]  ;;  %v312_v19 = vld [vmem:[%s1100_s28 + $0x130] sm:$0xff] }
  0x1f   : > { %v314_v20 = vld [vmem:[%s1100_s28 + $0x140] sm:$0xff]  ;;  %311 = vst [vmem:[%s1105_s29 + $0x90] sm:$0xff] %v310_v18  ;;  %313 = vst [vmem:[%s1105_s29 + $0x98] sm:$0xff] %v312_v19  ;;  %v316_v21 = vld [vmem:[%s1100_s28 + $0x150] sm:$0xff] }
  0x20   : > { %315 = vst [vmem:[%s1105_s29 + $0xa0] sm:$0xff] %v314_v20  ;;  %v318_v22 = vld [vmem:[%s1100_s28 + $0x160] sm:$0xff]  ;;  %v320_v23 = vld [vmem:[%s1100_s28 + $0x170] sm:$0xff]  ;;  %317 = vst [vmem:[%s1105_s29 + $0xa8] sm:$0xff] %v316_v21 }
  0x21   : > { %319 = vst [vmem:[%s1105_s29 + $0xb0] sm:$0xff] %v318_v22  ;;  %321 = vst [vmem:[%s1105_s29 + $0xb8] sm:$0xff] %v320_v23  ;;  %v322_v24 = vld [vmem:[%s1100_s28 + $0x180] sm:$0xff]  ;;  %v324_v25 = vld [vmem:[%s1100_s28 + $0x190] sm:$0xff] }
  0x22   : > { %v326_v26 = vld [vmem:[%s1100_s28 + $0x1a0] sm:$0xff]  ;;  %323 = vst [vmem:[%s1105_s29 + $0xc0] sm:$0xff] %v322_v24  ;;  %325 = vst [vmem:[%s1105_s29 + $0xc8] sm:$0xff] %v324_v25  ;;  %v328_v27 = vld [vmem:[%s1100_s28 + $0x1b0] sm:$0xff] }
  0x23   : > { %327 = vst [vmem:[%s1105_s29 + $0xd0] sm:$0xff] %v326_v26  ;;  %v330_v28 = vld [vmem:[%s1100_s28 + $0x1c0] sm:$0xff]  ;;  %v332_v29 = vld [vmem:[%s1100_s28 + $0x1d0] sm:$0xff]  ;;  %329 = vst [vmem:[%s1105_s29 + $0xd8] sm:$0xff] %v328_v27 }
  0x24   : > { %331 = vst [vmem:[%s1105_s29 + $0xe0] sm:$0xff] %v330_v28  ;;  %333 = vst [vmem:[%s1105_s29 + $0xe8] sm:$0xff] %v332_v29  ;;  %v334_v30 = vld [vmem:[%s1100_s28 + $0x1e0] sm:$0xff]  ;;  %v336_v31 = vld [vmem:[%s1100_s28 + $0x1f0] sm:$0xff] }
  0x25   : > { %335 = vst [vmem:[%s1105_s29 + $0xf0] sm:$0xff] %v334_v30  ;;  %337 = vst [vmem:[%s1105_s29 + $0xf8] sm:$0xff] %v336_v31 }
  0x26 PF: > { %p856_p8 = scmp.ge.s32.totalorder %s1030_s16, 1  ;;  %p350_p9 = scmp.lt.s32.totalorder %s1030_s16, 3 }
  0x28   : > { %p351_p10 = pnand %p856_p8, %p350_p9 }
  0x29   : > { %s357_s30 = sand.u32 (!%p351_p10), 1, %s1014_s12   ;;  %v991_v32 = vld [vmem:[%s1240_s0 + $0x4] ss:$8 sps:$4 sm:$0xff] (!%p351_p10)   ;;  %v989_v1 = vld [vmem:[%s1240_s0] ss:$8 sps:$4 sm:$0xff] (!%p351_p10)   ;;  %s859_s10 = sshll.u32 (!%p351_p10), %s1022_s14, 1  ;;  %v690_v2 = vlaneseq (!%p351_p10) }
  0x2a   : > { %354 = sbr.rel (%p351_p10) target bundleno = 335 (0x14f), region = 66  ;;  %s857_s4 = sshll.u32 (!%p351_p10), %s357_s30, 8  ;;  %662 = vmatprep.mubr.bf16.mxu0 (!%p351_p10), %v991_v32 }
  0x2b   : > { %s1176_s7 = scalar_lea.vmem (!%p351_p10), [#allocation3], %s857_s4  ;;  %p408_p11 = scmp.lt.s32.totalorder (!%p351_p10), %s859_s10, 3  ;;  %v691_v3 = vshrl.u32 (!%p351_p10), %v690_v2, 7 }
  0x2c   : > { %v941_v33 = vld [vmem:[%s1176_s7 + $0x4] ss:$8 sps:$4 sm:$0xff] (!%p351_p10)   ;;  %v943_v34 = vld [vmem:[%s1176_s7] ss:$8 sps:$4 sm:$0xff] (!%p351_p10)   ;;  %v944_v35 = vld [vmem:[%s1176_s7 + $0x14] ss:$8 sps:$4 sm:$0xff] (!%p351_p10)  }
  0x2d   : > { %630 = vmatprep.subr.bf16.mxu0 (!%p351_p10), %v941_v33  ;;  %v946_v36 = vld [vmem:[%s1176_s7 + $0x10] ss:$8 sps:$4 sm:$0xff] (!%p351_p10)   ;;  %v947_v37 = vld [vmem:[%s1176_s7 + $0x24] ss:$8 sps:$4 sm:$0xff] (!%p351_p10)   ;;  %v949_v38 = vld [vmem:[%s1176_s7 + $0x20] ss:$8 sps:$4 sm:$0xff] (!%p351_p10)  }
  0x2e   : > { %631 = vmatpush1.bf16.msra.mxu0 (!%p351_p10), %v943_v34  ;;  %v950_v39 = vld [vmem:[%s1176_s7 + $0x34] ss:$8 sps:$4 sm:$0xff] (!%p351_p10)   ;;  %v952_v40 = vld [vmem:[%s1176_s7 + $0x30] ss:$8 sps:$4 sm:$0xff] (!%p351_p10)   ;;  %v953_v41 = vld [vmem:[%s1176_s7 + $0x44] ss:$8 sps:$4 sm:$0xff] (!%p351_p10)  }
  0x2f   : > { %632 = vmatprep.subr.bf16.mxu0 (!%p351_p10), %v944_v35  ;;  %v955_v42 = vld [vmem:[%s1176_s7 + $0x40] ss:$8 sps:$4 sm:$0xff] (!%p351_p10)   ;;  %v956_v43 = vld [vmem:[%s1176_s7 + $0x54] ss:$8 sps:$4 sm:$0xff] (!%p351_p10)   ;;  %v958_v44 = vld [vmem:[%s1176_s7 + $0x50] ss:$8 sps:$4 sm:$0xff] (!%p351_p10)  }
  0x30   : > { %v959_v45 = vld [vmem:[%s1176_s7 + $0x64] ss:$8 sps:$4 sm:$0xff] (!%p351_p10)   ;;  %v961_v46 = vld [vmem:[%s1176_s7 + $0x60] ss:$8 sps:$4 sm:$0xff] (!%p351_p10)   ;;  %v962_v47 = vld [vmem:[%s1176_s7 + $0x74] ss:$8 sps:$4 sm:$0xff] (!%p351_p10)  }
  0x31   : > { %v964_v48 = vld [vmem:[%s1176_s7 + $0x70] ss:$8 sps:$4 sm:$0xff]   ;;  %v965_v49 = vld [vmem:[%s1176_s7 + $0x84] ss:$8 sps:$4 sm:$0xff]   ;;  %v967_v50 = vld [vmem:[%s1176_s7 + $0x80] ss:$8 sps:$4 sm:$0xff]  }
  0x32   : > { %633 = vmatpush1.bf16.msra.mxu0 %v946_v36  ;;  %v968_v51 = vld [vmem:[%s1176_s7 + $0x94] ss:$8 sps:$4 sm:$0xff]   ;;  %v970_v52 = vld [vmem:[%s1176_s7 + $0x90] ss:$8 sps:$4 sm:$0xff]   ;;  %v971_v53 = vld [vmem:[%s1176_s7 + $0xa4] ss:$8 sps:$4 sm:$0xff]  }
  0x33   : > { %634 = vmatprep.subr.bf16.mxu0 %v947_v37  ;;  %v973_v54 = vld [vmem:[%s1176_s7 + $0xa0] ss:$8 sps:$4 sm:$0xff]   ;;  %v974_v55 = vld [vmem:[%s1176_s7 + $0xb4] ss:$8 sps:$4 sm:$0xff]   ;;  %v976_v56 = vld [vmem:[%s1176_s7 + $0xb0] ss:$8 sps:$4 sm:$0xff]  }
  0x34   : > { %v977_v57 = vld [vmem:[%s1176_s7 + $0xc4] ss:$8 sps:$4 sm:$0xff]   ;;  %v979_v58 = vld [vmem:[%s1176_s7 + $0xc0] ss:$8 sps:$4 sm:$0xff]   ;;  %v980_v59 = vld [vmem:[%s1176_s7 + $0xd4] ss:$8 sps:$4 sm:$0xff]  }
  0x35   : > { %v982_v60 = vld [vmem:[%s1176_s7 + $0xd0] ss:$8 sps:$4 sm:$0xff]   ;;  %v983_v61 = vld [vmem:[%s1176_s7 + $0xe4] ss:$8 sps:$4 sm:$0xff]   ;;  %v985_v62 = vld [vmem:[%s1176_s7 + $0xe0] ss:$8 sps:$4 sm:$0xff]  }
  0x36   : > { %635 = vmatpush1.bf16.msra.mxu0 %v949_v38  ;;  %v986_v63 = vld [vmem:[%s1176_s7 + $0xf4] ss:$8 sps:$4 sm:$0xff]   ;;  %v988_v0 = vld [vmem:[%s1176_s7 + $0xf0] ss:$8 sps:$4 sm:$0xff]   ;;  %s1252_s10 = smov (!%p408_p11, %s859_s10), 3  ;;  %v692_v4 = vsub.s32 0, %v691_v3 }
  0x37   : > { %636 = vmatprep.subr.bf16.mxu0 %v950_v39  ;;  %s410_s19 = scalar_lea.vmem %s1242_s2, %s1252_s10  ;;  %v696_v6 = vsub.s32 1, %v691_v3  ;;  %s858_s20 = sshll.u32 %s357_s30, 5 }
  0x38   : > { %v688_v5 = vld [vmem:[%s410_s19] sm:$0x3]  ;;  %s392_s23 = scalar_lea.vmem [#allocation4], %s858_s20  ;;  %s900_s12 = sshll.u32 (%p1087_p6), %s1022_s14, 4 }
  0x39   : > { %v693_v7 = vrot.slane %v688_v5, %v692_v4  ;;  %v697_v8 = vrot.slane %v688_v5, %v696_v6  ;;  %s720_s26 = scalar_lea.vmem (%p1087_p6), %s1243_s3, %s900_s12 }
  0x3a   : > { %637 = vmatpush1.bf16.msra.mxu0 %v952_v40 }
  0x3b   : > { %638 = vmatprep.subr.bf16.mxu0 %v953_v41 }
  0x3e   : > { %639 = vmatpush1.bf16.msra.mxu0 %v955_v42 }
  0x3f   : > { %640 = vmatprep.subr.bf16.mxu0 %v956_v43 }
  0x42   : > { %641 = vmatpush1.bf16.msra.mxu0 %v958_v44 }
  0x43   : > { %642 = vmatprep.subr.bf16.mxu0 %v959_v45 }
  0x46   : > { %643 = vmatpush1.bf16.msra.mxu0 %v961_v46 }
  0x47   : > { %644 = vmatprep.subr.bf16.mxu0 %v962_v47 }
  0x4a   : > { %645 = vmatpush1.bf16.msra.mxu0 %v964_v48 }
  0x4b   : > { %646 = vmatprep.subr.bf16.mxu0 %v965_v49 }
  0x4e   : > { %647 = vmatpush1.bf16.msra.mxu0 %v967_v50 }
  0x4f   : > { %648 = vmatprep.subr.bf16.mxu0 %v968_v51 }
  0x52   : > { %649 = vmatpush1.bf16.msra.mxu0 %v970_v52 }
  0x53   : > { %650 = vmatprep.subr.bf16.mxu0 %v971_v53 }
  0x56   : > { %651 = vmatpush1.bf16.msra.mxu0 %v973_v54 }
  0x57   : > { %652 = vmatprep.subr.bf16.mxu0 %v974_v55 }
  0x5a   : > { %653 = vmatpush1.bf16.msra.mxu0 %v976_v56 }
  0x5b   : > { %654 = vmatprep.subr.bf16.mxu0 %v977_v57 }
  0x5e   : > { %655 = vmatpush1.bf16.msra.mxu0 %v979_v58 }
  0x5f   : > { %656 = vmatprep.subr.bf16.mxu0 %v980_v59 }
  0x62   : > { %657 = vmatpush1.bf16.msra.mxu0 %v982_v60 }
  0x63   : > { %658 = vmatprep.subr.bf16.mxu0 %v983_v61 }
  0x66   : > { %659 = vmatpush1.bf16.msra.mxu0 %v985_v62 }
  0x67   : > { %660 = vmatprep.subr.bf16.mxu0 %v986_v63 }
  0x6a   : > { %661 = vmatpush1.bf16.msra.mxu0 %v988_v0 }
  0x6d   : > { %663 = vmatmul.mubr.bf16.vlgmr.msra.gmra.mrb[0].mxu0 %v989_v1 }
 0x140   : > { %v664_v9 = vpop.f32.mrb[0].mxu0  ;;  %714 = sbr.rel (!%p1087_p6) target bundleno = 335 (0x14f), region = 82 }
 0x141   : > { %v700_v10 = vadd.f32 %v693_v7, %v664_v9  ;;  %v666_v11 = vpop.f32.mrb[1].mxu0 }
 0x142   : > { %v701_v12 = vadd.f32 %v697_v8, %v666_v11  ;;  %v668_v13 = vpop.f32.mrb[2].mxu0 }
 0x143   : > { %704 = vst [vmem:[%s392_s23] sm:$0xff] %v700_v10  ;;  %v702_v14 = vadd.f32 %v693_v7, %v668_v13  ;;  %v670_v15 = vpop.f32.mrb[3].mxu0 }
 0x144   : > { %705 = vst [vmem:[%s392_s23 + $0x8] sm:$0xff] %v701_v12  ;;  %v703_v16 = vadd.f32 %v697_v8, %v670_v15 }
 0x145   : > { %706 = vst [vmem:[%s392_s23 + $0x10] sm:$0xff] %v702_v14 }
 0x146   : > { %707 = vst [vmem:[%s392_s23 + $0x18] sm:$0xff] %v703_v16 }
 0x14a   : > { %v733_v17 = vld [vmem:[%s392_s23] sm:$0xff] }
 0x14b   : > { %v735_v18 = vld [vmem:[%s392_s23 + $0x8] sm:$0xff]  ;;  %734 = vst [vmem:[%s720_s26] sm:$0xff] %v733_v17 }
 0x14c   : > { %v737_v19 = vld [vmem:[%s392_s23 + $0x10] sm:$0xff]  ;;  %736 = vst [vmem:[%s720_s26 + $0x8] sm:$0xff] %v735_v18 }
 0x14d   : > { %v739_v20 = vld [vmem:[%s392_s23 + $0x18] sm:$0xff]  ;;  %738 = vst [vmem:[%s720_s26 + $0x20] sm:$0xff] %v737_v19 }
 0x14e   : > { %740 = vst [vmem:[%s720_s26 + $0x28] sm:$0xff] %v739_v20 }
 0x14f PF: > { %s13_s16 = sadd.s32 1, %s1030_s16   ;;  %s1245_s12 = smov %s1018_s13 }
 0x150   : > { %p10_p12 = scmp.ge.s32.totalorder %s13_s16, 4   ;;  %s1246_s13 = smov %s1092_s22 }
 0x151   : > { %s1247_s14 = smov %s1026_s15  ;;  %s1248_s15 = smov %s1250_s17 }
 0x152   :  { %12 = sbr.rel (!%p10_p12) target bundleno = 3 (0x3), region = 142 }

// kernel: _lambda_.40
= control target key start
LH: loop header
LB: loop body
LE: loop exit
PB: predicated region body
PF: predicated region fallthrough
CT: control target
= control target key end

     0   :  { %s2170_s0 = inlined_call_operand.vmem [shape: bf16[16,4608], index: 0, kind: input, shape index: {}]   ;;  %s2171_s1 = inlined_call_operand.vmem [shape: bf16[4608,512], index: 1, kind: input, shape index: {}]   ;;  %s2172_s2 = inlined_call_operand.vmem [shape: f32[1,512], index: 2, kind: input, shape index: {}]   ;;  %s2173_s3 = inlined_call_operand.vmem [shape: f32[16,512], index: 3, kind: input, shape index: {}]   ;;  %s2174_s4 = inlined_call_operand.vmem [shape: f32[16,512], index: 4, kind: output, shape index: {}]  }
   0x1   :  { %2177 = sst [smem:[#allocation10_spill]] %s2170_s0 }
   0x2   :  { %s1761_s15 = smov 0   ;;  %s1763_s16 = smov 0  }
   0x3   :  { %s1765_s17 = smov 0   ;;  %s1767_s18 = smov 0  }
   0x4   :  { %s1769_s19 = smov 0   ;;  %s1771_s20 = smov 0  }
   0x5   :  { %s1773_s21 = smov 0   ;;  %s1775_s22 = smov 0  }
   0x6   :  { %s1777_s23 = smov 0   ;;  %s1779_s24 = smov 0  }
   0x7   :  { %s1781_s25 = smov 0  }
   0x8 LB: > { %s1352_s26 = sadd.s32 4294967295, %s1733_s25   ;;  %s26_s27 = sadd.s32 1, %s1725_s23  ;;  %s1733_s25 = sphi %s1781_s25, %s14_s25   ;;  %s1729_s24 = sphi %s1779_s24, %s2198_s24   ;;  %s1725_s23 = sphi %s1777_s23, %s2197_s23   ;;  %s1721_s22 = sphi %s1775_s22, %s2196_s22   ;;  %s1717_s21 = sphi %s1773_s21, %s2195_s21   ;;  %s1713_s20 = sphi %s1771_s20, %s2194_s20   ;;  %s1709_s19 = sphi %s1769_s19, %s2193_s19   ;;  %s1705_s18 = sphi %s1767_s18, %s2192_s18   ;;  %s1701_s17 = sphi %s1765_s17, %s2191_s17   ;;  %s1697_s16 = sphi %s1763_s16, %s2190_s16   ;;  %s1693_s15 = sphi %s1761_s15, %s2189_s15  }
   0x9   : > { %p27_p0 = scmp.ge.s32.totalorder %s26_s27, 9  ;;  %s29_s28 = sadd.s32 1, %s1729_s24 }
   0xa   : > { %s42_s29 = sadd.s32 1, %s1713_s20  ;;  %p49_p1 = scmp.ne.s32.totalorder %s1713_s20, %s1709_s19 }
   0xb   : > { %s2200_s27 = smov (%p27_p0, %s26_s27), 0  ;;  %s2202_s28 = smov (!%p27_p0, %s29_s28), %s1729_s24 }
   0xc   : > { %2178 = sst [smem:[#allocation7_spill]] %s2200_s27  ;;  %s38_s30 = ssub.s32 %s1725_s23, %s2200_s27 }
   0xd   : > { %p50_p2 = scmp.eq.s32.totalorder %s1733_s25, 0  ;;  %p31_p3 = scmp.ge.s32.totalorder %s2202_s28, 2 }
   0xe   : > { %p40_p4 = scmp.eq.s32.totalorder %s38_s30, 0  ;;  %s70_s6 = sadd.s32 1, %s1705_s18 }
   0xf   : > { %p1830_p5 = por %p50_p2, %p49_p1  ;;  %s2204_s28 = smov (%p31_p3, %s2202_s28), 0 }
  0x10   : > { %2180 = sst [smem:[#allocation8_spill]] %s2204_s28  ;;  %s66_s8 = ssub.s32 %s1729_s24, %s2204_s28 }
  0x11   : > { %s1838_s7 = scalar_select %p40_p4, %s1713_s20, %s42_s29  }
  0x12   : > { %p77_p6 = scmp.ne.s32.totalorder %s1705_s18, %s1701_s17  ;;  %s67_s9 = sor.u32 %s66_s8, %s38_s30 }
  0x13   : > { %2181 = sst [smem:[#allocation9_spill]] %s1838_s7  ;;  %p122_p7 = scmp.eq.s32.totalorder %s66_s8, 0 }
  0x14   : > { %p68_p8 = scmp.eq.s32.totalorder %s67_s9, 0  ;;  %p1846_p9 = por %p77_p6, %p50_p2 }
  0x15   : > { %s124_s11 = sadd.s32 1, %s1697_s16  ;;  %p131_p10 = scmp.ne.s32.totalorder %s1697_s16, %s1693_s15 }
  0x16   : > { %s1854_s12 = scalar_select %p68_p8, %s1705_s18, %s70_s6  }
  0x17   : > { %s1857_s13 = scalar_select %p122_p7, %s1697_s16, %s124_s11  }
  0x18   : > { %p1861_p11 = por %p131_p10, %p50_p2  ;;  %p163_p12 = scmp.eq.s32.totalorder %s1352_s26, 17 }
  0x19   : > { %p1355_p0 = scmp.ge.s32.totalorder %s1733_s25, 18 }
  0x1a   : > { %p1865_p13 = por %p163_p12, %p131_p10 }
  0x1b   : > { %185 = sbr.rel (%p1355_p0) target bundleno = 92 (0x5c), region = 16 }
  0x22   : > { %188 = sbr.rel (!%p1830_p5) target bundleno = 46 (0x2e), region = 20  ;;  %s190_s30 = sand.u32 (%p1830_p5), 1, %s1713_s20  }
  0x23   : > { %s1448_s6 = sshll.u32 (%p1830_p5), %s1725_s23, 4  ;;  %s1356_s8 = sshll.u32 (%p1830_p5), %s190_s30, 5 }
  0x24   : > { %s2185_s0 = sld [smem:[#allocation10_spill]] (%p1830_p5)  ;;  %s192_s26 = scalar_lea.vmem (%p1830_p5), [#allocation3], %s1356_s8 }
  0x2a   : > { %s198_s28 = scalar_lea.vmem %s2185_s0, %s1448_s6 }
  0x2b   : > { %v211_v0 = vld [vmem:[%s198_s28] sm:$0xff]  ;;  %v213_v1 = vld [vmem:[%s198_s28 + $0x8] sm:$0xff]  ;;  %v215_v2 = vld [vmem:[%s198_s28 + $0x90] sm:$0xff] }
  0x2c   : > { %212 = vst [vmem:[%s192_s26] sm:$0xff] %v211_v0  ;;  %214 = vst [vmem:[%s192_s26 + $0x8] sm:$0xff] %v213_v1  ;;  %v217_v3 = vld [vmem:[%s198_s28 + $0x98] sm:$0xff] }
  0x2d   : > { %216 = vst [vmem:[%s192_s26 + $0x10] sm:$0xff] %v215_v2  ;;  %218 = vst [vmem:[%s192_s26 + $0x18] sm:$0xff] %v217_v3 }
  0x2e PF: > { %224 = sbr.rel (!%p1846_p9) target bundleno = 85 (0x55), region = 43  ;;  %s226_s5 = sand.u32 (%p1846_p9), 1, %s1705_s18  }
  0x2f   : > { %s1361_s30 = sshll.u32 (%p1846_p9), %s1729_s24, 1  ;;  %s1359_s9 = sshll.u32 (%p1846_p9), %s226_s5, 9 }
  0x30   : > { %s1449_s6 = sshll.u32 (%p1846_p9), %s1725_s23, 8  ;;  %s1890_s28 = scalar_lea.vmem (%p1846_p9), [#allocation4], %s1359_s9 }
  0x31   : > { %s232_s11 = sadd.s32 (%p1846_p9), %s1449_s6, %s1361_s30 }
  0x32   : > { %s1363_s0 = sshll.u32 (%p1846_p9), %s232_s11, 2 }
  0x33   : > { %s1885_s7 = scalar_lea.vmem (%p1846_p9), %s2171_s1, %s1363_s0 }
  0x34   : > { %v388_v4 = vld [vmem:[%s1885_s7] sm:$0xff] (%p1846_p9)  ;;  %v390_v5 = vld [vmem:[%s1885_s7 + $0x10] sm:$0xff] (%p1846_p9) }
  0x35   : > { %v392_v6 = vld [vmem:[%s1885_s7 + $0x20] sm:$0xff]  ;;  %389 = vst [vmem:[%s1890_s28] sm:$0xff] %v388_v4  ;;  %391 = vst [vmem:[%s1890_s28 + $0x8] sm:$0xff] %v390_v5  ;;  %v394_v7 = vld [vmem:[%s1885_s7 + $0x30] sm:$0xff] }
  0x36   : > { %393 = vst [vmem:[%s1890_s28 + $0x10] sm:$0xff] %v392_v6  ;;  %v396_v8 = vld [vmem:[%s1885_s7 + $0x40] sm:$0xff]  ;;  %v398_v9 = vld [vmem:[%s1885_s7 + $0x50] sm:$0xff]  ;;  %395 = vst [vmem:[%s1890_s28 + $0x18] sm:$0xff] %v394_v7 }
  0x37   : > { %397 = vst [vmem:[%s1890_s28 + $0x20] sm:$0xff] %v396_v8  ;;  %399 = vst [vmem:[%s1890_s28 + $0x28] sm:$0xff] %v398_v9  ;;  %v400_v10 = vld [vmem:[%s1885_s7 + $0x60] sm:$0xff]  ;;  %v402_v11 = vld [vmem:[%s1885_s7 + $0x70] sm:$0xff] }
  0x38   : > { %v404_v12 = vld [vmem:[%s1885_s7 + $0x80] sm:$0xff]  ;;  %401 = vst [vmem:[%s1890_s28 + $0x30] sm:$0xff] %v400_v10  ;;  %403 = vst [vmem:[%s1890_s28 + $0x38] sm:$0xff] %v402_v11  ;;  %v406_v13 = vld [vmem:[%s1885_s7 + $0x90] sm:$0xff] }
  0x39   : > { %405 = vst [vmem:[%s1890_s28 + $0x40] sm:$0xff] %v404_v12  ;;  %v408_v14 = vld [vmem:[%s1885_s7 + $0xa0] sm:$0xff]  ;;  %v410_v15 = vld [vmem:[%s1885_s7 + $0xb0] sm:$0xff]  ;;  %407 = vst [vmem:[%s1890_s28 + $0x48] sm:$0xff] %v406_v13 }
  0x3a   : > { %409 = vst [vmem:[%s1890_s28 + $0x50] sm:$0xff] %v408_v14  ;;  %411 = vst [vmem:[%s1890_s28 + $0x58] sm:$0xff] %v410_v15  ;;  %v412_v16 = vld [vmem:[%s1885_s7 + $0xc0] sm:$0xff]  ;;  %v414_v17 = vld [vmem:[%s1885_s7 + $0xd0] sm:$0xff] }
  0x3b   : > { %v416_v18 = vld [vmem:[%s1885_s7 + $0xe0] sm:$0xff]  ;;  %413 = vst [vmem:[%s1890_s28 + $0x60] sm:$0xff] %v412_v16  ;;  %415 = vst [vmem:[%s1890_s28 + $0x68] sm:$0xff] %v414_v17  ;;  %v418_v19 = vld [vmem:[%s1885_s7 + $0xf0] sm:$0xff] }
  0x3c   : > { %417 = vst [vmem:[%s1890_s28 + $0x70] sm:$0xff] %v416_v18  ;;  %v420_v20 = vld [vmem:[%s1885_s7 + $0x100] sm:$0xff]  ;;  %v422_v21 = vld [vmem:[%s1885_s7 + $0x110] sm:$0xff]  ;;  %419 = vst [vmem:[%s1890_s28 + $0x78] sm:$0xff] %v418_v19 }
  0x3d   : > { %421 = vst [vmem:[%s1890_s28 + $0x80] sm:$0xff] %v420_v20  ;;  %423 = vst [vmem:[%s1890_s28 + $0x88] sm:$0xff] %v422_v21  ;;  %v424_v22 = vld [vmem:[%s1885_s7 + $0x120] sm:$0xff]  ;;  %v426_v23 = vld [vmem:[%s1885_s7 + $0x130] sm:$0xff] }
  0x3e   : > { %v428_v24 = vld [vmem:[%s1885_s7 + $0x140] sm:$0xff]  ;;  %425 = vst [vmem:[%s1890_s28 + $0x90] sm:$0xff] %v424_v22  ;;  %427 = vst [vmem:[%s1890_s28 + $0x98] sm:$0xff] %v426_v23  ;;  %v430_v25 = vld [vmem:[%s1885_s7 + $0x150] sm:$0xff] }
  0x3f   : > { %429 = vst [vmem:[%s1890_s28 + $0xa0] sm:$0xff] %v428_v24  ;;  %v432_v26 = vld [vmem:[%s1885_s7 + $0x160] sm:$0xff]  ;;  %v434_v27 = vld [vmem:[%s1885_s7 + $0x170] sm:$0xff]  ;;  %431 = vst [vmem:[%s1890_s28 + $0xa8] sm:$0xff] %v430_v25 }
  0x40   : > { %433 = vst [vmem:[%s1890_s28 + $0xb0] sm:$0xff] %v432_v26  ;;  %435 = vst [vmem:[%s1890_s28 + $0xb8] sm:$0xff] %v434_v27  ;;  %v436_v28 = vld [vmem:[%s1885_s7 + $0x180] sm:$0xff]  ;;  %v438_v29 = vld [vmem:[%s1885_s7 + $0x190] sm:$0xff] }
  0x41   : > { %v440_v30 = vld [vmem:[%s1885_s7 + $0x1a0] sm:$0xff]  ;;  %437 = vst [vmem:[%s1890_s28 + $0xc0] sm:$0xff] %v436_v28  ;;  %439 = vst [vmem:[%s1890_s28 + $0xc8] sm:$0xff] %v438_v29  ;;  %v442_v31 = vld [vmem:[%s1885_s7 + $0x1b0] sm:$0xff] }
  0x42   : > { %441 = vst [vmem:[%s1890_s28 + $0xd0] sm:$0xff] %v440_v30  ;;  %v444_v32 = vld [vmem:[%s1885_s7 + $0x1c0] sm:$0xff]  ;;  %v446_v33 = vld [vmem:[%s1885_s7 + $0x1d0] sm:$0xff]  ;;  %443 = vst [vmem:[%s1890_s28 + $0xd8] sm:$0xff] %v442_v31 }
  0x43   : > { %445 = vst [vmem:[%s1890_s28 + $0xe0] sm:$0xff] %v444_v32  ;;  %447 = vst [vmem:[%s1890_s28 + $0xe8] sm:$0xff] %v446_v33  ;;  %v448_v34 = vld [vmem:[%s1885_s7 + $0x1e0] sm:$0xff]  ;;  %v450_v35 = vld [vmem:[%s1885_s7 + $0x1f0] sm:$0xff] }
  0x44   : > { %v452_v36 = vld [vmem:[%s1885_s7 + $0x200] sm:$0xff]  ;;  %449 = vst [vmem:[%s1890_s28 + $0xf0] sm:$0xff] %v448_v34  ;;  %451 = vst [vmem:[%s1890_s28 + $0xf8] sm:$0xff] %v450_v35  ;;  %v454_v37 = vld [vmem:[%s1885_s7 + $0x210] sm:$0xff] }
  0x45   : > { %453 = vst [vmem:[%s1890_s28 + $0x100] sm:$0xff] %v452_v36  ;;  %v456_v38 = vld [vmem:[%s1885_s7 + $0x220] sm:$0xff]  ;;  %v458_v39 = vld [vmem:[%s1885_s7 + $0x230] sm:$0xff]  ;;  %455 = vst [vmem:[%s1890_s28 + $0x108] sm:$0xff] %v454_v37 }
  0x46   : > { %457 = vst [vmem:[%s1890_s28 + $0x110] sm:$0xff] %v456_v38  ;;  %459 = vst [vmem:[%s1890_s28 + $0x118] sm:$0xff] %v458_v39  ;;  %v460_v40 = vld [vmem:[%s1885_s7 + $0x240] sm:$0xff]  ;;  %v462_v41 = vld [vmem:[%s1885_s7 + $0x250] sm:$0xff] }
  0x47   : > { %v464_v42 = vld [vmem:[%s1885_s7 + $0x260] sm:$0xff]  ;;  %461 = vst [vmem:[%s1890_s28 + $0x120] sm:$0xff] %v460_v40  ;;  %463 = vst [vmem:[%s1890_s28 + $0x128] sm:$0xff] %v462_v41  ;;  %v466_v43 = vld [vmem:[%s1885_s7 + $0x270] sm:$0xff] }
  0x48   : > { %465 = vst [vmem:[%s1890_s28 + $0x130] sm:$0xff] %v464_v42  ;;  %v468_v44 = vld [vmem:[%s1885_s7 + $0x280] sm:$0xff]  ;;  %v470_v45 = vld [vmem:[%s1885_s7 + $0x290] sm:$0xff]  ;;  %467 = vst [vmem:[%s1890_s28 + $0x138] sm:$0xff] %v466_v43 }
  0x49   : > { %469 = vst [vmem:[%s1890_s28 + $0x140] sm:$0xff] %v468_v44  ;;  %471 = vst [vmem:[%s1890_s28 + $0x148] sm:$0xff] %v470_v45  ;;  %v472_v46 = vld [vmem:[%s1885_s7 + $0x2a0] sm:$0xff]  ;;  %v474_v47 = vld [vmem:[%s1885_s7 + $0x2b0] sm:$0xff] }
  0x4a   : > { %v476_v48 = vld [vmem:[%s1885_s7 + $0x2c0] sm:$0xff]  ;;  %473 = vst [vmem:[%s1890_s28 + $0x150] sm:$0xff] %v472_v46  ;;  %475 = vst [vmem:[%s1890_s28 + $0x158] sm:$0xff] %v474_v47  ;;  %v478_v49 = vld [vmem:[%s1885_s7 + $0x2d0] sm:$0xff] }
  0x4b   : > { %477 = vst [vmem:[%s1890_s28 + $0x160] sm:$0xff] %v476_v48  ;;  %v480_v50 = vld [vmem:[%s1885_s7 + $0x2e0] sm:$0xff]  ;;  %v482_v51 = vld [vmem:[%s1885_s7 + $0x2f0] sm:$0xff]  ;;  %479 = vst [vmem:[%s1890_s28 + $0x168] sm:$0xff] %v478_v49 }
  0x4c   : > { %481 = vst [vmem:[%s1890_s28 + $0x170] sm:$0xff] %v480_v50  ;;  %483 = vst [vmem:[%s1890_s28 + $0x178] sm:$0xff] %v482_v51  ;;  %v484_v52 = vld [vmem:[%s1885_s7 + $0x300] sm:$0xff]  ;;  %v486_v53 = vld [vmem:[%s1885_s7 + $0x310] sm:$0xff] }
  0x4d   : > { %v488_v54 = vld [vmem:[%s1885_s7 + $0x320] sm:$0xff]  ;;  %485 = vst [vmem:[%s1890_s28 + $0x180] sm:$0xff] %v484_v52  ;;  %487 = vst [vmem:[%s1890_s28 + $0x188] sm:$0xff] %v486_v53  ;;  %v490_v55 = vld [vmem:[%s1885_s7 + $0x330] sm:$0xff] }
  0x4e   : > { %489 = vst [vmem:[%s1890_s28 + $0x190] sm:$0xff] %v488_v54  ;;  %v492_v56 = vld [vmem:[%s1885_s7 + $0x340] sm:$0xff]  ;;  %v494_v57 = vld [vmem:[%s1885_s7 + $0x350] sm:$0xff]  ;;  %491 = vst [vmem:[%s1890_s28 + $0x198] sm:$0xff] %v490_v55 }
  0x4f   : > { %493 = vst [vmem:[%s1890_s28 + $0x1a0] sm:$0xff] %v492_v56  ;;  %495 = vst [vmem:[%s1890_s28 + $0x1a8] sm:$0xff] %v494_v57  ;;  %v496_v58 = vld [vmem:[%s1885_s7 + $0x360] sm:$0xff]  ;;  %v498_v59 = vld [vmem:[%s1885_s7 + $0x370] sm:$0xff] }
  0x50   : > { %v500_v60 = vld [vmem:[%s1885_s7 + $0x380] sm:$0xff]  ;;  %497 = vst [vmem:[%s1890_s28 + $0x1b0] sm:$0xff] %v496_v58  ;;  %499 = vst [vmem:[%s1890_s28 + $0x1b8] sm:$0xff] %v498_v59  ;;  %v502_v61 = vld [vmem:[%s1885_s7 + $0x390] sm:$0xff] }
  0x51   : > { %501 = vst [vmem:[%s1890_s28 + $0x1c0] sm:$0xff] %v500_v60  ;;  %v504_v62 = vld [vmem:[%s1885_s7 + $0x3a0] sm:$0xff]  ;;  %v506_v63 = vld [vmem:[%s1885_s7 + $0x3b0] sm:$0xff]  ;;  %503 = vst [vmem:[%s1890_s28 + $0x1c8] sm:$0xff] %v502_v61 }
  0x52   : > { %505 = vst [vmem:[%s1890_s28 + $0x1d0] sm:$0xff] %v504_v62  ;;  %507 = vst [vmem:[%s1890_s28 + $0x1d8] sm:$0xff] %v506_v63  ;;  %v508_v0 = vld [vmem:[%s1885_s7 + $0x3c0] sm:$0xff]  ;;  %v510_v1 = vld [vmem:[%s1885_s7 + $0x3d0] sm:$0xff] }
  0x53   : > { %v512_v2 = vld [vmem:[%s1885_s7 + $0x3e0] sm:$0xff]  ;;  %509 = vst [vmem:[%s1890_s28 + $0x1e0] sm:$0xff] %v508_v0  ;;  %511 = vst [vmem:[%s1890_s28 + $0x1e8] sm:$0xff] %v510_v1  ;;  %v514_v3 = vld [vmem:[%s1885_s7 + $0x3f0] sm:$0xff] }
  0x54   : > { %513 = vst [vmem:[%s1890_s28 + $0x1f0] sm:$0xff] %v512_v2  ;;  %515 = vst [vmem:[%s1890_s28 + $0x1f8] sm:$0xff] %v514_v3 }
  0x55 PF: > { %529 = sbr.rel (!%p1861_p11) target bundleno = 92 (0x5c), region = 85  ;;  %s531_s0 = sand.u32 (%p1861_p11), 1, %s1697_s16  }
  0x56   : > { %s1450_s27 = sshll.u32 (%p1861_p11), %s1729_s24, 4  ;;  %s1364_s10 = sshll.u32 (%p1861_p11), %s531_s0, 5 }
  0x57   : > { %s539_s30 = scalar_lea.vmem (%p1861_p11), %s2173_s3, %s1450_s27  ;;  %s533_s9 = scalar_lea.vmem (%p1861_p11), [#allocation5], %s1364_s10 }
  0x58   : > { %v552_v4 = vld [vmem:[%s539_s30] sm:$0xff] (%p1861_p11)  ;;  %v554_v5 = vld [vmem:[%s539_s30 + $0x8] sm:$0xff] (%p1861_p11) }
  0x59   : > { %v556_v6 = vld [vmem:[%s539_s30 + $0x20] sm:$0xff] (%p1861_p11)  ;;  %553 = vst [vmem:[%s533_s9] sm:$0xff] (%p1861_p11), %v552_v4  ;;  %555 = vst [vmem:[%s533_s9 + $0x8] sm:$0xff] (%p1861_p11), %v554_v5  ;;  %v558_v7 = vld [vmem:[%s539_s30 + $0x28] sm:$0xff] (%p1861_p11) }
  0x5a   : > { %557 = vst [vmem:[%s533_s9 + $0x10] sm:$0xff] (%p1861_p11), %v556_v6  ;;  %559 = vst [vmem:[%s533_s9 + $0x18] sm:$0xff] (%p1861_p11), %v558_v7 }
  0x5c PF: > { %p1367_p1 = scmp.ge.s32.totalorder %s1733_s25, 1  ;;  %p564_p2 = scmp.lt.s32.totalorder %s1733_s25, 19 }
  0x5e   : > { %p565_p3 = pnand %p1367_p1, %p564_p2 }
  0x5f   : > { %s571_s7 = sand.u32 (!%p565_p3), 1, %s1709_s19   ;;  %s578_s14 = sand.u32 (!%p565_p3), 1, %s1701_s17  }
  0x60   : > { %568 = sbr.rel (%p565_p3) target bundleno = 418 (0x1a2), region = 108  ;;  %s1368_s6 = sshll.u32 (!%p565_p3), %s571_s7, 5 }
  0x61   : > { %s1369_s11 = sshll.u32 (!%p565_p3), %s578_s14, 9  ;;  %s585_s8 = sand.u32 (!%p565_p3), 1, %s1693_s15  }
  0x62   : > { %s1372_s28 = sshll.u32 (!%p565_p3), %s1721_s22, 1  ;;  %s1370_s0 = sshll.u32 (!%p565_p3), %s585_s8, 5 }
  0x63   : > { %p626_p4 = scmp.lt.s32.totalorder (!%p565_p3), %s1372_s28, 3  ;;  %s2036_s5 = scalar_lea.vmem (!%p565_p3), [#allocation3], %s1368_s6 }
  0x64   : > { %s2038_s30 = scalar_lea.vmem (!%p565_p3), [#allocation4], %s1369_s11  ;;  %s2040_s9 = scalar_lea.vmem (!%p565_p3), [#allocation5], %s1370_s0 }
  0x65   : > { %s2042_s17 = scalar_lea.vmem (!%p565_p3), [#allocation6], %s1370_s0  ;;  %p1373_p5 = scmp.ne.s32.totalorder (!%p565_p3), %s1717_s21, 0 }
  0x67   : > { %s2206_s28 = smov (!%p626_p4, %s1372_s28), 3  ;;  %637 = sbr.rel (%p1373_p5) target bundleno = 110 (0x6e), region = 124 }
  0x68   : > { %s628_s26 = scalar_lea.vmem %s2172_s2, %s2206_s28  ;;  %v1735_v8 = vmov (!%p1373_p5), 0.0  }
  0x69   : > { %638 = vst [vmem:[#allocation2] sm:$0xff] (!%p1373_p5), %v1735_v8  ;;  %639 = vst [vmem:[#allocation2 + $0x8] sm:$0xff] (!%p1373_p5), %v1735_v8 }
  0x6a   : > { %640 = vst [vmem:[#allocation2 + $0x10] sm:$0xff] (!%p1373_p5), %v1735_v8  ;;  %641 = vst [vmem:[#allocation2 + $0x18] sm:$0xff] (!%p1373_p5), %v1735_v8 }
  0x6e PF: > { %v1545_v9 = vld [vmem:[%s2038_s30 + $0x4] ss:$8 sps:$4 sm:$0xff]   ;;  %v1549_v11 = vld [vmem:[%s2038_s30] ss:$8 sps:$4 sm:$0xff]   ;;  %v1551_v13 = vld [vmem:[%s2038_s30 + $0x14] ss:$8 sps:$4 sm:$0xff]  }
  0x6f   : > { %v1547_v10 = vld [vmem:[%s2038_s30 + $0x104] ss:$8 sps:$4 sm:$0xff]   ;;  %1054 = vmatprep.subr.bf16.mxu1 %v1545_v9  ;;  %v1550_v12 = vld [vmem:[%s2038_s30 + $0x100] ss:$8 sps:$4 sm:$0xff]   ;;  %v1553_v14 = vld [vmem:[%s2038_s30 + $0x114] ss:$8 sps:$4 sm:$0xff]  }
  0x70   : > { %1097 = vmatprep.subr.bf16.mxu0 %v1547_v10  ;;  %1055 = vmatpush1.bf16.msra.mxu1 %v1549_v11  ;;  %v1555_v15 = vld [vmem:[%s2038_s30 + $0x10] ss:$8 sps:$4 sm:$0xff]   ;;  %v1557_v17 = vld [vmem:[%s2038_s30 + $0x24] ss:$8 sps:$4 sm:$0xff]   ;;  %v1561_v19 = vld [vmem:[%s2038_s30 + $0x20] ss:$8 sps:$4 sm:$0xff]  }
  0x71   : > { %1098 = vmatpush1.bf16.msra.mxu0 %v1550_v12  ;;  %1056 = vmatprep.subr.bf16.mxu1 %v1551_v13  ;;  %v1556_v16 = vld [vmem:[%s2038_s30 + $0x110] ss:$8 sps:$4 sm:$0xff]   ;;  %v1559_v18 = vld [vmem:[%s2038_s30 + $0x124] ss:$8 sps:$4 sm:$0xff]   ;;  %v1562_v20 = vld [vmem:[%s2038_s30 + $0x120] ss:$8 sps:$4 sm:$0xff]  }
  0x72   : > { %1099 = vmatprep.subr.bf16.mxu0 %v1553_v14  ;;  %v1563_v21 = vld [vmem:[%s2038_s30 + $0x34] ss:$8 sps:$4 sm:$0xff]   ;;  %v1567_v23 = vld [vmem:[%s2038_s30 + $0x30] ss:$8 sps:$4 sm:$0xff]   ;;  %v1569_v25 = vld [vmem:[%s2038_s30 + $0x44] ss:$8 sps:$4 sm:$0xff]  }
  0x73   : > { %v1565_v22 = vld [vmem:[%s2038_s30 + $0x134] ss:$8 sps:$4 sm:$0xff]   ;;  %v1568_v24 = vld [vmem:[%s2038_s30 + $0x130] ss:$8 sps:$4 sm:$0xff]   ;;  %v1571_v26 = vld [vmem:[%s2038_s30 + $0x144] ss:$8 sps:$4 sm:$0xff]  }
  0x74   : > { %1057 = vmatpush1.bf16.msra.mxu1 %v1555_v15  ;;  %v1573_v27 = vld [vmem:[%s2038_s30 + $0x40] ss:$8 sps:$4 sm:$0xff]   ;;  %v1575_v29 = vld [vmem:[%s2038_s30 + $0x54] ss:$8 sps:$4 sm:$0xff]   ;;  %v1579_v31 = vld [vmem:[%s2038_s30 + $0x50] ss:$8 sps:$4 sm:$0xff]  }
  0x75   : > { %1100 = vmatpush1.bf16.msra.mxu0 %v1556_v16  ;;  %1058 = vmatprep.subr.bf16.mxu1 %v1557_v17  ;;  %v1574_v28 = vld [vmem:[%s2038_s30 + $0x140] ss:$8 sps:$4 sm:$0xff]   ;;  %v1577_v30 = vld [vmem:[%s2038_s30 + $0x154] ss:$8 sps:$4 sm:$0xff]   ;;  %v1580_v32 = vld [vmem:[%s2038_s30 + $0x150] ss:$8 sps:$4 sm:$0xff]  }
  0x76   : > { %1101 = vmatprep.subr.bf16.mxu0 %v1559_v18  ;;  %v1581_v33 = vld [vmem:[%s2038_s30 + $0x64] ss:$8 sps:$4 sm:$0xff]   ;;  %v1585_v35 = vld [vmem:[%s2038_s30 + $0x60] ss:$8 sps:$4 sm:$0xff]   ;;  %v1587_v37 = vld [vmem:[%s2038_s30 + $0x74] ss:$8 sps:$4 sm:$0xff]  }
  0x77   : > { %v1583_v34 = vld [vmem:[%s2038_s30 + $0x164] ss:$8 sps:$4 sm:$0xff]   ;;  %v1586_v36 = vld [vmem:[%s2038_s30 + $0x160] ss:$8 sps:$4 sm:$0xff]   ;;  %v1589_v38 = vld [vmem:[%s2038_s30 + $0x174] ss:$8 sps:$4 sm:$0xff]  }
  0x78   : > { %1059 = vmatpush1.bf16.msra.mxu1 %v1561_v19  ;;  %v1591_v39 = vld [vmem:[%s2038_s30 + $0x70] ss:$8 sps:$4 sm:$0xff]   ;;  %v1593_v41 = vld [vmem:[%s2038_s30 + $0x84] ss:$8 sps:$4 sm:$0xff]   ;;  %v1597_v43 = vld [vmem:[%s2038_s30 + $0x80] ss:$8 sps:$4 sm:$0xff]  }
  0x79   : > { %1102 = vmatpush1.bf16.msra.mxu0 %v1562_v20  ;;  %1060 = vmatprep.subr.bf16.mxu1 %v1563_v21  ;;  %v1592_v40 = vld [vmem:[%s2038_s30 + $0x170] ss:$8 sps:$4 sm:$0xff]   ;;  %v1595_v42 = vld [vmem:[%s2038_s30 + $0x184] ss:$8 sps:$4 sm:$0xff]   ;;  %v1598_v44 = vld [vmem:[%s2038_s30 + $0x180] ss:$8 sps:$4 sm:$0xff]  }
  0x7a   : > { %1103 = vmatprep.subr.bf16.mxu0 %v1565_v22  ;;  %v1599_v45 = vld [vmem:[%s2038_s30 + $0x94] ss:$8 sps:$4 sm:$0xff]   ;;  %v1603_v47 = vld [vmem:[%s2038_s30 + $0x90] ss:$8 sps:$4 sm:$0xff]   ;;  %v1605_v49 = vld [vmem:[%s2038_s30 + $0xa4] ss:$8 sps:$4 sm:$0xff]  }
  0x7b   : > { %v1601_v46 = vld [vmem:[%s2038_s30 + $0x194] ss:$8 sps:$4 sm:$0xff]   ;;  %v1604_v48 = vld [vmem:[%s2038_s30 + $0x190] ss:$8 sps:$4 sm:$0xff]   ;;  %v1607_v50 = vld [vmem:[%s2038_s30 + $0x1a4] ss:$8 sps:$4 sm:$0xff]  }
  0x7c   : > { %1061 = vmatpush1.bf16.msra.mxu1 %v1567_v23  ;;  %v1609_v51 = vld [vmem:[%s2038_s30 + $0xa0] ss:$8 sps:$4 sm:$0xff]   ;;  %v1611_v53 = vld [vmem:[%s2038_s30 + $0xb4] ss:$8 sps:$4 sm:$0xff]   ;;  %v1615_v55 = vld [vmem:[%s2038_s30 + $0xb0] ss:$8 sps:$4 sm:$0xff]  }
  0x7d   : > { %1104 = vmatpush1.bf16.msra.mxu0 %v1568_v24  ;;  %1062 = vmatprep.subr.bf16.mxu1 %v1569_v25  ;;  %v1610_v52 = vld [vmem:[%s2038_s30 + $0x1a0] ss:$8 sps:$4 sm:$0xff]   ;;  %v1613_v54 = vld [vmem:[%s2038_s30 + $0x1b4] ss:$8 sps:$4 sm:$0xff]   ;;  %v1616_v57 = vld [vmem:[%s2038_s30 + $0x1b0] ss:$8 sps:$4 sm:$0xff]  }
  0x7e   : > { %1105 = vmatprep.subr.bf16.mxu0 %v1571_v26  ;;  %v1643_v56 = vld [vmem:[%s2036_s5 + $0x4] ss:$16 sps:$4 sm:$0xff]   ;;  %v1646_v60 = vld [vmem:[%s2036_s5 + $0xc] ss:$16 sps:$4 sm:$0xff]   ;;  %v1621_v61 = vld [vmem:[%s2038_s30 + $0xc0] ss:$8 sps:$4 sm:$0xff]  }
  0x7f   : > { %v1617_v58 = vld [vmem:[%s2038_s30 + $0xc4] ss:$8 sps:$4 sm:$0xff]   ;;  %1086 = vmatprep.mubr.bf16.mxu1 %v1643_v56  ;;  %1129 = vmatprep.mubr.bf16.mxu0 %v1646_v60  ;;  %v1622_v62 = vld [vmem:[%s2038_s30 + $0x1c0] ss:$8 sps:$4 sm:$0xff]   ;;  %v1623_v63 = vld [vmem:[%s2038_s30 + $0xd4] ss:$8 sps:$4 sm:$0xff]  }
  0x80   : > { %1063 = vmatpush1.bf16.msra.mxu1 %v1573_v27  ;;  %v1619_v59 = vld [vmem:[%s2038_s30 + $0x1c4] ss:$8 sps:$4 sm:$0xff]   ;;  %v1625_v0 = vld [vmem:[%s2038_s30 + $0x1d4] ss:$8 sps:$4 sm:$0xff]   ;;  %v1627_v1 = vld [vmem:[%s2038_s30 + $0xd0] ss:$8 sps:$4 sm:$0xff]  }
  0x81   : > { %1106 = vmatpush1.bf16.msra.mxu0 %v1574_v28  ;;  %1064 = vmatprep.subr.bf16.mxu1 %v1575_v29  ;;  %v1628_v2 = vld [vmem:[%s2038_s30 + $0x1d0] ss:$8 sps:$4 sm:$0xff]   ;;  %v1629_v3 = vld [vmem:[%s2038_s30 + $0xe4] ss:$8 sps:$4 sm:$0xff]   ;;  %v1633_v5 = vld [vmem:[%s2038_s30 + $0xe0] ss:$8 sps:$4 sm:$0xff]  }
  0x82   : > { %1107 = vmatprep.subr.bf16.mxu0 %v1577_v30  ;;  %v1631_v4 = vld [vmem:[%s2038_s30 + $0x1e4] ss:$8 sps:$4 sm:$0xff]   ;;  %v1634_v6 = vld [vmem:[%s2038_s30 + $0x1e0] ss:$8 sps:$4 sm:$0xff]   ;;  %v1635_v7 = vld [vmem:[%s2038_s30 + $0xf4] ss:$8 sps:$4 sm:$0xff]  }
  0x83   : > { %v1637_v8 = vld [vmem:[%s2038_s30 + $0x1f4] ss:$8 sps:$4 sm:$0xff]   ;;  %v1639_v9 = vld [vmem:[%s2038_s30 + $0xf0] ss:$8 sps:$4 sm:$0xff]   ;;  %v642_v14 = vld [vmem:[#allocation2] sm:$0xff]  ;;  %p1442_p6 = scmp.ne.s32.totalorder %s1717_s21, 8 }
  0x84   : > { %1065 = vmatpush1.bf16.msra.mxu1 %v1579_v31  ;;  %v1640_v10 = vld [vmem:[%s2038_s30 + $0x1f0] ss:$8 sps:$4 sm:$0xff]   ;;  %v643_v18 = vld [vmem:[#allocation2 + $0x8] sm:$0xff] }
  0x85   : > { %1108 = vmatpush1.bf16.msra.mxu0 %v1580_v32  ;;  %1066 = vmatprep.subr.bf16.mxu1 %v1581_v33  ;;  %v1641_v11 = vld [vmem:[%s2036_s5] ss:$16 sps:$4 sm:$0xff]   ;;  %v1644_v12 = vld [vmem:[%s2036_s5 + $0x8] ss:$16 sps:$4 sm:$0xff]   ;;  %v1158_v33 = vlaneseq (!%p1442_p6) }
  0x86   : > { %1109 = vmatprep.subr.bf16.mxu0 %v1583_v34  ;;  %v644_v22 = vld [vmem:[#allocation2 + $0x10] sm:$0xff]  ;;  %v645_v27 = vld [vmem:[#allocation2 + $0x18] sm:$0xff] }
  0x87   : > { %v1159_v34 = vshrl.u32 (!%p1442_p6), %v1158_v33, 7 }
  0x88   : > { %1067 = vmatpush1.bf16.msra.mxu1 %v1585_v35  ;;  %v1156_v35 = vld [vmem:[%s628_s26] sm:$0x3] (!%p1442_p6) }
  0x89   : > { %1110 = vmatpush1.bf16.msra.mxu0 %v1586_v36  ;;  %1068 = vmatprep.subr.bf16.mxu1 %v1587_v37  ;;  %v1160_v37 = vsub.s32 (!%p1442_p6), 0, %v1159_v34 }
  0x8a   : > { %1111 = vmatprep.subr.bf16.mxu0 %v1589_v38  ;;  %v1164_v38 = vsub.s32 (!%p1442_p6), 1, %v1159_v34 }
  0x8c   : > { %1069 = vmatpush1.bf16.msra.mxu1 %v1591_v39 }
  0x8d   : > { %1112 = vmatpush1.bf16.msra.mxu0 %v1592_v40  ;;  %1070 = vmatprep.subr.bf16.mxu1 %v1593_v41 }
  0x8e   : > { %1113 = vmatprep.subr.bf16.mxu0 %v1595_v42  ;;  %v1161_v42 = vrot.slane (!%p1442_p6), %v1156_v35, %v1160_v37 }
  0x90   : > { %1071 = vmatpush1.bf16.msra.mxu1 %v1597_v43  ;;  %v1172_v43 = vld [vmem:[%s2040_s9] sm:$0xff] (!%p1442_p6) }
  0x91   : > { %1114 = vmatpush1.bf16.msra.mxu0 %v1598_v44  ;;  %1072 = vmatprep.subr.bf16.mxu1 %v1599_v45  ;;  %v1165_v44 = vrot.slane (!%p1442_p6), %v1156_v35, %v1164_v38  ;;  %v1173_v45 = vld [vmem:[%s2040_s9 + $0x8] sm:$0xff] (!%p1442_p6) }
  0x92   : > { %1115 = vmatprep.subr.bf16.mxu0 %v1601_v46  ;;  %v1174_v46 = vld [vmem:[%s2040_s9 + $0x10] sm:$0xff] (!%p1442_p6) }
  0x94   : > { %1073 = vmatpush1.bf16.msra.mxu1 %v1603_v47  ;;  %v1175_v47 = vld [vmem:[%s2040_s9 + $0x18] sm:$0xff] (!%p1442_p6) }
  0x95   : > { %1116 = vmatpush1.bf16.msra.mxu0 %v1604_v48  ;;  %1074 = vmatprep.subr.bf16.mxu1 %v1605_v49 }
  0x96   : > { %1117 = vmatprep.subr.bf16.mxu0 %v1607_v50 }
  0x98   : > { %1075 = vmatpush1.bf16.msra.mxu1 %v1609_v51 }
  0x99   : > { %1118 = vmatpush1.bf16.msra.mxu0 %v1610_v52  ;;  %1076 = vmatprep.subr.bf16.mxu1 %v1611_v53 }
  0x9a   : > { %1119 = vmatprep.subr.bf16.mxu0 %v1613_v54 }
  0x9c   : > { %1077 = vmatpush1.bf16.msra.mxu1 %v1615_v55 }
  0x9d   : > { %1120 = vmatpush1.bf16.msra.mxu0 %v1616_v57  ;;  %1078 = vmatprep.subr.bf16.mxu1 %v1617_v58 }
  0x9e   : > { %1121 = vmatprep.subr.bf16.mxu0 %v1619_v59 }
  0xa0   : > { %1079 = vmatpush1.bf16.msra.mxu1 %v1621_v61 }
  0xa1   : > { %1122 = vmatpush1.bf16.msra.mxu0 %v1622_v62  ;;  %1080 = vmatprep.subr.bf16.mxu1 %v1623_v63 }
  0xa2   : > { %1123 = vmatprep.subr.bf16.mxu0 %v1625_v0 }
  0xa4   : > { %1081 = vmatpush1.bf16.msra.mxu1 %v1627_v1 }
  0xa5   : > { %1124 = vmatpush1.bf16.msra.mxu0 %v1628_v2  ;;  %1082 = vmatprep.subr.bf16.mxu1 %v1629_v3 }
  0xa6   : > { %1125 = vmatprep.subr.bf16.mxu0 %v1631_v4 }
  0xa8   : > { %1083 = vmatpush1.bf16.msra.mxu1 %v1633_v5 }
  0xa9   : > { %1126 = vmatpush1.bf16.msra.mxu0 %v1634_v6  ;;  %1084 = vmatprep.subr.bf16.mxu1 %v1635_v7 }
  0xaa   : > { %1127 = vmatprep.subr.bf16.mxu0 %v1637_v8 }
  0xac   : > { %1085 = vmatpush1.bf16.msra.mxu1 %v1639_v9 }
  0xad   : > { %1128 = vmatpush1.bf16.msra.mxu0 %v1640_v10 }
  0xaf   : > { %1087 = vmatmul.mubr.bf16.vlgmr.msra.gmra.mrb[0].mxu1 %v1641_v11 }
  0xb0   : > { %1130 = vmatmul.mubr.bf16.vlgmr.msra.gmra.mrb[0].mxu0 %v1644_v12 }
 0x182   : > { %v1088_v13 = vpop.f32.mrb[0].mxu1 }
 0x183   : > { %v1131_v15 = vpop.f32.mrb[0].mxu0  ;;  %v1090_v17 = vpop.f32.mrb[1].mxu1 }
 0x184   : > { %v1132_v16 = vadd.f32 %v1131_v15, %v1088_v13  ;;  %v1133_v19 = vpop.f32.mrb[1].mxu0  ;;  %v1092_v21 = vpop.f32.mrb[2].mxu1 }
 0x185   : > { %v1134_v20 = vadd.f32 %v1133_v19, %v1090_v17  ;;  %v1135_v23 = vpop.f32.mrb[2].mxu0  ;;  %v1094_v26 = vpop.f32.mrb[3].mxu1  ;;  %1151 = sbr.rel (%p1442_p6) target bundleno = 410 (0x19a), region = 128 }
 0x186   : > { %v1140_v24 = vadd.f32 %v1132_v16, %v642_v14  ;;  %v1136_v25 = vadd.f32 %v1135_v23, %v1092_v21  ;;  %v1137_v28 = vpop.f32.mrb[3].mxu0 }
 0x187   : > { %v1141_v29 = vadd.f32 %v1134_v20, %v643_v18  ;;  %v1138_v30 = vadd.f32 %v1137_v28, %v1094_v26 }
 0x188   : > { %1144 = vst [vmem:[#allocation2] sm:$0xff] %v1140_v24  ;;  %v1142_v31 = vadd.f32 %v1136_v25, %v644_v22 }
 0x189   : > { %1145 = vst [vmem:[#allocation2 + $0x8] sm:$0xff] %v1141_v29  ;;  %v1143_v32 = vadd.f32 %v1138_v30, %v645_v27 }
 0x18a   : > { %1146 = vst [vmem:[#allocation2 + $0x10] sm:$0xff] %v1142_v31 }
 0x18b   : > { %1147 = vst [vmem:[#allocation2 + $0x18] sm:$0xff] %v1143_v32 }
 0x18f   : > { %v1152_v36 = vld [vmem:[#allocation2] sm:$0xff] }
 0x190   : > { %v1153_v39 = vld [vmem:[#allocation2 + $0x8] sm:$0xff]  ;;  %v1168_v48 = vadd.f32 %v1161_v42, %v1152_v36 }
 0x191   : > { %v1154_v40 = vld [vmem:[#allocation2 + $0x10] sm:$0xff]  ;;  %v1169_v49 = vadd.f32 %v1165_v44, %v1153_v39 }
 0x192   : > { %v1155_v41 = vld [vmem:[#allocation2 + $0x18] sm:$0xff]  ;;  %v1170_v50 = vadd.f32 %v1161_v42, %v1154_v40  ;;  %v1176_v52 = vadd.f32 %v1172_v43, %v1168_v48 }
 0x193   : > { %v1171_v51 = vadd.f32 %v1165_v44, %v1155_v41  ;;  %v1177_v53 = vadd.f32 %v1173_v45, %v1169_v49 }
 0x194   : > { %v1178_v54 = vadd.f32 %v1174_v46, %v1170_v50  ;;  %v1180_v56 = vmax.f32 %v1176_v52, 0.0 }
 0x195   : > { %v1179_v55 = vadd.f32 %v1175_v47, %v1171_v51  ;;  %v1181_v57 = vmax.f32 %v1177_v53, 0.0 }
 0x196   : > { %v1182_v58 = vmax.f32 %v1178_v54, 0.0  ;;  %1184 = vst [vmem:[%s2042_s17] sm:$0xff] %v1180_v56 }
 0x197   : > { %v1183_v59 = vmax.f32 %v1179_v55, 0.0  ;;  %1185 = vst [vmem:[%s2042_s17 + $0x8] sm:$0xff] %v1181_v57 }
 0x198   : > { %1186 = vst [vmem:[%s2042_s17 + $0x10] sm:$0xff] %v1182_v58 }
 0x199   : > { %1187 = vst [vmem:[%s2042_s17 + $0x18] sm:$0xff] %v1183_v59 }
 0x19a PF: > { %1194 = sbr.rel (!%p1865_p13) target bundleno = 418 (0x1a2), region = 132  ;;  %s1451_s21 = sshll.u32 (%p1865_p13), %s1721_s22, 4 }
 0x19b   : > { %s1200_s6 = scalar_lea.vmem (%p1865_p13), %s2174_s4, %s1451_s21 }
 0x19d   : > { %v1213_v60 = vld [vmem:[%s2042_s17] sm:$0xff] (%p1865_p13) }
 0x19e   : > { %v1215_v61 = vld [vmem:[%s2042_s17 + $0x8] sm:$0xff] (%p1865_p13)  ;;  %1214 = vst [vmem:[%s1200_s6] sm:$0xff] (%p1865_p13), %v1213_v60 }
 0x19f   : > { %v1217_v62 = vld [vmem:[%s2042_s17 + $0x10] sm:$0xff] (%p1865_p13)  ;;  %1216 = vst [vmem:[%s1200_s6 + $0x8] sm:$0xff] (%p1865_p13), %v1215_v61 }
 0x1a0   : > { %v1219_v63 = vld [vmem:[%s2042_s17 + $0x18] sm:$0xff] (%p1865_p13)  ;;  %1218 = vst [vmem:[%s1200_s6 + $0x20] sm:$0xff] (%p1865_p13), %v1217_v62 }
 0x1a1   : > { %1220 = vst [vmem:[%s1200_s6 + $0x28] sm:$0xff] %v1219_v63 }
 0x1a2 PF: > { %s14_s25 = sadd.s32 1, %s1733_s25   ;;  %s2186_s22 = sld [smem:[#allocation9_spill]] }
 0x1a3   : > { %p11_p7 = scmp.ge.s32.totalorder %s14_s25, 20   ;;  %s2187_s29 = sld [smem:[#allocation7_spill]] }
 0x1a4   : > { %s2188_s11 = sld [smem:[#allocation8_spill]]  ;;  %s2189_s15 = smov %s1697_s16 }
 0x1a5   : > { %s2190_s16 = smov %s1857_s13  ;;  %s2191_s17 = smov %s1705_s18 }
 0x1a6   : > { %s2192_s18 = smov %s1854_s12  ;;  %s2193_s19 = smov %s1713_s20 }
 0x1a7   : > { %s2195_s21 = smov %s1725_s23  ;;  %13 = sbr.rel (!%p11_p7) target bundleno = 8 (0x8), region = 205 }
 0x1a8   : > { %s2194_s20 = smov %s2186_s22  ;;  %s2196_s22 = smov %s1729_s24 }
 0x1a9   : > { %s2197_s23 = smov %s2187_s29 }
 0x1aa   : > { %s2198_s24 = smov %s2188_s11 }

// kernel: _lambda_.41
= control target key start
LH: loop header
LB: loop body
LE: loop exit
PB: predicated region body
PF: predicated region fallthrough
CT: control target
= control target key end

     0   :  { %s2028_s0 = inlined_call_operand.vmem [shape: bf16[16,4608], index: 0, kind: input, shape index: {}]   ;;  %s2029_s1 = inlined_call_operand.vmem [shape: bf16[4608,512], index: 1, kind: input, shape index: {}]   ;;  %s2030_s2 = inlined_call_operand.vmem [shape: f32[1,512], index: 2, kind: input, shape index: {}]   ;;  %s2031_s3 = inlined_call_operand.vmem [shape: f32[16,512], index: 3, kind: output, shape index: {}]  }
   0x1   :  { %2033 = sst [smem:[#allocation7_spill]] %s2028_s0 }
   0x2   :  { %2034 = sst [smem:[#allocation8_spill]] %s2029_s1 }
   0x3   :  { %s1642_s12 = smov 0   ;;  %s1644_s13 = smov 0  }
   0x4   :  { %s1646_s14 = smov 0   ;;  %s1648_s15 = smov 0  }
   0x5   :  { %s1650_s16 = smov 0   ;;  %s1652_s17 = smov 0  }
   0x6   :  { %s1654_s18 = smov 0   ;;  %s1656_s19 = smov 0  }
   0x7   :  { %s1658_s20 = smov 0   ;;  %s1660_s21 = smov 0  }
   0x8   :  { %s1662_s22 = smov 0  }
   0x9 LB: > { %s1243_s23 = sadd.s32 4294967295, %s1619_s22   ;;  %s25_s24 = sadd.s32 1, %s1611_s20  ;;  %s1619_s22 = sphi %s1662_s22, %s13_s22   ;;  %s1615_s21 = sphi %s1660_s21, %s2051_s21   ;;  %s1611_s20 = sphi %s1658_s20, %s2050_s20   ;;  %s1607_s19 = sphi %s1656_s19, %s2049_s19   ;;  %s1603_s18 = sphi %s1654_s18, %s2048_s18   ;;  %s1599_s17 = sphi %s1652_s17, %s2047_s17   ;;  %s1595_s16 = sphi %s1650_s16, %s2046_s16   ;;  %s1591_s15 = sphi %s1648_s15, %s2045_s15   ;;  %s1587_s14 = sphi %s1646_s14, %s2044_s14   ;;  %s1583_s13 = sphi %s1644_s13, %s2043_s13   ;;  %s1579_s12 = sphi %s1642_s12, %s2042_s12  }
   0xa   : > { %p26_p0 = scmp.ge.s32.totalorder %s25_s24, 9  ;;  %s28_s25 = sadd.s32 1, %s1615_s21 }
   0xb   : > { %s41_s26 = sadd.s32 1, %s1599_s17  ;;  %p48_p1 = scmp.ne.s32.totalorder %s1599_s17, %s1595_s16 }
   0xc   : > { %s2053_s24 = smov (%p26_p0, %s25_s24), 0  ;;  %s2055_s25 = smov (!%p26_p0, %s28_s25), %s1615_s21 }
   0xd   : > { %s37_s27 = ssub.s32 %s1611_s20, %s2053_s24  ;;  %p49_p2 = scmp.eq.s32.totalorder %s1619_s22, 0 }
   0xe   : > { %p30_p3 = scmp.ge.s32.totalorder %s2055_s25, 2  ;;  %p39_p4 = scmp.eq.s32.totalorder %s37_s27, 0 }
   0xf   : > { %p1709_p5 = por %p49_p2, %p48_p1  ;;  %s69_s29 = sadd.s32 1, %s1591_s15 }
  0x10   : > { %s2057_s25 = smov (%p30_p3, %s2055_s25), 0  ;;  %p76_p6 = scmp.ne.s32.totalorder %s1591_s15, %s1587_s14 }
  0x11   : > { %2036 = sst [smem:[#allocation6_spill]] %s2057_s25  ;;  %s65_s4 = ssub.s32 %s1615_s21, %s2057_s25 }
  0x12   : > { %s1717_s30 = scalar_select %p39_p4, %s1599_s17, %s41_s26  }
  0x13   : > { %s66_s5 = sor.u32 %s65_s4, %s37_s27  ;;  %p121_p7 = scmp.eq.s32.totalorder %s65_s4, 0 }
  0x14   : > { %p67_p8 = scmp.eq.s32.totalorder %s66_s5, 0  ;;  %p1723_p9 = por %p76_p6, %p49_p2 }
  0x15   : > { %s123_s7 = sadd.s32 1, %s1583_s13  ;;  %p133_p10 = scmp.ne.s32.totalorder %s1583_s13, %s1579_s12 }
  0x16   : > { %s1731_s8 = scalar_select %p67_p8, %s1591_s15, %s69_s29  }
  0x17   : > { %s1734_s9 = scalar_select %p121_p7, %s1583_s13, %s123_s7  }
  0x18   : > { %p134_p11 = scmp.eq.s32.totalorder %s1243_s23, 17  ;;  %p1246_p13 = scmp.ge.s32.totalorder %s1619_s22, 18 }
  0x1a   : > { %p1736_p12 = por %p134_p11, %p133_p10  ;;  %156 = sbr.rel (%p1246_p13) target bundleno = 87 (0x57), region = 16 }
  0x21   : > { %159 = sbr.rel (!%p1709_p5) target bundleno = 45 (0x2d), region = 20  ;;  %s161_s11 = sand.u32 (%p1709_p5), 1, %s1599_s17  }
  0x22   : > { %s1335_s26 = sshll.u32 (%p1709_p5), %s1611_s20, 4  ;;  %s1247_s27 = sshll.u32 (%p1709_p5), %s161_s11, 5 }
  0x23   : > { %s2039_s0 = sld [smem:[#allocation7_spill]] (%p1709_p5)  ;;  %s163_s23 = scalar_lea.vmem (%p1709_p5), [#allocation3], %s1247_s27 }
  0x29   : > { %s169_s5 = scalar_lea.vmem %s2039_s0, %s1335_s26 }
  0x2a   : > { %v182_v0 = vld [vmem:[%s169_s5] sm:$0xff]  ;;  %v184_v1 = vld [vmem:[%s169_s5 + $0x8] sm:$0xff]  ;;  %v186_v2 = vld [vmem:[%s169_s5 + $0x90] sm:$0xff] }
  0x2b   : > { %183 = vst [vmem:[%s163_s23] sm:$0xff] %v182_v0  ;;  %185 = vst [vmem:[%s163_s23 + $0x8] sm:$0xff] %v184_v1  ;;  %v188_v3 = vld [vmem:[%s169_s5 + $0x98] sm:$0xff] }
  0x2c   : > { %187 = vst [vmem:[%s163_s23 + $0x10] sm:$0xff] %v186_v2  ;;  %189 = vst [vmem:[%s163_s23 + $0x18] sm:$0xff] %v188_v3 }
  0x2d PF: > { %195 = sbr.rel (!%p1723_p9) target bundleno = 87 (0x57), region = 43  ;;  %s197_s28 = sand.u32 (%p1723_p9), 1, %s1591_s15  }
  0x2e   : > { %s1252_s7 = sshll.u32 (%p1723_p9), %s1615_s21, 1  ;;  %s1250_s11 = sshll.u32 (%p1723_p9), %s197_s28, 9 }
  0x2f   : > { %s1336_s26 = sshll.u32 (%p1723_p9), %s1611_s20, 8  ;;  %s2040_s1 = sld [smem:[#allocation8_spill]] (%p1723_p9) }
  0x30   : > { %s203_s29 = sadd.s32 (%p1723_p9), %s1336_s26, %s1252_s7  ;;  %s1761_s6 = scalar_lea.vmem (%p1723_p9), [#allocation4], %s1250_s11 }
  0x31   : > { %s1254_s4 = sshll.u32 (%p1723_p9), %s203_s29, 2 }
  0x35   : > { %s1756_s25 = scalar_lea.vmem %s2040_s1, %s1254_s4 }
  0x36   : > { %v359_v4 = vld [vmem:[%s1756_s25] sm:$0xff]  ;;  %v361_v5 = vld [vmem:[%s1756_s25 + $0x10] sm:$0xff] }
  0x37   : > { %v363_v6 = vld [vmem:[%s1756_s25 + $0x20] sm:$0xff]  ;;  %360 = vst [vmem:[%s1761_s6] sm:$0xff] %v359_v4  ;;  %362 = vst [vmem:[%s1761_s6 + $0x8] sm:$0xff] %v361_v5  ;;  %v365_v7 = vld [vmem:[%s1756_s25 + $0x30] sm:$0xff] }
  0x38   : > { %364 = vst [vmem:[%s1761_s6 + $0x10] sm:$0xff] %v363_v6  ;;  %v367_v8 = vld [vmem:[%s1756_s25 + $0x40] sm:$0xff]  ;;  %v369_v9 = vld [vmem:[%s1756_s25 + $0x50] sm:$0xff]  ;;  %366 = vst [vmem:[%s1761_s6 + $0x18] sm:$0xff] %v365_v7 }
  0x39   : > { %368 = vst [vmem:[%s1761_s6 + $0x20] sm:$0xff] %v367_v8  ;;  %370 = vst [vmem:[%s1761_s6 + $0x28] sm:$0xff] %v369_v9  ;;  %v371_v10 = vld [vmem:[%s1756_s25 + $0x60] sm:$0xff]  ;;  %v373_v11 = vld [vmem:[%s1756_s25 + $0x70] sm:$0xff] }
  0x3a   : > { %v375_v12 = vld [vmem:[%s1756_s25 + $0x80] sm:$0xff]  ;;  %372 = vst [vmem:[%s1761_s6 + $0x30] sm:$0xff] %v371_v10  ;;  %374 = vst [vmem:[%s1761_s6 + $0x38] sm:$0xff] %v373_v11  ;;  %v377_v13 = vld [vmem:[%s1756_s25 + $0x90] sm:$0xff] }
  0x3b   : > { %376 = vst [vmem:[%s1761_s6 + $0x40] sm:$0xff] %v375_v12  ;;  %v379_v14 = vld [vmem:[%s1756_s25 + $0xa0] sm:$0xff]  ;;  %v381_v15 = vld [vmem:[%s1756_s25 + $0xb0] sm:$0xff]  ;;  %378 = vst [vmem:[%s1761_s6 + $0x48] sm:$0xff] %v377_v13 }
  0x3c   : > { %380 = vst [vmem:[%s1761_s6 + $0x50] sm:$0xff] %v379_v14  ;;  %382 = vst [vmem:[%s1761_s6 + $0x58] sm:$0xff] %v381_v15  ;;  %v383_v16 = vld [vmem:[%s1756_s25 + $0xc0] sm:$0xff]  ;;  %v385_v17 = vld [vmem:[%s1756_s25 + $0xd0] sm:$0xff] }
  0x3d   : > { %v387_v18 = vld [vmem:[%s1756_s25 + $0xe0] sm:$0xff]  ;;  %384 = vst [vmem:[%s1761_s6 + $0x60] sm:$0xff] %v383_v16  ;;  %386 = vst [vmem:[%s1761_s6 + $0x68] sm:$0xff] %v385_v17  ;;  %v389_v19 = vld [vmem:[%s1756_s25 + $0xf0] sm:$0xff] }
  0x3e   : > { %388 = vst [vmem:[%s1761_s6 + $0x70] sm:$0xff] %v387_v18  ;;  %v391_v20 = vld [vmem:[%s1756_s25 + $0x100] sm:$0xff]  ;;  %v393_v21 = vld [vmem:[%s1756_s25 + $0x110] sm:$0xff]  ;;  %390 = vst [vmem:[%s1761_s6 + $0x78] sm:$0xff] %v389_v19 }
  0x3f   : > { %392 = vst [vmem:[%s1761_s6 + $0x80] sm:$0xff] %v391_v20  ;;  %394 = vst [vmem:[%s1761_s6 + $0x88] sm:$0xff] %v393_v21  ;;  %v395_v22 = vld [vmem:[%s1756_s25 + $0x120] sm:$0xff]  ;;  %v397_v23 = vld [vmem:[%s1756_s25 + $0x130] sm:$0xff] }
  0x40   : > { %v399_v24 = vld [vmem:[%s1756_s25 + $0x140] sm:$0xff]  ;;  %396 = vst [vmem:[%s1761_s6 + $0x90] sm:$0xff] %v395_v22  ;;  %398 = vst [vmem:[%s1761_s6 + $0x98] sm:$0xff] %v397_v23  ;;  %v401_v25 = vld [vmem:[%s1756_s25 + $0x150] sm:$0xff] }
  0x41   : > { %400 = vst [vmem:[%s1761_s6 + $0xa0] sm:$0xff] %v399_v24  ;;  %v403_v26 = vld [vmem:[%s1756_s25 + $0x160] sm:$0xff]  ;;  %v405_v27 = vld [vmem:[%s1756_s25 + $0x170] sm:$0xff]  ;;  %402 = vst [vmem:[%s1761_s6 + $0xa8] sm:$0xff] %v401_v25 }
  0x42   : > { %404 = vst [vmem:[%s1761_s6 + $0xb0] sm:$0xff] %v403_v26  ;;  %406 = vst [vmem:[%s1761_s6 + $0xb8] sm:$0xff] %v405_v27  ;;  %v407_v28 = vld [vmem:[%s1756_s25 + $0x180] sm:$0xff]  ;;  %v409_v29 = vld [vmem:[%s1756_s25 + $0x190] sm:$0xff] }
  0x43   : > { %v411_v30 = vld [vmem:[%s1756_s25 + $0x1a0] sm:$0xff]  ;;  %408 = vst [vmem:[%s1761_s6 + $0xc0] sm:$0xff] %v407_v28  ;;  %410 = vst [vmem:[%s1761_s6 + $0xc8] sm:$0xff] %v409_v29  ;;  %v413_v31 = vld [vmem:[%s1756_s25 + $0x1b0] sm:$0xff] }
  0x44   : > { %412 = vst [vmem:[%s1761_s6 + $0xd0] sm:$0xff] %v411_v30  ;;  %v415_v32 = vld [vmem:[%s1756_s25 + $0x1c0] sm:$0xff]  ;;  %v417_v33 = vld [vmem:[%s1756_s25 + $0x1d0] sm:$0xff]  ;;  %414 = vst [vmem:[%s1761_s6 + $0xd8] sm:$0xff] %v413_v31 }
  0x45   : > { %416 = vst [vmem:[%s1761_s6 + $0xe0] sm:$0xff] %v415_v32  ;;  %418 = vst [vmem:[%s1761_s6 + $0xe8] sm:$0xff] %v417_v33  ;;  %v419_v34 = vld [vmem:[%s1756_s25 + $0x1e0] sm:$0xff]  ;;  %v421_v35 = vld [vmem:[%s1756_s25 + $0x1f0] sm:$0xff] }
  0x46   : > { %v423_v36 = vld [vmem:[%s1756_s25 + $0x200] sm:$0xff]  ;;  %420 = vst [vmem:[%s1761_s6 + $0xf0] sm:$0xff] %v419_v34  ;;  %422 = vst [vmem:[%s1761_s6 + $0xf8] sm:$0xff] %v421_v35  ;;  %v425_v37 = vld [vmem:[%s1756_s25 + $0x210] sm:$0xff] }
  0x47   : > { %424 = vst [vmem:[%s1761_s6 + $0x100] sm:$0xff] %v423_v36  ;;  %v427_v38 = vld [vmem:[%s1756_s25 + $0x220] sm:$0xff]  ;;  %v429_v39 = vld [vmem:[%s1756_s25 + $0x230] sm:$0xff]  ;;  %426 = vst [vmem:[%s1761_s6 + $0x108] sm:$0xff] %v425_v37 }
  0x48   : > { %428 = vst [vmem:[%s1761_s6 + $0x110] sm:$0xff] %v427_v38  ;;  %430 = vst [vmem:[%s1761_s6 + $0x118] sm:$0xff] %v429_v39  ;;  %v431_v40 = vld [vmem:[%s1756_s25 + $0x240] sm:$0xff]  ;;  %v433_v41 = vld [vmem:[%s1756_s25 + $0x250] sm:$0xff] }
  0x49   : > { %v435_v42 = vld [vmem:[%s1756_s25 + $0x260] sm:$0xff]  ;;  %432 = vst [vmem:[%s1761_s6 + $0x120] sm:$0xff] %v431_v40  ;;  %434 = vst [vmem:[%s1761_s6 + $0x128] sm:$0xff] %v433_v41  ;;  %v437_v43 = vld [vmem:[%s1756_s25 + $0x270] sm:$0xff] }
  0x4a   : > { %436 = vst [vmem:[%s1761_s6 + $0x130] sm:$0xff] %v435_v42  ;;  %v439_v44 = vld [vmem:[%s1756_s25 + $0x280] sm:$0xff]  ;;  %v441_v45 = vld [vmem:[%s1756_s25 + $0x290] sm:$0xff]  ;;  %438 = vst [vmem:[%s1761_s6 + $0x138] sm:$0xff] %v437_v43 }
  0x4b   : > { %440 = vst [vmem:[%s1761_s6 + $0x140] sm:$0xff] %v439_v44  ;;  %442 = vst [vmem:[%s1761_s6 + $0x148] sm:$0xff] %v441_v45  ;;  %v443_v46 = vld [vmem:[%s1756_s25 + $0x2a0] sm:$0xff]  ;;  %v445_v47 = vld [vmem:[%s1756_s25 + $0x2b0] sm:$0xff] }
  0x4c   : > { %v447_v48 = vld [vmem:[%s1756_s25 + $0x2c0] sm:$0xff]  ;;  %444 = vst [vmem:[%s1761_s6 + $0x150] sm:$0xff] %v443_v46  ;;  %446 = vst [vmem:[%s1761_s6 + $0x158] sm:$0xff] %v445_v47  ;;  %v449_v49 = vld [vmem:[%s1756_s25 + $0x2d0] sm:$0xff] }
  0x4d   : > { %448 = vst [vmem:[%s1761_s6 + $0x160] sm:$0xff] %v447_v48  ;;  %v451_v50 = vld [vmem:[%s1756_s25 + $0x2e0] sm:$0xff]  ;;  %v453_v51 = vld [vmem:[%s1756_s25 + $0x2f0] sm:$0xff]  ;;  %450 = vst [vmem:[%s1761_s6 + $0x168] sm:$0xff] %v449_v49 }
  0x4e   : > { %452 = vst [vmem:[%s1761_s6 + $0x170] sm:$0xff] %v451_v50  ;;  %454 = vst [vmem:[%s1761_s6 + $0x178] sm:$0xff] %v453_v51  ;;  %v455_v52 = vld [vmem:[%s1756_s25 + $0x300] sm:$0xff]  ;;  %v457_v53 = vld [vmem:[%s1756_s25 + $0x310] sm:$0xff] }
  0x4f   : > { %v459_v54 = vld [vmem:[%s1756_s25 + $0x320] sm:$0xff]  ;;  %456 = vst [vmem:[%s1761_s6 + $0x180] sm:$0xff] %v455_v52  ;;  %458 = vst [vmem:[%s1761_s6 + $0x188] sm:$0xff] %v457_v53  ;;  %v461_v55 = vld [vmem:[%s1756_s25 + $0x330] sm:$0xff] }
  0x50   : > { %460 = vst [vmem:[%s1761_s6 + $0x190] sm:$0xff] %v459_v54  ;;  %v463_v56 = vld [vmem:[%s1756_s25 + $0x340] sm:$0xff]  ;;  %v465_v57 = vld [vmem:[%s1756_s25 + $0x350] sm:$0xff]  ;;  %462 = vst [vmem:[%s1761_s6 + $0x198] sm:$0xff] %v461_v55 }
  0x51   : > { %464 = vst [vmem:[%s1761_s6 + $0x1a0] sm:$0xff] %v463_v56  ;;  %466 = vst [vmem:[%s1761_s6 + $0x1a8] sm:$0xff] %v465_v57  ;;  %v467_v58 = vld [vmem:[%s1756_s25 + $0x360] sm:$0xff]  ;;  %v469_v59 = vld [vmem:[%s1756_s25 + $0x370] sm:$0xff] }
  0x52   : > { %v471_v60 = vld [vmem:[%s1756_s25 + $0x380] sm:$0xff]  ;;  %468 = vst [vmem:[%s1761_s6 + $0x1b0] sm:$0xff] %v467_v58  ;;  %470 = vst [vmem:[%s1761_s6 + $0x1b8] sm:$0xff] %v469_v59  ;;  %v473_v61 = vld [vmem:[%s1756_s25 + $0x390] sm:$0xff] }
  0x53   : > { %472 = vst [vmem:[%s1761_s6 + $0x1c0] sm:$0xff] %v471_v60  ;;  %v475_v62 = vld [vmem:[%s1756_s25 + $0x3a0] sm:$0xff]  ;;  %v477_v63 = vld [vmem:[%s1756_s25 + $0x3b0] sm:$0xff]  ;;  %474 = vst [vmem:[%s1761_s6 + $0x1c8] sm:$0xff] %v473_v61 }
  0x54   : > { %476 = vst [vmem:[%s1761_s6 + $0x1d0] sm:$0xff] %v475_v62  ;;  %478 = vst [vmem:[%s1761_s6 + $0x1d8] sm:$0xff] %v477_v63  ;;  %v479_v0 = vld [vmem:[%s1756_s25 + $0x3c0] sm:$0xff]  ;;  %v481_v1 = vld [vmem:[%s1756_s25 + $0x3d0] sm:$0xff] }
  0x55   : > { %v483_v2 = vld [vmem:[%s1756_s25 + $0x3e0] sm:$0xff]  ;;  %480 = vst [vmem:[%s1761_s6 + $0x1e0] sm:$0xff] %v479_v0  ;;  %482 = vst [vmem:[%s1761_s6 + $0x1e8] sm:$0xff] %v481_v1  ;;  %v485_v3 = vld [vmem:[%s1756_s25 + $0x3f0] sm:$0xff] }
  0x56   : > { %484 = vst [vmem:[%s1761_s6 + $0x1f0] sm:$0xff] %v483_v2  ;;  %486 = vst [vmem:[%s1761_s6 + $0x1f8] sm:$0xff] %v485_v3 }
  0x57 PF: > { %p1255_p0 = scmp.ge.s32.totalorder %s1619_s22, 1  ;;  %p499_p1 = scmp.lt.s32.totalorder %s1619_s22, 19 }
  0x59   : > { %p500_p2 = pnand %p1255_p0, %p499_p1 }
  0x5a   : > { %s506_s0 = sand.u32 (!%p500_p2), 1, %s1595_s16   ;;  %s513_s5 = sand.u32 (!%p500_p2), 1, %s1587_s14  }
  0x5b   : > { %503 = sbr.rel (%p500_p2) target bundleno = 411 (0x19b), region = 85  ;;  %s1256_s23 = sshll.u32 (!%p500_p2), %s506_s0, 5 }
  0x5c   : > { %s1257_s28 = sshll.u32 (!%p500_p2), %s513_s5, 9  ;;  %s540_s7 = sand.u32 (!%p500_p2), 1, %s1579_s12  }
  0x5d   : > { %s1259_s11 = sshll.u32 (!%p500_p2), %s1607_s19, 1  ;;  %s1258_s25 = sshll.u32 (!%p500_p2), %s540_s7, 5 }
  0x5e   : > { %p548_p3 = scmp.lt.s32.totalorder (!%p500_p2), %s1259_s11, 3  ;;  %s1900_s27 = scalar_lea.vmem (!%p500_p2), [#allocation3], %s1256_s23 }
  0x5f   : > { %s1902_s6 = scalar_lea.vmem (!%p500_p2), [#allocation4], %s1257_s28  ;;  %s1904_s1 = scalar_lea.vmem (!%p500_p2), [#allocation5], %s1258_s25 }
  0x60   : > { %p1260_p4 = scmp.ne.s32.totalorder (!%p500_p2), %s1603_s18, 0 }
  0x62   : > { %s2059_s11 = smov (!%p548_p3, %s1259_s11), 3  ;;  %557 = sbr.rel (%p1260_p4) target bundleno = 105 (0x69), region = 97 }
  0x63   : > { %s550_s4 = scalar_lea.vmem %s2030_s2, %s2059_s11  ;;  %v1621_v4 = vmov (!%p1260_p4), 0.0  }
  0x64   : > { %558 = vst [vmem:[#allocation2] sm:$0xff] (!%p1260_p4), %v1621_v4  ;;  %559 = vst [vmem:[#allocation2 + $0x8] sm:$0xff] (!%p1260_p4), %v1621_v4 }
  0x65   : > { %560 = vst [vmem:[#allocation2 + $0x10] sm:$0xff] (!%p1260_p4), %v1621_v4  ;;  %561 = vst [vmem:[#allocation2 + $0x18] sm:$0xff] (!%p1260_p4), %v1621_v4 }
  0x69 PF: > { %v1431_v5 = vld [vmem:[%s1902_s6 + $0x4] ss:$8 sps:$4 sm:$0xff]   ;;  %v1435_v7 = vld [vmem:[%s1902_s6] ss:$8 sps:$4 sm:$0xff]   ;;  %v1437_v9 = vld [vmem:[%s1902_s6 + $0x14] ss:$8 sps:$4 sm:$0xff]  }
  0x6a   : > { %v1433_v6 = vld [vmem:[%s1902_s6 + $0x104] ss:$8 sps:$4 sm:$0xff]   ;;  %974 = vmatprep.subr.bf16.mxu1 %v1431_v5  ;;  %v1436_v8 = vld [vmem:[%s1902_s6 + $0x100] ss:$8 sps:$4 sm:$0xff]   ;;  %v1439_v10 = vld [vmem:[%s1902_s6 + $0x114] ss:$8 sps:$4 sm:$0xff]  }
  0x6b   : > { %1017 = vmatprep.subr.bf16.mxu0 %v1433_v6  ;;  %975 = vmatpush1.bf16.msra.mxu1 %v1435_v7  ;;  %v1441_v11 = vld [vmem:[%s1902_s6 + $0x10] ss:$8 sps:$4 sm:$0xff]   ;;  %v1443_v13 = vld [vmem:[%s1902_s6 + $0x24] ss:$8 sps:$4 sm:$0xff]   ;;  %v1447_v15 = vld [vmem:[%s1902_s6 + $0x20] ss:$8 sps:$4 sm:$0xff]  }
  0x6c   : > { %1018 = vmatpush1.bf16.msra.mxu0 %v1436_v8  ;;  %976 = vmatprep.subr.bf16.mxu1 %v1437_v9  ;;  %v1442_v12 = vld [vmem:[%s1902_s6 + $0x110] ss:$8 sps:$4 sm:$0xff]   ;;  %v1445_v14 = vld [vmem:[%s1902_s6 + $0x124] ss:$8 sps:$4 sm:$0xff]   ;;  %v1448_v16 = vld [vmem:[%s1902_s6 + $0x120] ss:$8 sps:$4 sm:$0xff]  }
  0x6d   : > { %1019 = vmatprep.subr.bf16.mxu0 %v1439_v10  ;;  %v1449_v17 = vld [vmem:[%s1902_s6 + $0x34] ss:$8 sps:$4 sm:$0xff]   ;;  %v1453_v19 = vld [vmem:[%s1902_s6 + $0x30] ss:$8 sps:$4 sm:$0xff]   ;;  %v1455_v21 = vld [vmem:[%s1902_s6 + $0x44] ss:$8 sps:$4 sm:$0xff]  }
  0x6e   : > { %v1451_v18 = vld [vmem:[%s1902_s6 + $0x134] ss:$8 sps:$4 sm:$0xff]   ;;  %v1454_v20 = vld [vmem:[%s1902_s6 + $0x130] ss:$8 sps:$4 sm:$0xff]   ;;  %v1457_v22 = vld [vmem:[%s1902_s6 + $0x144] ss:$8 sps:$4 sm:$0xff]  }
  0x6f   : > { %977 = vmatpush1.bf16.msra.mxu1 %v1441_v11  ;;  %v1459_v23 = vld [vmem:[%s1902_s6 + $0x40] ss:$8 sps:$4 sm:$0xff]   ;;  %v1461_v25 = vld [vmem:[%s1902_s6 + $0x54] ss:$8 sps:$4 sm:$0xff]   ;;  %v1465_v27 = vld [vmem:[%s1902_s6 + $0x50] ss:$8 sps:$4 sm:$0xff]  }
  0x70   : > { %1020 = vmatpush1.bf16.msra.mxu0 %v1442_v12  ;;  %978 = vmatprep.subr.bf16.mxu1 %v1443_v13  ;;  %v1460_v24 = vld [vmem:[%s1902_s6 + $0x140] ss:$8 sps:$4 sm:$0xff]   ;;  %v1463_v26 = vld [vmem:[%s1902_s6 + $0x154] ss:$8 sps:$4 sm:$0xff]   ;;  %v1466_v28 = vld [vmem:[%s1902_s6 + $0x150] ss:$8 sps:$4 sm:$0xff]  }
  0x71   : > { %1021 = vmatprep.subr.bf16.mxu0 %v1445_v14  ;;  %v1467_v29 = vld [vmem:[%s1902_s6 + $0x64] ss:$8 sps:$4 sm:$0xff]   ;;  %v1471_v31 = vld [vmem:[%s1902_s6 + $0x60] ss:$8 sps:$4 sm:$0xff]   ;;  %v1473_v33 = vld [vmem:[%s1902_s6 + $0x74] ss:$8 sps:$4 sm:$0xff]  }
  0x72   : > { %v1469_v30 = vld [vmem:[%s1902_s6 + $0x164] ss:$8 sps:$4 sm:$0xff]   ;;  %v1472_v32 = vld [vmem:[%s1902_s6 + $0x160] ss:$8 sps:$4 sm:$0xff]   ;;  %v1475_v34 = vld [vmem:[%s1902_s6 + $0x174] ss:$8 sps:$4 sm:$0xff]  }
  0x73   : > { %979 = vmatpush1.bf16.msra.mxu1 %v1447_v15  ;;  %v1477_v35 = vld [vmem:[%s1902_s6 + $0x70] ss:$8 sps:$4 sm:$0xff]   ;;  %v1479_v37 = vld [vmem:[%s1902_s6 + $0x84] ss:$8 sps:$4 sm:$0xff]   ;;  %v1483_v39 = vld [vmem:[%s1902_s6 + $0x80] ss:$8 sps:$4 sm:$0xff]  }
  0x74   : > { %1022 = vmatpush1.bf16.msra.mxu0 %v1448_v16  ;;  %980 = vmatprep.subr.bf16.mxu1 %v1449_v17  ;;  %v1478_v36 = vld [vmem:[%s1902_s6 + $0x170] ss:$8 sps:$4 sm:$0xff]   ;;  %v1481_v38 = vld [vmem:[%s1902_s6 + $0x184] ss:$8 sps:$4 sm:$0xff]   ;;  %v1484_v40 = vld [vmem:[%s1902_s6 + $0x180] ss:$8 sps:$4 sm:$0xff]  }
  0x75   : > { %1023 = vmatprep.subr.bf16.mxu0 %v1451_v18  ;;  %v1485_v41 = vld [vmem:[%s1902_s6 + $0x94] ss:$8 sps:$4 sm:$0xff]   ;;  %v1489_v43 = vld [vmem:[%s1902_s6 + $0x90] ss:$8 sps:$4 sm:$0xff]   ;;  %v1491_v45 = vld [vmem:[%s1902_s6 + $0xa4] ss:$8 sps:$4 sm:$0xff]  }
  0x76   : > { %v1487_v42 = vld [vmem:[%s1902_s6 + $0x194] ss:$8 sps:$4 sm:$0xff]   ;;  %v1490_v44 = vld [vmem:[%s1902_s6 + $0x190] ss:$8 sps:$4 sm:$0xff]   ;;  %v1493_v46 = vld [vmem:[%s1902_s6 + $0x1a4] ss:$8 sps:$4 sm:$0xff]  }
  0x77   : > { %981 = vmatpush1.bf16.msra.mxu1 %v1453_v19  ;;  %v1495_v47 = vld [vmem:[%s1902_s6 + $0xa0] ss:$8 sps:$4 sm:$0xff]   ;;  %v1497_v49 = vld [vmem:[%s1902_s6 + $0xb4] ss:$8 sps:$4 sm:$0xff]   ;;  %v1501_v51 = vld [vmem:[%s1902_s6 + $0xb0] ss:$8 sps:$4 sm:$0xff]  }
  0x78   : > { %1024 = vmatpush1.bf16.msra.mxu0 %v1454_v20  ;;  %982 = vmatprep.subr.bf16.mxu1 %v1455_v21  ;;  %v1496_v48 = vld [vmem:[%s1902_s6 + $0x1a0] ss:$8 sps:$4 sm:$0xff]   ;;  %v1499_v50 = vld [vmem:[%s1902_s6 + $0x1b4] ss:$8 sps:$4 sm:$0xff]   ;;  %v1502_v53 = vld [vmem:[%s1902_s6 + $0x1b0] ss:$8 sps:$4 sm:$0xff]  }
  0x79   : > { %1025 = vmatprep.subr.bf16.mxu0 %v1457_v22  ;;  %v1529_v52 = vld [vmem:[%s1900_s27 + $0x4] ss:$16 sps:$4 sm:$0xff]   ;;  %v1532_v56 = vld [vmem:[%s1900_s27 + $0xc] ss:$16 sps:$4 sm:$0xff]   ;;  %v1507_v57 = vld [vmem:[%s1902_s6 + $0xc0] ss:$8 sps:$4 sm:$0xff]  }
  0x7a   : > { %v1503_v54 = vld [vmem:[%s1902_s6 + $0xc4] ss:$8 sps:$4 sm:$0xff]   ;;  %1006 = vmatprep.mubr.bf16.mxu1 %v1529_v52  ;;  %1049 = vmatprep.mubr.bf16.mxu0 %v1532_v56  ;;  %v1508_v58 = vld [vmem:[%s1902_s6 + $0x1c0] ss:$8 sps:$4 sm:$0xff]   ;;  %v1509_v59 = vld [vmem:[%s1902_s6 + $0xd4] ss:$8 sps:$4 sm:$0xff]  }
  0x7b   : > { %983 = vmatpush1.bf16.msra.mxu1 %v1459_v23  ;;  %v1505_v55 = vld [vmem:[%s1902_s6 + $0x1c4] ss:$8 sps:$4 sm:$0xff]   ;;  %v1511_v60 = vld [vmem:[%s1902_s6 + $0x1d4] ss:$8 sps:$4 sm:$0xff]   ;;  %v1513_v61 = vld [vmem:[%s1902_s6 + $0xd0] ss:$8 sps:$4 sm:$0xff]  }
  0x7c   : > { %1026 = vmatpush1.bf16.msra.mxu0 %v1460_v24  ;;  %984 = vmatprep.subr.bf16.mxu1 %v1461_v25  ;;  %v1514_v62 = vld [vmem:[%s1902_s6 + $0x1d0] ss:$8 sps:$4 sm:$0xff]   ;;  %v1515_v63 = vld [vmem:[%s1902_s6 + $0xe4] ss:$8 sps:$4 sm:$0xff]   ;;  %v1519_v1 = vld [vmem:[%s1902_s6 + $0xe0] ss:$8 sps:$4 sm:$0xff]  }
  0x7d   : > { %1027 = vmatprep.subr.bf16.mxu0 %v1463_v26  ;;  %v1517_v0 = vld [vmem:[%s1902_s6 + $0x1e4] ss:$8 sps:$4 sm:$0xff]   ;;  %v1520_v2 = vld [vmem:[%s1902_s6 + $0x1e0] ss:$8 sps:$4 sm:$0xff]   ;;  %v1521_v3 = vld [vmem:[%s1902_s6 + $0xf4] ss:$8 sps:$4 sm:$0xff]  }
  0x7e   : > { %v1523_v4 = vld [vmem:[%s1902_s6 + $0x1f4] ss:$8 sps:$4 sm:$0xff]   ;;  %v1525_v5 = vld [vmem:[%s1902_s6 + $0xf0] ss:$8 sps:$4 sm:$0xff]   ;;  %v562_v10 = vld [vmem:[#allocation2] sm:$0xff]  ;;  %p1329_p5 = scmp.ne.s32.totalorder %s1603_s18, 8 }
  0x7f   : > { %985 = vmatpush1.bf16.msra.mxu1 %v1465_v27  ;;  %v1526_v6 = vld [vmem:[%s1902_s6 + $0x1f0] ss:$8 sps:$4 sm:$0xff]   ;;  %v563_v14 = vld [vmem:[#allocation2 + $0x8] sm:$0xff] }
  0x80   : > { %1028 = vmatpush1.bf16.msra.mxu0 %v1466_v28  ;;  %986 = vmatprep.subr.bf16.mxu1 %v1467_v29  ;;  %v1527_v7 = vld [vmem:[%s1900_s27] ss:$16 sps:$4 sm:$0xff]   ;;  %v1530_v8 = vld [vmem:[%s1900_s27 + $0x8] ss:$16 sps:$4 sm:$0xff]   ;;  %v1078_v29 = vlaneseq (!%p1329_p5) }
  0x81   : > { %1029 = vmatprep.subr.bf16.mxu0 %v1469_v30  ;;  %v564_v18 = vld [vmem:[#allocation2 + $0x10] sm:$0xff]  ;;  %v565_v23 = vld [vmem:[#allocation2 + $0x18] sm:$0xff] }
  0x82   : > { %v1079_v30 = vshrl.u32 (!%p1329_p5), %v1078_v29, 7 }
  0x83   : > { %987 = vmatpush1.bf16.msra.mxu1 %v1471_v31  ;;  %v1076_v31 = vld [vmem:[%s550_s4] sm:$0x3] (!%p1329_p5) }
  0x84   : > { %1030 = vmatpush1.bf16.msra.mxu0 %v1472_v32  ;;  %988 = vmatprep.subr.bf16.mxu1 %v1473_v33  ;;  %v1080_v33 = vsub.s32 (!%p1329_p5), 0, %v1079_v30 }
  0x85   : > { %1031 = vmatprep.subr.bf16.mxu0 %v1475_v34  ;;  %v1084_v34 = vsub.s32 (!%p1329_p5), 1, %v1079_v30 }
  0x87   : > { %989 = vmatpush1.bf16.msra.mxu1 %v1477_v35 }
  0x88   : > { %1032 = vmatpush1.bf16.msra.mxu0 %v1478_v36  ;;  %990 = vmatprep.subr.bf16.mxu1 %v1479_v37 }
  0x89   : > { %1033 = vmatprep.subr.bf16.mxu0 %v1481_v38  ;;  %v1081_v38 = vrot.slane (!%p1329_p5), %v1076_v31, %v1080_v33 }
  0x8b   : > { %991 = vmatpush1.bf16.msra.mxu1 %v1483_v39  ;;  %v1085_v39 = vrot.slane (!%p1329_p5), %v1076_v31, %v1084_v34 }
  0x8c   : > { %1034 = vmatpush1.bf16.msra.mxu0 %v1484_v40  ;;  %992 = vmatprep.subr.bf16.mxu1 %v1485_v41 }
  0x8d   : > { %1035 = vmatprep.subr.bf16.mxu0 %v1487_v42 }
  0x8f   : > { %993 = vmatpush1.bf16.msra.mxu1 %v1489_v43 }
  0x90   : > { %1036 = vmatpush1.bf16.msra.mxu0 %v1490_v44  ;;  %994 = vmatprep.subr.bf16.mxu1 %v1491_v45 }
  0x91   : > { %1037 = vmatprep.subr.bf16.mxu0 %v1493_v46 }
  0x93   : > { %995 = vmatpush1.bf16.msra.mxu1 %v1495_v47 }
  0x94   : > { %1038 = vmatpush1.bf16.msra.mxu0 %v1496_v48  ;;  %996 = vmatprep.subr.bf16.mxu1 %v1497_v49 }
  0x95   : > { %1039 = vmatprep.subr.bf16.mxu0 %v1499_v50 }
  0x97   : > { %997 = vmatpush1.bf16.msra.mxu1 %v1501_v51 }
  0x98   : > { %1040 = vmatpush1.bf16.msra.mxu0 %v1502_v53  ;;  %998 = vmatprep.subr.bf16.mxu1 %v1503_v54 }
  0x99   : > { %1041 = vmatprep.subr.bf16.mxu0 %v1505_v55 }
  0x9b   : > { %999 = vmatpush1.bf16.msra.mxu1 %v1507_v57 }
  0x9c   : > { %1042 = vmatpush1.bf16.msra.mxu0 %v1508_v58  ;;  %1000 = vmatprep.subr.bf16.mxu1 %v1509_v59 }
  0x9d   : > { %1043 = vmatprep.subr.bf16.mxu0 %v1511_v60 }
  0x9f   : > { %1001 = vmatpush1.bf16.msra.mxu1 %v1513_v61 }
  0xa0   : > { %1044 = vmatpush1.bf16.msra.mxu0 %v1514_v62  ;;  %1002 = vmatprep.subr.bf16.mxu1 %v1515_v63 }
  0xa1   : > { %1045 = vmatprep.subr.bf16.mxu0 %v1517_v0 }
  0xa3   : > { %1003 = vmatpush1.bf16.msra.mxu1 %v1519_v1 }
  0xa4   : > { %1046 = vmatpush1.bf16.msra.mxu0 %v1520_v2  ;;  %1004 = vmatprep.subr.bf16.mxu1 %v1521_v3 }
  0xa5   : > { %1047 = vmatprep.subr.bf16.mxu0 %v1523_v4 }
  0xa7   : > { %1005 = vmatpush1.bf16.msra.mxu1 %v1525_v5 }
  0xa8   : > { %1048 = vmatpush1.bf16.msra.mxu0 %v1526_v6 }
  0xaa   : > { %1007 = vmatmul.mubr.bf16.vlgmr.msra.gmra.mrb[0].mxu1 %v1527_v7 }
  0xab   : > { %1050 = vmatmul.mubr.bf16.vlgmr.msra.gmra.mrb[0].mxu0 %v1530_v8 }
 0x17d   : > { %v1008_v9 = vpop.f32.mrb[0].mxu1 }
 0x17e   : > { %v1051_v11 = vpop.f32.mrb[0].mxu0  ;;  %v1010_v13 = vpop.f32.mrb[1].mxu1 }
 0x17f   : > { %v1052_v12 = vadd.f32 %v1051_v11, %v1008_v9  ;;  %v1053_v15 = vpop.f32.mrb[1].mxu0  ;;  %v1012_v17 = vpop.f32.mrb[2].mxu1 }
 0x180   : > { %v1054_v16 = vadd.f32 %v1053_v15, %v1010_v13  ;;  %v1055_v19 = vpop.f32.mrb[2].mxu0  ;;  %v1014_v22 = vpop.f32.mrb[3].mxu1  ;;  %1071 = sbr.rel (%p1329_p5) target bundleno = 403 (0x193), region = 101 }
 0x181   : > { %v1060_v20 = vadd.f32 %v1052_v12, %v562_v10  ;;  %v1056_v21 = vadd.f32 %v1055_v19, %v1012_v17  ;;  %v1057_v24 = vpop.f32.mrb[3].mxu0 }
 0x182   : > { %v1061_v25 = vadd.f32 %v1054_v16, %v563_v14  ;;  %v1058_v26 = vadd.f32 %v1057_v24, %v1014_v22 }
 0x183   : > { %1064 = vst [vmem:[#allocation2] sm:$0xff] %v1060_v20  ;;  %v1062_v27 = vadd.f32 %v1056_v21, %v564_v18 }
 0x184   : > { %1065 = vst [vmem:[#allocation2 + $0x8] sm:$0xff] %v1061_v25  ;;  %v1063_v28 = vadd.f32 %v1058_v26, %v565_v23 }
 0x185   : > { %1066 = vst [vmem:[#allocation2 + $0x10] sm:$0xff] %v1062_v27 }
 0x186   : > { %1067 = vst [vmem:[#allocation2 + $0x18] sm:$0xff] %v1063_v28 }
 0x18a   : > { %v1072_v32 = vld [vmem:[#allocation2] sm:$0xff] }
 0x18b   : > { %v1073_v35 = vld [vmem:[#allocation2 + $0x8] sm:$0xff]  ;;  %v1088_v40 = vadd.f32 %v1081_v38, %v1072_v32 }
 0x18c   : > { %v1074_v36 = vld [vmem:[#allocation2 + $0x10] sm:$0xff]  ;;  %v1089_v41 = vadd.f32 %v1085_v39, %v1073_v35 }
 0x18d   : > { %v1075_v37 = vld [vmem:[#allocation2 + $0x18] sm:$0xff]  ;;  %v1090_v42 = vadd.f32 %v1081_v38, %v1074_v36  ;;  %v1092_v44 = vmax.f32 %v1088_v40, 0.0 }
 0x18e   : > { %v1091_v43 = vadd.f32 %v1085_v39, %v1075_v37  ;;  %v1093_v45 = vmax.f32 %v1089_v41, 0.0 }
 0x18f   : > { %v1094_v46 = vmax.f32 %v1090_v42, 0.0  ;;  %1096 = vst [vmem:[%s1904_s1] sm:$0xff] %v1092_v44 }
 0x190   : > { %v1095_v47 = vmax.f32 %v1091_v43, 0.0  ;;  %1097 = vst [vmem:[%s1904_s1 + $0x8] sm:$0xff] %v1093_v45 }
 0x191   : > { %1098 = vst [vmem:[%s1904_s1 + $0x10] sm:$0xff] %v1094_v46 }
 0x192   : > { %1099 = vst [vmem:[%s1904_s1 + $0x18] sm:$0xff] %v1095_v47 }
 0x193 PF: > { %1106 = sbr.rel (!%p1736_p12) target bundleno = 411 (0x19b), region = 105  ;;  %s1337_s16 = sshll.u32 (%p1736_p12), %s1607_s19, 4 }
 0x194   : > { %s1112_s5 = scalar_lea.vmem (%p1736_p12), %s2031_s3, %s1337_s16 }
 0x196   : > { %v1125_v48 = vld [vmem:[%s1904_s1] sm:$0xff] (%p1736_p12) }
 0x197   : > { %v1127_v49 = vld [vmem:[%s1904_s1 + $0x8] sm:$0xff] (%p1736_p12)  ;;  %1126 = vst [vmem:[%s1112_s5] sm:$0xff] (%p1736_p12), %v1125_v48 }
 0x198   : > { %v1129_v50 = vld [vmem:[%s1904_s1 + $0x10] sm:$0xff] (%p1736_p12)  ;;  %1128 = vst [vmem:[%s1112_s5 + $0x8] sm:$0xff] (%p1736_p12), %v1127_v49 }
 0x199   : > { %v1131_v51 = vld [vmem:[%s1904_s1 + $0x18] sm:$0xff] (%p1736_p12)  ;;  %1130 = vst [vmem:[%s1112_s5 + $0x20] sm:$0xff] (%p1736_p12), %v1129_v50 }
 0x19a   : > { %1132 = vst [vmem:[%s1112_s5 + $0x28] sm:$0xff] %v1131_v51 }
 0x19b PF: > { %s13_s22 = sadd.s32 1, %s1619_s22   ;;  %s2041_s10 = sld [smem:[#allocation6_spill]] }
 0x19c   : > { %p10_p6 = scmp.ge.s32.totalorder %s13_s22, 20   ;;  %s2042_s12 = smov %s1583_s13 }
 0x19d   : > { %s2043_s13 = smov %s1734_s9  ;;  %s2044_s14 = smov %s1591_s15 }
 0x19e   : > { %s2045_s15 = smov %s1731_s8  ;;  %s2046_s16 = smov %s1599_s17 }
 0x19f   : > { %s2047_s17 = smov %s1717_s30  ;;  %s2048_s18 = smov %s1611_s20 }
 0x1a0   : > { %s2049_s19 = smov %s1615_s21  ;;  %s2050_s20 = smov %s2053_s24 }
 0x1a1   : > { %s2051_s21 = smov %s2041_s10  ;;  %12 = sbr.rel (!%p10_p6) target bundleno = 9 (0x9), region = 170 }

// kernel: _lambda_.43
= control target key start
LH: loop header
LB: loop body
LE: loop exit
PB: predicated region body
PF: predicated region fallthrough
CT: control target
= control target key end

     0   :  { %s665_s1 = inlined_call_operand.vmem [shape: bf16[512,128], index: 1, kind: input, shape index: {}]   ;;  %s666_s0 = inlined_call_operand.vmem [shape: bf16[16,512], index: 0, kind: input, shape index: {}]   ;;  %s667_s2 = inlined_call_operand.vmem [shape: f32[1,128], index: 2, kind: input, shape index: {}]   ;;  %s668_s3 = inlined_call_operand.vmem [shape: f32[16,128], index: 3, kind: output, shape index: {}]  }
   0x1   :  { %v490_v0 = vld [vmem:[%s665_s1 + $0x40] sm:$0xff]   ;;  %v494_v4 = vld [vmem:[%s665_s1 + $0x48] sm:$0xff]   ;;  %v498_v8 = vld [vmem:[%s665_s1 + $0x50] sm:$0xff]  }
   0x2   :  { %v491_v1 = vld [vmem:[%s665_s1 + $0xc0] sm:$0xff]   ;;  %446 = vmatprep.subr.bf16.mxu0 %v490_v0  ;;  %v495_v5 = vld [vmem:[%s665_s1 + $0xc8] sm:$0xff]   ;;  %v499_v9 = vld [vmem:[%s665_s1 + $0xd0] sm:$0xff]  }
   0x3   :  { %v492_v2 = vld [vmem:[%s665_s1] sm:$0xff]   ;;  %468 = vmatprep.subr.bf16.mxu1 %v491_v1  ;;  %v496_v6 = vld [vmem:[%s665_s1 + $0x8] sm:$0xff]   ;;  %v500_v10 = vld [vmem:[%s665_s1 + $0x10] sm:$0xff]  }
   0x4   :  { %v493_v3 = vld [vmem:[%s665_s1 + $0x80] sm:$0xff]   ;;  %447 = vmatpush3.bf16.msra.mxu0 %v492_v2  ;;  %v497_v7 = vld [vmem:[%s665_s1 + $0x88] sm:$0xff]   ;;  %v501_v11 = vld [vmem:[%s665_s1 + $0x90] sm:$0xff]  }
   0x5   :  { %469 = vmatpush3.bf16.msra.mxu1 %v493_v3  ;;  %448 = vmatprep.subr.bf16.mxu0 %v494_v4  ;;  %v502_v12 = vld [vmem:[%s665_s1 + $0x58] sm:$0xff]   ;;  %v506_v16 = vld [vmem:[%s665_s1 + $0x60] sm:$0xff]   ;;  %v510_v20 = vld [vmem:[%s665_s1 + $0x68] sm:$0xff]  }
   0x6   :  { %470 = vmatprep.subr.bf16.mxu1 %v495_v5  ;;  %v503_v13 = vld [vmem:[%s665_s1 + $0xd8] sm:$0xff]   ;;  %v507_v17 = vld [vmem:[%s665_s1 + $0xe0] sm:$0xff]   ;;  %v511_v21 = vld [vmem:[%s665_s1 + $0xe8] sm:$0xff]  }
   0x7   :  { %v504_v14 = vld [vmem:[%s665_s1 + $0x18] sm:$0xff]   ;;  %v508_v18 = vld [vmem:[%s665_s1 + $0x20] sm:$0xff]   ;;  %v512_v22 = vld [vmem:[%s665_s1 + $0x28] sm:$0xff]  }
   0x8   :  { %449 = vmatpush3.bf16.msra.mxu0 %v496_v6  ;;  %v505_v15 = vld [vmem:[%s665_s1 + $0x98] sm:$0xff]   ;;  %v509_v19 = vld [vmem:[%s665_s1 + $0xa0] sm:$0xff]   ;;  %v513_v23 = vld [vmem:[%s665_s1 + $0xa8] sm:$0xff]  }
   0x9   :  { %471 = vmatpush3.bf16.msra.mxu1 %v497_v7  ;;  %450 = vmatprep.subr.bf16.mxu0 %v498_v8  ;;  %v514_v24 = vld [vmem:[%s665_s1 + $0x70] sm:$0xff]   ;;  %v518_v28 = vld [vmem:[%s665_s1 + $0x78] sm:$0xff]   ;;  %v445_v45 = vld [vmem:[%s667_s2] ss:$0 sm:$0xff] }
   0xa   :  { %472 = vmatprep.subr.bf16.mxu1 %v499_v9  ;;  %v515_v25 = vld [vmem:[%s665_s1 + $0xf0] sm:$0xff]   ;;  %v519_v29 = vld [vmem:[%s665_s1 + $0xf8] sm:$0xff]  }
   0xb   :  { %v516_v26 = vld [vmem:[%s665_s1 + $0x30] sm:$0xff]   ;;  %v520_v30 = vld [vmem:[%s665_s1 + $0x38] sm:$0xff]  }
   0xc   :  { %451 = vmatpush3.bf16.msra.mxu0 %v500_v10  ;;  %v517_v27 = vld [vmem:[%s665_s1 + $0xb0] sm:$0xff]   ;;  %v521_v31 = vld [vmem:[%s665_s1 + $0xb8] sm:$0xff]  }
   0xd   :  { %473 = vmatpush3.bf16.msra.mxu1 %v501_v11  ;;  %452 = vmatprep.subr.bf16.mxu0 %v502_v12  ;;  %v522_v32 = vld [vmem:[%s666_s0] ss:$16 sps:$4 sm:$0xff]   ;;  %v524_v33 = vld [vmem:[%s666_s0 + $0x4] ss:$16 sps:$4 sm:$0xff]   ;;  %v525_v34 = vld [vmem:[%s666_s0 + $0x8] ss:$16 sps:$4 sm:$0xff]  }
   0xe   :  { %474 = vmatprep.subr.bf16.mxu1 %v503_v13  ;;  %v527_v35 = vld [vmem:[%s666_s0 + $0xc] ss:$16 sps:$4 sm:$0xff]   ;;  %335 = vmatprep.mubr.bf16.mxu0 %v524_v33 }
   0xf   :  { %376 = vmatprep.mubr.bf16.mxu1 %v527_v35 }
  0x10   :  { %453 = vmatpush3.bf16.msra.mxu0 %v504_v14 }
  0x11   :  { %475 = vmatpush3.bf16.msra.mxu1 %v505_v15  ;;  %454 = vmatprep.subr.bf16.mxu0 %v506_v16 }
  0x12   :  { %476 = vmatprep.subr.bf16.mxu1 %v507_v17 }
  0x14   :  { %455 = vmatpush3.bf16.msra.mxu0 %v508_v18 }
  0x15   :  { %477 = vmatpush3.bf16.msra.mxu1 %v509_v19  ;;  %456 = vmatprep.subr.bf16.mxu0 %v510_v20 }
  0x16   :  { %478 = vmatprep.subr.bf16.mxu1 %v511_v21 }
  0x18   :  { %457 = vmatpush3.bf16.msra.mxu0 %v512_v22 }
  0x19   :  { %479 = vmatpush3.bf16.msra.mxu1 %v513_v23  ;;  %458 = vmatprep.subr.bf16.mxu0 %v514_v24 }
  0x1a   :  { %480 = vmatprep.subr.bf16.mxu1 %v515_v25 }
  0x1c   :  { %459 = vmatpush3.bf16.msra.mxu0 %v516_v26 }
  0x1d   :  { %481 = vmatpush3.bf16.msra.mxu1 %v517_v27  ;;  %460 = vmatprep.subr.bf16.mxu0 %v518_v28 }
  0x1e   :  { %482 = vmatprep.subr.bf16.mxu1 %v519_v29 }
  0x20   :  { %461 = vmatpush3.bf16.msra.mxu0 %v520_v30 }
  0x21   :  { %483 = vmatpush3.bf16.msra.mxu1 %v521_v31 }
  0x23   :  { %336 = vmatmul.mubr.bf16.vlgmr.msra.gmra.mrb[0].mxu0 %v522_v32 }
  0x24   :  { %377 = vmatmul.mubr.bf16.vlgmr.msra.gmra.mrb[0].mxu1 %v525_v34 }
  0xf6   :  { %v462_v36 = vpop.f32.mrb[0].mxu0 }
  0xf7   :  { %v484_v37 = vpop.f32.mrb[0].mxu1  ;;  %v463_v38 = vpop.f32.mrb[1].mxu0 }
  0xf8   :  { %v464_v39 = vadd.f32 %v463_v38, %v462_v36  ;;  %v485_v40 = vpop.f32.mrb[1].mxu1  ;;  %v465_v41 = vpop.f32.mrb[2].mxu0 }
  0xf9   :  { %v486_v42 = vadd.f32 %v485_v40, %v484_v37  ;;  %v487_v43 = vpop.f32.mrb[2].mxu1  ;;  %v466_v44 = vpop.f32.mrb[3].mxu0 }
  0xfa   :  { %v467_v46 = vadd.f32 %v466_v44, %v465_v41  ;;  %v488_v47 = vpop.f32.mrb[3].mxu1 }
  0xfb   :  { %v379_v48 = vadd.f32 %v486_v42, %v464_v39  ;;  %v489_v49 = vadd.f32 %v488_v47, %v487_v43 }
  0xfd   :  { %v401_v50 = vadd.f32 %v445_v45, %v379_v48  ;;  %v382_v51 = vadd.f32 %v489_v49, %v467_v46 }
  0xff   :  { %403 = vst [vmem:[%s668_s3] sm:$0xff] %v401_v50  ;;  %v402_v52 = vadd.f32 %v445_v45, %v382_v51 }
 0x101   :  { %404 = vst [vmem:[%s668_s3 + $0x8] sm:$0xff] %v402_v52 }

</bundles_post_ra>
